<compile_context>
chip_gen: v7x
topology: tpu7x:2x2x1
jax: 0.10.0
libtpu: 0.0.40
codegen_flags: <defaults>
</compile_context>

<pallas_src>
import functools

import jax
import jax.numpy as jnp
from jax.experimental import pallas as pl
from jax.experimental.pallas import tpu as pltpu


# ---------------------------------------------------------------------------
# Channel plan (real CMU model in parentheses), scaled for a small test:
#   input           : 4   (3)
#   block0 (VGG)    : 16  (128)
#   pre_stage       : 8   (128)
#   stage*_shared   : 16  (128)
#   stage*_1 (PAF)  : 6   (38)   1x1 conv, no ReLU
#   stage*_2 (heat) : 4   (19)   1x1 conv, no ReLU
# ---------------------------------------------------------------------------
C_IN, C_BASE, C_PRE, C_SHARED, C_PAF, C_HEAT = 4, 16, 8, 16, 6, 4
CPAD = 128          # lane width; all "wide" activations live in 128 lanes
C_IN_PAD = 8        # narrow input lanes (full-dim block, NOT padded to 128)
CH1 = C_PAF + C_HEAT        # stage-1 heads occupy lanes [0, CH1)
PRE_OFF = CH1               # pre_stage output occupies lanes [CH1, CH1+C_PRE)
H2_OFF = 64                 # stage-2 heads occupy lanes [64, 64+CH1) in output


# ---------------------------------------------------------------------------
# Fused forward kernel: one grid step == one image, everything in VMEM.
# ---------------------------------------------------------------------------
def _fused_pose_kernel(x_ref, w0_ref, b0_ref, wpre_ref, bpre_ref,
                       w1s_ref, b1s_ref, w1h_ref, b1h_ref,
                       w2s_ref, b2s_ref, w2h_ref, b2h_ref,
                       heads_ref, *, H, W):
    HW = H * W

    # Column masks for the 3x3 halo (computed once, reused by every 3x3 conv).
    xcol = jax.lax.broadcasted_iota(jnp.int32, (HW, 1), 0) % W
    mask_l = xcol >= 1            # tap dx = -1 is invalid at x == 0
    mask_r = xcol < (W - 1)       # tap dx = +1 is invalid at x == W-1

    def shift_rows(a, s):
        # b[r] = a[r + s] if 0 <= r + s < HW else 0      (a: (HW, C) f32)
        if s == 0:
            return a
        z = jnp.zeros((abs(s), a.shape[1]), a.dtype)
        if s > 0:
            return jnp.concatenate([a[s:], z], axis=0)
        return jnp.concatenate([z, a[:s]], axis=0)

    def conv3x3(a, w_ref):
        # a: (HW, C) f32; w_ref: (9, C, CPAD) bf16 (one slab per tap).
        # 9 accumulated matmuls — no (HW, 9*C) im2col patch is materialized.
        acc = None
        t = 0
        for dy in (-1, 0, 1):
            for dx in (-1, 0, 1):
                col = shift_rows(a, dy * W + dx)
                if dx == -1:
                    col = jnp.where(mask_l, col, 0.0)
                elif dx == 1:
                    col = jnp.where(mask_r, col, 0.0)
                part = jnp.dot(col.astype(jnp.bfloat16), w_ref[t],
                               preferred_element_type=jnp.float32)
                acc = part if acc is None else acc + part
                t += 1
        return acc

    def conv1x1(a, w_ref):
        return jnp.dot(a.astype(jnp.bfloat16), w_ref[...],
                       preferred_element_type=jnp.float32)

    # Narrow bf16 input; shift/mask path runs in f32 (known-good lowering).
    x = x_ref[0].astype(jnp.float32)                                  # (HW, 8)

    a_vgg = jnp.maximum(conv3x3(x, w0_ref) + b0_ref[...], 0.0)        # basemodel
    # pre_stage output is packed at lanes [PRE_OFF, PRE_OFF + C_PRE).
    out1 = jnp.maximum(conv3x3(a_vgg, wpre_ref) + bpre_ref[...], 0.0)
    out1_shr = jnp.maximum(conv3x3(out1, w1s_ref) + b1s_ref[...], 0.0)

    # stage1_1 / stage1_2 fused: lanes [0:C_PAF]=PAF, [C_PAF:CH1]=heat.
    heads1 = conv1x1(out1_shr, w1h_ref) + b1h_ref[...]

    # torch.cat([out1_1, out1_2, out1], 1) == heads1 + out1 (disjoint lanes),
    # so stage2_shared is a single 3x3 conv with the original unsplit weight.
    cat_act = heads1 + out1
    out2_shr = jnp.maximum(conv3x3(cat_act, w2s_ref) + b2s_ref[...], 0.0)

    # stage2 heads land at lanes [H2_OFF, H2_OFF + CH1) via weight packing,
    # so both stages share ONE lane-dense output write.
    heads2 = conv1x1(out2_shr, w2h_ref) + b2h_ref[...]
    heads_ref[0] = (heads1 + heads2).astype(heads_ref.dtype)


# ---------------------------------------------------------------------------
# Parameter packing into the kernel layout (per-tap slabs / lane offsets / bf16).
# ---------------------------------------------------------------------------
def _pack_conv3x3(w, *, cin_off=0, cout_off=0, cin_pad=CPAD):
    """(KH, KW, Cin, Cout) -> (KH*KW, cin_pad, CPAD) bf16, rows/cols at offsets."""
    KH, KW, Cin, Cout = w.shape
    wp = jnp.zeros((KH * KW, cin_pad, CPAD), jnp.float32)
    wp = wp.at[:, cin_off:cin_off + Cin, cout_off:cout_off + Cout].set(
        w.reshape(KH * KW, Cin, Cout))
    return wp.astype(jnp.bfloat16)


def _pack_bias(b, *, off=0):
    return jnp.zeros((1, CPAD), jnp.float32).at[0, off:off + b.shape[0]].set(b)


def _pack_heads(p_paf, p_heat, *, out_off=0):
    """Fuse a stage's two 1x1 heads into one (CPAD, CPAD) bf16 matmul + bias,
    with output columns placed at lane offset `out_off`."""
    w_paf, b_paf = p_paf["w"][0, 0], p_paf["b"]      # (Cs, C_PAF)
    w_heat, b_heat = p_heat["w"][0, 0], p_heat["b"]  # (Cs, C_HEAT)
    cs, cp = w_paf.shape
    ch = w_heat.shape[1]
    wm = jnp.zeros((CPAD, CPAD), jnp.float32)
    wm = wm.at[:cs, out_off:out_off + cp].set(w_paf)
    wm = wm.at[:cs, out_off + cp:out_off + cp + ch].set(w_heat)
    bm = (jnp.zeros((1, CPAD), jnp.float32)
          .at[0, out_off:out_off + cp].set(b_paf)
          .at[0, out_off + cp:out_off + cp + ch].set(b_heat))
    return wm.astype(jnp.bfloat16), bm


# ---------------------------------------------------------------------------
# PoseModel.forward (upsample=False path), NCHW in / NCHW out like torch.
# ---------------------------------------------------------------------------
@jax.jit
def pose_model_forward(params, x_nchw):
    nb, cin, H, W = x_nchw.shape
    HW = H * W

    w0 = _pack_conv3x3(params["block0"]["w"], cin_pad=C_IN_PAD)
    b0 = _pack_bias(params["block0"]["b"])
    wpre = _pack_conv3x3(params["block_pre_stage"]["w"], cout_off=PRE_OFF)
    bpre = _pack_bias(params["block_pre_stage"]["b"], off=PRE_OFF)
    w1s = _pack_conv3x3(params["block1_shared"]["w"], cin_off=PRE_OFF)
    b1s = _pack_bias(params["block1_shared"]["b"])
    w1h, b1h = _pack_heads(params["block1_1"], params["block1_2"])
    # Unsplit stage-2 shared weight: its Cin order (paf, heat, pre) matches the
    # lane layout of heads1 + out1 exactly, so pack rows at [0, 18).
    w2s = _pack_conv3x3(params["block2_shared"]["w"])
    b2s = _pack_bias(params["block2_shared"]["b"])
    w2h, b2h = _pack_heads(params["block2_1"], params["block2_2"], out_off=H2_OFF)

    # NCHW -> flat NHWC bf16; channels padded only to 8 lanes (not 128).
    x = jnp.transpose(x_nchw, (0, 2, 3, 1)).reshape(nb, HW, cin)
    x = jnp.pad(x, ((0, 0), (0, 0), (0, C_IN_PAD - cin))).astype(jnp.bfloat16)

    x_spec = pl.BlockSpec((1, HW, C_IN_PAD), lambda n: (n, 0, 0))
    out_spec = pl.BlockSpec((1, HW, CPAD), lambda n: (n, 0, 0))

    def _const(arr):
        # Weights never change across the grid -> single-buffer them.
        return pl.BlockSpec(arr.shape, lambda n: (0,) * arr.ndim,
                            pipeline_mode=pl.Buffered(1))

    heads = pl.pallas_call(
        functools.partial(_fused_pose_kernel, H=H, W=W),
        out_shape=jax.ShapeDtypeStruct((nb, HW, CPAD), jnp.float32),
        grid=(nb,),
        in_specs=[x_spec,
                  _const(w0), _const(b0), _const(wpre), _const(bpre),
                  _const(w1s), _const(b1s), _const(w1h), _const(b1h),
                  _const(w2s), _const(b2s), _const(w2h), _const(b2h)],
        out_specs=out_spec,
        compiler_params=pltpu.CompilerParams(
            dimension_semantics=("parallel",)),
    )(x, w0, b0, wpre, bpre, w1s, b1s, w1h, b1h, w2s, b2s, w2h, b2h)

    # Slice the single lane-dense head tensor back into the four NCHW outputs.
    h = heads.reshape(nb, H, W, CPAD)
    t = lambda a: jnp.transpose(a, (0, 3, 1, 2))
    out1_1 = t(h[..., 0:C_PAF])
    out1_2 = t(h[..., C_PAF:CH1])
    out2_1 = t(h[..., H2_OFF:H2_OFF + C_PAF])
    out2_2 = t(h[..., H2_OFF + C_PAF:H2_OFF + CH1])
    return out1_1, out1_2, out2_1, out2_2


# ---------------------------------------------------------------------------
# Parameter construction (deterministic, in-script) + plain-JAX reference.
# ---------------------------------------------------------------------------
def _conv_params(key, kh, kw, cin, cout):
    wk, bk = jax.random.split(key)
    scale = 1.0 / jnp.sqrt(jnp.float32(kh * kw * cin))
    w = jax.random.normal(wk, (kh, kw, cin, cout), jnp.float32) * scale
    b = jax.random.normal(bk, (cout,), jnp.float32) * 0.01
    return {"w": w, "b": b}


def init_pose_params(key):
    keys = jax.random.split(key, 8)
    cat_ch = C_PAF + C_HEAT + C_PRE
    return {
        "block0":          _conv_params(keys[0], 3, 3, C_IN, C_BASE),
        "block_pre_stage": _conv_params(keys[1], 3, 3, C_BASE, C_PRE),
        "block1_shared":   _conv_params(keys[2], 3, 3, C_PRE, C_SHARED),
        "block1_1":        _conv_params(keys[3], 1, 1, C_SHARED, C_PAF),
        "block1_2":        _conv_params(keys[4], 1, 1, C_SHARED, C_HEAT),
        "block2_shared":   _conv_params(keys[5], 3, 3, cat_ch, C_SHARED),
        "block2_1":        _conv_params(keys[6], 1, 1, C_SHARED, C_PAF),
        "block2_2":        _conv_params(keys[7], 1, 1, C_SHARED, C_HEAT),
    }


def _conv_ref(h, p, relu):
    out = jax.lax.conv_general_dilated(
        h, p["w"], window_strides=(1, 1), padding="SAME",
        dimension_numbers=("NHWC", "HWIO", "NHWC"))
    out = out + p["b"]
    return jnp.maximum(out, 0.0) if relu else out


@jax.jit
def pose_model_reference(params, x_nchw):
    x = jnp.transpose(x_nchw, (0, 2, 3, 1))
    out1_vgg = _conv_ref(x, params["block0"], True)
    out1 = _conv_ref(out1_vgg, params["block_pre_stage"], True)
    out1_shared = _conv_ref(out1, params["block1_shared"], True)
    out1_1 = _conv_ref(out1_shared, params["block1_1"], False)
    out1_2 = _conv_ref(out1_shared, params["block1_2"], False)
    out2 = jnp.concatenate([out1_1, out1_2, out1], axis=-1)
    out2_shared = _conv_ref(out2, params["block2_shared"], True)
    out2_1 = _conv_ref(out2_shared, params["block2_1"], False)
    out2_2 = _conv_ref(out2_shared, params["block2_2"], False)
    t = lambda a: jnp.transpose(a, (0, 3, 1, 2))
    return t(out1_1), t(out1_2), t(out2_1), t(out2_2)


if __name__ == "__main__":
    N, H, W = 2, 16, 16
    key = jax.random.PRNGKey(0)
    xkey, pkey = jax.random.split(key)
    x = jax.random.normal(xkey, (N, C_IN, H, W), jnp.float32)   # NCHW input

    params = init_pose_params(pkey)

    outs = jax.block_until_ready(pose_model_forward(params, x))
    refs = jax.block_until_ready(pose_model_reference(params, x))

    expected_shapes = [
        (N, C_PAF, H, W),   # out1_1
        (N, C_HEAT, H, W),  # out1_2
        (N, C_PAF, H, W),   # out2_1
        (N, C_HEAT, H, W),  # out2_2
    ]
    assert len(outs) == 4
    for o, r, s in zip(outs, refs, expected_shapes):
        assert o.shape == s, (o.shape, s)
        assert o.dtype == jnp.float32
        err = float(jnp.max(jnp.abs(o - r)))
        # bf16 matmul operands vs f32 reference -> loose tolerance.
        assert jnp.allclose(o, r, atol=5e-2, rtol=5e-2), err

    print("KERNEL_OK")
</pallas_src>

<mosaic_0001>
module attributes {stable_mosaic.version = 11 : i64} {
  func.func @_fused_pose_kernel(%arg0: i32, %arg1: memref<1x256x8xbf16, #tpu.memory_space<vmem>>, %arg2: memref<9x8x128xbf16, #tpu.memory_space<vmem>>, %arg3: memref<1x128xf32, #tpu.memory_space<vmem>>, %arg4: memref<9x128x128xbf16, #tpu.memory_space<vmem>>, %arg5: memref<1x128xf32, #tpu.memory_space<vmem>>, %arg6: memref<9x128x128xbf16, #tpu.memory_space<vmem>>, %arg7: memref<1x128xf32, #tpu.memory_space<vmem>>, %arg8: memref<128x128xbf16, #tpu.memory_space<vmem>>, %arg9: memref<1x128xf32, #tpu.memory_space<vmem>>, %arg10: memref<9x128x128xbf16, #tpu.memory_space<vmem>>, %arg11: memref<1x128xf32, #tpu.memory_space<vmem>>, %arg12: memref<128x128xbf16, #tpu.memory_space<vmem>>, %arg13: memref<1x128xf32, #tpu.memory_space<vmem>>, %arg14: memref<1x256x128xf32, #tpu.memory_space<vmem>>) attributes {dimension_semantics = [#tpu.dimension_semantics<parallel>], iteration_bounds = array<i64: 2>, scalar_prefetch = 0 : i64, scratch_operands = 0 : i64, tpu.core_type = #tpu.core_type<tc>, window_params = [{transform_indices = @transform_0, window_bounds = array<i64: 1, 256, 8>}, {pipeline_mode = #tpu.pipeline_mode<synchronous>, transform_indices = @transform_1, window_bounds = array<i64: 9, 8, 128>}, {pipeline_mode = #tpu.pipeline_mode<synchronous>, transform_indices = @transform_2, window_bounds = array<i64: 1, 128>}, {pipeline_mode = #tpu.pipeline_mode<synchronous>, transform_indices = @transform_3, window_bounds = array<i64: 9, 128, 128>}, {pipeline_mode = #tpu.pipeline_mode<synchronous>, transform_indices = @transform_4, window_bounds = array<i64: 1, 128>}, {pipeline_mode = #tpu.pipeline_mode<synchronous>, transform_indices = @transform_5, window_bounds = array<i64: 9, 128, 128>}, {pipeline_mode = #tpu.pipeline_mode<synchronous>, transform_indices = @transform_6, window_bounds = array<i64: 1, 128>}, {pipeline_mode = #tpu.pipeline_mode<synchronous>, transform_indices = @transform_7, window_bounds = array<i64: 128, 128>}, {pipeline_mode = #tpu.pipeline_mode<synchronous>, transform_indices = @transform_8, window_bounds = array<i64: 1, 128>}, {pipeline_mode = #tpu.pipeline_mode<synchronous>, transform_indices = @transform_9, window_bounds = array<i64: 9, 128, 128>}, {pipeline_mode = #tpu.pipeline_mode<synchronous>, transform_indices = @transform_10, window_bounds = array<i64: 1, 128>}, {pipeline_mode = #tpu.pipeline_mode<synchronous>, transform_indices = @transform_11, window_bounds = array<i64: 128, 128>}, {pipeline_mode = #tpu.pipeline_mode<synchronous>, transform_indices = @transform_12, window_bounds = array<i64: 1, 128>}, {transform_indices = @transform_13, window_bounds = array<i64: 1, 256, 128>}]} {
    %0 = tpu.iota {dimensions = array<i32: 0>} : vector<256x1xi32>
    %c16_i32 = arith.constant 16 : i32
    %c0_i32 = arith.constant 0 : i32
    %1 = arith.cmpi eq, %c16_i32, %c0_i32 : i32
    %c1_i32 = arith.constant 1 : i32
    %2 = arith.select %1, %c1_i32, %c16_i32 : i32
    %3 = vector.broadcast %2 : i32 to vector<256x1xi32>
    %4 = arith.remsi %0, %3 : vector<256x1xi32>
    %c0_i32_0 = arith.constant 0 : i32
    %5 = vector.broadcast %c0_i32_0 : i32 to vector<256x1xi32>
    %6 = arith.cmpi ne, %4, %5 : vector<256x1xi32>
    %c0_i32_1 = arith.constant 0 : i32
    %7 = vector.broadcast %c0_i32_1 : i32 to vector<256x1xi32>
    %8 = arith.cmpi slt, %4, %7 : vector<256x1xi32>
    %c0_i32_2 = arith.constant 0 : i32
    %9 = arith.cmpi slt, %2, %c0_i32_2 : i32
    %10 = vector.broadcast %9 : i1 to vector<256x1xi1>
    %11 = vector.broadcast %10 : vector<256x1xi1> to vector<256x1xi1>
    %12 = arith.xori %8, %11 : vector<256x1xi1>
    %13 = arith.andi %12, %6 : vector<256x1xi1>
    %14 = vector.broadcast %2 : i32 to vector<256x1xi32>
    %15 = arith.addi %4, %14 : vector<256x1xi32>
    %16 = arith.select %13, %15, %4 : vector<256x1xi1>, vector<256x1xi32>
    %c1_i32_3 = arith.constant 1 : i32
    %17 = vector.broadcast %c1_i32_3 : i32 to vector<256x1xi32>
    %18 = arith.cmpi sge, %16, %17 : vector<256x1xi32>
    %c15_i32 = arith.constant 15 : i32
    %19 = vector.broadcast %c15_i32 : i32 to vector<256x1xi32>
    %20 = arith.cmpi slt, %16, %19 : vector<256x1xi32>
    %c0 = arith.constant 0 : index
    %c0_4 = arith.constant 0 : index
    %c0_5 = arith.constant 0 : index
    %21 = vector.load %arg1[%c0, %c0_4, %c0_5] : memref<1x256x8xbf16, #tpu.memory_space<vmem>>, vector<1x256x8xbf16>
    %22 = vector.shape_cast %21 : vector<1x256x8xbf16> to vector<256x8xbf16>
    %23 = arith.extf %22 : vector<256x8xbf16> to vector<256x8xf32>
    %cst = arith.constant 0.000000e+00 : f32
    %24 = vector.broadcast %cst : f32 to vector<17x8xf32>
    %25 = vector.extract_strided_slice %23 {offsets = [0, 0], sizes = [239, 8], strides = [1, 1]} : vector<256x8xf32> to vector<239x8xf32>
    %26 = tpu.concatenate %24, %25 in 0 : vector<17x8xf32>, vector<239x8xf32> -> vector<256x8xf32>
    %cst_6 = arith.constant 0.000000e+00 : f32
    %27 = vector.shape_cast %18 : vector<256x1xi1> to vector<256x1xi1>
    %28 = vector.broadcast %27 : vector<256x1xi1> to vector<256x8xi1>
    %29 = vector.broadcast %cst_6 : f32 to vector<256x8xf32>
    %30 = arith.select %28, %26, %29 : vector<256x8xi1>, vector<256x8xf32>
    %31 = arith.truncf %30 : vector<256x8xf32> to vector<256x8xbf16>
    %c0_7 = arith.constant 0 : index
    %c0_8 = arith.constant 0 : index
    %c0_9 = arith.constant 0 : index
    %32 = vector.load %arg2[%c0_7, %c0_8, %c0_9] : memref<9x8x128xbf16, #tpu.memory_space<vmem>>, vector<1x8x128xbf16>
    %33 = vector.shape_cast %32 : vector<1x8x128xbf16> to vector<8x128xbf16>
    %cst_10 = arith.constant dense<0.000000e+00> : vector<256x128xf32>
    %34 = tpu.matmul %31, %33, %cst_10 {dimension_numbers = #tpu.dot_dimension_numbers<[1], [0], [0], [1], [0, 0, 1, 1], [], []>} : vector<256x8xbf16>, vector<8x128xbf16>, vector<256x128xf32> -> vector<256x128xf32>
    %cst_11 = arith.constant 0.000000e+00 : f32
    %35 = vector.broadcast %cst_11 : f32 to vector<16x8xf32>
    %36 = vector.extract_strided_slice %23 {offsets = [0, 0], sizes = [240, 8], strides = [1, 1]} : vector<256x8xf32> to vector<240x8xf32>
    %37 = tpu.concatenate %35, %36 in 0 : vector<16x8xf32>, vector<240x8xf32> -> vector<256x8xf32>
    %38 = arith.truncf %37 : vector<256x8xf32> to vector<256x8xbf16>
    %c1 = arith.constant 1 : index
    %c0_12 = arith.constant 0 : index
    %c0_13 = arith.constant 0 : index
    %39 = vector.load %arg2[%c1, %c0_12, %c0_13] : memref<9x8x128xbf16, #tpu.memory_space<vmem>>, vector<1x8x128xbf16>
    %40 = vector.shape_cast %39 : vector<1x8x128xbf16> to vector<8x128xbf16>
    %cst_14 = arith.constant dense<0.000000e+00> : vector<256x128xf32>
    %41 = tpu.matmul %38, %40, %cst_14 {dimension_numbers = #tpu.dot_dimension_numbers<[1], [0], [0], [1], [0, 0, 1, 1], [], []>} : vector<256x8xbf16>, vector<8x128xbf16>, vector<256x128xf32> -> vector<256x128xf32>
    %42 = arith.addf %34, %41 : vector<256x128xf32>
    %cst_15 = arith.constant 0.000000e+00 : f32
    %43 = vector.broadcast %cst_15 : f32 to vector<15x8xf32>
    %44 = vector.extract_strided_slice %23 {offsets = [0, 0], sizes = [241, 8], strides = [1, 1]} : vector<256x8xf32> to vector<241x8xf32>
    %45 = tpu.concatenate %43, %44 in 0 : vector<15x8xf32>, vector<241x8xf32> -> vector<256x8xf32>
    %cst_16 = arith.constant 0.000000e+00 : f32
    %46 = vector.shape_cast %20 : vector<256x1xi1> to vector<256x1xi1>
    %47 = vector.broadcast %46 : vector<256x1xi1> to vector<256x8xi1>
    %48 = vector.broadcast %cst_16 : f32 to vector<256x8xf32>
    %49 = arith.select %47, %45, %48 : vector<256x8xi1>, vector<256x8xf32>
    %50 = arith.truncf %49 : vector<256x8xf32> to vector<256x8xbf16>
    %c2 = arith.constant 2 : index
    %c0_17 = arith.constant 0 : index
    %c0_18 = arith.constant 0 : index
    %51 = vector.load %arg2[%c2, %c0_17, %c0_18] : memref<9x8x128xbf16, #tpu.memory_space<vmem>>, vector<1x8x128xbf16>
    %52 = vector.shape_cast %51 : vector<1x8x128xbf16> to vector<8x128xbf16>
    %cst_19 = arith.constant dense<0.000000e+00> : vector<256x128xf32>
    %53 = tpu.matmul %50, %52, %cst_19 {dimension_numbers = #tpu.dot_dimension_numbers<[1], [0], [0], [1], [0, 0, 1, 1], [], []>} : vector<256x8xbf16>, vector<8x128xbf16>, vector<256x128xf32> -> vector<256x128xf32>
    %54 = arith.addf %42, %53 : vector<256x128xf32>
    %cst_20 = arith.constant 0.000000e+00 : f32
    %55 = vector.broadcast %cst_20 : f32 to vector<1x8xf32>
    %56 = vector.extract_strided_slice %23 {offsets = [0, 0], sizes = [255, 8], strides = [1, 1]} : vector<256x8xf32> to vector<255x8xf32>
    %57 = tpu.concatenate %55, %56 in 0 : vector<1x8xf32>, vector<255x8xf32> -> vector<256x8xf32>
    %cst_21 = arith.constant 0.000000e+00 : f32
    %58 = vector.shape_cast %18 : vector<256x1xi1> to vector<256x1xi1>
    %59 = vector.broadcast %58 : vector<256x1xi1> to vector<256x8xi1>
    %60 = vector.broadcast %cst_21 : f32 to vector<256x8xf32>
    %61 = arith.select %59, %57, %60 : vector<256x8xi1>, vector<256x8xf32>
    %62 = arith.truncf %61 : vector<256x8xf32> to vector<256x8xbf16>
    %c3 = arith.constant 3 : index
    %c0_22 = arith.constant 0 : index
    %c0_23 = arith.constant 0 : index
    %63 = vector.load %arg2[%c3, %c0_22, %c0_23] : memref<9x8x128xbf16, #tpu.memory_space<vmem>>, vector<1x8x128xbf16>
    %64 = vector.shape_cast %63 : vector<1x8x128xbf16> to vector<8x128xbf16>
    %cst_24 = arith.constant dense<0.000000e+00> : vector<256x128xf32>
    %65 = tpu.matmul %62, %64, %cst_24 {dimension_numbers = #tpu.dot_dimension_numbers<[1], [0], [0], [1], [0, 0, 1, 1], [], []>} : vector<256x8xbf16>, vector<8x128xbf16>, vector<256x128xf32> -> vector<256x128xf32>
    %66 = arith.addf %54, %65 : vector<256x128xf32>
    %67 = arith.truncf %23 : vector<256x8xf32> to vector<256x8xbf16>
    %c4 = arith.constant 4 : index
    %c0_25 = arith.constant 0 : index
    %c0_26 = arith.constant 0 : index
    %68 = vector.load %arg2[%c4, %c0_25, %c0_26] : memref<9x8x128xbf16, #tpu.memory_space<vmem>>, vector<1x8x128xbf16>
    %69 = vector.shape_cast %68 : vector<1x8x128xbf16> to vector<8x128xbf16>
    %cst_27 = arith.constant dense<0.000000e+00> : vector<256x128xf32>
    %70 = tpu.matmul %67, %69, %cst_27 {dimension_numbers = #tpu.dot_dimension_numbers<[1], [0], [0], [1], [0, 0, 1, 1], [], []>} : vector<256x8xbf16>, vector<8x128xbf16>, vector<256x128xf32> -> vector<256x128xf32>
    %71 = arith.addf %66, %70 : vector<256x128xf32>
    %cst_28 = arith.constant 0.000000e+00 : f32
    %72 = vector.broadcast %cst_28 : f32 to vector<1x8xf32>
    %73 = vector.extract_strided_slice %23 {offsets = [1, 0], sizes = [255, 8], strides = [1, 1]} : vector<256x8xf32> to vector<255x8xf32>
    %74 = tpu.concatenate %73, %72 in 0 : vector<255x8xf32>, vector<1x8xf32> -> vector<256x8xf32>
    %cst_29 = arith.constant 0.000000e+00 : f32
    %75 = vector.shape_cast %20 : vector<256x1xi1> to vector<256x1xi1>
    %76 = vector.broadcast %75 : vector<256x1xi1> to vector<256x8xi1>
    %77 = vector.broadcast %cst_29 : f32 to vector<256x8xf32>
    %78 = arith.select %76, %74, %77 : vector<256x8xi1>, vector<256x8xf32>
    %79 = arith.truncf %78 : vector<256x8xf32> to vector<256x8xbf16>
    %c5 = arith.constant 5 : index
    %c0_30 = arith.constant 0 : index
    %c0_31 = arith.constant 0 : index
    %80 = vector.load %arg2[%c5, %c0_30, %c0_31] : memref<9x8x128xbf16, #tpu.memory_space<vmem>>, vector<1x8x128xbf16>
    %81 = vector.shape_cast %80 : vector<1x8x128xbf16> to vector<8x128xbf16>
    %cst_32 = arith.constant dense<0.000000e+00> : vector<256x128xf32>
    %82 = tpu.matmul %79, %81, %cst_32 {dimension_numbers = #tpu.dot_dimension_numbers<[1], [0], [0], [1], [0, 0, 1, 1], [], []>} : vector<256x8xbf16>, vector<8x128xbf16>, vector<256x128xf32> -> vector<256x128xf32>
    %83 = arith.addf %71, %82 : vector<256x128xf32>
    %cst_33 = arith.constant 0.000000e+00 : f32
    %84 = vector.broadcast %cst_33 : f32 to vector<15x8xf32>
    %85 = vector.extract_strided_slice %23 {offsets = [15, 0], sizes = [241, 8], strides = [1, 1]} : vector<256x8xf32> to vector<241x8xf32>
    %86 = tpu.concatenate %85, %84 in 0 : vector<241x8xf32>, vector<15x8xf32> -> vector<256x8xf32>
    %cst_34 = arith.constant 0.000000e+00 : f32
    %87 = vector.shape_cast %18 : vector<256x1xi1> to vector<256x1xi1>
    %88 = vector.broadcast %87 : vector<256x1xi1> to vector<256x8xi1>
    %89 = vector.broadcast %cst_34 : f32 to vector<256x8xf32>
    %90 = arith.select %88, %86, %89 : vector<256x8xi1>, vector<256x8xf32>
    %91 = arith.truncf %90 : vector<256x8xf32> to vector<256x8xbf16>
    %c6 = arith.constant 6 : index
    %c0_35 = arith.constant 0 : index
    %c0_36 = arith.constant 0 : index
    %92 = vector.load %arg2[%c6, %c0_35, %c0_36] : memref<9x8x128xbf16, #tpu.memory_space<vmem>>, vector<1x8x128xbf16>
    %93 = vector.shape_cast %92 : vector<1x8x128xbf16> to vector<8x128xbf16>
    %cst_37 = arith.constant dense<0.000000e+00> : vector<256x128xf32>
    %94 = tpu.matmul %91, %93, %cst_37 {dimension_numbers = #tpu.dot_dimension_numbers<[1], [0], [0], [1], [0, 0, 1, 1], [], []>} : vector<256x8xbf16>, vector<8x128xbf16>, vector<256x128xf32> -> vector<256x128xf32>
    %95 = arith.addf %83, %94 : vector<256x128xf32>
    %cst_38 = arith.constant 0.000000e+00 : f32
    %96 = vector.broadcast %cst_38 : f32 to vector<16x8xf32>
    %97 = vector.extract_strided_slice %23 {offsets = [16, 0], sizes = [240, 8], strides = [1, 1]} : vector<256x8xf32> to vector<240x8xf32>
    %98 = tpu.concatenate %97, %96 in 0 : vector<240x8xf32>, vector<16x8xf32> -> vector<256x8xf32>
    %99 = arith.truncf %98 : vector<256x8xf32> to vector<256x8xbf16>
    %c7 = arith.constant 7 : index
    %c0_39 = arith.constant 0 : index
    %c0_40 = arith.constant 0 : index
    %100 = vector.load %arg2[%c7, %c0_39, %c0_40] : memref<9x8x128xbf16, #tpu.memory_space<vmem>>, vector<1x8x128xbf16>
    %101 = vector.shape_cast %100 : vector<1x8x128xbf16> to vector<8x128xbf16>
    %cst_41 = arith.constant dense<0.000000e+00> : vector<256x128xf32>
    %102 = tpu.matmul %99, %101, %cst_41 {dimension_numbers = #tpu.dot_dimension_numbers<[1], [0], [0], [1], [0, 0, 1, 1], [], []>} : vector<256x8xbf16>, vector<8x128xbf16>, vector<256x128xf32> -> vector<256x128xf32>
    %103 = arith.addf %95, %102 : vector<256x128xf32>
    %cst_42 = arith.constant 0.000000e+00 : f32
    %104 = vector.broadcast %cst_42 : f32 to vector<17x8xf32>
    %105 = vector.extract_strided_slice %23 {offsets = [17, 0], sizes = [239, 8], strides = [1, 1]} : vector<256x8xf32> to vector<239x8xf32>
    %106 = tpu.concatenate %105, %104 in 0 : vector<239x8xf32>, vector<17x8xf32> -> vector<256x8xf32>
    %cst_43 = arith.constant 0.000000e+00 : f32
    %107 = vector.shape_cast %20 : vector<256x1xi1> to vector<256x1xi1>
    %108 = vector.broadcast %107 : vector<256x1xi1> to vector<256x8xi1>
    %109 = vector.broadcast %cst_43 : f32 to vector<256x8xf32>
    %110 = arith.select %108, %106, %109 : vector<256x8xi1>, vector<256x8xf32>
    %111 = arith.truncf %110 : vector<256x8xf32> to vector<256x8xbf16>
    %c8 = arith.constant 8 : index
    %c0_44 = arith.constant 0 : index
    %c0_45 = arith.constant 0 : index
    %112 = vector.load %arg2[%c8, %c0_44, %c0_45] : memref<9x8x128xbf16, #tpu.memory_space<vmem>>, vector<1x8x128xbf16>
    %113 = vector.shape_cast %112 : vector<1x8x128xbf16> to vector<8x128xbf16>
    %cst_46 = arith.constant dense<0.000000e+00> : vector<256x128xf32>
    %114 = tpu.matmul %111, %113, %cst_46 {dimension_numbers = #tpu.dot_dimension_numbers<[1], [0], [0], [1], [0, 0, 1, 1], [], []>} : vector<256x8xbf16>, vector<8x128xbf16>, vector<256x128xf32> -> vector<256x128xf32>
    %115 = arith.addf %103, %114 : vector<256x128xf32>
    %c0_47 = arith.constant 0 : index
    %c0_48 = arith.constant 0 : index
    %116 = vector.load %arg3[%c0_47, %c0_48] : memref<1x128xf32, #tpu.memory_space<vmem>>, vector<1x128xf32>
    %117 = vector.broadcast %116 : vector<1x128xf32> to vector<256x128xf32>
    %118 = arith.addf %115, %117 : vector<256x128xf32>
    %cst_49 = arith.constant 0.000000e+00 : f32
    %119 = vector.broadcast %cst_49 : f32 to vector<256x128xf32>
    %120 = arith.maximumf %118, %119 : vector<256x128xf32>
    %cst_50 = arith.constant 0.000000e+00 : f32
    %121 = vector.broadcast %cst_50 : f32 to vector<17x128xf32>
    %122 = vector.extract_strided_slice %120 {offsets = [0, 0], sizes = [239, 128], strides = [1, 1]} : vector<256x128xf32> to vector<239x128xf32>
    %123 = tpu.concatenate %121, %122 in 0 : vector<17x128xf32>, vector<239x128xf32> -> vector<256x128xf32>
    %cst_51 = arith.constant 0.000000e+00 : f32
    %124 = vector.shape_cast %18 : vector<256x1xi1> to vector<256x1xi1>
    %125 = vector.broadcast %124 : vector<256x1xi1> to vector<256x128xi1>
    %126 = vector.broadcast %cst_51 : f32 to vector<256x128xf32>
    %127 = arith.select %125, %123, %126 : vector<256x128xi1>, vector<256x128xf32>
    %128 = arith.truncf %127 : vector<256x128xf32> to vector<256x128xbf16>
    %c0_52 = arith.constant 0 : index
    %c0_53 = arith.constant 0 : index
    %c0_54 = arith.constant 0 : index
    %129 = vector.load %arg4[%c0_52, %c0_53, %c0_54] : memref<9x128x128xbf16, #tpu.memory_space<vmem>>, vector<1x128x128xbf16>
    %130 = vector.shape_cast %129 : vector<1x128x128xbf16> to vector<128x128xbf16>
    %cst_55 = arith.constant dense<0.000000e+00> : vector<256x128xf32>
    %131 = tpu.matmul %128, %130, %cst_55 {dimension_numbers = #tpu.dot_dimension_numbers<[1], [0], [0], [1], [0, 0, 1, 1], [], []>} : vector<256x128xbf16>, vector<128x128xbf16>, vector<256x128xf32> -> vector<256x128xf32>
    %cst_56 = arith.constant 0.000000e+00 : f32
    %132 = vector.broadcast %cst_56 : f32 to vector<16x128xf32>
    %133 = vector.extract_strided_slice %120 {offsets = [0, 0], sizes = [240, 128], strides = [1, 1]} : vector<256x128xf32> to vector<240x128xf32>
    %134 = tpu.concatenate %132, %133 in 0 : vector<16x128xf32>, vector<240x128xf32> -> vector<256x128xf32>
    %135 = arith.truncf %134 : vector<256x128xf32> to vector<256x128xbf16>
    %c1_57 = arith.constant 1 : index
    %c0_58 = arith.constant 0 : index
    %c0_59 = arith.constant 0 : index
    %136 = vector.load %arg4[%c1_57, %c0_58, %c0_59] : memref<9x128x128xbf16, #tpu.memory_space<vmem>>, vector<1x128x128xbf16>
    %137 = vector.shape_cast %136 : vector<1x128x128xbf16> to vector<128x128xbf16>
    %cst_60 = arith.constant dense<0.000000e+00> : vector<256x128xf32>
    %138 = tpu.matmul %135, %137, %cst_60 {dimension_numbers = #tpu.dot_dimension_numbers<[1], [0], [0], [1], [0, 0, 1, 1], [], []>} : vector<256x128xbf16>, vector<128x128xbf16>, vector<256x128xf32> -> vector<256x128xf32>
    %139 = arith.addf %131, %138 : vector<256x128xf32>
    %cst_61 = arith.constant 0.000000e+00 : f32
    %140 = vector.broadcast %cst_61 : f32 to vector<15x128xf32>
    %141 = vector.extract_strided_slice %120 {offsets = [0, 0], sizes = [241, 128], strides = [1, 1]} : vector<256x128xf32> to vector<241x128xf32>
    %142 = tpu.concatenate %140, %141 in 0 : vector<15x128xf32>, vector<241x128xf32> -> vector<256x128xf32>
    %cst_62 = arith.constant 0.000000e+00 : f32
    %143 = vector.shape_cast %20 : vector<256x1xi1> to vector<256x1xi1>
    %144 = vector.broadcast %143 : vector<256x1xi1> to vector<256x128xi1>
    %145 = vector.broadcast %cst_62 : f32 to vector<256x128xf32>
    %146 = arith.select %144, %142, %145 : vector<256x128xi1>, vector<256x128xf32>
    %147 = arith.truncf %146 : vector<256x128xf32> to vector<256x128xbf16>
    %c2_63 = arith.constant 2 : index
    %c0_64 = arith.constant 0 : index
    %c0_65 = arith.constant 0 : index
    %148 = vector.load %arg4[%c2_63, %c0_64, %c0_65] : memref<9x128x128xbf16, #tpu.memory_space<vmem>>, vector<1x128x128xbf16>
    %149 = vector.shape_cast %148 : vector<1x128x128xbf16> to vector<128x128xbf16>
    %cst_66 = arith.constant dense<0.000000e+00> : vector<256x128xf32>
    %150 = tpu.matmul %147, %149, %cst_66 {dimension_numbers = #tpu.dot_dimension_numbers<[1], [0], [0], [1], [0, 0, 1, 1], [], []>} : vector<256x128xbf16>, vector<128x128xbf16>, vector<256x128xf32> -> vector<256x128xf32>
    %151 = arith.addf %139, %150 : vector<256x128xf32>
    %cst_67 = arith.constant 0.000000e+00 : f32
    %152 = vector.broadcast %cst_67 : f32 to vector<1x128xf32>
    %153 = vector.extract_strided_slice %120 {offsets = [0, 0], sizes = [255, 128], strides = [1, 1]} : vector<256x128xf32> to vector<255x128xf32>
    %154 = tpu.concatenate %152, %153 in 0 : vector<1x128xf32>, vector<255x128xf32> -> vector<256x128xf32>
    %cst_68 = arith.constant 0.000000e+00 : f32
    %155 = vector.shape_cast %18 : vector<256x1xi1> to vector<256x1xi1>
    %156 = vector.broadcast %155 : vector<256x1xi1> to vector<256x128xi1>
    %157 = vector.broadcast %cst_68 : f32 to vector<256x128xf32>
    %158 = arith.select %156, %154, %157 : vector<256x128xi1>, vector<256x128xf32>
    %159 = arith.truncf %158 : vector<256x128xf32> to vector<256x128xbf16>
    %c3_69 = arith.constant 3 : index
    %c0_70 = arith.constant 0 : index
    %c0_71 = arith.constant 0 : index
    %160 = vector.load %arg4[%c3_69, %c0_70, %c0_71] : memref<9x128x128xbf16, #tpu.memory_space<vmem>>, vector<1x128x128xbf16>
    %161 = vector.shape_cast %160 : vector<1x128x128xbf16> to vector<128x128xbf16>
    %cst_72 = arith.constant dense<0.000000e+00> : vector<256x128xf32>
    %162 = tpu.matmul %159, %161, %cst_72 {dimension_numbers = #tpu.dot_dimension_numbers<[1], [0], [0], [1], [0, 0, 1, 1], [], []>} : vector<256x128xbf16>, vector<128x128xbf16>, vector<256x128xf32> -> vector<256x128xf32>
    %163 = arith.addf %151, %162 : vector<256x128xf32>
    %164 = arith.truncf %120 : vector<256x128xf32> to vector<256x128xbf16>
    %c4_73 = arith.constant 4 : index
    %c0_74 = arith.constant 0 : index
    %c0_75 = arith.constant 0 : index
    %165 = vector.load %arg4[%c4_73, %c0_74, %c0_75] : memref<9x128x128xbf16, #tpu.memory_space<vmem>>, vector<1x128x128xbf16>
    %166 = vector.shape_cast %165 : vector<1x128x128xbf16> to vector<128x128xbf16>
    %cst_76 = arith.constant dense<0.000000e+00> : vector<256x128xf32>
    %167 = tpu.matmul %164, %166, %cst_76 {dimension_numbers = #tpu.dot_dimension_numbers<[1], [0], [0], [1], [0, 0, 1, 1], [], []>} : vector<256x128xbf16>, vector<128x128xbf16>, vector<256x128xf32> -> vector<256x128xf32>
    %168 = arith.addf %163, %167 : vector<256x128xf32>
    %cst_77 = arith.constant 0.000000e+00 : f32
    %169 = vector.broadcast %cst_77 : f32 to vector<1x128xf32>
    %170 = vector.extract_strided_slice %120 {offsets = [1, 0], sizes = [255, 128], strides = [1, 1]} : vector<256x128xf32> to vector<255x128xf32>
    %171 = tpu.concatenate %170, %169 in 0 : vector<255x128xf32>, vector<1x128xf32> -> vector<256x128xf32>
    %cst_78 = arith.constant 0.000000e+00 : f32
    %172 = vector.shape_cast %20 : vector<256x1xi1> to vector<256x1xi1>
    %173 = vector.broadcast %172 : vector<256x1xi1> to vector<256x128xi1>
    %174 = vector.broadcast %cst_78 : f32 to vector<256x128xf32>
    %175 = arith.select %173, %171, %174 : vector<256x128xi1>, vector<256x128xf32>
    %176 = arith.truncf %175 : vector<256x128xf32> to vector<256x128xbf16>
    %c5_79 = arith.constant 5 : index
    %c0_80 = arith.constant 0 : index
    %c0_81 = arith.constant 0 : index
    %177 = vector.load %arg4[%c5_79, %c0_80, %c0_81] : memref<9x128x128xbf16, #tpu.memory_space<vmem>>, vector<1x128x128xbf16>
    %178 = vector.shape_cast %177 : vector<1x128x128xbf16> to vector<128x128xbf16>
    %cst_82 = arith.constant dense<0.000000e+00> : vector<256x128xf32>
    %179 = tpu.matmul %176, %178, %cst_82 {dimension_numbers = #tpu.dot_dimension_numbers<[1], [0], [0], [1], [0, 0, 1, 1], [], []>} : vector<256x128xbf16>, vector<128x128xbf16>, vector<256x128xf32> -> vector<256x128xf32>
    %180 = arith.addf %168, %179 : vector<256x128xf32>
    %cst_83 = arith.constant 0.000000e+00 : f32
    %181 = vector.broadcast %cst_83 : f32 to vector<15x128xf32>
    %182 = vector.extract_strided_slice %120 {offsets = [15, 0], sizes = [241, 128], strides = [1, 1]} : vector<256x128xf32> to vector<241x128xf32>
    %183 = tpu.concatenate %182, %181 in 0 : vector<241x128xf32>, vector<15x128xf32> -> vector<256x128xf32>
    %cst_84 = arith.constant 0.000000e+00 : f32
    %184 = vector.shape_cast %18 : vector<256x1xi1> to vector<256x1xi1>
    %185 = vector.broadcast %184 : vector<256x1xi1> to vector<256x128xi1>
    %186 = vector.broadcast %cst_84 : f32 to vector<256x128xf32>
    %187 = arith.select %185, %183, %186 : vector<256x128xi1>, vector<256x128xf32>
    %188 = arith.truncf %187 : vector<256x128xf32> to vector<256x128xbf16>
    %c6_85 = arith.constant 6 : index
    %c0_86 = arith.constant 0 : index
    %c0_87 = arith.constant 0 : index
    %189 = vector.load %arg4[%c6_85, %c0_86, %c0_87] : memref<9x128x128xbf16, #tpu.memory_space<vmem>>, vector<1x128x128xbf16>
    %190 = vector.shape_cast %189 : vector<1x128x128xbf16> to vector<128x128xbf16>
    %cst_88 = arith.constant dense<0.000000e+00> : vector<256x128xf32>
    %191 = tpu.matmul %188, %190, %cst_88 {dimension_numbers = #tpu.dot_dimension_numbers<[1], [0], [0], [1], [0, 0, 1, 1], [], []>} : vector<256x128xbf16>, vector<128x128xbf16>, vector<256x128xf32> -> vector<256x128xf32>
    %192 = arith.addf %180, %191 : vector<256x128xf32>
    %cst_89 = arith.constant 0.000000e+00 : f32
    %193 = vector.broadcast %cst_89 : f32 to vector<16x128xf32>
    %194 = vector.extract_strided_slice %120 {offsets = [16, 0], sizes = [240, 128], strides = [1, 1]} : vector<256x128xf32> to vector<240x128xf32>
    %195 = tpu.concatenate %194, %193 in 0 : vector<240x128xf32>, vector<16x128xf32> -> vector<256x128xf32>
    %196 = arith.truncf %195 : vector<256x128xf32> to vector<256x128xbf16>
    %c7_90 = arith.constant 7 : index
    %c0_91 = arith.constant 0 : index
    %c0_92 = arith.constant 0 : index
    %197 = vector.load %arg4[%c7_90, %c0_91, %c0_92] : memref<9x128x128xbf16, #tpu.memory_space<vmem>>, vector<1x128x128xbf16>
    %198 = vector.shape_cast %197 : vector<1x128x128xbf16> to vector<128x128xbf16>
    %cst_93 = arith.constant dense<0.000000e+00> : vector<256x128xf32>
    %199 = tpu.matmul %196, %198, %cst_93 {dimension_numbers = #tpu.dot_dimension_numbers<[1], [0], [0], [1], [0, 0, 1, 1], [], []>} : vector<256x128xbf16>, vector<128x128xbf16>, vector<256x128xf32> -> vector<256x128xf32>
    %200 = arith.addf %192, %199 : vector<256x128xf32>
    %cst_94 = arith.constant 0.000000e+00 : f32
    %201 = vector.broadcast %cst_94 : f32 to vector<17x128xf32>
    %202 = vector.extract_strided_slice %120 {offsets = [17, 0], sizes = [239, 128], strides = [1, 1]} : vector<256x128xf32> to vector<239x128xf32>
    %203 = tpu.concatenate %202, %201 in 0 : vector<239x128xf32>, vector<17x128xf32> -> vector<256x128xf32>
    %cst_95 = arith.constant 0.000000e+00 : f32
    %204 = vector.shape_cast %20 : vector<256x1xi1> to vector<256x1xi1>
    %205 = vector.broadcast %204 : vector<256x1xi1> to vector<256x128xi1>
    %206 = vector.broadcast %cst_95 : f32 to vector<256x128xf32>
    %207 = arith.select %205, %203, %206 : vector<256x128xi1>, vector<256x128xf32>
    %208 = arith.truncf %207 : vector<256x128xf32> to vector<256x128xbf16>
    %c8_96 = arith.constant 8 : index
    %c0_97 = arith.constant 0 : index
    %c0_98 = arith.constant 0 : index
    %209 = vector.load %arg4[%c8_96, %c0_97, %c0_98] : memref<9x128x128xbf16, #tpu.memory_space<vmem>>, vector<1x128x128xbf16>
    %210 = vector.shape_cast %209 : vector<1x128x128xbf16> to vector<128x128xbf16>
    %cst_99 = arith.constant dense<0.000000e+00> : vector<256x128xf32>
    %211 = tpu.matmul %208, %210, %cst_99 {dimension_numbers = #tpu.dot_dimension_numbers<[1], [0], [0], [1], [0, 0, 1, 1], [], []>} : vector<256x128xbf16>, vector<128x128xbf16>, vector<256x128xf32> -> vector<256x128xf32>
    %212 = arith.addf %200, %211 : vector<256x128xf32>
    %c0_100 = arith.constant 0 : index
    %c0_101 = arith.constant 0 : index
    %213 = vector.load %arg5[%c0_100, %c0_101] : memref<1x128xf32, #tpu.memory_space<vmem>>, vector<1x128xf32>
    %214 = vector.broadcast %213 : vector<1x128xf32> to vector<256x128xf32>
    %215 = arith.addf %212, %214 : vector<256x128xf32>
    %cst_102 = arith.constant 0.000000e+00 : f32
    %216 = vector.broadcast %cst_102 : f32 to vector<256x128xf32>
    %217 = arith.maximumf %215, %216 : vector<256x128xf32>
    %cst_103 = arith.constant 0.000000e+00 : f32
    %218 = vector.broadcast %cst_103 : f32 to vector<17x128xf32>
    %219 = vector.extract_strided_slice %217 {offsets = [0, 0], sizes = [239, 128], strides = [1, 1]} : vector<256x128xf32> to vector<239x128xf32>
    %220 = tpu.concatenate %218, %219 in 0 : vector<17x128xf32>, vector<239x128xf32> -> vector<256x128xf32>
    %cst_104 = arith.constant 0.000000e+00 : f32
    %221 = vector.shape_cast %18 : vector<256x1xi1> to vector<256x1xi1>
    %222 = vector.broadcast %221 : vector<256x1xi1> to vector<256x128xi1>
    %223 = vector.broadcast %cst_104 : f32 to vector<256x128xf32>
    %224 = arith.select %222, %220, %223 : vector<256x128xi1>, vector<256x128xf32>
    %225 = arith.truncf %224 : vector<256x128xf32> to vector<256x128xbf16>
    %c0_105 = arith.constant 0 : index
    %c0_106 = arith.constant 0 : index
    %c0_107 = arith.constant 0 : index
    %226 = vector.load %arg6[%c0_105, %c0_106, %c0_107] : memref<9x128x128xbf16, #tpu.memory_space<vmem>>, vector<1x128x128xbf16>
    %227 = vector.shape_cast %226 : vector<1x128x128xbf16> to vector<128x128xbf16>
    %cst_108 = arith.constant dense<0.000000e+00> : vector<256x128xf32>
    %228 = tpu.matmul %225, %227, %cst_108 {dimension_numbers = #tpu.dot_dimension_numbers<[1], [0], [0], [1], [0, 0, 1, 1], [], []>} : vector<256x128xbf16>, vector<128x128xbf16>, vector<256x128xf32> -> vector<256x128xf32>
    %cst_109 = arith.constant 0.000000e+00 : f32
    %229 = vector.broadcast %cst_109 : f32 to vector<16x128xf32>
    %230 = vector.extract_strided_slice %217 {offsets = [0, 0], sizes = [240, 128], strides = [1, 1]} : vector<256x128xf32> to vector<240x128xf32>
    %231 = tpu.concatenate %229, %230 in 0 : vector<16x128xf32>, vector<240x128xf32> -> vector<256x128xf32>
    %232 = arith.truncf %231 : vector<256x128xf32> to vector<256x128xbf16>
    %c1_110 = arith.constant 1 : index
    %c0_111 = arith.constant 0 : index
    %c0_112 = arith.constant 0 : index
    %233 = vector.load %arg6[%c1_110, %c0_111, %c0_112] : memref<9x128x128xbf16, #tpu.memory_space<vmem>>, vector<1x128x128xbf16>
    %234 = vector.shape_cast %233 : vector<1x128x128xbf16> to vector<128x128xbf16>
    %cst_113 = arith.constant dense<0.000000e+00> : vector<256x128xf32>
    %235 = tpu.matmul %232, %234, %cst_113 {dimension_numbers = #tpu.dot_dimension_numbers<[1], [0], [0], [1], [0, 0, 1, 1], [], []>} : vector<256x128xbf16>, vector<128x128xbf16>, vector<256x128xf32> -> vector<256x128xf32>
    %236 = arith.addf %228, %235 : vector<256x128xf32>
    %cst_114 = arith.constant 0.000000e+00 : f32
    %237 = vector.broadcast %cst_114 : f32 to vector<15x128xf32>
    %238 = vector.extract_strided_slice %217 {offsets = [0, 0], sizes = [241, 128], strides = [1, 1]} : vector<256x128xf32> to vector<241x128xf32>
    %239 = tpu.concatenate %237, %238 in 0 : vector<15x128xf32>, vector<241x128xf32> -> vector<256x128xf32>
    %cst_115 = arith.constant 0.000000e+00 : f32
    %240 = vector.shape_cast %20 : vector<256x1xi1> to vector<256x1xi1>
    %241 = vector.broadcast %240 : vector<256x1xi1> to vector<256x128xi1>
    %242 = vector.broadcast %cst_115 : f32 to vector<256x128xf32>
    %243 = arith.select %241, %239, %242 : vector<256x128xi1>, vector<256x128xf32>
    %244 = arith.truncf %243 : vector<256x128xf32> to vector<256x128xbf16>
    %c2_116 = arith.constant 2 : index
    %c0_117 = arith.constant 0 : index
    %c0_118 = arith.constant 0 : index
    %245 = vector.load %arg6[%c2_116, %c0_117, %c0_118] : memref<9x128x128xbf16, #tpu.memory_space<vmem>>, vector<1x128x128xbf16>
    %246 = vector.shape_cast %245 : vector<1x128x128xbf16> to vector<128x128xbf16>
    %cst_119 = arith.constant dense<0.000000e+00> : vector<256x128xf32>
    %247 = tpu.matmul %244, %246, %cst_119 {dimension_numbers = #tpu.dot_dimension_numbers<[1], [0], [0], [1], [0, 0, 1, 1], [], []>} : vector<256x128xbf16>, vector<128x128xbf16>, vector<256x128xf32> -> vector<256x128xf32>
    %248 = arith.addf %236, %247 : vector<256x128xf32>
    %cst_120 = arith.constant 0.000000e+00 : f32
    %249 = vector.broadcast %cst_120 : f32 to vector<1x128xf32>
    %250 = vector.extract_strided_slice %217 {offsets = [0, 0], sizes = [255, 128], strides = [1, 1]} : vector<256x128xf32> to vector<255x128xf32>
    %251 = tpu.concatenate %249, %250 in 0 : vector<1x128xf32>, vector<255x128xf32> -> vector<256x128xf32>
    %cst_121 = arith.constant 0.000000e+00 : f32
    %252 = vector.shape_cast %18 : vector<256x1xi1> to vector<256x1xi1>
    %253 = vector.broadcast %252 : vector<256x1xi1> to vector<256x128xi1>
    %254 = vector.broadcast %cst_121 : f32 to vector<256x128xf32>
    %255 = arith.select %253, %251, %254 : vector<256x128xi1>, vector<256x128xf32>
    %256 = arith.truncf %255 : vector<256x128xf32> to vector<256x128xbf16>
    %c3_122 = arith.constant 3 : index
    %c0_123 = arith.constant 0 : index
    %c0_124 = arith.constant 0 : index
    %257 = vector.load %arg6[%c3_122, %c0_123, %c0_124] : memref<9x128x128xbf16, #tpu.memory_space<vmem>>, vector<1x128x128xbf16>
    %258 = vector.shape_cast %257 : vector<1x128x128xbf16> to vector<128x128xbf16>
    %cst_125 = arith.constant dense<0.000000e+00> : vector<256x128xf32>
    %259 = tpu.matmul %256, %258, %cst_125 {dimension_numbers = #tpu.dot_dimension_numbers<[1], [0], [0], [1], [0, 0, 1, 1], [], []>} : vector<256x128xbf16>, vector<128x128xbf16>, vector<256x128xf32> -> vector<256x128xf32>
    %260 = arith.addf %248, %259 : vector<256x128xf32>
    %261 = arith.truncf %217 : vector<256x128xf32> to vector<256x128xbf16>
    %c4_126 = arith.constant 4 : index
    %c0_127 = arith.constant 0 : index
    %c0_128 = arith.constant 0 : index
    %262 = vector.load %arg6[%c4_126, %c0_127, %c0_128] : memref<9x128x128xbf16, #tpu.memory_space<vmem>>, vector<1x128x128xbf16>
    %263 = vector.shape_cast %262 : vector<1x128x128xbf16> to vector<128x128xbf16>
    %cst_129 = arith.constant dense<0.000000e+00> : vector<256x128xf32>
    %264 = tpu.matmul %261, %263, %cst_129 {dimension_numbers = #tpu.dot_dimension_numbers<[1], [0], [0], [1], [0, 0, 1, 1], [], []>} : vector<256x128xbf16>, vector<128x128xbf16>, vector<256x128xf32> -> vector<256x128xf32>
    %265 = arith.addf %260, %264 : vector<256x128xf32>
    %cst_130 = arith.constant 0.000000e+00 : f32
    %266 = vector.broadcast %cst_130 : f32 to vector<1x128xf32>
    %267 = vector.extract_strided_slice %217 {offsets = [1, 0], sizes = [255, 128], strides = [1, 1]} : vector<256x128xf32> to vector<255x128xf32>
    %268 = tpu.concatenate %267, %266 in 0 : vector<255x128xf32>, vector<1x128xf32> -> vector<256x128xf32>
    %cst_131 = arith.constant 0.000000e+00 : f32
    %269 = vector.shape_cast %20 : vector<256x1xi1> to vector<256x1xi1>
    %270 = vector.broadcast %269 : vector<256x1xi1> to vector<256x128xi1>
    %271 = vector.broadcast %cst_131 : f32 to vector<256x128xf32>
    %272 = arith.select %270, %268, %271 : vector<256x128xi1>, vector<256x128xf32>
    %273 = arith.truncf %272 : vector<256x128xf32> to vector<256x128xbf16>
    %c5_132 = arith.constant 5 : index
    %c0_133 = arith.constant 0 : index
    %c0_134 = arith.constant 0 : index
    %274 = vector.load %arg6[%c5_132, %c0_133, %c0_134] : memref<9x128x128xbf16, #tpu.memory_space<vmem>>, vector<1x128x128xbf16>
    %275 = vector.shape_cast %274 : vector<1x128x128xbf16> to vector<128x128xbf16>
    %cst_135 = arith.constant dense<0.000000e+00> : vector<256x128xf32>
    %276 = tpu.matmul %273, %275, %cst_135 {dimension_numbers = #tpu.dot_dimension_numbers<[1], [0], [0], [1], [0, 0, 1, 1], [], []>} : vector<256x128xbf16>, vector<128x128xbf16>, vector<256x128xf32> -> vector<256x128xf32>
    %277 = arith.addf %265, %276 : vector<256x128xf32>
    %cst_136 = arith.constant 0.000000e+00 : f32
    %278 = vector.broadcast %cst_136 : f32 to vector<15x128xf32>
    %279 = vector.extract_strided_slice %217 {offsets = [15, 0], sizes = [241, 128], strides = [1, 1]} : vector<256x128xf32> to vector<241x128xf32>
    %280 = tpu.concatenate %279, %278 in 0 : vector<241x128xf32>, vector<15x128xf32> -> vector<256x128xf32>
    %cst_137 = arith.constant 0.000000e+00 : f32
    %281 = vector.shape_cast %18 : vector<256x1xi1> to vector<256x1xi1>
    %282 = vector.broadcast %281 : vector<256x1xi1> to vector<256x128xi1>
    %283 = vector.broadcast %cst_137 : f32 to vector<256x128xf32>
    %284 = arith.select %282, %280, %283 : vector<256x128xi1>, vector<256x128xf32>
    %285 = arith.truncf %284 : vector<256x128xf32> to vector<256x128xbf16>
    %c6_138 = arith.constant 6 : index
    %c0_139 = arith.constant 0 : index
    %c0_140 = arith.constant 0 : index
    %286 = vector.load %arg6[%c6_138, %c0_139, %c0_140] : memref<9x128x128xbf16, #tpu.memory_space<vmem>>, vector<1x128x128xbf16>
    %287 = vector.shape_cast %286 : vector<1x128x128xbf16> to vector<128x128xbf16>
    %cst_141 = arith.constant dense<0.000000e+00> : vector<256x128xf32>
    %288 = tpu.matmul %285, %287, %cst_141 {dimension_numbers = #tpu.dot_dimension_numbers<[1], [0], [0], [1], [0, 0, 1, 1], [], []>} : vector<256x128xbf16>, vector<128x128xbf16>, vector<256x128xf32> -> vector<256x128xf32>
    %289 = arith.addf %277, %288 : vector<256x128xf32>
    %cst_142 = arith.constant 0.000000e+00 : f32
    %290 = vector.broadcast %cst_142 : f32 to vector<16x128xf32>
    %291 = vector.extract_strided_slice %217 {offsets = [16, 0], sizes = [240, 128], strides = [1, 1]} : vector<256x128xf32> to vector<240x128xf32>
    %292 = tpu.concatenate %291, %290 in 0 : vector<240x128xf32>, vector<16x128xf32> -> vector<256x128xf32>
    %293 = arith.truncf %292 : vector<256x128xf32> to vector<256x128xbf16>
    %c7_143 = arith.constant 7 : index
    %c0_144 = arith.constant 0 : index
    %c0_145 = arith.constant 0 : index
    %294 = vector.load %arg6[%c7_143, %c0_144, %c0_145] : memref<9x128x128xbf16, #tpu.memory_space<vmem>>, vector<1x128x128xbf16>
    %295 = vector.shape_cast %294 : vector<1x128x128xbf16> to vector<128x128xbf16>
    %cst_146 = arith.constant dense<0.000000e+00> : vector<256x128xf32>
    %296 = tpu.matmul %293, %295, %cst_146 {dimension_numbers = #tpu.dot_dimension_numbers<[1], [0], [0], [1], [0, 0, 1, 1], [], []>} : vector<256x128xbf16>, vector<128x128xbf16>, vector<256x128xf32> -> vector<256x128xf32>
    %297 = arith.addf %289, %296 : vector<256x128xf32>
    %cst_147 = arith.constant 0.000000e+00 : f32
    %298 = vector.broadcast %cst_147 : f32 to vector<17x128xf32>
    %299 = vector.extract_strided_slice %217 {offsets = [17, 0], sizes = [239, 128], strides = [1, 1]} : vector<256x128xf32> to vector<239x128xf32>
    %300 = tpu.concatenate %299, %298 in 0 : vector<239x128xf32>, vector<17x128xf32> -> vector<256x128xf32>
    %cst_148 = arith.constant 0.000000e+00 : f32
    %301 = vector.shape_cast %20 : vector<256x1xi1> to vector<256x1xi1>
    %302 = vector.broadcast %301 : vector<256x1xi1> to vector<256x128xi1>
    %303 = vector.broadcast %cst_148 : f32 to vector<256x128xf32>
    %304 = arith.select %302, %300, %303 : vector<256x128xi1>, vector<256x128xf32>
    %305 = arith.truncf %304 : vector<256x128xf32> to vector<256x128xbf16>
    %c8_149 = arith.constant 8 : index
    %c0_150 = arith.constant 0 : index
    %c0_151 = arith.constant 0 : index
    %306 = vector.load %arg6[%c8_149, %c0_150, %c0_151] : memref<9x128x128xbf16, #tpu.memory_space<vmem>>, vector<1x128x128xbf16>
    %307 = vector.shape_cast %306 : vector<1x128x128xbf16> to vector<128x128xbf16>
    %cst_152 = arith.constant dense<0.000000e+00> : vector<256x128xf32>
    %308 = tpu.matmul %305, %307, %cst_152 {dimension_numbers = #tpu.dot_dimension_numbers<[1], [0], [0], [1], [0, 0, 1, 1], [], []>} : vector<256x128xbf16>, vector<128x128xbf16>, vector<256x128xf32> -> vector<256x128xf32>
    %309 = arith.addf %297, %308 : vector<256x128xf32>
    %c0_153 = arith.constant 0 : index
    %c0_154 = arith.constant 0 : index
    %310 = vector.load %arg7[%c0_153, %c0_154] : memref<1x128xf32, #tpu.memory_space<vmem>>, vector<1x128xf32>
    %311 = vector.broadcast %310 : vector<1x128xf32> to vector<256x128xf32>
    %312 = arith.addf %309, %311 : vector<256x128xf32>
    %cst_155 = arith.constant 0.000000e+00 : f32
    %313 = vector.broadcast %cst_155 : f32 to vector<256x128xf32>
    %314 = arith.maximumf %312, %313 : vector<256x128xf32>
    %315 = arith.truncf %314 : vector<256x128xf32> to vector<256x128xbf16>
    %c0_156 = arith.constant 0 : index
    %c0_157 = arith.constant 0 : index
    %316 = vector.load %arg8[%c0_156, %c0_157] : memref<128x128xbf16, #tpu.memory_space<vmem>>, vector<128x128xbf16>
    %cst_158 = arith.constant dense<0.000000e+00> : vector<256x128xf32>
    %317 = tpu.matmul %315, %316, %cst_158 {dimension_numbers = #tpu.dot_dimension_numbers<[1], [0], [0], [1], [0, 0, 1, 1], [], []>} : vector<256x128xbf16>, vector<128x128xbf16>, vector<256x128xf32> -> vector<256x128xf32>
    %c0_159 = arith.constant 0 : index
    %c0_160 = arith.constant 0 : index
    %318 = vector.load %arg9[%c0_159, %c0_160] : memref<1x128xf32, #tpu.memory_space<vmem>>, vector<1x128xf32>
    %319 = vector.broadcast %318 : vector<1x128xf32> to vector<256x128xf32>
    %320 = arith.addf %317, %319 : vector<256x128xf32>
    %321 = arith.addf %320, %217 : vector<256x128xf32>
    %cst_161 = arith.constant 0.000000e+00 : f32
    %322 = vector.broadcast %cst_161 : f32 to vector<17x128xf32>
    %323 = vector.extract_strided_slice %321 {offsets = [0, 0], sizes = [239, 128], strides = [1, 1]} : vector<256x128xf32> to vector<239x128xf32>
    %324 = tpu.concatenate %322, %323 in 0 : vector<17x128xf32>, vector<239x128xf32> -> vector<256x128xf32>
    %cst_162 = arith.constant 0.000000e+00 : f32
    %325 = vector.shape_cast %18 : vector<256x1xi1> to vector<256x1xi1>
    %326 = vector.broadcast %325 : vector<256x1xi1> to vector<256x128xi1>
    %327 = vector.broadcast %cst_162 : f32 to vector<256x128xf32>
    %328 = arith.select %326, %324, %327 : vector<256x128xi1>, vector<256x128xf32>
    %329 = arith.truncf %328 : vector<256x128xf32> to vector<256x128xbf16>
    %c0_163 = arith.constant 0 : index
    %c0_164 = arith.constant 0 : index
    %c0_165 = arith.constant 0 : index
    %330 = vector.load %arg10[%c0_163, %c0_164, %c0_165] : memref<9x128x128xbf16, #tpu.memory_space<vmem>>, vector<1x128x128xbf16>
    %331 = vector.shape_cast %330 : vector<1x128x128xbf16> to vector<128x128xbf16>
    %cst_166 = arith.constant dense<0.000000e+00> : vector<256x128xf32>
    %332 = tpu.matmul %329, %331, %cst_166 {dimension_numbers = #tpu.dot_dimension_numbers<[1], [0], [0], [1], [0, 0, 1, 1], [], []>} : vector<256x128xbf16>, vector<128x128xbf16>, vector<256x128xf32> -> vector<256x128xf32>
    %cst_167 = arith.constant 0.000000e+00 : f32
    %333 = vector.broadcast %cst_167 : f32 to vector<16x128xf32>
    %334 = vector.extract_strided_slice %321 {offsets = [0, 0], sizes = [240, 128], strides = [1, 1]} : vector<256x128xf32> to vector<240x128xf32>
    %335 = tpu.concatenate %333, %334 in 0 : vector<16x128xf32>, vector<240x128xf32> -> vector<256x128xf32>
    %336 = arith.truncf %335 : vector<256x128xf32> to vector<256x128xbf16>
    %c1_168 = arith.constant 1 : index
    %c0_169 = arith.constant 0 : index
    %c0_170 = arith.constant 0 : index
    %337 = vector.load %arg10[%c1_168, %c0_169, %c0_170] : memref<9x128x128xbf16, #tpu.memory_space<vmem>>, vector<1x128x128xbf16>
    %338 = vector.shape_cast %337 : vector<1x128x128xbf16> to vector<128x128xbf16>
    %cst_171 = arith.constant dense<0.000000e+00> : vector<256x128xf32>
    %339 = tpu.matmul %336, %338, %cst_171 {dimension_numbers = #tpu.dot_dimension_numbers<[1], [0], [0], [1], [0, 0, 1, 1], [], []>} : vector<256x128xbf16>, vector<128x128xbf16>, vector<256x128xf32> -> vector<256x128xf32>
    %340 = arith.addf %332, %339 : vector<256x128xf32>
    %cst_172 = arith.constant 0.000000e+00 : f32
    %341 = vector.broadcast %cst_172 : f32 to vector<15x128xf32>
    %342 = vector.extract_strided_slice %321 {offsets = [0, 0], sizes = [241, 128], strides = [1, 1]} : vector<256x128xf32> to vector<241x128xf32>
    %343 = tpu.concatenate %341, %342 in 0 : vector<15x128xf32>, vector<241x128xf32> -> vector<256x128xf32>
    %cst_173 = arith.constant 0.000000e+00 : f32
    %344 = vector.shape_cast %20 : vector<256x1xi1> to vector<256x1xi1>
    %345 = vector.broadcast %344 : vector<256x1xi1> to vector<256x128xi1>
    %346 = vector.broadcast %cst_173 : f32 to vector<256x128xf32>
    %347 = arith.select %345, %343, %346 : vector<256x128xi1>, vector<256x128xf32>
    %348 = arith.truncf %347 : vector<256x128xf32> to vector<256x128xbf16>
    %c2_174 = arith.constant 2 : index
    %c0_175 = arith.constant 0 : index
    %c0_176 = arith.constant 0 : index
    %349 = vector.load %arg10[%c2_174, %c0_175, %c0_176] : memref<9x128x128xbf16, #tpu.memory_space<vmem>>, vector<1x128x128xbf16>
    %350 = vector.shape_cast %349 : vector<1x128x128xbf16> to vector<128x128xbf16>
    %cst_177 = arith.constant dense<0.000000e+00> : vector<256x128xf32>
    %351 = tpu.matmul %348, %350, %cst_177 {dimension_numbers = #tpu.dot_dimension_numbers<[1], [0], [0], [1], [0, 0, 1, 1], [], []>} : vector<256x128xbf16>, vector<128x128xbf16>, vector<256x128xf32> -> vector<256x128xf32>
    %352 = arith.addf %340, %351 : vector<256x128xf32>
    %cst_178 = arith.constant 0.000000e+00 : f32
    %353 = vector.broadcast %cst_178 : f32 to vector<1x128xf32>
    %354 = vector.extract_strided_slice %321 {offsets = [0, 0], sizes = [255, 128], strides = [1, 1]} : vector<256x128xf32> to vector<255x128xf32>
    %355 = tpu.concatenate %353, %354 in 0 : vector<1x128xf32>, vector<255x128xf32> -> vector<256x128xf32>
    %cst_179 = arith.constant 0.000000e+00 : f32
    %356 = vector.shape_cast %18 : vector<256x1xi1> to vector<256x1xi1>
    %357 = vector.broadcast %356 : vector<256x1xi1> to vector<256x128xi1>
    %358 = vector.broadcast %cst_179 : f32 to vector<256x128xf32>
    %359 = arith.select %357, %355, %358 : vector<256x128xi1>, vector<256x128xf32>
    %360 = arith.truncf %359 : vector<256x128xf32> to vector<256x128xbf16>
    %c3_180 = arith.constant 3 : index
    %c0_181 = arith.constant 0 : index
    %c0_182 = arith.constant 0 : index
    %361 = vector.load %arg10[%c3_180, %c0_181, %c0_182] : memref<9x128x128xbf16, #tpu.memory_space<vmem>>, vector<1x128x128xbf16>
    %362 = vector.shape_cast %361 : vector<1x128x128xbf16> to vector<128x128xbf16>
    %cst_183 = arith.constant dense<0.000000e+00> : vector<256x128xf32>
    %363 = tpu.matmul %360, %362, %cst_183 {dimension_numbers = #tpu.dot_dimension_numbers<[1], [0], [0], [1], [0, 0, 1, 1], [], []>} : vector<256x128xbf16>, vector<128x128xbf16>, vector<256x128xf32> -> vector<256x128xf32>
    %364 = arith.addf %352, %363 : vector<256x128xf32>
    %365 = arith.truncf %321 : vector<256x128xf32> to vector<256x128xbf16>
    %c4_184 = arith.constant 4 : index
    %c0_185 = arith.constant 0 : index
    %c0_186 = arith.constant 0 : index
    %366 = vector.load %arg10[%c4_184, %c0_185, %c0_186] : memref<9x128x128xbf16, #tpu.memory_space<vmem>>, vector<1x128x128xbf16>
    %367 = vector.shape_cast %366 : vector<1x128x128xbf16> to vector<128x128xbf16>
    %cst_187 = arith.constant dense<0.000000e+00> : vector<256x128xf32>
    %368 = tpu.matmul %365, %367, %cst_187 {dimension_numbers = #tpu.dot_dimension_numbers<[1], [0], [0], [1], [0, 0, 1, 1], [], []>} : vector<256x128xbf16>, vector<128x128xbf16>, vector<256x128xf32> -> vector<256x128xf32>
    %369 = arith.addf %364, %368 : vector<256x128xf32>
    %cst_188 = arith.constant 0.000000e+00 : f32
    %370 = vector.broadcast %cst_188 : f32 to vector<1x128xf32>
    %371 = vector.extract_strided_slice %321 {offsets = [1, 0], sizes = [255, 128], strides = [1, 1]} : vector<256x128xf32> to vector<255x128xf32>
    %372 = tpu.concatenate %371, %370 in 0 : vector<255x128xf32>, vector<1x128xf32> -> vector<256x128xf32>
    %cst_189 = arith.constant 0.000000e+00 : f32
    %373 = vector.shape_cast %20 : vector<256x1xi1> to vector<256x1xi1>
    %374 = vector.broadcast %373 : vector<256x1xi1> to vector<256x128xi1>
    %375 = vector.broadcast %cst_189 : f32 to vector<256x128xf32>
    %376 = arith.select %374, %372, %375 : vector<256x128xi1>, vector<256x128xf32>
    %377 = arith.truncf %376 : vector<256x128xf32> to vector<256x128xbf16>
    %c5_190 = arith.constant 5 : index
    %c0_191 = arith.constant 0 : index
    %c0_192 = arith.constant 0 : index
    %378 = vector.load %arg10[%c5_190, %c0_191, %c0_192] : memref<9x128x128xbf16, #tpu.memory_space<vmem>>, vector<1x128x128xbf16>
    %379 = vector.shape_cast %378 : vector<1x128x128xbf16> to vector<128x128xbf16>
    %cst_193 = arith.constant dense<0.000000e+00> : vector<256x128xf32>
    %380 = tpu.matmul %377, %379, %cst_193 {dimension_numbers = #tpu.dot_dimension_numbers<[1], [0], [0], [1], [0, 0, 1, 1], [], []>} : vector<256x128xbf16>, vector<128x128xbf16>, vector<256x128xf32> -> vector<256x128xf32>
    %381 = arith.addf %369, %380 : vector<256x128xf32>
    %cst_194 = arith.constant 0.000000e+00 : f32
    %382 = vector.broadcast %cst_194 : f32 to vector<15x128xf32>
    %383 = vector.extract_strided_slice %321 {offsets = [15, 0], sizes = [241, 128], strides = [1, 1]} : vector<256x128xf32> to vector<241x128xf32>
    %384 = tpu.concatenate %383, %382 in 0 : vector<241x128xf32>, vector<15x128xf32> -> vector<256x128xf32>
    %cst_195 = arith.constant 0.000000e+00 : f32
    %385 = vector.shape_cast %18 : vector<256x1xi1> to vector<256x1xi1>
    %386 = vector.broadcast %385 : vector<256x1xi1> to vector<256x128xi1>
    %387 = vector.broadcast %cst_195 : f32 to vector<256x128xf32>
    %388 = arith.select %386, %384, %387 : vector<256x128xi1>, vector<256x128xf32>
    %389 = arith.truncf %388 : vector<256x128xf32> to vector<256x128xbf16>
    %c6_196 = arith.constant 6 : index
    %c0_197 = arith.constant 0 : index
    %c0_198 = arith.constant 0 : index
    %390 = vector.load %arg10[%c6_196, %c0_197, %c0_198] : memref<9x128x128xbf16, #tpu.memory_space<vmem>>, vector<1x128x128xbf16>
    %391 = vector.shape_cast %390 : vector<1x128x128xbf16> to vector<128x128xbf16>
    %cst_199 = arith.constant dense<0.000000e+00> : vector<256x128xf32>
    %392 = tpu.matmul %389, %391, %cst_199 {dimension_numbers = #tpu.dot_dimension_numbers<[1], [0], [0], [1], [0, 0, 1, 1], [], []>} : vector<256x128xbf16>, vector<128x128xbf16>, vector<256x128xf32> -> vector<256x128xf32>
    %393 = arith.addf %381, %392 : vector<256x128xf32>
    %cst_200 = arith.constant 0.000000e+00 : f32
    %394 = vector.broadcast %cst_200 : f32 to vector<16x128xf32>
    %395 = vector.extract_strided_slice %321 {offsets = [16, 0], sizes = [240, 128], strides = [1, 1]} : vector<256x128xf32> to vector<240x128xf32>
    %396 = tpu.concatenate %395, %394 in 0 : vector<240x128xf32>, vector<16x128xf32> -> vector<256x128xf32>
    %397 = arith.truncf %396 : vector<256x128xf32> to vector<256x128xbf16>
    %c7_201 = arith.constant 7 : index
    %c0_202 = arith.constant 0 : index
    %c0_203 = arith.constant 0 : index
    %398 = vector.load %arg10[%c7_201, %c0_202, %c0_203] : memref<9x128x128xbf16, #tpu.memory_space<vmem>>, vector<1x128x128xbf16>
    %399 = vector.shape_cast %398 : vector<1x128x128xbf16> to vector<128x128xbf16>
    %cst_204 = arith.constant dense<0.000000e+00> : vector<256x128xf32>
    %400 = tpu.matmul %397, %399, %cst_204 {dimension_numbers = #tpu.dot_dimension_numbers<[1], [0], [0], [1], [0, 0, 1, 1], [], []>} : vector<256x128xbf16>, vector<128x128xbf16>, vector<256x128xf32> -> vector<256x128xf32>
    %401 = arith.addf %393, %400 : vector<256x128xf32>
    %cst_205 = arith.constant 0.000000e+00 : f32
    %402 = vector.broadcast %cst_205 : f32 to vector<17x128xf32>
    %403 = vector.extract_strided_slice %321 {offsets = [17, 0], sizes = [239, 128], strides = [1, 1]} : vector<256x128xf32> to vector<239x128xf32>
    %404 = tpu.concatenate %403, %402 in 0 : vector<239x128xf32>, vector<17x128xf32> -> vector<256x128xf32>
    %cst_206 = arith.constant 0.000000e+00 : f32
    %405 = vector.shape_cast %20 : vector<256x1xi1> to vector<256x1xi1>
    %406 = vector.broadcast %405 : vector<256x1xi1> to vector<256x128xi1>
    %407 = vector.broadcast %cst_206 : f32 to vector<256x128xf32>
    %408 = arith.select %406, %404, %407 : vector<256x128xi1>, vector<256x128xf32>
    %409 = arith.truncf %408 : vector<256x128xf32> to vector<256x128xbf16>
    %c8_207 = arith.constant 8 : index
    %c0_208 = arith.constant 0 : index
    %c0_209 = arith.constant 0 : index
    %410 = vector.load %arg10[%c8_207, %c0_208, %c0_209] : memref<9x128x128xbf16, #tpu.memory_space<vmem>>, vector<1x128x128xbf16>
    %411 = vector.shape_cast %410 : vector<1x128x128xbf16> to vector<128x128xbf16>
    %cst_210 = arith.constant dense<0.000000e+00> : vector<256x128xf32>
    %412 = tpu.matmul %409, %411, %cst_210 {dimension_numbers = #tpu.dot_dimension_numbers<[1], [0], [0], [1], [0, 0, 1, 1], [], []>} : vector<256x128xbf16>, vector<128x128xbf16>, vector<256x128xf32> -> vector<256x128xf32>
    %413 = arith.addf %401, %412 : vector<256x128xf32>
    %c0_211 = arith.constant 0 : index
    %c0_212 = arith.constant 0 : index
    %414 = vector.load %arg11[%c0_211, %c0_212] : memref<1x128xf32, #tpu.memory_space<vmem>>, vector<1x128xf32>
    %415 = vector.broadcast %414 : vector<1x128xf32> to vector<256x128xf32>
    %416 = arith.addf %413, %415 : vector<256x128xf32>
    %cst_213 = arith.constant 0.000000e+00 : f32
    %417 = vector.broadcast %cst_213 : f32 to vector<256x128xf32>
    %418 = arith.maximumf %416, %417 : vector<256x128xf32>
    %419 = arith.truncf %418 : vector<256x128xf32> to vector<256x128xbf16>
    %c0_214 = arith.constant 0 : index
    %c0_215 = arith.constant 0 : index
    %420 = vector.load %arg12[%c0_214, %c0_215] : memref<128x128xbf16, #tpu.memory_space<vmem>>, vector<128x128xbf16>
    %cst_216 = arith.constant dense<0.000000e+00> : vector<256x128xf32>
    %421 = tpu.matmul %419, %420, %cst_216 {dimension_numbers = #tpu.dot_dimension_numbers<[1], [0], [0], [1], [0, 0, 1, 1], [], []>} : vector<256x128xbf16>, vector<128x128xbf16>, vector<256x128xf32> -> vector<256x128xf32>
    %c0_217 = arith.constant 0 : index
    %c0_218 = arith.constant 0 : index
    %422 = vector.load %arg13[%c0_217, %c0_218] : memref<1x128xf32, #tpu.memory_space<vmem>>, vector<1x128xf32>
    %423 = vector.broadcast %422 : vector<1x128xf32> to vector<256x128xf32>
    %424 = arith.addf %421, %423 : vector<256x128xf32>
    %425 = arith.addf %320, %424 : vector<256x128xf32>
    %c0_219 = arith.constant 0 : index
    %c0_220 = arith.constant 0 : index
    %c0_221 = arith.constant 0 : index
    %426 = vector.load %arg14[%c0_219, %c0_220, %c0_221] : memref<1x256x128xf32, #tpu.memory_space<vmem>>, vector<1x256x128xf32>
    %427 = vector.shape_cast %426 : vector<1x256x128xf32> to vector<256x128xf32>
    %428 = vector.shape_cast %425 : vector<256x128xf32> to vector<1x256x128xf32>
    tpu.vector_store %arg14[%c0_219, %c0_220, %c0_221], %428 {strides = array<i32>} : memref<1x256x128xf32, #tpu.memory_space<vmem>>, vector<1x256x128xf32>,
    return
  }
  func.func @transform_0(%arg0: i32) -> (i32, i32, i32) {
    %c0_i32 = arith.constant 0 : i32
    %c0_i32_0 = arith.constant 0 : i32
    %c0_i32_1 = arith.constant 0 : i32
    return %arg0, %c0_i32, %c0_i32_0 : i32, i32, i32
  }
  func.func @transform_1(%arg0: i32) -> (i32, i32, i32) {
    %c0_i32 = arith.constant 0 : i32
    %c0_i32_0 = arith.constant 0 : i32
    %c0_i32_1 = arith.constant 0 : i32
    %c0_i32_2 = arith.constant 0 : i32
    return %c0_i32, %c0_i32_0, %c0_i32_1 : i32, i32, i32
  }
  func.func @transform_2(%arg0: i32) -> (i32, i32) {
    %c0_i32 = arith.constant 0 : i32
    %c0_i32_0 = arith.constant 0 : i32
    %c0_i32_1 = arith.constant 0 : i32
    return %c0_i32, %c0_i32_0 : i32, i32
  }
  func.func @transform_3(%arg0: i32) -> (i32, i32, i32) {
    %c0_i32 = arith.constant 0 : i32
    %c0_i32_0 = arith.constant 0 : i32
    %c0_i32_1 = arith.constant 0 : i32
    %c0_i32_2 = arith.constant 0 : i32
    return %c0_i32, %c0_i32_0, %c0_i32_1 : i32, i32, i32
  }
  func.func @transform_4(%arg0: i32) -> (i32, i32) {
    %c0_i32 = arith.constant 0 : i32
    %c0_i32_0 = arith.constant 0 : i32
    %c0_i32_1 = arith.constant 0 : i32
    return %c0_i32, %c0_i32_0 : i32, i32
  }
  func.func @transform_5(%arg0: i32) -> (i32, i32, i32) {
    %c0_i32 = arith.constant 0 : i32
    %c0_i32_0 = arith.constant 0 : i32
    %c0_i32_1 = arith.constant 0 : i32
    %c0_i32_2 = arith.constant 0 : i32
    return %c0_i32, %c0_i32_0, %c0_i32_1 : i32, i32, i32
  }
  func.func @transform_6(%arg0: i32) -> (i32, i32) {
    %c0_i32 = arith.constant 0 : i32
    %c0_i32_0 = arith.constant 0 : i32
    %c0_i32_1 = arith.constant 0 : i32
    return %c0_i32, %c0_i32_0 : i32, i32
  }
  func.func @transform_7(%arg0: i32) -> (i32, i32) {
    %c0_i32 = arith.constant 0 : i32
    %c0_i32_0 = arith.constant 0 : i32
    %c0_i32_1 = arith.constant 0 : i32
    return %c0_i32, %c0_i32_0 : i32, i32
  }
  func.func @transform_8(%arg0: i32) -> (i32, i32) {
    %c0_i32 = arith.constant 0 : i32
    %c0_i32_0 = arith.constant 0 : i32
    %c0_i32_1 = arith.constant 0 : i32
    return %c0_i32, %c0_i32_0 : i32, i32
  }
  func.func @transform_9(%arg0: i32) -> (i32, i32, i32) {
    %c0_i32 = arith.constant 0 : i32
    %c0_i32_0 = arith.constant 0 : i32
    %c0_i32_1 = arith.constant 0 : i32
    %c0_i32_2 = arith.constant 0 : i32
    return %c0_i32, %c0_i32_0, %c0_i32_1 : i32, i32, i32
  }
  func.func @transform_10(%arg0: i32) -> (i32, i32) {
    %c0_i32 = arith.constant 0 : i32
    %c0_i32_0 = arith.constant 0 : i32
    %c0_i32_1 = arith.constant 0 : i32
    return %c0_i32, %c0_i32_0 : i32, i32
  }
  func.func @transform_11(%arg0: i32) -> (i32, i32) {
    %c0_i32 = arith.constant 0 : i32
    %c0_i32_0 = arith.constant 0 : i32
    %c0_i32_1 = arith.constant 0 : i32
    return %c0_i32, %c0_i32_0 : i32, i32
  }
  func.func @transform_12(%arg0: i32) -> (i32, i32) {
    %c0_i32 = arith.constant 0 : i32
    %c0_i32_0 = arith.constant 0 : i32
    %c0_i32_1 = arith.constant 0 : i32
    return %c0_i32, %c0_i32_0 : i32, i32
  }
  func.func @transform_13(%arg0: i32) -> (i32, i32, i32) {
    %c0_i32 = arith.constant 0 : i32
    %c0_i32_0 = arith.constant 0 : i32
    %c0_i32_1 = arith.constant 0 : i32
    return %arg0, %c0_i32, %c0_i32_0 : i32, i32, i32
  }
}

</mosaic_0001>

<bundles_post_ra>
// kernel: pose_model_forward.1
= control target key start
LH: loop header
LB: loop body
LE: loop exit
PB: predicated region body
PF: predicated region fallthrough
CT: control target
= control target key end

     0   :  { %s18693_s25 = smov 0   ;;  %s23365_s0 = inlined_call_operand.vmem [shape: bf16[2,256,8], index: 0, kind: input, shape index: {}]   ;;  %s23366_s1 = inlined_call_operand.vmem [shape: bf16[9,8,128], index: 1, kind: input, shape index: {}]   ;;  %s23367_s2 = inlined_call_operand.vmem [shape: f32[1,128], index: 2, kind: input, shape index: {}]   ;;  %s23368_s3 = inlined_call_operand.vmem [shape: bf16[9,128,128], index: 3, kind: input, shape index: {}]   ;;  %s23369_s4 = inlined_call_operand.vmem [shape: f32[1,128], index: 4, kind: input, shape index: {}]   ;;  %s23370_s5 = inlined_call_operand.vmem [shape: bf16[9,128,128], index: 5, kind: input, shape index: {}]   ;;  %s23371_s6 = inlined_call_operand.vmem [shape: f32[1,128], index: 6, kind: input, shape index: {}]   ;;  %s23372_s7 = inlined_call_operand.vmem [shape: bf16[128,128], index: 7, kind: input, shape index: {}]   ;;  %s23373_s8 = inlined_call_operand.vmem [shape: f32[1,128], index: 8, kind: input, shape index: {}]   ;;  %s23374_s9 = inlined_call_operand.vmem [shape: bf16[9,128,128], index: 9, kind: input, shape index: {}]   ;;  %s23375_s10 = inlined_call_operand.vmem [shape: f32[1,128], index: 10, kind: input, shape index: {}]   ;;  %s23376_s11 = inlined_call_operand.vmem [shape: bf16[128,128], index: 11, kind: input, shape index: {}]   ;;  %s23377_s12 = inlined_call_operand.vmem [shape: f32[1,128], index: 12, kind: input, shape index: {}]   ;;  %s23378_s13 = inlined_call_operand.vmem [shape: f32[2,256,128], index: 13, kind: output, shape index: {}]  }
   0x1 LB: > { %s13096_s26 = sadd.s32 4294967295, %s18618_s25   ;;  %p13100_p0 = scmp.ge.s32.totalorder %s18618_s25, 1  ;;  %s18618_s25 = sphi %s18693_s25, %s23_s25  }
   0x2   : > { %p387_p1 = scmp.lt.s32.totalorder %s18618_s25, 3 }
   0x4   : > { %p388_p2 = pnand %p13100_p0, %p387_p1 }
   0x6   : > { %391 = sbr.rel (%p388_p2) target bundleno = 3452 (0xd7c), region = 72 }
   0xd   : > { %v13120_v0 = vld [vmem:[%s23366_s1 + $0x4] sm:$0xf]  ;;  %vm23453_vm0 = vcmask 1043456   ;;  %v1218_v1 = vld [vmem:[%s23366_s1] sm:$0xf]  ;;  %v23380_v3 = vmov 0.0|0.0   ;;  %v442_v10 = vlaneseq }
   0xe   : > { %18328 = vmatprep.subr.msk.bf16.mxu0 %vm23453_vm0, %v13120_v0  ;;  %v1287_v2 = vsel %vm23453_vm0, %v13120_v0, 0  ;;  %15608 = vmatprep.mubr.bf16.mxu0 %v23380_v3  ;;  %p431_p3 = scmp.lt.s32.totalorder %s13096_s26, 1  ;;  %vm23458_vm1 = vcmask 64512   ;;  %v1496_v7 = vsel %vm23453_vm0, %v1218_v1, 0  ;;  %v13151_v9 = vld [vmem:[%s23366_s1 + $0x8] sm:$0xf] }
   0xf   : > { %15607 = vmatpush3.bf16.msra.mxu0 %v1287_v2  ;;  %15928 = vmatprep.mubr.bf16.mxu1 %v23380_v3  ;;  %vm23501_vm2 = vcmask 1046528   ;;  %v18752_v16 = vshrl.u32 %v442_v10, 7  ;;  %vm23468_vm3 = vcmask 1040384   ;;  %v18763_v19 = vsel %vm23453_vm0, %v13151_v9, 0 }
  0x10   : > { %18329 = vmatprep.subr.msk.bf16.mxu0 %vm23453_vm0, %v1218_v1  ;;  %s25397_s26 = smov (!%p431_p3, %s13096_s26), 1  ;;  %24016 = vst [vmem:[#allocation9_spill] sm:$0xff] %v18763_v19  ;;  %v24019_v37 = vmov 0  ;;  %v24024_v45 = vmov 0 }
  0x11   : > { %s14755_s14 = sshll.u32 %s25397_s26, 7  ;;  %v445_v17 = vadd.s32 16, %v18752_v16  ;;  %v446_v21 = vadd.s32 24, %v18752_v16  ;;  %v18771_v23 = vadd.s32 32, %v18752_v16  ;;  %v18774_v24 = vadd.s32 48, %v18752_v16  ;;  %s14756_s30 = sshll.u32 %s25397_s26, 8 }
  0x12   : > { %s18718_s17 = scalar_lea.vmem %s23365_s0, %s14755_s14  ;;  %v18777_v25 = vadd.s32 64, %v18752_v16  ;;  %v18780_v26 = vadd.s32 80, %v18752_v16  ;;  %v18783_v27 = vadd.s32 96, %v18752_v16  ;;  %v18786_v28 = vadd.s32 112, %v18752_v16  ;;  %s23265_s16 = scalar_lea.vmem %s23378_s13, %s14756_s30 }
  0x13   : > { %v18721_v4 = vld [vmem:[%s18718_s17] sm:$0xff]   ;;  %v18724_v5 = vld [vmem:[%s18718_s17 + $0x8] sm:$0xff]   ;;  %v18741_v13 = vld [vmem:[%s18718_s17 + $0x10] sm:$0xff]   ;;  %v493_v29 = vand.u32 15, %v445_v17  ;;  %v500_v31 = vand.u32 15, %v446_v21 }
  0x14   : > { %24009 = vst [vmem:[#allocation2_spill] sm:$0xff] %v18721_v4  ;;  %24010 = vst [vmem:[#allocation3_spill] sm:$0xff] %v18724_v5  ;;  %v956_v6 = vunpack.c.h.bf16 %v18721_v4  ;;  %v957_v8 = vunpack.c.l.bf16 %v18724_v5  ;;  %15609 = vmatmul.mubr.msk.bf16.vlgmr.msra.gmra.mrb[0].mxu0 %vm23458_vm1, %v18721_v4  ;;  %v18744_v14 = vld [vmem:[%s18718_s17 + $0x18] sm:$0xff]   ;;  %v18760_v18 = vld [vmem:[%s18718_s17 + $0x20] sm:$0xff]   ;;  %v23379_v20 = vunpack.c.l.bf16 %v18721_v4  ;;  %v958_v39 = vunpack.c.h.bf16 %v18724_v5 }
  0x15   : > { %15641 = vmatpush3.bf16.msra.mxu0 %v1496_v7  ;;  %15612 = vmatprep.mubr.msk.bf16.mxu0 %vm23458_vm1, %v18724_v5  ;;  %24012 = vst [vmem:[#allocation5_spill] sm:$0xff] %v18741_v13  ;;  %24013 = vst [vmem:[#allocation6_spill] sm:$0xff] %v18744_v14  ;;  %v18768_v22 = vld [vmem:[%s18718_s17 + $0x28] sm:$0xff]   ;;  %v18798_v33 = vld [vmem:[%s18718_s17 + $0x30] sm:$0xff]   ;;  %vm18803_vm4 = vcmp.ge.s32.totalorder %v493_v29, 1  ;;  %v959_v42 = vunpack.c.l.bf16 %v18741_v13  ;;  %v960_v43 = vunpack.c.h.bf16 %v18741_v13  ;;  %vm18820_vm5 = vcmp.lt.s32.totalorder %v500_v31, 15 }
  0x16   : > { %v18734_v11 = vrot.slane %v956_v6, 1  ;;  %v18738_v12 = vrot.slane %v957_v8, 1  ;;  %18330 = vmatprep.subr.msk.bf16.mxu0 %vm23453_vm0, %v13151_v9  ;;  %24015 = vst [vmem:[#allocation8_spill] sm:$0xff] %v18760_v18  ;;  %24017 = vst [vmem:[#allocation10_spill] sm:$0xff] %v18768_v22  ;;  %v18790_v30 = vrot.slane %v23379_v20, 7  ;;  %v24020_v37 = vsel %vm18803_vm4, 4294967295, %v24019_v37 }
  0x17   : > { %24018 = vst [vmem:[#allocation11_spill] sm:$0xff] %v18798_v33  ;;  %24021 = vst [vmem:[#allocation12_spill] sm:$0xff] %v24020_v37  ;;  %v18813_v40 = vld [vmem:[%s18718_s17 + $0x38] sm:$0xff]   ;;  %v18818_v44 = vrot.slane %v956_v6, 7  ;;  %v24025_v45 = vsel %vm18820_vm5, 4294967295, %v24024_v45  ;;  %v18824_v46 = vrot.slane %v957_v8, 7  ;;  %v961_v49 = vunpack.c.l.bf16 %v18744_v14 }
  0x18   : > { %24011 = vst [vmem:[#allocation4_spill] sm:$0xff] %v18734_v11  ;;  %v18750_v15 = vsel %vm23501_vm2, %v18734_v11, %v18738_v12  ;;  %v18809_v38 = vsel %vm23468_vm3, 0.0, %v18790_v30  ;;  %24023 = vst [vmem:[#allocation14_spill] sm:$0xff] %v18813_v40  ;;  %v18826_v47 = vrot.slane %v958_v39, 7  ;;  %v18828_v48 = vrot.slane %v958_v39, 1  ;;  %v18838_v55 = vld [vmem:[%s18718_s17 + $0x40] sm:$0xff]  }
  0x19   : > { %24014 = vst [vmem:[#allocation7_spill] sm:$0xff] %v18750_v15  ;;  %24022 = vst [vmem:[#allocation13_spill] sm:$0xff] %v18809_v38  ;;  %v962_v50 = vunpack.c.h.bf16 %v18744_v14  ;;  %v1025_v52 = vrot.slane %v959_v42, 7  ;;  %v963_v53 = vunpack.c.l.bf16 %v18760_v18  ;;  %v964_v54 = vunpack.c.h.bf16 %v18760_v18  ;;  %v18847_v58 = vld [vmem:[%s18718_s17 + $0x48] sm:$0xff]   ;;  %v18902_v20 = vld [vmem:[%s18718_s17 + $0x50] sm:$0xff]  }
  0x1a   : > { %24026 = vst [vmem:[#allocation15_spill] sm:$0xff] %v24025_v45  ;;  %24027 = vst [vmem:[#allocation16_spill] sm:$0xff] %v18838_v55  ;;  %v18840_v56 = vrot.slane %v960_v43, 7  ;;  %v18842_v57 = vrot.slane %v959_v42, 1  ;;  %v18852_v60 = vrot.slane %v960_v43, 1  ;;  %v965_v61 = vunpack.c.l.bf16 %v18768_v22  ;;  %v18912_v41 = vld [vmem:[%s18718_s17 + $0x58] sm:$0xff]  }
  0x1b   : > { %24029 = vst [vmem:[#allocation18_spill] sm:$0xff] %v18847_v58  ;;  %v966_v62 = vunpack.c.h.bf16 %v18768_v22  ;;  %v18858_v63 = vrot.slane %v961_v49, 7  ;;  %v18860_v0 = vrot.slane %v962_v50, 7  ;;  %v18862_v1 = vrot.slane %v961_v49, 1  ;;  %24034 = vst [vmem:[#allocation23_spill] sm:$0xff] %v18902_v20 }
  0x1c   : > { %15613 = vmatmul.mubr.msk.bf16.gmra.mrb[4].mxu0 %vm23458_vm1, %v18741_v13  ;;  %24028 = vst [vmem:[#allocation17_spill] sm:$0xff] %v18842_v57  ;;  %24030 = vst [vmem:[#allocation19_spill] sm:$0xff] %v18852_v60  ;;  %v18864_v2 = vrot.slane %v962_v50, 1  ;;  %v18866_v6 = vrot.slane %v963_v53, 7  ;;  %v18868_v7 = vrot.slane %v964_v54, 7  ;;  %v967_v8 = vunpack.c.l.bf16 %v18798_v33 }
  0x1d   : > { %15616 = vmatprep.mubr.msk.bf16.mxu0 %vm23458_vm1, %v18744_v14  ;;  %v18873_v9 = vsel %vm23468_vm3, %v18826_v47, %v1025_v52  ;;  %v968_v10 = vunpack.c.h.bf16 %v18798_v33  ;;  %v18878_v17 = vsel %vm23468_vm3, %v1025_v52, %v18840_v56  ;;  %v18883_v29 = vrot.slane %v963_v53, 1  ;;  %24035 = vst [vmem:[#allocation24_spill] sm:$0xff] %v18912_v41 }
  0x1e   : > { %v3041_v21 = vsel %vm18803_vm4, %v18873_v9, 0.0  ;;  %v18885_v31 = vrot.slane %v964_v54, 1  ;;  %v18890_v42 = vrot.slane %v965_v61, 7  ;;  %v18892_v43 = vrot.slane %v966_v62, 7 }
  0x1f   : > { %24031 = vst [vmem:[#allocation20_spill] sm:$0xff] %v18883_v29  ;;  %v18888_v39 = vpack.c.bf16 %v18878_v17, %v3041_v21  ;;  %v969_v49 = vunpack.c.l.bf16 %v18813_v40  ;;  %v970_v50 = vunpack.c.h.bf16 %v18813_v40  ;;  %v18896_v52 = vrot.slane %v965_v61, 1 }
  0x20   : > { %24032 = vst [vmem:[#allocation21_spill] sm:$0xff] %v18885_v31  ;;  %v18898_v59 = vrot.slane %v966_v62, 1  ;;  %v971_v53 = vunpack.c.l.bf16 %v18838_v55  ;;  %v18904_v54 = vrot.slane %v967_v8, 7  ;;  %v18906_v21 = vrot.slane %v968_v10, 7 }
  0x21   : > { %24033 = vst [vmem:[#allocation22_spill] sm:$0xff] %v18888_v39  ;;  %v972_v3 = vunpack.c.h.bf16 %v18838_v55  ;;  %v18914_v36 = vrot.slane %v967_v8, 1  ;;  %v18916_v61 = vrot.slane %v968_v10, 1  ;;  %v18920_v62 = vrot.slane %v969_v49, 7 }
  0x22   : > { %v18922_v51 = vrot.slane %v970_v50, 7  ;;  %v973_v35 = vunpack.c.l.bf16 %v18847_v58  ;;  %v974_v34 = vunpack.c.h.bf16 %v18847_v58  ;;  %v18926_v32 = vrot.slane %v969_v49, 1 }
  0x23   : > { %24036 = vst [vmem:[#allocation25_spill] sm:$0xff] %v18914_v36  ;;  %24037 = vst [vmem:[#allocation26_spill] sm:$0xff] %v18916_v61  ;;  %v18928_v39 = vrot.slane %v970_v50, 1  ;;  %v18930_v8 = vrot.slane %v971_v53, 7  ;;  %v18932_v10 = vrot.slane %v971_v53, 1  ;;  %v978_v49 = vunpack.c.h.bf16 %v18912_v41  ;;  %v18943_v50 = vld [vmem:[%s18718_s17 + $0x60] sm:$0xff]  }
  0x24   : > { %15617 = vmatmul.mubr.msk.bf16.gmra.mrb[8].mxu0 %vm23458_vm1, %v18760_v18  ;;  %24040 = vst [vmem:[#allocation29_spill] sm:$0xff] %v18943_v50  ;;  %v18945_v18 = vrot.slane %v973_v35, 7  ;;  %v18947_v14 = vrot.slane %v974_v34, 7  ;;  %v18949_v53 = vrot.slane %v973_v35, 1  ;;  %v18951_v13 = vrot.slane %v974_v34, 1 }
  0x25   : > { %15620 = vmatprep.mubr.msk.bf16.mxu0 %vm23458_vm1, %v18768_v22  ;;  %24038 = vst [vmem:[#allocation27_spill] sm:$0xff] %v18932_v10  ;;  %v18938_v22 = vrot.slane %v972_v3, 1  ;;  %v979_v5 = vunpack.c.l.bf16 %v18943_v50  ;;  %v980_v15 = vunpack.c.h.bf16 %v18943_v50  ;;  %v18965_v10 = vld [vmem:[%s18718_s17 + $0x70] sm:$0xff]   ;;  %v18973_v29 = vrot.slane %v978_v49, 7 }
  0x26   : > { %24041 = vst [vmem:[#allocation30_spill] sm:$0xff] %v18951_v13  ;;  %24045 = vst [vmem:[#allocation34_spill] sm:$0xff] %v18965_v10  ;;  %v18979_v13 = vrot.slane %v978_v49, 1  ;;  %v459_v37 = vadd.s32 128, %v18752_v16 }
  0x27   : > { %24039 = vst [vmem:[#allocation28_spill] sm:$0xff] %v18938_v22  ;;  %24049 = vst [vmem:[#allocation38_spill] sm:$0xff] %v18973_v29  ;;  %v18983_v4 = vrot.slane %v979_v5, 7  ;;  %v18996_v49 = vrot.slane %v980_v15, 1 }
  0x28   : > { %24051 = vst [vmem:[#allocation40_spill] sm:$0xff] %v18979_v13  ;;  %v24057_v13 = vand.u32 15, %v18771_v23 }
  0x29   : > { %24052 = vst [vmem:[#allocation41_spill] sm:$0xff] %v18983_v4  ;;  %24056 = vst [vmem:[#allocation45_spill] sm:$0xff] %v18996_v49 }
  0x2a   : > { %vm19000_vm6 = vcmp.ge.s32.totalorder %v24057_v13, 1 }
  0x2c   : > { %15621 = vmatmul.mubr.msk.bf16.gmra.mrb[12].mxu0 %vm23458_vm1, %v18798_v33  ;;  %v976_v33 = vunpack.c.h.bf16 %v18902_v20 }
  0x2d   : > { %15624 = vmatprep.mubr.msk.bf16.mxu0 %vm23458_vm1, %v18813_v40  ;;  %v975_v40 = vunpack.c.l.bf16 %v18902_v20 }
  0x2e   : > { %v18960_v11 = vrot.slane %v976_v33, 7  ;;  %v18969_v35 = vrot.slane %v976_v33, 1  ;;  %v983_v33 = vunpack.c.l.bf16 %v18965_v10 }
  0x2f   : > { %v18958_v45 = vrot.slane %v975_v40, 7  ;;  %v18967_v36 = vrot.slane %v975_v40, 1  ;;  %v18985_v40 = vrot.slane %v980_v15, 7 }
  0x30   : > { %24044 = vst [vmem:[#allocation33_spill] sm:$0xff] %v18960_v11  ;;  %24047 = vst [vmem:[#allocation36_spill] sm:$0xff] %v18969_v35  ;;  %v24058_v35 = vmov 0 }
  0x31   : > { %24043 = vst [vmem:[#allocation32_spill] sm:$0xff] %v18958_v45  ;;  %24046 = vst [vmem:[#allocation35_spill] sm:$0xff] %v18967_v36  ;;  %v984_v36 = vunpack.c.h.bf16 %v18965_v10  ;;  %v24059_v35 = vsel %vm19000_vm6, 4294967295, %v24058_v35 }
  0x32   : > { %24053 = vst [vmem:[#allocation42_spill] sm:$0xff] %v18985_v40  ;;  %24060 = vst [vmem:[#allocation46_spill] sm:$0xff] %v24059_v35  ;;  %v19007_v40 = vsel %vm23468_vm3, %v18818_v44, %v18824_v46  ;;  %v24178_v35 = vmov 0 }
  0x33   : > { %24061 = vst [vmem:[#allocation47_spill] sm:$0xff] %v19007_v40  ;;  %v19025_v49 = vrot.slane %v984_v36, 7 }
  0x34   : > { %15625 = vmatmul.mubr.msk.bf16.gmra.mrb[16].mxu0 %vm23458_vm1, %v18838_v55  ;;  %v18934_v55 = vrot.slane %v972_v3, 7  ;;  %v18956_v3 = vld [vmem:[%s18718_s17 + $0x68] sm:$0xff]  }
  0x35   : > { %15628 = vmatprep.mubr.msk.bf16.mxu0 %vm23458_vm1, %v18847_v58  ;;  %v977_v58 = vunpack.c.l.bf16 %v18912_v41  ;;  %24042 = vst [vmem:[#allocation31_spill] sm:$0xff] %v18956_v3  ;;  %v981_v19 = vunpack.c.l.bf16 %v18956_v3  ;;  %24068 = vst [vmem:[#allocation51_spill] sm:$0xff] %v19025_v49  ;;  %v19234_v49 = vsel %vm23468_vm3, %v18973_v29, %v18983_v4  ;;  %v24120_v4 = vld [vmem:[#allocation2_spill] sm:$0xff] }
  0x36   : > { %24118 = vst [vmem:[#allocation76_spill] sm:$0xff] %v19234_v49  ;;  %v24121_v29 = vunpack.c.l.bf16 %v24120_v4  ;;  %v24138_v49 = vld [vmem:[#allocation40_spill] sm:$0xff] }
  0x37   : > { %v18971_v34 = vrot.slane %v977_v58, 7  ;;  %v18977_v57 = vrot.slane %v977_v58, 1  ;;  %v18994_v58 = vrot.slane %v979_v5, 1  ;;  %v19015_v5 = vrot.slane %v981_v19, 7  ;;  %v24134_v4 = vld [vmem:[#allocation36_spill] sm:$0xff] }
  0x38   : > { %v19019_v23 = vrot.slane %v981_v19, 1  ;;  %v19043_v19 = vsel %vm23468_vm3, %v18824_v46, %v18826_v47  ;;  %v19060_v46 = vrot.slane %v983_v33, 1  ;;  %v19062_v47 = vrot.slane %v984_v36, 1 }
  0x39   : > { %24048 = vst [vmem:[#allocation37_spill] sm:$0xff] %v18971_v34  ;;  %24050 = vst [vmem:[#allocation39_spill] sm:$0xff] %v18977_v57  ;;  %v24062_v57 = vand.u32 15, %v18774_v24  ;;  %v24070_v24 = vmov 0  ;;  %v24079_v36 = vand.u32 15, %v18780_v26  ;;  %v24086_v26 = vmov 0 }
  0x3a   : > { %24055 = vst [vmem:[#allocation44_spill] sm:$0xff] %v18994_v58  ;;  %24066 = vst [vmem:[#allocation49_spill] sm:$0xff] %v19015_v5  ;;  %v19023_v58 = vrot.slane %v983_v33, 7 }
  0x3b   : > { %vm19011_vm7 = vcmp.ge.s32.totalorder %v24062_v57, 1  ;;  %v19036_v57 = vsel %vm23468_vm3, %v18840_v56, %v18858_v63  ;;  %24074 = vst [vmem:[#allocation54_spill] sm:$0xff] %v19043_v19  ;;  %v24075_v56 = vsel %vm18803_vm4, %v18809_v38, 0.0  ;;  %24076 = vst [vmem:[#allocation55_spill] sm:$0xff] %v19060_v46  ;;  %vm19080_vm9 = vcmp.ge.s32.totalorder %v24079_v36, 1 }
  0x3c   : > { %15629 = vmatmul.mubr.msk.bf16.gmra.mrb[20].mxu0 %vm23458_vm1, %v18902_v20  ;;  %v982_v20 = vunpack.c.h.bf16 %v18956_v3  ;;  %24067 = vst [vmem:[#allocation50_spill] sm:$0xff] %v19023_v58  ;;  %24073 = vst [vmem:[#allocation53_spill] sm:$0xff] %v19036_v57  ;;  %v19105_v36 = vsel %vm23468_vm3, %v18868_v7, %v18890_v42  ;;  %v24115_v46 = vmov 0  ;;  %vm24148_vm4 = vcmask 1043456  }
  0x3d   : > { %15632 = vmatprep.mubr.msk.bf16.mxu0 %vm23458_vm1, %v18912_v41  ;;  %v18992_v41 = vsel %vm23468_vm3, %v18790_v30, %v18818_v44  ;;  %v24063_v30 = vmov 0  ;;  %v24069_v44 = vand.u32 15, %v18777_v25  ;;  %v1176_v25 = vsel %vm19011_vm7, %v18873_v9, 0.0  ;;  %24077 = vst [vmem:[#allocation56_spill] sm:$0xff] %v19062_v47 }
  0x3e   : > { %24054 = vst [vmem:[#allocation43_spill] sm:$0xff] %v18992_v41  ;;  %v24064_v30 = vsel %vm19011_vm7, 4294967295, %v24063_v30  ;;  %v19017_v15 = vrot.slane %v982_v20, 7  ;;  %v19021_v13 = vrot.slane %v982_v20, 1  ;;  %v1174_v20 = vsel %vm19000_vm6, %v19007_v40, 0.0 }
  0x3f   : > { %24065 = vst [vmem:[#allocation48_spill] sm:$0xff] %v24064_v30  ;;  %vm19029_vm8 = vcmp.ge.s32.totalorder %v24069_v44, 1  ;;  %v19056_v44 = vpack.c.bf16 %v18992_v41, %v24075_v56  ;;  %v577_v30 = vand.u32 15, %v18786_v28  ;;  %v19072_v56 = vsel %vm23501_vm2, %v18738_v12, %v18828_v48 }
  0x40   : > { %v24071_v24 = vsel %vm19029_vm8, 4294967295, %v24070_v24  ;;  %24078 = vst [vmem:[#allocation57_spill] sm:$0xff] %v19072_v56  ;;  %v1204_v40 = vpack.c.bf16 %v19043_v19, %v1174_v20  ;;  %v19076_v33 = vpack.c.bf16 %v18878_v17, %v1176_v25  ;;  %v461_v28 = vadd.s32 144, %v18752_v16 }
  0x41   : > { %24072 = vst [vmem:[#allocation52_spill] sm:$0xff] %v24071_v24  ;;  %v19088_v24 = vsel %vm23468_vm3, %v18858_v63, %v18860_v0  ;;  %v19093_v12 = vsel %vm23468_vm3, %v18860_v0, %v18866_v6  ;;  %v24085_v20 = vand.u32 15, %v18783_v27  ;;  %v463_v25 = vadd.s32 160, %v18752_v16 }
  0x42   : > { %24083 = vst [vmem:[#allocation59_spill] sm:$0xff] %v19088_v24  ;;  %24084 = vst [vmem:[#allocation60_spill] sm:$0xff] %v19093_v12  ;;  %v465_v63 = vadd.s32 176, %v18752_v16  ;;  %v19112_v0 = vsel %vm23501_vm2, %v18852_v60, %v18862_v1  ;;  %vm19114_vm11 = vcmp.ge.s32.totalorder %v577_v30, 1  ;;  %v24089_v27 = vmov 0 }
  0x43   : > { %vm19097_vm10 = vcmp.ge.s32.totalorder %v24085_v20, 1  ;;  %v24090_v27 = vsel %vm19114_vm11, 4294967295, %v24089_v27  ;;  %v19121_v20 = vsel %vm23468_vm3, %v18892_v43, %v18904_v54  ;;  %v591_v19 = vand.u32 15, %v459_v37 }
  0x44   : > { %15633 = vmatmul.mubr.msk.bf16.gmra.mrb[24].mxu0 %vm23458_vm1, %v18943_v50  ;;  %v1178_v50 = vsel %vm19029_vm8, %v19036_v57, 0.0  ;;  %v24087_v26 = vsel %vm19097_vm10, 4294967295, %v24086_v26  ;;  %v467_v57 = vadd.s32 192, %v18752_v16  ;;  %24091 = vst [vmem:[#allocation62_spill] sm:$0xff] %v24090_v27  ;;  %v19126_v41 = vsel %vm23501_vm2, %v18862_v1, %v18864_v2 }
  0x45   : > { %15636 = vmatprep.mubr.msk.bf16.mxu0 %vm23458_vm1, %v18956_v3  ;;  %v24080_v3 = vmov 0  ;;  %24088 = vst [vmem:[#allocation61_spill] sm:$0xff] %v24087_v26  ;;  %24092 = vst [vmem:[#allocation63_spill] sm:$0xff] %v19126_v41  ;;  %v19129_v38 = vpack.c.bf16 %v19088_v24, %v1178_v50  ;;  %v1180_v30 = vsel %vm19080_vm9, %v19093_v12, 0.0  ;;  %v605_v60 = vand.u32 15, %v461_v28 }
  0x46   : > { %v24081_v3 = vsel %vm19080_vm9, 4294967295, %v24080_v3  ;;  %v469_v47 = vadd.s32 208, %v18752_v16  ;;  %v19140_v37 = vsel %vm23468_vm3, %v18866_v6, %v18868_v7  ;;  %v19148_v50 = vsel %vm23468_vm3, %v18906_v21, %v18920_v62 }
  0x47   : > { %24082 = vst [vmem:[#allocation58_spill] sm:$0xff] %v24081_v3  ;;  %24093 = vst [vmem:[#allocation64_spill] sm:$0xff] %v19140_v37  ;;  %v619_v28 = vand.u32 15, %v463_v25  ;;  %v24094_v3 = vmov 0.0|0.0   ;;  %v633_v24 = vand.u32 15, %v465_v63  ;;  %v647_v12 = vand.u32 15, %v467_v57 }
  0x48   : > { %v19157_v6 = vsel %vm23501_vm2, %v18885_v31, %v18896_v52  ;;  %vm19159_vm12 = vcmp.ge.s32.totalorder %v591_v19, 1  ;;  %v24095_v7 = vmov 0  ;;  %v19166_v25 = vsel %vm23468_vm3, %v18922_v51, %v18930_v8 }
  0x49   : > { %v24096_v7 = vsel %vm19159_vm12, 4294967295, %v24095_v7  ;;  %24098 = vst [vmem:[#allocation66_spill] sm:$0xff] %v19166_v25  ;;  %v471_v1 = vadd.s32 224, %v18752_v16  ;;  %v19172_v57 = vsel %vm23501_vm2, %v18896_v52, %v18898_v59  ;;  %vm19174_vm13 = vcmp.ge.s32.totalorder %v605_v60, 1 }
  0x4a   : > { %24097 = vst [vmem:[#allocation65_spill] sm:$0xff] %v24096_v7  ;;  %24099 = vst [vmem:[#allocation67_spill] sm:$0xff] %v19172_v57  ;;  %v24100_v63 = vmov 0  ;;  %v19181_v19 = vsel %vm23468_vm3, %v18934_v55, %v18945_v18  ;;  %vm19188_vm14 = vcmp.ge.s32.totalorder %v619_v28, 1  ;;  %v24104_v31 = vmov 0 }
  0x4b   : > { %v24101_v63 = vsel %vm19174_vm13, 4294967295, %v24100_v63  ;;  %24103 = vst [vmem:[#allocation69_spill] sm:$0xff] %v19181_v19  ;;  %v24105_v31 = vsel %vm19188_vm14, 4294967295, %v24104_v31  ;;  %v19195_v60 = vsel %vm23468_vm3, %v18960_v11, %v18971_v34  ;;  %v19200_v52 = vsel %vm23501_vm2, %v18916_v61, %v18926_v32  ;;  %v13168_v61 = vld [vmem:[%s23366_s1 + $0xc] sm:$0xf]  ;;  %v24125_v19 = vld [vmem:[#allocation30_spill] sm:$0xff] }
  0x4c   : > { %15637 = vmatmul.mubr.msk.bf16.gmra.mrb[28].mxu0 %vm23458_vm1, %v18965_v10  ;;  %24102 = vst [vmem:[#allocation68_spill] sm:$0xff] %v24101_v63  ;;  %v19186_v10 = vsel %vm23468_vm3, %v18947_v14, %v18958_v45  ;;  %24106 = vst [vmem:[#allocation70_spill] sm:$0xff] %v24105_v31  ;;  %v19205_v57 = vsel %vm23501_vm2, %v18926_v32, %v18928_v39  ;;  %vm19207_vm15 = vcmp.ge.s32.totalorder %v633_v24, 1  ;;  %vm19211_vm0 = vcmp.ge.s32.totalorder %v647_v12, 1  ;;  %v24136_v24 = vld [vmem:[#allocation42_spill] sm:$0xff]  ;;  %v24210_v63 = vld [vmem:[#allocation37_spill] sm:$0xff] }
  0x4d   : > { %15642 = vmatprep.mubr.bf16.mxu0 %v24094_v3  ;;  %v661_v3 = vand.u32 15, %v469_v47  ;;  %24107 = vst [vmem:[#allocation71_spill] sm:$0xff] %v19195_v60  ;;  %24108 = vst [vmem:[#allocation72_spill] sm:$0xff] %v19205_v57  ;;  %v24109_v47 = vmov 0  ;;  %v24112_v28 = vmov 0  ;;  %v473_v41 = vadd.s32 240, %v18752_v16 }
  0x4e   : > { %v24110_v47 = vsel %vm19207_vm15, 4294967295, %v24109_v47  ;;  %v24113_v28 = vsel %vm19211_vm0, 4294967295, %v24112_v28  ;;  %v444_v56 = vadd.s32 8, %v18752_v16  ;;  %v675_v12 = vand.u32 15, %v471_v1 }
  0x4f   : > { %24111 = vst [vmem:[#allocation73_spill] sm:$0xff] %v24110_v47  ;;  %24114 = vst [vmem:[#allocation74_spill] sm:$0xff] %v24113_v28  ;;  %v448_v57 = vadd.s32 40, %v18752_v16  ;;  %vm19227_vm1 = vcmp.ge.s32.totalorder %v661_v3, 1  ;;  %v450_v34 = vadd.s32 56, %v18752_v16  ;;  %v19240_v32 = vsel %vm23501_vm2, %v18938_v22, %v18949_v53  ;;  %v24123_v22 = vld [vmem:[#allocation9_spill] sm:$0xff] }
  0x50   : > { %v24116_v46 = vsel %vm19227_vm1, 4294967295, %v24115_v46  ;;  %vm24119_vm9 = vcmask 64512   ;;  %v19255_v45 = vrot.slane %v24121_v29, 1  ;;  %v689_v11 = vand.u32 15, %v473_v41  ;;  %v24232_v28 = vld [vmem:[#allocation76_spill] sm:$0xff] }
  0x51   : > { %24117 = vst [vmem:[#allocation75_spill] sm:$0xff] %v24116_v46  ;;  %vm24124_vm3 = vmmov %vm24119_vm9  ;;  %v486_v3 = vand.u32 15, %v444_v56  ;;  %v19263_v1 = vsel %vm23501_vm2, %v18949_v53, %v24125_v19  ;;  %v24127_v29 = vmov 0  ;;  %vm24130_vm8 = vcmask 1043456  }
  0x52   : > { %24122 = vst [vmem:[#allocation77_spill] sm:$0xff] %v19255_v45  ;;  %24126 = vst [vmem:[#allocation9_spill] sm:$0xff] %v19263_v1  ;;  %v528_v53 = vand.u32 15, %v450_v34  ;;  %v454_v56 = vadd.s32 88, %v18752_v16  ;;  %v458_v1 = vadd.s32 120, %v18752_v16  ;;  %v24143_v34 = vmov 0 }
  0x54   : > { %15643 = vmatmul.mubr.msk.bf16.vlgmr.msra.gmra.mrb[0].mxu0 %vm24119_vm9, %v19056_v44  ;;  %v1207_v44 = vpack.c.bf16 %v19140_v37, %v1180_v30  ;;  %vm19268_vm9 = vcmp.ge.s32.totalorder %v675_v12, 1  ;;  %v24133_v30 = vld [vmem:[#allocation39_spill] sm:$0xff]  ;;  %vm19328_vm1 = vcmp.lt.s32.totalorder %v528_v53, 15 }
  0x55   : > { %15675 = vmatpush3.bf16.msra.mxu0 %v24123_v22  ;;  %15646 = vmatprep.mubr.msk.bf16.mxu0 %vm24124_vm3, %v1204_v40  ;;  %v24128_v29 = vsel %vm19268_vm9, 4294967295, %v24127_v29  ;;  %v514_v22 = vand.u32 15, %v448_v57  ;;  %v452_v40 = vadd.s32 72, %v18752_v16  ;;  %vm24131_vm3 = vcmask 1040384  }
  0x56   : > { %24129 = vst [vmem:[#allocation30_spill] sm:$0xff] %v24128_v29  ;;  %18331 = vmatprep.subr.msk.bf16.mxu0 %vm24130_vm8, %v13168_v61  ;;  %v19277_v41 = vsel %vm24131_vm3, %v18890_v42, %v18892_v43  ;;  %v19283_v12 = vsel %vm23501_vm2, %v24134_v4, %v24133_v30  ;;  %vm24137_vm7 = vmmov %vm24131_vm3  ;;  %v456_v57 = vadd.s32 104, %v18752_v16  ;;  %v19295_v42 = vsel %vm23501_vm2, %v24133_v30, %v24138_v49 }
  0x57   : > { %24132 = vst [vmem:[#allocation78_spill] sm:$0xff] %v19277_v41  ;;  %24135 = vst [vmem:[#allocation39_spill] sm:$0xff] %v19283_v12  ;;  %v19288_v37 = vsel %vm24137_vm7, %v24136_v24, %v19015_v5  ;;  %vm19297_vm8 = vcmp.ge.s32.totalorder %v689_v11, 1  ;;  %v24140_v43 = vmov 0  ;;  %vm19301_vm3 = vcmp.lt.s32.totalorder %v486_v3, 15 }
  0x58   : > { %24139 = vst [vmem:[#allocation42_spill] sm:$0xff] %v19295_v42  ;;  %v24141_v43 = vsel %vm19297_vm8, 4294967295, %v24140_v43  ;;  %v24144_v34 = vsel %vm19301_vm3, 4294967295, %v24143_v34  ;;  %v19307_v4 = vsel %vm23501_vm2, 0.0, %v19255_v45  ;;  %v460_v12 = vadd.s32 136, %v18752_v16  ;;  %v24146_v42 = vld [vmem:[#allocation45_spill] sm:$0xff] }
  0x59   : > { %24142 = vst [vmem:[#allocation79_spill] sm:$0xff] %v24141_v43  ;;  %24145 = vst [vmem:[#allocation80_spill] sm:$0xff] %v24144_v34  ;;  %v19313_v46 = vsel %vm24137_vm7, %v19017_v15, %v19023_v58  ;;  %v542_v30 = vand.u32 15, %v452_v40  ;;  %v462_v11 = vadd.s32 152, %v18752_v16  ;;  %v19319_v3 = vsel %vm23501_vm2, %v24146_v42, %v19019_v23  ;;  %v24156_v40 = vld [vmem:[#allocation17_spill] sm:$0xff] }
  0x5a   : > { %24147 = vst [vmem:[#allocation81_spill] sm:$0xff] %v19319_v3  ;;  %v19322_v49 = vsel %vm24148_vm4, %v13168_v61, 0  ;;  %vm19324_vm5 = vcmp.lt.s32.totalorder %v514_v22, 15  ;;  %v24149_v45 = vmov 0  ;;  %v24152_v5 = vmov 0  ;;  %v24257_v43 = vld [vmem:[#allocation77_spill] sm:$0xff] }
  0x5b   : > { %v24150_v45 = vsel %vm19324_vm5, 4294967295, %v24149_v45  ;;  %v24153_v5 = vsel %vm19328_vm1, 4294967295, %v24152_v5  ;;  %v556_v58 = vand.u32 15, %v454_v56  ;;  %vm24155_vm7 = vcmask 64512  }
  0x5c   : > { %24151 = vst [vmem:[#allocation82_spill] sm:$0xff] %v24150_v45  ;;  %24154 = vst [vmem:[#allocation83_spill] sm:$0xff] %v24153_v5  ;;  %15647 = vmatmul.mubr.msk.bf16.gmra.mrb[4].mxu0 %vm24155_vm7, %v19076_v33  ;;  %v19337_v42 = vsel %vm23501_vm2, %v18828_v48, %v24156_v40  ;;  %v570_v3 = vand.u32 15, %v456_v57  ;;  %v584_v61 = vand.u32 15, %v458_v1  ;;  %v19342_v22 = vsel %vm23501_vm2, %v19019_v23, %v19021_v13  ;;  %v24162_v57 = vld [vmem:[#allocation20_spill] sm:$0xff] }
  0x5d   : > { %vm24157_vm4 = vmmov %vm24155_vm7  ;;  %v598_v1 = vand.u32 15, %v460_v12  ;;  %v24158_v23 = vsel %vm19097_vm10, %v19105_v36, 0.0  ;;  %vm19360_vm7 = vcmp.lt.s32.totalorder %v542_v30, 15  ;;  %v19367_v53 = vsel %vm23501_vm2, %v18864_v2, %v24162_v57  ;;  %v24166_v30 = vld [vmem:[#allocation25_spill] sm:$0xff]  ;;  %v24206_v48 = vld [vmem:[#allocation32_spill] sm:$0xff] }
  0x5e   : > { %15650 = vmatprep.mubr.msk.bf16.mxu0 %vm24157_vm4, %v19129_v38  ;;  %v1208_v56 = vpack.c.bf16 %v19277_v41, %v24158_v23  ;;  %v24159_v38 = vmov 0  ;;  %v612_v33 = vand.u32 15, %v462_v11  ;;  %vm19375_vm4 = vcmp.lt.s32.totalorder %v556_v58, 15 }
  0x5f   : > { %v24160_v38 = vsel %vm19360_vm7, 4294967295, %v24159_v38  ;;  %v24163_v23 = vmov 0  ;;  %v19382_v41 = vsel %vm23501_vm2, %v18898_v59, %v24166_v30  ;;  %vm19384_vm10 = vcmp.lt.s32.totalorder %v570_v3, 15  ;;  %v24176_v3 = vld [vmem:[#allocation27_spill] sm:$0xff] }
  0x60   : > { %24161 = vst [vmem:[#allocation17_spill] sm:$0xff] %v24160_v38  ;;  %v24164_v23 = vsel %vm19375_vm4, 4294967295, %v24163_v23  ;;  %v24167_v2 = vmov 0  ;;  %vm19388_vm3 = vcmp.lt.s32.totalorder %v584_v61, 15  ;;  %v24170_v11 = vmov 0 }
  0x61   : > { %24165 = vst [vmem:[#allocation20_spill] sm:$0xff] %v24164_v23  ;;  %v24168_v2 = vsel %vm19384_vm10, 4294967295, %v24167_v2  ;;  %v24171_v11 = vsel %vm19388_vm3, 4294967295, %v24170_v11  ;;  %v464_v12 = vadd.s32 168, %v18752_v16  ;;  %v2122_v58 = vsel %vm19000_vm6, %v18873_v9, 0.0 }
  0x62   : > { %24169 = vst [vmem:[#allocation25_spill] sm:$0xff] %v24168_v2  ;;  %24172 = vst [vmem:[#allocation84_spill] sm:$0xff] %v24171_v11  ;;  %vm19399_vm2 = vcmp.lt.s32.totalorder %v598_v1, 15  ;;  %v24173_v59 = vmov 0  ;;  %vm24177_vm1 = vcmask 1046528   ;;  %v19409_v26 = vpack.c.bf16 %v18878_v17, %v2122_v58 }
  0x63   : > { %v24174_v59 = vsel %vm19399_vm2, 4294967295, %v24173_v59  ;;  %v19406_v61 = vsel %vm24177_vm1, %v18928_v39, %v24176_v3  ;;  %vm19414_vm6 = vcmp.lt.s32.totalorder %v612_v33, 15  ;;  %vm24181_vm1 = vcmask 64512  }
  0x64   : > { %24175 = vst [vmem:[#allocation85_spill] sm:$0xff] %v24174_v59  ;;  %v24179_v35 = vsel %vm19414_vm6, 4294967295, %v24178_v35  ;;  %15651 = vmatmul.mubr.msk.bf16.gmra.mrb[8].mxu0 %vm24181_vm1, %v1207_v44  ;;  %v626_v58 = vand.u32 15, %v464_v12  ;;  %vm24182_vm4 = vmmov %vm24181_vm1  ;;  %vm24183_vm7 = vcmask 1040384   ;;  %v466_v39 = vadd.s32 184, %v18752_v16 }
  0x65   : > { %24180 = vst [vmem:[#allocation27_spill] sm:$0xff] %v24179_v35  ;;  %15654 = vmatprep.mubr.msk.bf16.mxu0 %vm24182_vm4, %v1208_v56  ;;  %v19432_v33 = vsel %vm24183_vm7, %v18904_v54, %v18906_v21  ;;  %vm24185_vm1 = vmmov %vm24183_vm7  ;;  %v24186_v56 = vsel %vm19114_vm11, %v19121_v20, 0.0  ;;  %v24187_v54 = vsel %vm19159_vm12, %v19148_v50, 0.0  ;;  %v24189_v1 = vmov 0 }
  0x66   : > { %24184 = vst [vmem:[#allocation86_spill] sm:$0xff] %v19432_v33  ;;  %v19441_v44 = vsel %vm24185_vm1, %v18920_v62, %v18922_v51  ;;  %v1209_v12 = vpack.c.bf16 %v19432_v33, %v24186_v56  ;;  %vm24188_vm7 = vmmov %vm24182_vm4  ;;  %vm19454_vm4 = vcmp.lt.s32.totalorder %v626_v58, 15  ;;  %v468_v51 = vadd.s32 200, %v18752_v16 }
  0x67   : > { %v1210_v21 = vpack.c.bf16 %v19441_v44, %v24187_v54  ;;  %v24190_v1 = vsel %vm19454_vm4, 4294967295, %v24189_v1  ;;  %vm24192_vm1 = vmmov %vm24188_vm7  ;;  %vm24193_vm11 = vcmask 1040384   ;;  %v640_v56 = vand.u32 15, %v466_v39 }
  0x68   : > { %24191 = vst [vmem:[#allocation87_spill] sm:$0xff] %v24190_v1  ;;  %v19463_v62 = vsel %vm24193_vm11, %v18930_v8, %v18934_v55  ;;  %v470_v17 = vadd.s32 216, %v18752_v16  ;;  %vm24195_vm12 = vmmov %vm24193_vm11  ;;  %v24197_v58 = vsel %vm19174_vm13, %v19166_v25, 0.0  ;;  %v24200_v8 = vld [vmem:[#allocation35_spill] sm:$0xff]  ;;  %vm24201_vm11 = vcmask 1046528  }
  0x69   : > { %24194 = vst [vmem:[#allocation88_spill] sm:$0xff] %v19463_v62  ;;  %v1211_v54 = vpack.c.bf16 %v19463_v62, %v24197_v58  ;;  %v19484_v39 = vsel %vm24201_vm11, %v24125_v19, %v24200_v8  ;;  %v24205_v58 = vld [vmem:[#allocation33_spill] sm:$0xff]  ;;  %v24209_v19 = vld [vmem:[#allocation38_spill] sm:$0xff] }
  0x6a   : > { %24202 = vst [vmem:[#allocation35_spill] sm:$0xff] %v19484_v39 }
  0x6c   : > { %15655 = vmatmul.mubr.msk.bf16.gmra.mrb[12].mxu0 %vm24188_vm7, %v1209_v12  ;;  %v19469_v12 = vsel %vm24195_vm12, %v18945_v18, %v18947_v14  ;;  %vm24203_vm7 = vmmov %vm24192_vm1  ;;  %v654_v18 = vand.u32 15, %v468_v51  ;;  %v24213_v51 = vsel %vm19207_vm15, %v19186_v10, 0.0  ;;  %v24214_v14 = vsel %vm19211_vm0, %v19195_v60, 0.0  ;;  %v24236_v60 = vld [vmem:[#allocation40_spill] sm:$0xff] }
  0x6d   : > { %15658 = vmatprep.mubr.msk.bf16.mxu0 %vm24192_vm1, %v1210_v21  ;;  %24196 = vst [vmem:[#allocation89_spill] sm:$0xff] %v19469_v12  ;;  %v24198_v21 = vld [vmem:[#allocation69_spill] sm:$0xff]  ;;  %vm24204_vm12 = vmmov %vm24192_vm1  ;;  %vm24207_vm1 = vcmask 1040384   ;;  %vm24226_vm0 = vcmask 1040384  }
  0x6e   : > { %v24199_v9 = vsel %vm19188_vm14, %v24198_v21, 0.0  ;;  %v19494_v31 = vsel %vm24207_vm1, %v24206_v48, %v24205_v58  ;;  %vm24211_vm11 = vmmov %vm24207_vm1  ;;  %vm19517_vm1 = vcmp.lt.s32.totalorder %v654_v18, 15  ;;  %v24221_v58 = vmov 0 }
  0x6f   : > { %v1212_v55 = vpack.c.bf16 %v19469_v12, %v24199_v9  ;;  %24208 = vst [vmem:[#allocation33_spill] sm:$0xff] %v19494_v31  ;;  %v668_v9 = vand.u32 15, %v470_v17  ;;  %v472_v12 = vadd.s32 232, %v18752_v16  ;;  %v24215_v17 = vmov 0  ;;  %vm24224_vm15 = vmmov %vm24204_vm12 }
  0x74   : > { %15659 = vmatmul.mubr.msk.bf16.gmra.mrb[16].mxu0 %vm24203_vm7, %v1211_v54  ;;  %v19500_v54 = vsel %vm24211_vm11, %v24210_v63, %v24209_v19  ;;  %vm19512_vm7 = vcmp.lt.s32.totalorder %v640_v56, 15  ;;  %v24218_v63 = vmov 0  ;;  %vm19521_vm11 = vcmp.lt.s32.totalorder %v668_v9, 15  ;;  %v24225_v19 = vld [vmem:[#allocation41_spill] sm:$0xff]  ;;  %v24230_v9 = vld [vmem:[#allocation75_spill] sm:$0xff] }
  0x75   : > { %15662 = vmatprep.mubr.msk.bf16.mxu0 %vm24204_vm12, %v1212_v55  ;;  %24212 = vst [vmem:[#allocation32_spill] sm:$0xff] %v19500_v54  ;;  %v1213_v55 = vpack.c.bf16 %v19494_v31, %v24213_v51  ;;  %v1214_v48 = vpack.c.bf16 %v19500_v54, %v24214_v14  ;;  %v24216_v17 = vsel %vm19512_vm7, 4294967295, %v24215_v17  ;;  %v24219_v63 = vsel %vm19517_vm1, 4294967295, %v24218_v63  ;;  %v19538_v54 = vld [vmem:[%s18718_s17 + $0x78] sm:$0xff]  }
  0x76   : > { %24217 = vst [vmem:[#allocation38_spill] sm:$0xff] %v24216_v17  ;;  %24220 = vst [vmem:[#allocation37_spill] sm:$0xff] %v24219_v63  ;;  %v24222_v58 = vsel %vm19521_vm11, 4294967295, %v24221_v58  ;;  %v19529_v14 = vsel %vm24226_vm0, %v24225_v19, %v24136_v24  ;;  %v682_v56 = vand.u32 15, %v472_v12  ;;  %v474_v51 = vadd.s32 248, %v18752_v16  ;;  %v24235_v19 = vld [vmem:[#allocation44_spill] sm:$0xff] }
  0x77   : > { %24223 = vst [vmem:[#allocation90_spill] sm:$0xff] %v24222_v58  ;;  %vm24231_vm14 = vnez %v24230_v9  ;;  %v24234_v24 = vsel %vm19268_vm9, %v19288_v37, 0.0  ;;  %vm24243_vm9 = vcmask 1040384   ;;  %v24245_v17 = vmov 0 }
  0x78   : > { %v24233_v47 = vsel %vm24231_vm14, %v24232_v28, 0.0  ;;  %v696_v29 = vand.u32 15, %v474_v51  ;;  %v24252_v58 = vunpack.c.l.bf16 %v19538_v54  ;;  %v24256_v51 = vld [vmem:[#allocation4_spill] sm:$0xff] }
  0x7c   : > { %15663 = vmatmul.mubr.msk.bf16.gmra.mrb[20].mxu0 %vm24204_vm12, %v1213_v55  ;;  %v24227_v55 = vld [vmem:[#allocation49_spill] sm:$0xff]  ;;  %vm24228_vm12 = vmmov %vm24226_vm0  ;;  %vm24237_vm0 = vcmask 1046528  }
  0x7d   : > { %15666 = vmatprep.mubr.msk.bf16.mxu0 %vm24224_vm15, %v1214_v48  ;;  %v19535_v18 = vsel %vm24228_vm12, %v24227_v55, %v19017_v15  ;;  %v1215_v48 = vpack.c.bf16 %v19529_v14, %v24233_v47  ;;  %v19553_v31 = vsel %vm24237_vm0, %v24236_v60, %v24235_v19  ;;  %v24239_v15 = vld [vmem:[#allocation39_spill] sm:$0xff]  ;;  %vm24240_vm12 = vmmov %vm24224_vm15  ;;  %v24244_v60 = vld [vmem:[#allocation81_spill] sm:$0xff]  ;;  %vm19572_vm0 = vcmp.lt.s32.totalorder %v682_v56, 15 }
  0x7e   : > { %24229 = vst [vmem:[#allocation41_spill] sm:$0xff] %v19535_v18  ;;  %v1216_v12 = vpack.c.bf16 %v19535_v18, %v24234_v24  ;;  %24238 = vst [vmem:[#allocation49_spill] sm:$0xff] %v19553_v31  ;;  %v1840_v55 = vsel %vm19512_vm7, %v24239_v15, 0.0  ;;  %v1842_v47 = vsel %vm19517_vm1, %v19553_v31, 0.0  ;;  %v24241_v24 = vld [vmem:[#allocation51_spill] sm:$0xff]  ;;  %v24242_v18 = vld [vmem:[#allocation50_spill] sm:$0xff] }
  0x7f   : > { %v19567_v9 = vsel %vm24243_vm9, %v24242_v18, %v24241_v24  ;;  %v24246_v17 = vsel %vm19572_vm0, 4294967295, %v24245_v17  ;;  %v24248_v15 = vld [vmem:[#allocation55_spill] sm:$0xff]  ;;  %v24251_v18 = vsel %vm19297_vm8, %v19313_v46, 0.0  ;;  %v23566_v24 = vmov 0.0  }
  0x80   : > { %24247 = vst [vmem:[#allocation44_spill] sm:$0xff] %v24246_v17  ;;  %v1217_v31 = vpack.c.bf16 %v19567_v9, %v24251_v18  ;;  %vm24254_vm9 = vnez %v24144_v34  ;;  %v24259_v17 = vmov 0 }
  0x84   : > { %15667 = vmatmul.mubr.msk.bf16.gmra.mrb[24].mxu0 %vm24224_vm15, %v1215_v48  ;;  %v1844_v48 = vsel %vm19521_vm11, %v24244_v60, 0.0  ;;  %vm24249_vm15 = vcmask 1046528   ;;  %v19592_v60 = vrot.slane %v24252_v58, 1  ;;  %vm24258_vm11 = vmmov %vm24240_vm12  ;;  %v24262_v58 = vmov 0 }
  0x85   : > { %15670 = vmatprep.mubr.msk.bf16.mxu0 %vm24240_vm12, %v1216_v12  ;;  %v19579_v63 = vsel %vm24249_vm15, %v19021_v13, %v24248_v15  ;;  %v479_v12 = vand.u32 15, %v18752_v16  ;;  %v24255_v16 = vsel %vm24254_vm9, %v19307_v4, 0.0  ;;  %v19603_v18 = vsel %vm24249_vm15, %v24257_v43, %v24256_v51  ;;  %v24265_v4 = vld [vmem:[#allocation15_spill] sm:$0xff] }
  0x86   : > { %24250 = vst [vmem:[#allocation40_spill] sm:$0xff] %v19579_v63  ;;  %v1846_v56 = vsel %vm19572_vm0, %v19579_v63, 0.0  ;;  %24253 = vst [vmem:[#allocation50_spill] sm:$0xff] %v19592_v60  ;;  %v1849_v13 = vpack.c.bf16 %v24255_v16, %v23566_v24  ;;  %vm19606_vm0 = vcmp.lt.s32.totalorder %v696_v29, 15  ;;  %vm24266_vm7 = vnez %v24265_v4  ;;  %v24267_v16 = vld [vmem:[#allocation7_spill] sm:$0xff]  ;;  %v24269_v63 = vld [vmem:[#allocation57_spill] sm:$0xff] }
  0x87   : > { %v24260_v17 = vsel %vm19606_vm0, 4294967295, %v24259_v17  ;;  %vm19610_vm1 = vcmp.ge.s32.totalorder %v479_v12, 1  ;;  %v24270_v43 = vsel %vm19324_vm5, %v19337_v42, 0.0  ;;  %v24271_v29 = vld [vmem:[#allocation56_spill] sm:$0xff]  ;;  %v24274_v4 = vld [vmem:[#allocation13_spill] sm:$0xff]  ;;  %vm24277_vm5 = vcmask 1043456  }
  0x88   : > { %24261 = vst [vmem:[#allocation55_spill] sm:$0xff] %v24260_v17  ;;  %v24263_v58 = vsel %vm19610_vm1, 4294967295, %v24262_v58  ;;  %v13185_v12 = vld [vmem:[%s23366_s1 + $0x10] sm:$0xf]  ;;  %v2118_v45 = vsel %vm19610_vm1, %v24274_v4, 0.0  ;;  %vm24281_vm1 = vnez %v24160_v38 }
  0x89   : > { %24264 = vst [vmem:[#allocation4_spill] sm:$0xff] %v24263_v58  ;;  %v24287_v58 = vld [vmem:[#allocation67_spill] sm:$0xff] }
  0x8c   : > { %15671 = vmatmul.mubr.msk.bf16.gmra.mrb[28].mxu0 %vm24240_vm12, %v1217_v31  ;;  %v24268_v31 = vsel %vm24266_vm7, %v24267_v16, 0.0 }
  0x8d   : > { %15676 = vmatprep.mubr.msk.bf16.mxu0 %vm24258_vm11, %v1849_v13  ;;  %v1850_v24 = vpack.c.bf16 %v24268_v31, %v19603_v18  ;;  %v1851_v13 = vpack.c.bf16 %v24270_v43, %v24269_v63  ;;  %vm24272_vm11 = vmmov %vm24249_vm15  ;;  %v24276_v43 = vld [vmem:[#allocation19_spill] sm:$0xff] }
  0x8e   : > { %v19627_v51 = vsel %vm24272_vm11, %v24271_v29, %v19592_v60  ;;  %vm24275_vm15 = vmmov %vm24240_vm12  ;;  %v19644_v60 = vsel %vm24272_vm11, %v24156_v40, %v24276_v43  ;;  %v24284_v40 = vld [vmem:[#allocation21_spill] sm:$0xff] }
  0x8f   : > { %24273 = vst [vmem:[#allocation77_spill] sm:$0xff] %v19627_v51  ;;  %v1848_v31 = vsel %vm19606_vm0, %v19627_v51, 0.0  ;;  %v24280_v51 = vld [vmem:[#allocation63_spill] sm:$0xff]  ;;  %vm24283_vm0 = vmmov %vm24275_vm15 }
  0x94   : > { %15677 = vmatmul.mubr.msk.bf16.vlgmr.msra.gmra.mrb[0].mxu0 %vm24240_vm12, %v1850_v24  ;;  %vm24278_vm12 = vnez %v24153_v5 }
  0x95   : > { %15709 = vmatpush3.bf16.msra.mxu0 %v19322_v49  ;;  %15680 = vmatprep.mubr.msk.bf16.mxu0 %vm24275_vm15, %v1851_v13  ;;  %v24279_v24 = vsel %vm24278_vm12, %v19112_v0, 0.0  ;;  %v24282_v49 = vsel %vm24281_vm1, %v19367_v53, 0.0  ;;  %v19662_v13 = vsel %vm24272_vm11, %v24162_v57, %v24284_v40 }
  0x96   : > { %18332 = vmatprep.subr.msk.bf16.mxu0 %vm24277_vm5, %v13185_v12  ;;  %v1852_v17 = vpack.c.bf16 %v24279_v24, %v19644_v60  ;;  %v1853_v4 = vpack.c.bf16 %v24282_v49, %v24280_v51  ;;  %vm24285_vm5 = vnez %v24164_v23  ;;  %v24288_v49 = vsel %vm19384_vm10, %v19382_v41, 0.0 }
  0x97   : > { %v24286_v43 = vsel %vm24285_vm5, %v19157_v6, 0.0  ;;  %v1855_v51 = vpack.c.bf16 %v24288_v49, %v24287_v58  ;;  %v24293_v49 = vsel %vm19399_vm2, %v19406_v61, 0.0  ;;  %vm24305_vm2 = vmmov %vm24283_vm0 }
  0x98   : > { %v1854_v24 = vpack.c.bf16 %v24286_v43, %v19662_v13  ;;  %v24292_v43 = vld [vmem:[#allocation72_spill] sm:$0xff] }
  0x99   : > { %v1857_v58 = vpack.c.bf16 %v24293_v49, %v24292_v43  ;;  %v24299_v49 = vsel %vm19454_vm4, %v19484_v39, 0.0  ;;  %vm24307_vm4 = vmmov %vm24272_vm11 }
  0x9c   : > { %15681 = vmatmul.mubr.msk.bf16.gmra.mrb[4].mxu0 %vm24275_vm15, %v1852_v17  ;;  %vm24289_vm15 = vmmov %vm24283_vm0  ;;  %v24290_v17 = vld [vmem:[#allocation26_spill] sm:$0xff] }
  0x9d   : > { %15684 = vmatprep.mubr.msk.bf16.mxu0 %vm24283_vm0, %v1853_v4  ;;  %v19679_v57 = vsel %vm24272_vm11, %v24166_v30, %v24290_v17  ;;  %v24291_v4 = vsel %vm19388_vm3, %v19200_v52, 0.0 }
  0x9e   : > { %v1856_v40 = vpack.c.bf16 %v24291_v4, %v19679_v57  ;;  %v24298_v4 = vld [vmem:[#allocation9_spill] sm:$0xff] }
  0x9f   : > { %v1859_v43 = vpack.c.bf16 %v24299_v49, %v24298_v4 }
  0xa4   : > { %15685 = vmatmul.mubr.msk.bf16.gmra.mrb[8].mxu0 %vm24289_vm15, %v1854_v24  ;;  %vm24294_vm15 = vmmov %vm24283_vm0  ;;  %v24297_v24 = vsel %vm19414_vm6, %v19240_v32, 0.0 }
  0xa5   : > { %15688 = vmatprep.mubr.msk.bf16.mxu0 %vm24283_vm0, %v1855_v51  ;;  %v24295_v51 = vld [vmem:[#allocation28_spill] sm:$0xff]  ;;  %vm24304_vm6 = vmmov %vm24283_vm0 }
  0xa6   : > { %v19696_v30 = vsel %vm24272_vm11, %v24176_v3, %v24295_v51  ;;  %v24303_v51 = vld [vmem:[#allocation42_spill] sm:$0xff] }
  0xa7   : > { %24296 = vst [vmem:[#allocation7_spill] sm:$0xff] %v19696_v30  ;;  %v1858_v17 = vpack.c.bf16 %v24297_v24, %v19696_v30  ;;  %v1861_v35 = vpack.c.bf16 %v1842_v47, %v24303_v51  ;;  %v24306_v24 = vld [vmem:[#allocation45_spill] sm:$0xff] }
  0xa8   : > { %v19722_v49 = vsel %vm24307_vm4, %v24235_v19, %v24306_v24  ;;  %v24313_v19 = vld [vmem:[#allocation47_spill] sm:$0xff] }
  0xac   : > { %15689 = vmatmul.mubr.msk.bf16.gmra.mrb[12].mxu0 %vm24294_vm15, %v1856_v40  ;;  %vm24300_vm15 = vmmov %vm24283_vm0 }
  0xad   : > { %15692 = vmatprep.mubr.msk.bf16.mxu0 %vm24283_vm0, %v1857_v58  ;;  %v24301_v58 = vld [vmem:[#allocation36_spill] sm:$0xff] }
  0xae   : > { %v19713_v3 = vsel %vm24272_vm11, %v24200_v8, %v24301_v58  ;;  %vm24309_vm11 = vmmov %vm24307_vm4  ;;  %v24314_v58 = vld [vmem:[#allocation12_spill] sm:$0xff] }
  0xaf   : > { %24302 = vst [vmem:[#allocation57_spill] sm:$0xff] %v19713_v3  ;;  %v1860_v40 = vpack.c.bf16 %v1840_v55, %v19713_v3  ;;  %v19731_v8 = vsel %vm24309_vm11, %v24248_v15, %v24271_v29  ;;  %v24311_v55 = vld [vmem:[#allocation43_spill] sm:$0xff]  ;;  %vm24316_vm4 = vmmov %vm24283_vm0  ;;  %v13218_v15 = vld [vmem:[%s23366_s1 + $0x14] sm:$0xf] }
  0xb0   : > { %24310 = vst [vmem:[#allocation56_spill] sm:$0xff] %v19731_v8  ;;  %v2150_v47 = vpack.c.bf16 %v24311_v55, %v2118_v45  ;;  %vm24319_vm11 = vmmov %vm24283_vm0  ;;  %v24320_v45 = vld [vmem:[#allocation53_spill] sm:$0xff]  ;;  %v24321_v29 = vld [vmem:[#allocation48_spill] sm:$0xff] }
  0xb4   : > { %15693 = vmatmul.mubr.msk.bf16.gmra.mrb[16].mxu0 %vm24300_vm15, %v1858_v17  ;;  %v1863_v17 = vpack.c.bf16 %v1846_v56, %v19342_v22  ;;  %vm24308_vm15 = vmmov %vm24283_vm0 }
  0xb5   : > { %15696 = vmatprep.mubr.msk.bf16.mxu0 %vm24283_vm0, %v1859_v43  ;;  %v1862_v43 = vpack.c.bf16 %v1844_v48, %v19722_v49 }
  0xbc   : > { %15697 = vmatmul.mubr.msk.bf16.gmra.mrb[20].mxu0 %vm24304_vm6, %v1860_v40  ;;  %vm24315_vm6 = vnez %v24314_v58  ;;  %v24318_v40 = vld [vmem:[#allocation54_spill] sm:$0xff] }
  0xbd   : > { %15700 = vmatprep.mubr.msk.bf16.mxu0 %vm24305_vm2, %v1861_v35  ;;  %v1864_v35 = vpack.c.bf16 %v1848_v31, %v19731_v8  ;;  %vm24312_vm2 = vmmov %vm24283_vm0  ;;  %v2120_v48 = vsel %vm24315_vm6, %v24313_v19, 0.0 }
  0xbe   : > { %v2151_v24 = vpack.c.bf16 %v24318_v40, %v2120_v48  ;;  %vm24328_vm6 = vmmov %vm24283_vm0 }
  0xc4   : > { %15701 = vmatmul.mubr.msk.bf16.gmra.mrb[24].mxu0 %vm24308_vm15, %v1862_v43  ;;  %vm24317_vm15 = vcmask 1043456   ;;  %v24323_v43 = vld [vmem:[#allocation60_spill] sm:$0xff] }
  0xc5   : > { %15704 = vmatprep.mubr.msk.bf16.mxu0 %vm24283_vm0, %v1863_v17  ;;  %v2543_v56 = vsel %vm24317_vm15, %v13185_v12, 0  ;;  %v24324_v17 = vld [vmem:[#allocation52_spill] sm:$0xff] }
  0xcc   : > { %15705 = vmatmul.mubr.msk.bf16.gmra.mrb[28].mxu0 %vm24312_vm2, %v1864_v35  ;;  %vm24322_vm2 = vnez %v24321_v29  ;;  %v24326_v35 = vld [vmem:[#allocation59_spill] sm:$0xff] }
  0xcd   : > { %15710 = vmatprep.mubr.msk.bf16.mxu0 %vm24316_vm4, %v2150_v47  ;;  %v2124_v31 = vsel %vm24322_vm2, %v24320_v45, 0.0  ;;  %vm24325_vm4 = vnez %v24324_v17  ;;  %v24327_v47 = vld [vmem:[#allocation64_spill] sm:$0xff]  ;;  %v24333_v17 = vld [vmem:[#allocation78_spill] sm:$0xff] }
  0xce   : > { %v2126_v12 = vsel %vm24325_vm4, %v24323_v43, 0.0  ;;  %v2153_v55 = vpack.c.bf16 %v24326_v35, %v2124_v31  ;;  %vm24335_vm4 = vmmov %vm24283_vm0 }
  0xcf   : > { %v2154_v48 = vpack.c.bf16 %v24327_v47, %v2126_v12 }
  0xd4   : > { %15711 = vmatmul.mubr.msk.bf16.vlgmr.msra.gmra.mrb[0].mxu0 %vm24283_vm0, %v2151_v24  ;;  %v24331_v24 = vld [vmem:[#allocation61_spill] sm:$0xff] }
  0xd5   : > { %15743 = vmatpush3.bf16.msra.mxu0 %v2543_v56  ;;  %15714 = vmatprep.mubr.msk.bf16.mxu0 %vm24319_vm11, %v19409_v26  ;;  %v24329_v26 = vld [vmem:[#allocation58_spill] sm:$0xff]  ;;  %vm24332_vm2 = vnez %v24331_v24 }
  0xd6   : > { %18333 = vmatprep.subr.msk.bf16.mxu0 %vm24317_vm15, %v13218_v15  ;;  %vm24330_vm11 = vnez %v24329_v26  ;;  %v2130_v58 = vsel %vm24332_vm2, %v19121_v20, 0.0  ;;  %vm24334_vm15 = vmmov %vm24283_vm0 }
  0xd7   : > { %v2128_v56 = vsel %vm24330_vm11, %v19105_v36, 0.0  ;;  %v2156_v43 = vpack.c.bf16 %v19432_v33, %v2130_v58  ;;  %vm24338_vm2 = vmmov %vm24335_vm4 }
  0xd8   : > { %v2155_v29 = vpack.c.bf16 %v24333_v17, %v2128_v56  ;;  %vm24339_vm11 = vmmov %vm24338_vm2 }
  0xdc   : > { %15715 = vmatmul.mubr.msk.bf16.gmra.mrb[4].mxu0 %vm24328_vm6, %v2153_v55  ;;  %vm24336_vm6 = vnez %v24090_v27  ;;  %v24343_v27 = vld [vmem:[#allocation89_spill] sm:$0xff] }
  0xdd   : > { %15718 = vmatprep.mubr.msk.bf16.mxu0 %vm24283_vm0, %v2154_v48  ;;  %v2132_v31 = vsel %vm24336_vm6, %v19148_v50, 0.0  ;;  %vm24337_vm0 = vnez %v24096_v7  ;;  %v24344_v7 = vld [vmem:[#allocation33_spill] sm:$0xff] }
  0xde   : > { %v2134_v12 = vsel %vm24337_vm0, %v19166_v25, 0.0  ;;  %v2157_v55 = vpack.c.bf16 %v19441_v44, %v2132_v31  ;;  %vm24346_vm0 = vmmov %vm24338_vm2  ;;  %v24347_v31 = vld [vmem:[#allocation71_spill] sm:$0xff] }
  0xdf   : > { %v2158_v48 = vpack.c.bf16 %v19463_v62, %v2134_v12  ;;  %v24348_v12 = vld [vmem:[#allocation73_spill] sm:$0xff]  ;;  %v24352_v62 = vld [vmem:[#allocation32_spill] sm:$0xff] }
  0xe4   : > { %15719 = vmatmul.mubr.msk.bf16.gmra.mrb[8].mxu0 %vm24334_vm15, %v2155_v29  ;;  %v2136_v29 = vsel %vm19174_vm13, %v24198_v21, 0.0  ;;  %vm24345_vm15 = vmmov %vm24338_vm2 }
  0xe5   : > { %15722 = vmatprep.mubr.msk.bf16.mxu0 %vm24335_vm4, %v2156_v43  ;;  %v24341_v43 = vld [vmem:[#allocation70_spill] sm:$0xff]  ;;  %v2159_v33 = vpack.c.bf16 %v24343_v27, %v2136_v29  ;;  %vm24354_vm13 = vmmov %vm24346_vm0  ;;  %v23605_v29 = vunpack.c.h.bf16 %v19538_v54 }
  0xe6   : > { %vm24342_vm4 = vnez %v24341_v43 }
  0xe7   : > { %v2138_v56 = vsel %vm24342_vm4, %v19186_v10, 0.0  ;;  %vm24353_vm4 = vmmov %vm24346_vm0 }
  0xe8   : > { %v2160_v25 = vpack.c.bf16 %v24344_v7, %v2138_v56  ;;  %v24356_v56 = vld [vmem:[#allocation30_spill] sm:$0xff] }
  0xec   : > { %15723 = vmatmul.mubr.msk.bf16.gmra.mrb[12].mxu0 %vm24338_vm2, %v2157_v55  ;;  %vm24349_vm2 = vnez %v24348_v12 }
  0xed   : > { %15726 = vmatprep.mubr.msk.bf16.mxu0 %vm24339_vm11, %v2158_v48  ;;  %v2140_v55 = vsel %vm24349_vm2, %v24347_v31, 0.0  ;;  %v24350_v48 = vld [vmem:[#allocation74_spill] sm:$0xff] }
  0xee   : > { %vm24351_vm11 = vnez %v24350_v48  ;;  %v2161_v21 = vpack.c.bf16 %v24352_v62, %v2140_v55  ;;  %v24358_v48 = vunpack.c.l.bf16 %v19538_v54  ;;  %v24359_v55 = vld [vmem:[#allocation41_spill] sm:$0xff] }
  0xef   : > { %v2142_v58 = vsel %vm24351_vm11, %v24232_v28, 0.0  ;;  %vm24367_vm11 = vmmov %vm24353_vm4 }
  0xf0   : > { %v2162_v43 = vpack.c.bf16 %v19529_v14, %v2142_v58  ;;  %v2112_v28 = vrot.slane %v24358_v48, 7  ;;  %v24382_v48 = vld [vmem:[#allocation14_spill] sm:$0xff] }
  0xf4   : > { %15727 = vmatmul.mubr.msk.bf16.gmra.mrb[16].mxu0 %vm24345_vm15, %v2159_v33  ;;  %vm24362_vm15 = vmmov %vm24353_vm4 }
  0xf5   : > { %15730 = vmatprep.mubr.msk.bf16.mxu0 %vm24346_vm0, %v2160_v25  ;;  %v2144_v25 = vsel %vm24231_vm14, %v19288_v37, 0.0  ;;  %vm24357_vm0 = vnez %v24356_v56  ;;  %vm24365_vm14 = vmmov %vm24353_vm4 }
  0xf6   : > { %v2146_v12 = vsel %vm24357_vm0, %v19313_v46, 0.0  ;;  %v2163_v62 = vpack.c.bf16 %v24359_v55, %v2144_v25 }
  0xf7   : > { %v2164_v58 = vpack.c.bf16 %v19567_v9, %v2146_v12 }
  0xfc   : > { %15731 = vmatmul.mubr.msk.bf16.gmra.mrb[20].mxu0 %vm24353_vm4, %v2161_v21  ;;  %v19812_v21 = vrot.slane %v23605_v29, 7  ;;  %v24366_v29 = vld [vmem:[#allocation2_spill] sm:$0xff] }
  0xfd   : > { %15734 = vmatprep.mubr.msk.bf16.mxu0 %vm24354_vm13, %v2162_v43  ;;  %v24360_v43 = vld [vmem:[#allocation51_spill] sm:$0xff]  ;;  %vm24361_vm13 = vcmask 1040384  }
  0xfe   : > { %v19816_v33 = vsel %vm24361_vm13, %v24360_v43, %v2112_v28  ;;  %vm24363_vm0 = vmmov %vm24361_vm13  ;;  %vm24368_vm13 = vcmask 1043456  }
  0xff   : > { %v19822_v56 = vsel %vm24363_vm0, %v2112_v28, %v19812_v21  ;;  %v2148_v12 = vsel %vm19297_vm8, %v19816_v33, 0.0  ;;  %v2842_v43 = vsel %vm24368_vm13, %v13218_v15, 0  ;;  %vm24370_vm0 = vmmov %vm24353_vm4  ;;  %v24371_v28 = vld [vmem:[#allocation5_spill] sm:$0xff]  ;;  %v24378_v15 = vld [vmem:[#allocation10_spill] sm:$0xff] }
 0x100   : > { %v2165_v25 = vpack.c.bf16 %v19822_v56, %v2148_v12  ;;  %v24374_v12 = vld [vmem:[#allocation6_spill] sm:$0xff]  ;;  %vm24381_vm8 = vmmov %vm24370_vm0 }
 0x101   : > { %vm24384_vm2 = vmmov %vm24370_vm0 }
 0x104   : > { %15735 = vmatmul.mubr.msk.bf16.gmra.mrb[24].mxu0 %vm24353_vm4, %v2163_v62  ;;  %v13235_v62 = vld [vmem:[%s23366_s1 + $0x18] sm:$0xf]  ;;  %vm24372_vm4 = vmmov %vm24370_vm0 }
 0x105   : > { %15738 = vmatprep.mubr.msk.bf16.mxu0 %vm24362_vm15, %v2164_v58  ;;  %v24369_v58 = vld [vmem:[#allocation3_spill] sm:$0xff]  ;;  %vm24373_vm15 = vmmov %vm24368_vm13 }
 0x106   : > { %vm24379_vm13 = vmmov %vm24370_vm0 }
 0x10c   : > { %15739 = vmatmul.mubr.msk.bf16.gmra.mrb[28].mxu0 %vm24365_vm14, %v2165_v25  ;;  %vm24375_vm14 = vmmov %vm24370_vm0  ;;  %v24376_v25 = vld [vmem:[#allocation8_spill] sm:$0xff] }
 0x10d   : > { %15744 = vmatprep.mubr.msk.bf16.mxu0 %vm24367_vm11, %v24366_v29  ;;  %vm24377_vm11 = vmmov %vm24370_vm0  ;;  %v24380_v29 = vld [vmem:[#allocation11_spill] sm:$0xff] }
 0x114   : > { %15745 = vmatmul.mubr.msk.bf16.vlgmr.msra.gmra.mrb[0].mxu0 %vm24370_vm0, %v24369_v58  ;;  %v24387_v58 = vld [vmem:[#allocation23_spill] sm:$0xff] }
 0x115   : > { %15777 = vmatpush3.bf16.msra.mxu0 %v2842_v43  ;;  %15748 = vmatprep.mubr.msk.bf16.mxu0 %vm24372_vm4, %v24371_v28  ;;  %v24383_v43 = vld [vmem:[#allocation16_spill] sm:$0xff]  ;;  %v24385_v28 = vld [vmem:[#allocation18_spill] sm:$0xff]  ;;  %vm24386_vm4 = vmmov %vm24370_vm0 }
 0x116   : > { %18334 = vmatprep.subr.msk.bf16.mxu0 %vm24373_vm15, %v13235_v62  ;;  %vm24388_vm15 = vmmov %vm24370_vm0 }
 0x11c   : > { %15749 = vmatmul.mubr.msk.bf16.gmra.mrb[4].mxu0 %vm24375_vm14, %v24374_v12  ;;  %v24389_v12 = vld [vmem:[#allocation24_spill] sm:$0xff]  ;;  %vm24390_vm14 = vmmov %vm24370_vm0 }
 0x11d   : > { %15752 = vmatprep.mubr.msk.bf16.mxu0 %vm24377_vm11, %v24376_v25  ;;  %v24391_v25 = vld [vmem:[#allocation29_spill] sm:$0xff]  ;;  %vm24392_vm11 = vmmov %vm24370_vm0 }
 0x124   : > { %15753 = vmatmul.mubr.msk.bf16.gmra.mrb[8].mxu0 %vm24379_vm13, %v24378_v15  ;;  %v24393_v15 = vld [vmem:[#allocation31_spill] sm:$0xff]  ;;  %vm24396_vm13 = vmmov %vm24370_vm0 }
 0x125   : > { %15756 = vmatprep.mubr.msk.bf16.mxu0 %vm24381_vm8, %v24380_v29  ;;  %vm24394_vm8 = vmmov %vm24370_vm0  ;;  %v24395_v29 = vld [vmem:[#allocation34_spill] sm:$0xff] }
 0x12c   : > { %15757 = vmatmul.mubr.msk.bf16.gmra.mrb[12].mxu0 %vm24370_vm0, %v24382_v48 }
 0x12d   : > { %15760 = vmatprep.mubr.msk.bf16.mxu0 %vm24384_vm2, %v24383_v43  ;;  %v2744_v43 = vsel %vm24254_vm9, %v24267_v16, 0.0  ;;  %vm24397_vm2 = vmmov %vm24370_vm0 }
 0x134   : > { %15761 = vmatmul.mubr.msk.bf16.gmra.mrb[16].mxu0 %vm24386_vm4, %v24385_v28  ;;  %v2775_v28 = vpack.c.bf16 %v2744_v43, %v19603_v18  ;;  %v13253_v18 = vld [vmem:[%s23366_s1 + $0x1c] sm:$0xf] }
 0x135   : > { %15764 = vmatprep.mubr.msk.bf16.mxu0 %vm24388_vm15, %v24387_v58  ;;  %v2746_v58 = vsel %vm24266_vm7, %v19337_v42, 0.0  ;;  %vm24401_vm15 = vcmask 1043456  }
 0x136   : > { %v3137_v16 = vsel %vm24401_vm15, %v13235_v62, 0  ;;  %v24405_v62 = vld [vmem:[#allocation63_spill] sm:$0xff] }
 0x13c   : > { %15765 = vmatmul.mubr.msk.bf16.gmra.mrb[20].mxu0 %vm24390_vm14, %v24389_v12  ;;  %vm24402_vm14 = vmmov %vm24370_vm0  ;;  %v18390_v12 = vld [vmem:[%s23368_s3 + $0xd0] sm:$0xff]  }
 0x13d   : > { %15768 = vmatprep.mubr.msk.bf16.mxu0 %vm24392_vm11, %v24391_v25  ;;  %vm24403_vm11 = vmmov %vm24370_vm0 }
 0x144   : > { %15769 = vmatmul.mubr.msk.bf16.gmra.mrb[24].mxu0 %vm24394_vm8, %v24393_v15  ;;  %v24399_v15 = vld [vmem:[#allocation82_spill] sm:$0xff]  ;;  %vm24404_vm8 = vmmov %vm24401_vm15 }
 0x145   : > { %15772 = vmatprep.mubr.msk.bf16.mxu0 %vm24396_vm13, %v24395_v29  ;;  %vm24400_vm4 = vnez %v24399_v15  ;;  %v2776_v29 = vpack.c.bf16 %v2746_v58, %v24269_v63  ;;  %v2752_v58 = vsel %vm24281_vm1, %v19157_v6, 0.0  ;;  %vm24406_vm13 = vmmov %vm24370_vm0  ;;  %v24732_v15 = vmov 0 }
 0x146   : > { %v2748_v25 = vsel %vm24400_vm4, %v19112_v0, 0.0  ;;  %v2779_v43 = vpack.c.bf16 %v2752_v58, %v19662_v13  ;;  %vm24409_vm15 = vmmov %vm24370_vm0 }
 0x147   : > { %v2777_v34 = vpack.c.bf16 %v2748_v25, %v19644_v60 }
 0x14c   : > { %15773 = vmatmul.mubr.msk.bf16.gmra.mrb[28].mxu0 %vm24397_vm2, %v19538_v54  ;;  %vm24407_vm2 = vmmov %vm24370_vm0 }
 0x14d   : > { %15778 = vmatprep.mubr.msk.bf16.mxu0 %vm24370_vm0, %v2775_v28  ;;  %v2750_v28 = vsel %vm24278_vm12, %v19367_v53, 0.0 }
 0x14e   : > { %v2778_v25 = vpack.c.bf16 %v2750_v28, %v24405_v62  ;;  %v2758_v28 = vsel %vm19388_vm3, %v19406_v61, 0.0 }
 0x154   : > { %15779 = vmatmul.mubr.msk.bf16.vlgmr.msra.gmra.mrb[0].mxu0 %vm24402_vm14, %v2776_v29  ;;  %v2756_v29 = vsel %vm19384_vm10, %v19200_v52, 0.0  ;;  %vm24410_vm14 = vnez %v24174_v59 }
 0x155   : > { %15811 = vmatpush3.bf16.msra.mxu0 %v3137_v16  ;;  %15782 = vmatprep.mubr.msk.bf16.mxu0 %vm24403_vm11, %v2777_v34  ;;  %v2754_v34 = vsel %vm24285_vm5, %v19382_v41, 0.0  ;;  %v24408_v16 = vld [vmem:[#allocation67_spill] sm:$0xff]  ;;  %v2781_v5 = vpack.c.bf16 %v2756_v29, %v19679_v57  ;;  %v2760_v58 = vsel %vm24410_vm14, %v19240_v32, 0.0  ;;  %vm24412_vm11 = vmmov %vm24370_vm0 }
 0x156   : > { %18335 = vmatprep.subr.msk.bf16.mxu0 %vm24404_vm8, %v13253_v18  ;;  %v2780_v38 = vpack.c.bf16 %v2754_v34, %v24408_v16  ;;  %v2783_v2 = vpack.c.bf16 %v2760_v58, %v19696_v30  ;;  %vm24413_vm8 = vmmov %vm24370_vm0  ;;  %v24416_v34 = vld [vmem:[#allocation39_spill] sm:$0xff]  ;;  %v24420_v58 = vld [vmem:[#allocation38_spill] sm:$0xff] }
 0x157   : > { %v24423_v30 = vld [vmem:[#allocation37_spill] sm:$0xff] }
 0x15c   : > { %15783 = vmatmul.mubr.msk.bf16.gmra.mrb[4].mxu0 %vm24406_vm13, %v2778_v25  ;;  %v24411_v25 = vld [vmem:[#allocation72_spill] sm:$0xff] }
 0x15d   : > { %15786 = vmatprep.mubr.msk.bf16.mxu0 %vm24407_vm2, %v2779_v43  ;;  %v2782_v43 = vpack.c.bf16 %v2758_v28, %v24411_v25  ;;  %vm24417_vm2 = vnez %v24190_v1  ;;  %v24419_v28 = vld [vmem:[#allocation49_spill] sm:$0xff] }
 0x15e   : > { %v2764_v29 = vsel %vm24417_vm2, %v24416_v34, 0.0  ;;  %vm24425_vm2 = vmmov %vm24370_vm0 }
 0x15f   : > { %v2785_v59 = vpack.c.bf16 %v2764_v29, %v19713_v3  ;;  %v24430_v29 = vld [vmem:[#allocation77_spill] sm:$0xff]  ;;  %v24431_v3 = vld [vmem:[#allocation44_spill] sm:$0xff] }
 0x164   : > { %15787 = vmatmul.mubr.msk.bf16.gmra.mrb[8].mxu0 %vm24370_vm0, %v2780_v38  ;;  %v24414_v38 = vld [vmem:[#allocation27_spill] sm:$0xff] }
 0x165   : > { %15790 = vmatprep.mubr.msk.bf16.mxu0 %vm24409_vm15, %v2781_v5  ;;  %vm24415_vm13 = vnez %v24414_v38  ;;  %vm24418_vm15 = vmmov %vm24370_vm0 }
 0x166   : > { %v2762_v5 = vsel %vm24415_vm13, %v19484_v39, 0.0  ;;  %vm24426_vm13 = vmmov %vm24370_vm0 }
 0x167   : > { %v2784_v11 = vpack.c.bf16 %v2762_v5, %v24298_v4  ;;  %v24427_v5 = vld [vmem:[#allocation40_spill] sm:$0xff] }
 0x16c   : > { %15791 = vmatmul.mubr.msk.bf16.gmra.mrb[12].mxu0 %vm24412_vm11, %v2782_v43  ;;  %vm24421_vm11 = vnez %v24420_v58  ;;  %v24422_v43 = vld [vmem:[#allocation81_spill] sm:$0xff] }
 0x16d   : > { %15794 = vmatprep.mubr.msk.bf16.mxu0 %vm24413_vm8, %v2783_v2  ;;  %v2766_v2 = vsel %vm24421_vm11, %v24419_v28, 0.0  ;;  %vm24424_vm8 = vnez %v24423_v30  ;;  %v24433_v28 = vunpack.c.h.bf16 %v19538_v54 }
 0x16e   : > { %v2768_v38 = vsel %vm24424_vm8, %v24422_v43, 0.0  ;;  %v2786_v39 = vpack.c.bf16 %v2766_v2, %v24303_v51  ;;  %vm24434_vm8 = vcmask 1046528  }
 0x16f   : > { %v2787_v1 = vpack.c.bf16 %v2768_v38, %v19722_v49  ;;  %v2738_v30 = vrot.slane %v24433_v28, 1  ;;  %v24440_v28 = vld [vmem:[#allocation4_spill] sm:$0xff] }
 0x170   : > { %vm24441_vm11 = vnez %v24440_v28  ;;  %v24446_v28 = vld [vmem:[#allocation22_spill] sm:$0xff] }
 0x171   : > { %v19947_v38 = vsel %vm24434_vm8, %v2738_v30, 0.0 }
 0x174   : > { %15795 = vmatmul.mubr.msk.bf16.gmra.mrb[16].mxu0 %vm24370_vm0, %v2784_v11  ;;  %v24428_v11 = vld [vmem:[#allocation90_spill] sm:$0xff] }
 0x175   : > { %15798 = vmatprep.mubr.msk.bf16.mxu0 %vm24418_vm15, %v2785_v59  ;;  %vm24429_vm0 = vnez %v24428_v11  ;;  %vm24432_vm15 = vnez %v24431_v3  ;;  %v24438_v3 = vld [vmem:[#allocation55_spill] sm:$0xff] }
 0x176   : > { %v2770_v59 = vsel %vm24429_vm0, %v24427_v5, 0.0  ;;  %v2772_v58 = vsel %vm24432_vm15, %v24430_v29, 0.0  ;;  %vm24437_vm0 = vmmov %vm24434_vm8  ;;  %vm24439_vm15 = vnez %v24438_v3 }
 0x177   : > { %v2788_v43 = vpack.c.bf16 %v2770_v59, %v19342_v22  ;;  %v2789_v2 = vpack.c.bf16 %v2772_v58, %v19731_v8  ;;  %v2774_v11 = vsel %vm24439_vm15, %v19947_v38, 0.0  ;;  %v3039_v59 = vsel %vm24441_vm11, %v24313_v19, 0.0  ;;  %vm24442_vm8 = vmmov %vm24425_vm2  ;;  %v13269_v19 = vld [vmem:[%s23366_s1 + $0x20] sm:$0xf] }
 0x178   : > { %v3070_v8 = vpack.c.bf16 %v24318_v40, %v3039_v59  ;;  %vm24447_vm11 = vmmov %vm24425_vm2  ;;  %v24449_v40 = vld [vmem:[#allocation60_spill] sm:$0xff] }
 0x179   : > { %vm24448_vm15 = vmmov %vm24425_vm2 }
 0x17c   : > { %15799 = vmatmul.mubr.msk.bf16.gmra.mrb[20].mxu0 %vm24425_vm2, %v2786_v39 }
 0x17d   : > { %15802 = vmatprep.mubr.msk.bf16.mxu0 %vm24426_vm13, %v2787_v1  ;;  %vm24435_vm13 = vmmov %vm24425_vm2  ;;  %v24436_v1 = vld [vmem:[#allocation50_spill] sm:$0xff] }
 0x17e   : > { %v19953_v39 = vsel %vm24437_vm0, %v24436_v1, %v2738_v30 }
 0x17f   : > { %v2790_v58 = vpack.c.bf16 %v2774_v11, %v19953_v39 }
 0x184   : > { %15803 = vmatmul.mubr.msk.bf16.gmra.mrb[24].mxu0 %vm24425_vm2, %v2788_v43  ;;  %v24443_v43 = vld [vmem:[#allocation46_spill] sm:$0xff] }
 0x185   : > { %15806 = vmatprep.mubr.msk.bf16.mxu0 %vm24435_vm13, %v2789_v2  ;;  %vm24444_vm0 = vnez %v24443_v43  ;;  %vm24445_vm13 = vcmask 1043456  }
 0x186   : > { %v3043_v30 = vsel %vm24444_vm0, %v24320_v45, 0.0  ;;  %v3339_v1 = vsel %vm24445_vm13, %v13253_v18, 0  ;;  %v24452_v45 = vld [vmem:[#allocation52_spill] sm:$0xff]  ;;  %vm24454_vm0 = vmmov %vm24445_vm13 }
 0x187   : > { %v3072_v2 = vpack.c.bf16 %v24326_v35, %v3043_v30  ;;  %vm24455_vm13 = vmmov %vm24447_vm11  ;;  %v24458_v30 = vld [vmem:[#allocation86_spill] sm:$0xff] }
 0x18c   : > { %15807 = vmatmul.mubr.msk.bf16.gmra.mrb[28].mxu0 %vm24442_vm8, %v2790_v58 }
 0x18d   : > { %15812 = vmatprep.mubr.msk.bf16.mxu0 %vm24425_vm2, %v3070_v8  ;;  %v24450_v8 = vld [vmem:[#allocation48_spill] sm:$0xff]  ;;  %vm24453_vm2 = vnez %v24452_v45 }
 0x18e   : > { %vm24451_vm8 = vnez %v24450_v8  ;;  %v3047_v35 = vsel %vm24453_vm2, %v19105_v36, 0.0 }
 0x18f   : > { %v3045_v11 = vsel %vm24451_vm8, %v24449_v40, 0.0  ;;  %v3074_v59 = vpack.c.bf16 %v24333_v17, %v3047_v35  ;;  %vm24457_vm8 = vnez %v24331_v24  ;;  %v24461_v17 = vld [vmem:[#allocation66_spill] sm:$0xff]  ;;  %v24463_v40 = vld [vmem:[#allocation69_spill] sm:$0xff]  ;;  %v24466_v35 = vld [vmem:[#allocation88_spill] sm:$0xff] }
 0x190   : > { %v3073_v18 = vpack.c.bf16 %v24327_v47, %v3045_v11  ;;  %v3051_v58 = vsel %vm24457_vm8, %v19148_v50, 0.0  ;;  %v24462_v47 = vld [vmem:[#allocation62_spill] sm:$0xff]  ;;  %v24464_v11 = vld [vmem:[#allocation65_spill] sm:$0xff] }
 0x194   : > { %15813 = vmatmul.mubr.msk.bf16.vlgmr.msra.gmra.mrb[0].mxu0 %vm24447_vm11, %v24446_v28 }
 0x195   : > { %15845 = vmatpush3.bf16.msra.mxu0 %v3339_v1  ;;  %15816 = vmatprep.mubr.msk.bf16.mxu0 %vm24448_vm15, %v3072_v2  ;;  %vm24456_vm15 = vnez %v24329_v26  ;;  %v3076_v2 = vpack.c.bf16 %v19441_v44, %v3051_v58  ;;  %v3053_v1 = vsel %vm24336_vm6, %v24461_v17, 0.0  ;;  %v24469_v44 = vld [vmem:[#allocation68_spill] sm:$0xff]  ;;  %v24477_v17 = vld [vmem:[#allocation73_spill] sm:$0xff] }
 0x196   : > { %18336 = vmatprep.subr.msk.bf16.mxu0 %vm24454_vm0, %v13269_v19  ;;  %v3049_v28 = vsel %vm24456_vm15, %v19121_v20, 0.0  ;;  %vm24459_vm0 = vmmov %vm24447_vm11 }
 0x197   : > { %v3075_v36 = vpack.c.bf16 %v24458_v30, %v3049_v28  ;;  %vm24460_vm2 = vmmov %vm24459_vm0  ;;  %v24471_v28 = vld [vmem:[#allocation70_spill] sm:$0xff] }
 0x198   : > { %vm24468_vm8 = vmmov %vm24459_vm0 }
 0x199   : > { %vm24475_vm6 = vmmov %vm24468_vm8 }
 0x19c   : > { %15817 = vmatmul.mubr.msk.bf16.gmra.mrb[4].mxu0 %vm24455_vm13, %v3073_v18  ;;  %vm24465_vm13 = vnez %v24464_v11  ;;  %v3077_v18 = vpack.c.bf16 %v24466_v35, %v3053_v1 }
 0x19d   : > { %15820 = vmatprep.mubr.msk.bf16.mxu0 %vm24447_vm11, %v3074_v59  ;;  %v3055_v20 = vsel %vm24465_vm13, %v24463_v40, 0.0  ;;  %vm24467_vm11 = vmmov %vm24459_vm0  ;;  %v24479_v40 = vld [vmem:[#allocation74_spill] sm:$0xff] }
 0x19e   : > { %v3078_v50 = vpack.c.bf16 %v24343_v27, %v3055_v20  ;;  %vm24474_vm13 = vmmov %vm24468_vm8  ;;  %v24476_v27 = vld [vmem:[#allocation76_spill] sm:$0xff] }
 0x1a4   : > { %15821 = vmatmul.mubr.msk.bf16.gmra.mrb[8].mxu0 %vm24459_vm0, %v3075_v36  ;;  %vm24470_vm0 = vnez %v24469_v44  ;;  %v24473_v36 = vld [vmem:[#allocation32_spill] sm:$0xff] }
 0x1a5   : > { %15824 = vmatprep.mubr.msk.bf16.mxu0 %vm24460_vm2, %v3076_v2  ;;  %v3057_v59 = vsel %vm24470_vm0, %v19186_v10, 0.0  ;;  %vm24472_vm2 = vnez %v24471_v28 }
 0x1a6   : > { %v3059_v58 = vsel %vm24472_vm2, %v24347_v31, 0.0  ;;  %v3079_v30 = vpack.c.bf16 %v24344_v7, %v3057_v59  ;;  %vm24481_vm2 = vmmov %vm24475_vm6  ;;  %v24483_v7 = vld [vmem:[#allocation75_spill] sm:$0xff] }
 0x1a7   : > { %v3080_v2 = vpack.c.bf16 %v24473_v36, %v3059_v58  ;;  %vm24482_vm0 = vmmov %vm24481_vm2 }
 0x1ac   : > { %15825 = vmatmul.mubr.msk.bf16.gmra.mrb[12].mxu0 %vm24467_vm11, %v3077_v18  ;;  %vm24478_vm11 = vnez %v24477_v17  ;;  %v24485_v18 = vld [vmem:[#allocation30_spill] sm:$0xff] }
 0x1ad   : > { %15828 = vmatprep.mubr.msk.bf16.mxu0 %vm24468_vm8, %v3078_v50  ;;  %v3061_v1 = vsel %vm24478_vm11, %v24476_v27, 0.0  ;;  %vm24480_vm8 = vnez %v24479_v40  ;;  %vm24488_vm11 = vmmov %vm24482_vm0  ;;  %v18367_v27 = vld [vmem:[%s23368_s3 + $0x58] sm:$0xff]  }
 0x1ae   : > { %v3063_v10 = vsel %vm24480_vm8, %v19288_v37, 0.0  ;;  %v3081_v20 = vpack.c.bf16 %v19529_v14, %v3061_v1  ;;  %vm24487_vm8 = vcmask 1040384   ;;  %v24499_v1 = vld [vmem:[#allocation6_spill] sm:$0xff] }
 0x1af   : > { %v3082_v31 = vpack.c.bf16 %v24359_v55, %v3063_v10  ;;  %v3038_v14 = vsel %vm24487_vm8, %v19812_v21, 0.0  ;;  %v24490_v55 = vld [vmem:[#allocation79_spill] sm:$0xff]  ;;  %v18366_v21 = vld [vmem:[%s23368_s3 + $0x50] sm:$0xff]   ;;  %v18368_v10 = vld [vmem:[%s23368_s3 + $0x60] sm:$0xff]  }
 0x1b4   : > { %15829 = vmatmul.mubr.msk.bf16.gmra.mrb[16].mxu0 %vm24474_vm13, %v3079_v30  ;;  %vm24484_vm13 = vnez %v24483_v7  ;;  %v24492_v30 = vmov 0.0  }
 0x1b5   : > { %15832 = vmatprep.mubr.msk.bf16.mxu0 %vm24475_vm6, %v3080_v2  ;;  %v3065_v35 = vsel %vm24484_vm13, %v19313_v46, 0.0  ;;  %vm24486_vm6 = vnez %v24485_v18  ;;  %v24497_v2 = vld [vmem:[#allocation5_spill] sm:$0xff] }
 0x1b6   : > { %v3067_v50 = vsel %vm24486_vm6, %v19816_v33, 0.0  ;;  %v3083_v59 = vpack.c.bf16 %v19567_v9, %v3065_v35  ;;  %v18364_v9 = vld [vmem:[%s23368_s3 + $0x40] sm:$0xff]   ;;  %v18365_v33 = vld [vmem:[%s23368_s3 + $0x48] sm:$0xff]  }
 0x1b7   : > { %v3084_v37 = vpack.c.bf16 %v19822_v56, %v3067_v50  ;;  %v24494_v56 = vld [vmem:[#allocation3_spill] sm:$0xff]  ;;  %15912 = vmatprep.subr.bf16.mxu1 %v18364_v9  ;;  %v24506_v50 = vld [vmem:[#allocation16_spill] sm:$0xff] }
 0x1b8   : > { %15913 = vmatpush3.bf16.msra.mxu1 %v18364_v9  ;;  %v24504_v35 = vld [vmem:[#allocation11_spill] sm:$0xff]  ;;  %v24518_v9 = vld [vmem:[#allocation34_spill] sm:$0xff] }
 0x1b9   : > { %15914 = vmatprep.subr.bf16.mxu1 %v18365_v33 }
 0x1bc   : > { %15833 = vmatmul.mubr.msk.bf16.gmra.mrb[20].mxu0 %vm24481_vm2, %v3081_v20  ;;  %vm24489_vm2 = vmmov %vm24482_vm0  ;;  %15915 = vmatpush3.bf16.msra.mxu1 %v18365_v33  ;;  %v18369_v20 = vld [vmem:[%s23368_s3 + $0x68] sm:$0xff]   ;;  %v3535_v33 = vsel %vm24254_vm9, %v19337_v42, 0.0 }
 0x1bd   : > { %15836 = vmatprep.mubr.msk.bf16.mxu0 %vm24482_vm0, %v3082_v31  ;;  %vm24491_vm0 = vnez %v24490_v55  ;;  %vm24493_vm13 = vmmov %vm24489_vm2  ;;  %15916 = vmatprep.subr.bf16.mxu1 %v18366_v21  ;;  %v24502_v31 = vld [vmem:[#allocation10_spill] sm:$0xff] }
 0x1be   : > { %v3069_v58 = vsel %vm24491_vm0, %v3038_v14, 0.0  ;;  %vm24495_vm8 = vmmov %vm24489_vm2  ;;  %v24512_v14 = vld [vmem:[#allocation24_spill] sm:$0xff] }
 0x1bf   : > { %v3085_v46 = vpack.c.bf16 %v24492_v30, %v3069_v58  ;;  %vm24507_vm0 = vmmov %vm24489_vm2  ;;  %v24514_v58 = vld [vmem:[#allocation29_spill] sm:$0xff] }
 0x1c0   : > { %15917 = vmatpush3.bf16.msra.mxu1 %v18366_v21  ;;  %vm24511_vm6 = vmmov %vm24507_vm0  ;;  %v24521_v21 = vmov 0.0|0.0  }
 0x1c1   : > { %15918 = vmatprep.subr.bf16.mxu1 %v18367_v27  ;;  %vm24515_vm15 = vmmov %vm24507_vm0 }
 0x1c4   : > { %15837 = vmatmul.mubr.msk.bf16.gmra.mrb[24].mxu0 %vm24488_vm11, %v3083_v59  ;;  %vm24496_vm11 = vcmask 1043456   ;;  %15919 = vmatpush3.bf16.msra.mxu1 %v18367_v27  ;;  %v24508_v59 = vld [vmem:[#allocation18_spill] sm:$0xff] }
 0x1c5   : > { %15840 = vmatprep.mubr.msk.bf16.mxu0 %vm24489_vm2, %v3084_v37  ;;  %v3627_v36 = vsel %vm24496_vm11, %v13269_v19, 0  ;;  %v24500_v19 = vld [vmem:[#allocation8_spill] sm:$0xff]  ;;  %15920 = vmatprep.subr.bf16.mxu1 %v18368_v10  ;;  %vm24503_vm11 = vmmov %vm24489_vm2  ;;  %v24510_v37 = vld [vmem:[#allocation23_spill] sm:$0xff] }
 0x1c8   : > { %15921 = vmatpush3.bf16.msra.mxu1 %v18368_v10 }
 0x1c9   : > { %15922 = vmatprep.subr.bf16.mxu1 %v18369_v20 }
 0x1cc   : > { %15841 = vmatmul.mubr.msk.bf16.gmra.mrb[28].mxu0 %vm24493_vm13, %v3085_v46  ;;  %vm24498_vm13 = vmmov %vm24489_vm2  ;;  %15923 = vmatpush3.bf16.msra.mxu1 %v18369_v20  ;;  %v24516_v46 = vld [vmem:[#allocation31_spill] sm:$0xff] }
 0x1cd   : > { %15846 = vmatprep.mubr.msk.bf16.mxu0 %vm24495_vm8, %v24494_v56  ;;  %vm24501_vm8 = vmmov %vm24489_vm2  ;;  %v3564_v56 = vpack.c.bf16 %v3535_v33, %v24269_v63  ;;  %v3541_v63 = vsel %vm24278_vm12, %v19157_v6, 0.0  ;;  %v3547_v6 = vsel %vm19384_vm10, %v19406_v61, 0.0  ;;  %v24532_v20 = vld [vmem:[#allocation35_spill] sm:$0xff] }
 0x1ce   : > { %v3567_v10 = vpack.c.bf16 %v3541_v63, %v19662_v13 }
 0x1d4   : > { %15847 = vmatmul.mubr.msk.bf16.vlgmr.msra.gmra.mrb[0].mxu0 %vm24498_vm13, %v24497_v2  ;;  %vm24505_vm13 = vmmov %vm24489_vm2  ;;  %v3539_v2 = vsel %vm24400_vm4, %v19367_v53, 0.0 }
 0x1d5   : > { %15879 = vmatpush3.bf16.msra.mxu0 %v3627_v36  ;;  %15850 = vmatprep.mubr.msk.bf16.mxu0 %vm24489_vm2, %v24499_v1  ;;  %v3537_v36 = vsel %vm24266_vm7, %v19112_v0, 0.0  ;;  %v3566_v27 = vpack.c.bf16 %v3539_v2, %v24405_v62  ;;  %v3543_v1 = vsel %vm24281_vm1, %v19382_v41, 0.0  ;;  %v3570_v41 = vpack.c.bf16 %v3547_v6, %v24411_v25 }
 0x1d6   : > { %v3568_v53 = vpack.c.bf16 %v3543_v1, %v24408_v16  ;;  %v3549_v16 = vsel %vm19388_vm3, %v19240_v32, 0.0  ;;  %v24556_v1 = vld [vmem:[#allocation56_spill] sm:$0xff] }
 0x1dc   : > { %15851 = vmatmul.mubr.msk.bf16.gmra.mrb[4].mxu0 %vm24501_vm8, %v24500_v19  ;;  %vm24509_vm8 = vmmov %vm24507_vm0 }
 0x1dd   : > { %15854 = vmatprep.mubr.msk.bf16.mxu0 %vm24503_vm11, %v24502_v31  ;;  %vm24513_vm11 = vmmov %vm24507_vm0 }
 0x1e4   : > { %15855 = vmatmul.mubr.msk.bf16.gmra.mrb[8].mxu0 %vm24505_vm13, %v24504_v35  ;;  %vm24517_vm13 = vmmov %vm24507_vm0  ;;  %v24534_v35 = vld [vmem:[#allocation7_spill] sm:$0xff] }
 0x1e5   : > { %15858 = vmatprep.mubr.msk.bf16.mxu0 %vm24489_vm2, %v24382_v48  ;;  %vm24519_vm2 = vmmov %vm24507_vm0  ;;  %v24708_v48 = vmov 0 }
 0x1ec   : > { %15859 = vmatmul.mubr.msk.bf16.gmra.mrb[12].mxu0 %vm24507_vm0, %v24506_v50  ;;  %v3571_v50 = vpack.c.bf16 %v3549_v16, %v24534_v35 }
 0x1ed   : > { %15862 = vmatprep.mubr.msk.bf16.mxu0 %vm24509_vm8, %v24508_v59  ;;  %vm24524_vm8 = vmmov %vm24507_vm0  ;;  %v24539_v59 = vld [vmem:[#allocation49_spill] sm:$0xff] }
 0x1f4   : > { %15863 = vmatmul.mubr.msk.bf16.gmra.mrb[16].mxu0 %vm24511_vm6, %v24510_v37  ;;  %vm24523_vm6 = vmmov %vm24507_vm0  ;;  %v24540_v37 = vld [vmem:[#allocation87_spill] sm:$0xff] }
 0x1f5   : > { %15866 = vmatprep.mubr.msk.bf16.mxu0 %vm24513_vm11, %v24512_v14  ;;  %vm24527_vm11 = vmmov %vm24507_vm0  ;;  %v24542_v14 = vld [vmem:[#allocation57_spill] sm:$0xff] }
 0x1fc   : > { %15867 = vmatmul.mubr.msk.bf16.gmra.mrb[20].mxu0 %vm24515_vm15, %v24514_v58  ;;  %vm24522_vm15 = vmmov %vm24507_vm0 }
 0x1fd   : > { %15870 = vmatprep.mubr.msk.bf16.mxu0 %vm24517_vm13, %v24516_v46  ;;  %vm24528_vm13 = vmmov %vm24507_vm0 }
 0x204   : > { %15871 = vmatmul.mubr.msk.bf16.gmra.mrb[24].mxu0 %vm24519_vm2, %v24518_v9  ;;  %vm24530_vm2 = vmmov %vm24507_vm0  ;;  %v24546_v9 = vld [vmem:[#allocation38_spill] sm:$0xff] }
 0x205   : > { %15874 = vmatprep.mubr.msk.bf16.mxu0 %vm24507_vm0, %v19538_v54  ;;  %v3565_v54 = vpack.c.bf16 %v3537_v36, %v19644_v60  ;;  %v3545_v60 = vsel %vm24285_vm5, %v19200_v52, 0.0  ;;  %v3551_v52 = vsel %vm24410_vm14, %v24532_v20, 0.0 }
 0x206   : > { %v3569_v19 = vpack.c.bf16 %v3545_v60, %v19679_v57  ;;  %v3572_v61 = vpack.c.bf16 %v3551_v52, %v24298_v4  ;;  %v24537_v57 = vld [vmem:[#allocation27_spill] sm:$0xff]  ;;  %v24545_v4 = vld [vmem:[#allocation81_spill] sm:$0xff] }
 0x20c   : > { %15875 = vmatmul.mubr.bf16.gmra.mrb[28].mxu0 %v24521_v21 }
 0x20d   : > { %15880 = vmatprep.mubr.msk.bf16.mxu0 %vm24522_vm15, %v3564_v56  ;;  %vm24535_vm15 = vmmov %vm24507_vm0  ;;  %v24548_v56 = vld [vmem:[#allocation37_spill] sm:$0xff] }
 0x214   : > { %15881 = vmatmul.mubr.msk.bf16.vlgmr.msra.gmra.mrb[0].mxu0 %vm24523_vm6, %v3565_v54  ;;  %vm24536_vm6 = vmmov %vm24507_vm0 }
 0x215   : > { %15884 = vmatprep.mubr.msk.bf16.mxu0 %vm24524_vm8, %v3566_v27  ;;  %vm24538_vm8 = vnez %v24537_v57  ;;  %v24554_v27 = vld [vmem:[#allocation44_spill] sm:$0xff] }
 0x216   : > { %v3553_v25 = vsel %vm24538_vm8, %v24416_v34, 0.0 }
 0x217   : > { %v3573_v58 = vpack.c.bf16 %v3553_v25, %v24542_v14 }
 0x21c   : > { %15885 = vmatmul.mubr.msk.bf16.gmra.mrb[4].mxu0 %vm24527_vm11, %v3567_v10  ;;  %vm24541_vm11 = vnez %v24540_v37 }
 0x21d   : > { %15888 = vmatprep.mubr.msk.bf16.mxu0 %vm24528_vm13, %v3568_v53  ;;  %v3555_v32 = vsel %vm24541_vm11, %v24539_v59, 0.0  ;;  %vm24543_vm13 = vmmov %vm24507_vm0 }
 0x21e   : > { %v3574_v46 = vpack.c.bf16 %v3555_v32, %v24303_v51  ;;  %v24552_v51 = vld [vmem:[#allocation90_spill] sm:$0xff] }
 0x224   : > { %15889 = vmatmul.mubr.msk.bf16.gmra.mrb[8].mxu0 %vm24530_vm2, %v3569_v19  ;;  %vm24544_vm2 = vmmov %vm24507_vm0 }
 0x225   : > { %15892 = vmatprep.mubr.msk.bf16.mxu0 %vm24507_vm0, %v3570_v41  ;;  %vm24547_vm0 = vnez %v24546_v9  ;;  %vm24551_vm11 = vmmov %vm24544_vm2 }
 0x226   : > { %v3557_v33 = vsel %vm24547_vm0, %v24545_v4, 0.0 }
 0x227   : > { %v3575_v36 = vpack.c.bf16 %v3557_v33, %v19722_v49  ;;  %v18371_v49 = vld [vmem:[%s23368_s3 + $0x78] sm:$0xff]  }
 0x22c   : > { %15893 = vmatmul.mubr.msk.bf16.gmra.mrb[12].mxu0 %vm24535_vm15, %v3571_v50  ;;  %vm24549_vm15 = vnez %v24548_v56 }
 0x22d   : > { %15896 = vmatprep.mubr.msk.bf16.mxu0 %vm24536_vm6, %v3572_v61  ;;  %v3559_v34 = vsel %vm24549_vm15, %v24427_v5, 0.0  ;;  %vm24550_vm6 = vmmov %vm24544_vm2 }
 0x22e   : > { %v3576_v2 = vpack.c.bf16 %v3559_v34, %v19342_v22  ;;  %vm24557_vm15 = vmmov %vm24550_vm6  ;;  %v18370_v22 = vld [vmem:[%s23368_s3 + $0x70] sm:$0xff]  }
 0x22f   : > { %vm24558_vm0 = vmmov %vm24550_vm6  ;;  %15924 = vmatprep.subr.bf16.mxu1 %v18370_v22 }
 0x230   : > { %15925 = vmatpush3.bf16.msra.mxu1 %v18370_v22 }
 0x231   : > { %15926 = vmatprep.subr.bf16.mxu1 %v18371_v49 }
 0x234   : > { %15897 = vmatmul.mubr.msk.bf16.gmra.mrb[16].mxu0 %vm24543_vm13, %v3573_v58  ;;  %vm24553_vm13 = vnez %v24552_v51  ;;  %15927 = vmatpush3.bf16.msra.mxu1 %v18371_v49 }
 0x235   : > { %15900 = vmatprep.mubr.msk.bf16.mxu0 %vm24544_vm2, %v3574_v46  ;;  %v3561_v54 = vsel %vm24553_vm13, %v24430_v29, 0.0  ;;  %vm24555_vm2 = vnez %v24554_v27  ;;  %v18372_v29 = vld [vmem:[%s23368_s3] sm:$0xff]  }
 0x236   : > { %v3563_v63 = vsel %vm24555_vm2, %v19947_v38, 0.0  ;;  %v3577_v10 = vpack.c.bf16 %v3561_v54, %v24556_v1  ;;  %15960 = vmatprep.subr.bf16.mxu1 %v18372_v29  ;;  %v20182_v38 = vld [vmem:[%s23367_s2] ss:$0 sm:$0xff] }
 0x237   : > { %v3578_v5 = vpack.c.bf16 %v3563_v63, %v19953_v39 }
 0x23c   : > { %15901 = vmatmul.mubr.msk.bf16.gmra.mrb[20].mxu0 %vm24550_vm6, %v3575_v36  ;;  %vm24564_vm6 = vcmask 1046528  }
 0x23d   : > { %15904 = vmatprep.mubr.msk.bf16.mxu0 %vm24551_vm11, %v3576_v2  ;;  %vm24560_vm11 = vcmask 1040384   ;;  %vm24565_vm2 = vmmov %vm24564_vm6 }
 0x244   : > { %15905 = vmatmul.mubr.msk.bf16.gmra.mrb[24].mxu0 %vm24557_vm15, %v3577_v10  ;;  %v18373_v10 = vld [vmem:[%s23368_s3 + $0x8] sm:$0xff]  }
 0x245   : > { %15908 = vmatprep.mubr.msk.bf16.mxu0 %vm24558_vm0, %v3578_v5  ;;  %vm24562_vm0 = vmmov %vm24560_vm11 }
 0x246   : > { %vm24563_vm15 = vmmov %vm24562_vm0 }
 0x24c   : > { %15909 = vmatmul.mubr.bf16.gmra.mrb[28].mxu0 %v24521_v21 }
 0x24d   : > { %16360 = vmatprep.mubr.bf16.mxu0 %v24521_v21 }
 0x2e7   : > { %v15882_v39 = vpop.f32.mrb[0].mxu0 }
 0x2e8   : > { %v3831_v53 = vadd.f32 %v15882_v39, %v20182_v38  ;;  %v3663_v60 = vpop.f32.mrb[1].mxu0 }
 0x2e9   : > { %v3829_v6 = vadd.f32 %v20182_v38, %v3663_v60  ;;  %v15883_v19 = vpop.f32.mrb[2].mxu0 }
 0x2ea   : > { %v3863_v41 = vmax.f32 %v3831_v53, 0.0  ;;  %v3832_v16 = vadd.f32 %v15883_v19, %v20182_v38  ;;  %v3666_v20 = vpop.f32.mrb[3].mxu0 }
 0x2eb   : > { %v20187_v52 = vmax.f32 %v3829_v6, 0.0  ;;  %v3830_v35 = vadd.f32 %v20182_v38, %v3666_v20 }
 0x2ec   : > { %v3864_v50 = vmax.f32 %v3832_v16, 0.0  ;;  %v3926_v59 = vrot.slane %v3863_v41, 7  ;;  %v4528_v32 = vrot.slane %v3863_v41, 1 }
 0x2ed   : > { %v3923_v61 = vrot.slane %v20187_v52, 7  ;;  %v3862_v25 = vmax.f32 %v3830_v35, 0.0  ;;  %v23627_v46 = vrot.slane %v20187_v52, 1 }
 0x2ee   : > { %v3928_v14 = vrot.slane %v3864_v50, 7  ;;  %v20191_v58 = vpack.c.bf16 %v3864_v50, %v3863_v41  ;;  %v4530_v4 = vrot.slane %v3864_v50, 1 }
 0x2ef   : > { %v3924_v33 = vrot.slane %v3862_v25, 7  ;;  %v4526_v34 = vrot.slane %v3862_v25, 1  ;;  %v15886_v36 = vpop.f32.mrb[4].mxu0  ;;  %v4012_v2 = vsel %vm24560_vm11, 0.0, %v3923_v61  ;;  %v20197_v1 = vpack.c.bf16 %v3862_v25, %v20187_v52  ;;  %vm24567_vm11 = vmmov %vm24564_vm6 }
 0x2f0   : > { %24559 = vst [vmem:[#allocation13_spill] sm:$0xff] %v20191_v58  ;;  %v3835_v54 = vadd.f32 %v15886_v36, %v20182_v38  ;;  %v3679_v63 = vpop.f32.mrb[5].mxu0  ;;  %v3929_v5 = vsel %vm24562_vm0, %v3926_v59, %v3928_v14  ;;  %v4531_v25 = vsel %vm24567_vm11, %v4528_v32, %v4530_v4  ;;  %v18374_v36 = vld [vmem:[%s23368_s3 + $0x10] sm:$0xff]   ;;  %vm24572_vm11 = vmmov %vm24562_vm0 }
 0x2f1   : > { %24561 = vst [vmem:[#allocation19_spill] sm:$0xff] %v20197_v1  ;;  %v3925_v22 = vsel %vm24563_vm15, %v3923_v61, %v3924_v33  ;;  %v4527_v49 = vsel %vm24564_vm6, %v23627_v46, %v4526_v34  ;;  %v4529_v39 = vsel %vm24565_vm2, %v4526_v34, %v4528_v32  ;;  %v3833_v53 = vadd.f32 %v20182_v38, %v3679_v63  ;;  %v15887_v60 = vpop.f32.mrb[6].mxu0  ;;  %vm24566_vm2 = vmmov %vm24562_vm0 }
 0x2f2   : > { %v20209_v6 = vpack.c.bf16 %v3925_v22, %v4012_v2  ;;  %v20211_v19 = vpack.c.bf16 %v4529_v39, %v4527_v49  ;;  %v3867_v41 = vmax.f32 %v3835_v54, 0.0  ;;  %v3836_v16 = vadd.f32 %v15887_v60, %v20182_v38  ;;  %15929 = vmatmul.mubr.bf16.vlgmr.msra.gmra.mrb[0].mxu1 %v20197_v1  ;;  %v3682_v20 = vpop.f32.mrb[7].mxu0  ;;  %vm24570_vm15 = vmmov %vm24562_vm0 }
 0x2f3   : > { %v3865_v35 = vmax.f32 %v3833_v53, 0.0  ;;  %15961 = vmatpush3.bf16.msra.mxu1 %v18372_v29  ;;  %v3834_v50 = vadd.f32 %v20182_v38, %v3682_v20  ;;  %15932 = vmatprep.mubr.bf16.mxu1 %v20191_v58  ;;  %v3927_v61 = vsel %vm24566_vm2, %v3924_v33, %v3926_v59  ;;  %vm24571_vm2 = vmmov %vm24564_vm6 }
 0x2f4   : > { %v20219_v34 = vmax.f32 %v3836_v16, 0.0  ;;  %15962 = vmatprep.subr.bf16.mxu1 %v18373_v10  ;;  %v20224_v2 = vpack.c.bf16 %v3929_v5, %v3927_v61  ;;  %v3934_v54 = vrot.slane %v3867_v41, 7  ;;  %v4536_v49 = vrot.slane %v3867_v41, 1 }
 0x2f5   : > { %v3930_v63 = vrot.slane %v3865_v35, 7  ;;  %v4532_v29 = vrot.slane %v3865_v35, 1  ;;  %v3866_v22 = vmax.f32 %v3834_v50, 0.0  ;;  %v18375_v50 = vld [vmem:[%s23368_s3 + $0x18] sm:$0xff]  }
 0x2f6   : > { %v3936_v39 = vrot.slane %v20219_v34, 7  ;;  %v4538_v59 = vrot.slane %v20219_v34, 1  ;;  %v20229_v32 = vpack.c.bf16 %v20219_v34, %v3867_v41 }
 0x2f7   : > { %v3932_v33 = vrot.slane %v3866_v22, 7  ;;  %v4534_v53 = vrot.slane %v3866_v22, 1  ;;  %v15890_v60 = vpop.f32.mrb[8].mxu0  ;;  %v20231_v16 = vpack.c.bf16 %v3866_v22, %v3865_v35  ;;  %15963 = vmatpush3.bf16.msra.mxu1 %v18373_v10  ;;  %v3931_v5 = vsel %vm24562_vm0, %v3928_v14, %v3930_v63 }
 0x2f8   : > { %24568 = vst [vmem:[#allocation21_spill] sm:$0xff] %v20229_v32  ;;  %v3839_v20 = vadd.f32 %v15890_v60, %v20182_v38  ;;  %v3695_v61 = vpop.f32.mrb[9].mxu0  ;;  %15964 = vmatprep.subr.bf16.mxu1 %v18374_v36  ;;  %v3937_v46 = vsel %vm24570_vm15, %v3934_v54, %v3936_v39  ;;  %v4533_v41 = vsel %vm24564_vm6, %v4530_v4, %v4532_v29  ;;  %vm24573_vm15 = vmmov %vm24571_vm2 }
 0x2f9   : > { %24569 = vst [vmem:[#allocation26_spill] sm:$0xff] %v20231_v16  ;;  %v4539_v34 = vsel %vm24571_vm2, %v4536_v49, %v4538_v59  ;;  %v3837_v35 = vadd.f32 %v20182_v38, %v3695_v61  ;;  %v15891_v22 = vpop.f32.mrb[10].mxu0  ;;  %v3933_v10 = vsel %vm24572_vm11, %v3930_v63, %v3932_v33  ;;  %v3935_v14 = vsel %vm24562_vm0, %v3932_v33, %v3934_v54  ;;  %vm24574_vm6 = vmmov %vm24571_vm2  ;;  %v18376_v33 = vld [vmem:[%s23368_s3 + $0x20] sm:$0xff]  }
 0x2fa   : > { %v20244_v60 = vpack.c.bf16 %v4533_v41, %v4531_v25  ;;  %v3871_v58 = vmax.f32 %v3839_v20, 0.0  ;;  %v3840_v1 = vadd.f32 %v15891_v22, %v20182_v38  ;;  %15933 = vmatmul.mubr.bf16.gmra.mrb[4].mxu1 %v20231_v16  ;;  %v3698_v3 = vpop.f32.mrb[11].mxu0  ;;  %v20248_v27 = vpack.c.bf16 %v3933_v10, %v3931_v5  ;;  %vm24578_vm2 = vmmov %vm24562_vm0 }
 0x2fb   : > { %v20250_v4 = vpack.c.bf16 %v3937_v46, %v3935_v14  ;;  %v3869_v51 = vmax.f32 %v3837_v35, 0.0  ;;  %v3838_v61 = vadd.f32 %v20182_v38, %v3698_v3  ;;  %15936 = vmatprep.mubr.bf16.mxu1 %v20229_v32  ;;  %15965 = vmatpush3.bf16.msra.mxu1 %v18374_v36  ;;  %v4535_v54 = vsel %vm24573_vm15, %v4532_v29, %v4534_v53  ;;  %vm24579_vm11 = vmmov %vm24562_vm0 }
 0x2fc   : > { %v4537_v25 = vsel %vm24574_vm6, %v4534_v53, %v4536_v49  ;;  %v20256_v63 = vmax.f32 %v3840_v1, 0.0  ;;  %15966 = vmatprep.subr.bf16.mxu1 %v18375_v50  ;;  %v3942_v46 = vrot.slane %v3871_v58, 7  ;;  %v4544_v35 = vrot.slane %v3871_v58, 1  ;;  %vm24580_vm0 = vmmov %vm24574_vm6 }
 0x2fd   : > { %v20261_v5 = vpack.c.bf16 %v4537_v25, %v4535_v54  ;;  %v3938_v20 = vrot.slane %v3869_v51, 7  ;;  %v4540_v41 = vrot.slane %v3869_v51, 1  ;;  %v3870_v3 = vmax.f32 %v3838_v61, 0.0  ;;  %v18377_v61 = vld [vmem:[%s23368_s3 + $0x28] sm:$0xff]   ;;  %vm24581_vm15 = vmmov %vm24580_vm0 }
 0x2fe   : > { %v3944_v36 = vrot.slane %v20256_v63, 7  ;;  %v4546_v29 = vrot.slane %v20256_v63, 1  ;;  %v20266_v49 = vpack.c.bf16 %v20256_v63, %v3871_v58  ;;  %vm24582_vm6 = vmmov %vm24578_vm2 }
 0x2ff   : > { %24575 = vst [vmem:[#allocation28_spill] sm:$0xff] %v20261_v5  ;;  %v3940_v1 = vrot.slane %v3870_v3, 7  ;;  %v4542_v53 = vrot.slane %v3870_v3, 1  ;;  %v15894_v22 = vpop.f32.mrb[12].mxu0  ;;  %v20268_v10 = vpack.c.bf16 %v3870_v3, %v3869_v51  ;;  %15967 = vmatpush3.bf16.msra.mxu1 %v18375_v50  ;;  %v3939_v14 = vsel %vm24578_vm2, %v3936_v39, %v3938_v20 }
 0x300   : > { %24576 = vst [vmem:[#allocation9_spill] sm:$0xff] %v20266_v49  ;;  %v3843_v54 = vadd.f32 %v15894_v22, %v20182_v38  ;;  %v3711_v25 = vpop.f32.mrb[13].mxu0  ;;  %15968 = vmatprep.subr.bf16.mxu1 %v18376_v33  ;;  %v3945_v32 = vsel %vm24579_vm11, %v3942_v46, %v3944_v36  ;;  %v4541_v58 = vsel %vm24580_vm0, %v4538_v59, %v4540_v41  ;;  %vm24584_vm11 = vmmov %vm24580_vm0 }
 0x301   : > { %24577 = vst [vmem:[#allocation36_spill] sm:$0xff] %v20268_v10  ;;  %v4547_v63 = vsel %vm24581_vm15, %v4544_v35, %v4546_v29  ;;  %v3841_v51 = vadd.f32 %v20182_v38, %v3711_v25  ;;  %v15895_v3 = vpop.f32.mrb[14].mxu0  ;;  %v3941_v50 = vsel %vm24582_vm6, %v3938_v20, %v3940_v1  ;;  %v3943_v39 = vsel %vm24578_vm2, %v3940_v1, %v3942_v46  ;;  %v18378_v1 = vld [vmem:[%s23368_s3 + $0x30] sm:$0xff]   ;;  %vm24588_vm15 = vmmov %vm24578_vm2 }
 0x302   : > { %v20281_v22 = vpack.c.bf16 %v4541_v58, %v4539_v34  ;;  %v3875_v16 = vmax.f32 %v3843_v54, 0.0  ;;  %v3844_v56 = vadd.f32 %v15895_v3, %v20182_v38  ;;  %15937 = vmatmul.mubr.bf16.gmra.mrb[8].mxu1 %v20268_v10  ;;  %v3714_v9 = vpop.f32.mrb[15].mxu0  ;;  %v20285_v37 = vpack.c.bf16 %v3941_v50, %v3939_v14  ;;  %vm24589_vm6 = vmmov %vm24578_vm2 }
 0x303   : > { %v20287_v59 = vpack.c.bf16 %v3945_v32, %v3943_v39  ;;  %v3873_v57 = vmax.f32 %v3841_v51, 0.0  ;;  %v3842_v25 = vadd.f32 %v20182_v38, %v3714_v9  ;;  %15940 = vmatprep.mubr.bf16.mxu1 %v20266_v49  ;;  %15969 = vmatpush3.bf16.msra.mxu1 %v18376_v33  ;;  %v4543_v46 = vsel %vm24584_vm11, %v4540_v41, %v4542_v53  ;;  %vm24590_vm2 = vmmov %vm24580_vm0 }
 0x304   : > { %24583 = vst [vmem:[#allocation42_spill] sm:$0xff] %v20281_v22  ;;  %v4545_v34 = vsel %vm24580_vm0, %v4542_v53, %v4544_v35  ;;  %v20293_v20 = vmax.f32 %v3844_v56, 0.0  ;;  %15970 = vmatprep.subr.bf16.mxu1 %v18377_v61  ;;  %v3950_v32 = vrot.slane %v3875_v16, 7  ;;  %v4552_v51 = vrot.slane %v3875_v16, 1  ;;  %vm24591_vm11 = vmmov %vm24580_vm0 }
 0x305   : > { %v20298_v14 = vpack.c.bf16 %v4545_v34, %v4543_v46  ;;  %v3946_v54 = vrot.slane %v3873_v57, 7  ;;  %v4548_v58 = vrot.slane %v3873_v57, 1  ;;  %v3874_v9 = vmax.f32 %v3842_v25, 0.0  ;;  %v18379_v25 = vld [vmem:[%s23368_s3 + $0x38] sm:$0xff]   ;;  %vm24592_vm0 = vmmov %vm24589_vm6 }
 0x306   : > { %v3952_v33 = vrot.slane %v20293_v20, 7  ;;  %v4554_v41 = vrot.slane %v20293_v20, 1  ;;  %v20303_v35 = vpack.c.bf16 %v20293_v20, %v3875_v16  ;;  %vm24603_vm13 = vmmov %vm24592_vm0 }
 0x307   : > { %24585 = vst [vmem:[#allocation45_spill] sm:$0xff] %v20298_v14  ;;  %v3948_v56 = vrot.slane %v3874_v9, 7  ;;  %v4550_v53 = vrot.slane %v3874_v9, 1  ;;  %v15898_v3 = vpop.f32.mrb[16].mxu0  ;;  %v20305_v50 = vpack.c.bf16 %v3874_v9, %v3873_v57  ;;  %15971 = vmatpush3.bf16.msra.mxu1 %v18377_v61  ;;  %v3947_v39 = vsel %vm24588_vm15, %v3944_v36, %v3946_v54  ;;  %vm24593_vm15 = vmmov %vm24592_vm0 }
 0x308   : > { %24586 = vst [vmem:[#allocation43_spill] sm:$0xff] %v20303_v35  ;;  %v3847_v46 = vadd.f32 %v15898_v3, %v20182_v38  ;;  %v3727_v34 = vpop.f32.mrb[17].mxu0  ;;  %15972 = vmatprep.subr.bf16.mxu1 %v18378_v1  ;;  %v3953_v49 = vsel %vm24589_vm6, %v3950_v32, %v3952_v33  ;;  %v4549_v16 = vsel %vm24590_vm2, %v4546_v29, %v4548_v58  ;;  %vm24595_vm6 = vmmov %vm24590_vm2 }
 0x309   : > { %24587 = vst [vmem:[#allocation47_spill] sm:$0xff] %v20305_v50  ;;  %v4555_v20 = vsel %vm24591_vm11, %v4552_v51, %v4554_v41  ;;  %v3845_v57 = vadd.f32 %v20182_v38, %v3727_v34  ;;  %v15899_v9 = vpop.f32.mrb[18].mxu0  ;;  %v3949_v61 = vsel %vm24592_vm0, %v3946_v54, %v3948_v56  ;;  %v3951_v36 = vsel %vm24593_vm15, %v3948_v56, %v3950_v32  ;;  %v20333_v56 = vld [vmem:[%s23368_s3 + $0x80] sm:$0xff]   ;;  %vm24599_vm11 = vmmov %vm24592_vm0 }
 0x30a   : > { %v20318_v3 = vpack.c.bf16 %v4549_v16, %v4547_v63  ;;  %v3879_v10 = vmax.f32 %v3847_v46, 0.0  ;;  %v3848_v31 = vadd.f32 %v15899_v9, %v20182_v38  ;;  %15941 = vmatmul.mubr.bf16.gmra.mrb[12].mxu1 %v20305_v50  ;;  %v3730_v13 = vpop.f32.mrb[19].mxu0  ;;  %v20322_v14 = vpack.c.bf16 %v3949_v61, %v3947_v39  ;;  %vm24600_vm15 = vmmov %vm24590_vm2 }
 0x30b   : > { %v20324_v29 = vpack.c.bf16 %v3953_v49, %v3951_v36  ;;  %v3877_v62 = vmax.f32 %v3845_v57, 0.0  ;;  %v3846_v34 = vadd.f32 %v20182_v38, %v3730_v13  ;;  %15944 = vmatprep.mubr.bf16.mxu1 %v20303_v35  ;;  %15973 = vmatpush3.bf16.msra.mxu1 %v18378_v1  ;;  %v4551_v32 = vsel %vm24595_vm6, %v4548_v58, %v4550_v53  ;;  %vm24601_vm6 = vmmov %vm24590_vm2 }
 0x30c   : > { %24594 = vst [vmem:[#allocation54_spill] sm:$0xff] %v20318_v3  ;;  %v4553_v63 = vsel %vm24590_vm2, %v4550_v53, %v4552_v51  ;;  %v3880_v54 = vmax.f32 %v3848_v31, 0.0  ;;  %15974 = vmatprep.subr.bf16.mxu1 %v18379_v25  ;;  %v3958_v49 = vrot.slane %v3879_v10, 7  ;;  %v4560_v57 = vrot.slane %v3879_v10, 1  ;;  %vm24602_vm2 = vmmov %vm24592_vm0 }
 0x30d   : > { %v20335_v39 = vpack.c.bf16 %v4553_v63, %v4551_v32  ;;  %v3954_v46 = vrot.slane %v3877_v62, 7  ;;  %v4556_v16 = vrot.slane %v3877_v62, 1  ;;  %v3878_v13 = vmax.f32 %v3846_v34, 0.0 }
 0x30e   : > { %v3960_v9 = vrot.slane %v3880_v54, 7  ;;  %v4562_v1 = vrot.slane %v3880_v54, 1  ;;  %v20337_v61 = vpack.c.bf16 %v3880_v54, %v3879_v10 }
 0x30f   : > { %24596 = vst [vmem:[#allocation53_spill] sm:$0xff] %v20335_v39  ;;  %v3956_v58 = vrot.slane %v3878_v13, 7  ;;  %v4558_v51 = vrot.slane %v3878_v13, 1  ;;  %v15902_v31 = vpop.f32.mrb[20].mxu0  ;;  %v20339_v53 = vpack.c.bf16 %v3878_v13, %v3877_v62  ;;  %15975 = vmatpush3.bf16.msra.mxu1 %v18379_v25  ;;  %v3955_v36 = vsel %vm24599_vm11, %v3952_v33, %v3954_v46  ;;  %vm24605_vm11 = vmmov %vm24601_vm6 }
 0x310   : > { %24597 = vst [vmem:[#allocation59_spill] sm:$0xff] %v20337_v61  ;;  %v3851_v32 = vadd.f32 %v15902_v31, %v20182_v38  ;;  %v3743_v63 = vpop.f32.mrb[21].mxu0  ;;  %16008 = vmatprep.subr.bf16.mxu1 %v20333_v56  ;;  %v3961_v34 = vsel %vm24592_vm0, %v3958_v49, %v3960_v9  ;;  %v4557_v35 = vsel %vm24600_vm15, %v4554_v41, %v4556_v16  ;;  %vm24610_vm15 = vmmov %vm24592_vm0 }
 0x311   : > { %24598 = vst [vmem:[#allocation64_spill] sm:$0xff] %v20339_v53  ;;  %v4563_v10 = vsel %vm24601_vm6, %v4560_v57, %v4562_v1  ;;  %v3849_v54 = vadd.f32 %v20182_v38, %v3743_v63  ;;  %v15903_v50 = vpop.f32.mrb[22].mxu0  ;;  %v3957_v62 = vsel %vm24602_vm2, %v3954_v46, %v3956_v58  ;;  %v3959_v25 = vsel %vm24603_vm13, %v3956_v58, %v3958_v49  ;;  %vm24606_vm13 = vmmov %vm24601_vm6 }
 0x312   : > { %v20350_v13 = vpack.c.bf16 %v4557_v35, %v4555_v20  ;;  %v3883_v33 = vmax.f32 %v3851_v32, 0.0  ;;  %v3852_v31 = vadd.f32 %v15903_v50, %v20182_v38  ;;  %15945 = vmatmul.mubr.bf16.gmra.mrb[16].mxu1 %v20339_v53  ;;  %v3746_v39 = vpop.f32.mrb[23].mxu0  ;;  %v20354_v3 = vpack.c.bf16 %v3957_v62, %v3955_v36  ;;  %vm24611_vm2 = vmmov %vm24601_vm6 }
 0x313   : > { %v20356_v41 = vpack.c.bf16 %v3961_v34, %v3959_v25  ;;  %v3881_v23 = vmax.f32 %v3849_v54, 0.0  ;;  %v3850_v63 = vadd.f32 %v20182_v38, %v3746_v39  ;;  %15948 = vmatprep.mubr.bf16.mxu1 %v20337_v61  ;;  %v4559_v46 = vsel %vm24605_vm11, %v4556_v16, %v4558_v51  ;;  %vm24612_vm11 = vmmov %vm24592_vm0 }
 0x314   : > { %24604 = vst [vmem:[#allocation58_spill] sm:$0xff] %v20350_v13  ;;  %v4561_v35 = vsel %vm24606_vm13, %v4558_v51, %v4560_v57  ;;  %v3884_v20 = vmax.f32 %v3852_v31, 0.0  ;;  %v3966_v50 = vrot.slane %v3883_v33, 7  ;;  %v4568_v36 = vrot.slane %v3883_v33, 1  ;;  %vm24613_vm13 = vmmov %vm24592_vm0 }
 0x315   : > { %v20362_v49 = vpack.c.bf16 %v4561_v35, %v4559_v46  ;;  %v3962_v58 = vrot.slane %v3881_v23, 7  ;;  %v4564_v32 = vrot.slane %v3881_v23, 1  ;;  %v3882_v53 = vmax.f32 %v3850_v63, 0.0 }
 0x316   : > { %v3968_v62 = vrot.slane %v3884_v20, 7  ;;  %v4570_v34 = vrot.slane %v3884_v20, 1  ;;  %v20364_v25 = vpack.c.bf16 %v3884_v20, %v3883_v33 }
 0x317   : > { %24607 = vst [vmem:[#allocation61_spill] sm:$0xff] %v20362_v49  ;;  %v3964_v54 = vrot.slane %v3882_v53, 7  ;;  %v4566_v39 = vrot.slane %v3882_v53, 1  ;;  %v15906_v13 = vpop.f32.mrb[24].mxu0  ;;  %v20366_v61 = vpack.c.bf16 %v3882_v53, %v3881_v23  ;;  %v3963_v16 = vsel %vm24592_vm0, %v3960_v9, %v3962_v58  ;;  %vm24615_vm0 = vmmov %vm24611_vm2 }
 0x318   : > { %24608 = vst [vmem:[#allocation78_spill] sm:$0xff] %v20364_v25  ;;  %v3855_v57 = vadd.f32 %v15906_v13, %v20182_v38  ;;  %v3759_v51 = vpop.f32.mrb[25].mxu0  ;;  %v3969_v31 = vsel %vm24610_vm15, %v3966_v50, %v3968_v62  ;;  %v4565_v46 = vsel %vm24601_vm6, %v4562_v1, %v4564_v32  ;;  %v4571_v63 = vsel %vm24611_vm2, %v4568_v36, %v4570_v34  ;;  %vm24616_vm15 = vmmov %vm24615_vm0 }
 0x319   : > { %24609 = vst [vmem:[#allocation89_spill] sm:$0xff] %v20366_v61  ;;  %v3853_v35 = vadd.f32 %v20182_v38, %v3759_v51  ;;  %v15907_v33 = vpop.f32.mrb[26].mxu0  ;;  %v3965_v20 = vsel %vm24612_vm11, %v3962_v58, %v3964_v54  ;;  %v3967_v49 = vsel %vm24613_vm13, %v3964_v54, %v3966_v50  ;;  %v20376_v23 = vpack.c.bf16 %v4565_v46, %v4563_v10  ;;  %vm24618_vm6 = vmmov %vm24612_vm11 }
 0x31a   : > { %v3887_v53 = vmax.f32 %v3855_v57, 0.0  ;;  %v3856_v9 = vadd.f32 %v15907_v33, %v20182_v38  ;;  %15949 = vmatmul.mubr.bf16.gmra.mrb[20].mxu1 %v20366_v61  ;;  %v3762_v13 = vpop.f32.mrb[27].mxu0  ;;  %v20380_v22 = vpack.c.bf16 %v3965_v20, %v3963_v16  ;;  %v20382_v1 = vpack.c.bf16 %v3969_v31, %v3967_v49  ;;  %vm24619_vm2 = vmmov %vm24618_vm6 }
 0x31b   : > { %24614 = vst [vmem:[#allocation33_spill] sm:$0xff] %v20376_v23  ;;  %v3885_v5 = vmax.f32 %v3853_v35, 0.0  ;;  %v3854_v51 = vadd.f32 %v20182_v38, %v3762_v13  ;;  %15952 = vmatprep.mubr.bf16.mxu1 %v20364_v25  ;;  %v4567_v58 = vsel %vm24615_vm0, %v4564_v32, %v4566_v39  ;;  %v4569_v10 = vsel %vm24616_vm15, %v4566_v39, %v4568_v36  ;;  %vm24620_vm11 = vmmov %vm24615_vm0 }
 0x31c   : > { %v3888_v50 = vmax.f32 %v3856_v9, 0.0  ;;  %v20388_v54 = vpack.c.bf16 %v4569_v10, %v4567_v58  ;;  %v3974_v57 = vrot.slane %v3887_v53, 7  ;;  %v4576_v16 = vrot.slane %v3887_v53, 1  ;;  %vm24621_vm13 = vmmov %vm24615_vm0 }
 0x31d   : > { %v3970_v46 = vrot.slane %v3885_v5, 7  ;;  %v4572_v33 = vrot.slane %v3885_v5, 1  ;;  %v3886_v61 = vmax.f32 %v3854_v51, 0.0  ;;  %vm24622_vm0 = vmmov %vm24619_vm2 }
 0x31e   : > { %24617 = vst [vmem:[#allocation71_spill] sm:$0xff] %v20388_v54  ;;  %v3976_v20 = vrot.slane %v3888_v50, 7  ;;  %v4578_v49 = vrot.slane %v3888_v50, 1  ;;  %v20390_v31 = vpack.c.bf16 %v3888_v50, %v3887_v53  ;;  %vm24623_vm15 = vmmov %vm24622_vm0 }
 0x31f   : > { %v3972_v35 = vrot.slane %v3886_v61, 7  ;;  %v4574_v13 = vrot.slane %v3886_v61, 1  ;;  %v15910_v23 = vpop.f32.mrb[28].mxu0  ;;  %v20392_v25 = vpack.c.bf16 %v3886_v61, %v3885_v5  ;;  %v3971_v32 = vsel %vm24618_vm6, %v3968_v62, %v3970_v46  ;;  %vm24624_vm6 = vmmov %vm24620_vm11 }
 0x320   : > { %v3859_v36 = vadd.f32 %v15910_v23, %v20182_v38  ;;  %v3775_v39 = vpop.f32.mrb[29].mxu0  ;;  %v3977_v9 = vsel %vm24619_vm2, %v3974_v57, %v3976_v20  ;;  %v4573_v58 = vsel %vm24620_vm11, %v4570_v34, %v4572_v33  ;;  %v4579_v51 = vsel %vm24621_vm13, %v4576_v16, %v4578_v49  ;;  %vm24625_vm2 = vmmov %vm24624_vm6 }
 0x321   : > { %v3857_v10 = vadd.f32 %v20182_v38, %v3775_v39  ;;  %v15911_v53 = vpop.f32.mrb[30].mxu0  ;;  %v3973_v50 = vsel %vm24622_vm0, %v3970_v46, %v3972_v35  ;;  %v3975_v54 = vsel %vm24623_vm15, %v3972_v35, %v3974_v57  ;;  %v20402_v5 = vpack.c.bf16 %v4573_v58, %v4571_v63  ;;  %vm24628_vm11 = vmmov %vm24622_vm0 }
 0x322   : > { %v3891_v61 = vmax.f32 %v3859_v36, 0.0  ;;  %v3860_v62 = vadd.f32 %v15911_v53, %v20182_v38  ;;  %15953 = vmatmul.mubr.bf16.gmra.mrb[24].mxu1 %v20392_v25  ;;  %v3778_v23 = vpop.f32.mrb[31].mxu0  ;;  %v20406_v0 = vpack.c.bf16 %v3973_v50, %v3971_v32  ;;  %v20408_v34 = vpack.c.bf16 %v3977_v9, %v3975_v54  ;;  %vm24629_vm13 = vmmov %vm24625_vm2 }
 0x323   : > { %v3889_v42 = vmax.f32 %v3857_v10, 0.0  ;;  %v3858_v39 = vadd.f32 %v20182_v38, %v3778_v23  ;;  %15956 = vmatprep.mubr.bf16.mxu1 %v20390_v31  ;;  %v4575_v46 = vsel %vm24624_vm6, %v4572_v33, %v4574_v13  ;;  %v4577_v63 = vsel %vm24625_vm2, %v4574_v13, %v4576_v16  ;;  %vm24630_vm0 = vmmov %vm24625_vm2 }
 0x324   : > { %v20414_v57 = vmax.f32 %v3860_v62, 0.0  ;;  %v20416_v35 = vpack.c.bf16 %v4577_v63, %v4575_v46  ;;  %v4584_v36 = vrot.slane %v3891_v61, 1  ;;  %v4924_v50 = vrot.slane %v3891_v61, 7  ;;  %vm24631_vm15 = vmmov %vm24628_vm11 }
 0x325   : > { %v3978_v58 = vrot.slane %v3889_v42, 7  ;;  %v4580_v53 = vrot.slane %v3889_v42, 1  ;;  %v3890_v32 = vmax.f32 %v3858_v39, 0.0  ;;  %vm24632_vm6 = vmmov %vm24628_vm11 }
 0x326   : > { %24626 = vst [vmem:[#allocation41_spill] sm:$0xff] %v20414_v57  ;;  %v23662_v54 = vrot.slane %v20414_v57, 7  ;;  %v5495_v9 = vrot.slane %v20414_v57, 1  ;;  %v20421_v38 = vpack.c.bf16 %v20414_v57, %v3891_v61  ;;  %vm24633_vm2 = vmmov %vm24630_vm0  ;;  %v24752_v57 = vld [vmem:[#allocation33_spill] sm:$0xff] }
 0x327   : > { %v3980_v10 = vrot.slane %v3890_v32, 7  ;;  %v4582_v33 = vrot.slane %v3890_v32, 1  ;;  %v20423_v23 = vpack.c.bf16 %v3890_v32, %v3889_v42  ;;  %v3979_v16 = vsel %vm24628_vm11, %v3976_v20, %v3978_v58  ;;  %vm24634_vm8 = vmmov %vm24630_vm0 }
 0x328   : > { %24627 = vst [vmem:[#allocation51_spill] sm:$0xff] %v20421_v38  ;;  %v5499_v13 = vsel %vm24629_vm13, %v5495_v9, 0.0  ;;  %v4581_v62 = vsel %vm24630_vm0, %v4578_v49, %v4580_v53  ;;  %v4927_v39 = vsel %vm24631_vm15, %v4924_v50, %v23662_v54  ;;  %vm24635_vm11 = vmmov %vm24632_vm6 }
 0x329   : > { %v3981_v46 = vsel %vm24632_vm6, %v3978_v58, %v3980_v10  ;;  %v20432_v63 = vpack.c.bf16 %v4581_v62, %v4579_v51  ;;  %v4583_v61 = vsel %vm24633_vm2, %v4580_v53, %v4582_v33  ;;  %v4585_v38 = vsel %vm24634_vm8, %v4582_v33, %v4584_v36  ;;  %vm24636_vm13 = vmmov %vm24630_vm0  ;;  %v24639_v58 = vld [vmem:[#allocation12_spill] sm:$0xff]  ;;  %v18385_v33 = vld [vmem:[%s23368_s3 + $0xa8] sm:$0xff]  }
 0x32a   : > { %15957 = vmatmul.mubr.bf16.gmra.mrb[28].mxu1 %v20423_v23  ;;  %v20437_v42 = vpack.c.bf16 %v3981_v46, %v3979_v16  ;;  %v20439_v20 = vpack.c.bf16 %v4585_v38, %v4583_v61  ;;  %v4925_v49 = vsel %vm24635_vm11, %v3980_v10, %v4924_v50  ;;  %v5496_v32 = vsel %vm24636_vm13, %v4584_v36, %v5495_v9  ;;  %v18381_v36 = vld [vmem:[%s23368_s3 + $0x88] sm:$0xff]   ;;  %v18383_v38 = vld [vmem:[%s23368_s3 + $0x98] sm:$0xff]  }
 0x32b   : > { %15976 = vmatprep.mubr.bf16.mxu1 %v24521_v21  ;;  %v20444_v54 = vpack.c.bf16 %v4927_v39, %v4925_v49  ;;  %v20446_v51 = vpack.c.bf16 %v5499_v13, %v5496_v32  ;;  %vm18622_vm0 = vmmov 1   ;;  %vm24640_vm15 = vnez %v24639_v58  ;;  %v18387_v13 = vld [vmem:[%s23368_s3 + $0xb8] sm:$0xff]   ;;  %v24746_v21 = vld [vmem:[#allocation87_spill] sm:$0xff] }
 0x32c   : > { %vm20451_vm8 = vmpackc.low %vm18622_vm0, %vm24640_vm15  ;;  %v24641_v53 = vmov 0  ;;  %vm24644_vm6 = vnez %v24443_v43  ;;  %v24645_v50 = vmov 0  ;;  %v18382_v43 = vld [vmem:[%s23368_s3 + $0x90] sm:$0xff]   ;;  %vm24648_vm11 = vnez %v24450_v8  ;;  %v18384_v8 = vld [vmem:[%s23368_s3 + $0xa0] sm:$0xff]  }
 0x32d   : > { %24637 = vst [vmem:[#allocation2_spill] sm:$0xff] %v20444_v54  ;;  %24638 = vst [vmem:[#allocation14_spill] sm:$0xff] %v20446_v51  ;;  %v24642_v53 = vsel %vm20451_vm8, 4294967295, %v24641_v53  ;;  %v24649_v9 = vmov 0  ;;  %vm24652_vm15 = vnez %v24452_v45  ;;  %v24657_v45 = vmov 0 }
 0x32e   : > { %24643 = vst [vmem:[#allocation15_spill] sm:$0xff] %v24642_v53  ;;  %vm20458_vm2 = vmpackc.low %vm18622_vm0, %vm24644_vm6  ;;  %v24661_v10 = vmov 0  ;;  %v24669_v16 = vmov 0  ;;  %v24677_v62 = vmov 0  ;;  %v24702_v46 = vmov 0 }
 0x32f   : > { %v24646_v50 = vsel %vm20458_vm2, 4294967295, %v24645_v50  ;;  %vm20478_vm13 = vmpackc.low %vm18622_vm0, %vm24648_vm11  ;;  %vm24656_vm11 = vnez %v24329_v26  ;;  %v18386_v26 = vld [vmem:[%s23368_s3 + $0xb0] sm:$0xff]   ;;  %v24712_v49 = vmov 0  ;;  %v24716_v58 = vmov 0 }
 0x330   : > { %24647 = vst [vmem:[#allocation82_spill] sm:$0xff] %v24646_v50  ;;  %v24650_v9 = vsel %vm20478_vm13, 4294967295, %v24649_v9  ;;  %vm20485_vm6 = vmpackc.low %vm18622_vm0, %vm24652_vm15  ;;  %v24743_v32 = vmov 0  ;;  %v24760_v51 = vmov 0 }
 0x331   : > { %24651 = vst [vmem:[#allocation63_spill] sm:$0xff] %v24650_v9  ;;  %vm20504_vm15 = vmpackc.low %vm18622_vm0, %vm24656_vm11 }
 0x332   : > { %15977 = vmatmul.mubr.msk.bf16.vlgmr.msra.gmra.mrb[0].mxu1 %vm20451_vm8, %v20209_v6  ;;  %v24658_v45 = vsel %vm20504_vm15, 4294967295, %v24657_v45 }
 0x333   : > { %16009 = vmatpush3.bf16.msra.mxu1 %v20333_v56  ;;  %15980 = vmatprep.mubr.msk.bf16.mxu1 %vm20458_vm2, %v20224_v2  ;;  %v24653_v56 = vmov 0  ;;  %24659 = vst [vmem:[#allocation72_spill] sm:$0xff] %v24658_v45 }
 0x334   : > { %16010 = vmatprep.subr.bf16.mxu1 %v18381_v36  ;;  %v24654_v56 = vsel %vm20485_vm6, 4294967295, %v24653_v56 }
 0x335   : > { %24655 = vst [vmem:[#allocation67_spill] sm:$0xff] %v24654_v56 }
 0x337   : > { %16011 = vmatpush3.bf16.msra.mxu1 %v18381_v36  ;;  %v18391_v36 = vld [vmem:[%s23368_s3 + $0xd8] sm:$0xff]  }
 0x338   : > { %16012 = vmatprep.subr.bf16.mxu1 %v18382_v43 }
 0x33a   : > { %15981 = vmatmul.mubr.msk.bf16.gmra.mrb[4].mxu1 %vm20478_vm13, %v20248_v27  ;;  %vm24660_vm13 = vnez %v24331_v24  ;;  %v24665_v24 = vmov 0 }
 0x33b   : > { %15984 = vmatprep.mubr.msk.bf16.mxu1 %vm20485_vm6, %v20250_v4  ;;  %16013 = vmatpush3.bf16.msra.mxu1 %v18382_v43  ;;  %vm20511_vm2 = vmpackc.low %vm18622_vm0, %vm24660_vm13  ;;  %vm24664_vm13 = vnez %v24462_v47  ;;  %v18388_v47 = vld [vmem:[%s23368_s3 + $0xc0] sm:$0xff]   ;;  %v24719_v43 = vld [vmem:[#allocation28_spill] sm:$0xff] }
 0x33c   : > { %16014 = vmatprep.subr.bf16.mxu1 %v18383_v38  ;;  %v24662_v10 = vsel %vm20511_vm2, 4294967295, %v24661_v10  ;;  %vm20530_vm11 = vmpackc.low %vm18622_vm0, %vm24664_vm13 }
 0x33d   : > { %24663 = vst [vmem:[#allocation39_spill] sm:$0xff] %v24662_v10  ;;  %v24666_v24 = vsel %vm20530_vm11, 4294967295, %v24665_v24 }
 0x33e   : > { %24667 = vst [vmem:[#allocation40_spill] sm:$0xff] %v24666_v24 }
 0x33f   : > { %16015 = vmatpush3.bf16.msra.mxu1 %v18383_v38  ;;  %v24720_v38 = vld [vmem:[#allocation42_spill] sm:$0xff] }
 0x340   : > { %16016 = vmatprep.subr.bf16.mxu1 %v18384_v8 }
 0x342   : > { %15985 = vmatmul.mubr.msk.bf16.gmra.mrb[8].mxu1 %vm20504_vm15, %v20285_v37  ;;  %vm24668_vm15 = vnez %v24464_v11  ;;  %v24673_v11 = vmov 0 }
 0x343   : > { %15988 = vmatprep.mubr.msk.bf16.mxu1 %vm20511_vm2, %v20287_v59  ;;  %16017 = vmatpush3.bf16.msra.mxu1 %v18384_v8  ;;  %vm20537_vm6 = vmpackc.low %vm18622_vm0, %vm24668_vm15  ;;  %vm24672_vm15 = vnez %v24469_v44  ;;  %v24681_v44 = vmov 0  ;;  %v18392_v8 = vld [vmem:[%s23368_s3 + $0xe0] sm:$0xff]  }
 0x344   : > { %16018 = vmatprep.subr.bf16.mxu1 %v18385_v33  ;;  %v24670_v16 = vsel %vm20537_vm6, 4294967295, %v24669_v16  ;;  %vm20556_vm13 = vmpackc.low %vm18622_vm0, %vm24672_vm15  ;;  %vm24680_vm15 = vnez %v24477_v17  ;;  %v24689_v17 = vmov 0 }
 0x345   : > { %24671 = vst [vmem:[#allocation77_spill] sm:$0xff] %v24670_v16  ;;  %v24674_v11 = vsel %vm20556_vm13, 4294967295, %v24673_v11 }
 0x346   : > { %24675 = vst [vmem:[#allocation50_spill] sm:$0xff] %v24674_v11 }
 0x347   : > { %16019 = vmatpush3.bf16.msra.mxu1 %v18385_v33  ;;  %v24739_v33 = vld [vmem:[#allocation53_spill] sm:$0xff] }
 0x348   : > { %16020 = vmatprep.subr.bf16.mxu1 %v18386_v26 }
 0x34a   : > { %15989 = vmatmul.mubr.msk.bf16.gmra.mrb[12].mxu1 %vm20530_vm11, %v20322_v14  ;;  %vm24676_vm11 = vnez %v24471_v28  ;;  %v24685_v28 = vmov 0 }
 0x34b   : > { %15992 = vmatprep.mubr.msk.bf16.mxu1 %vm20537_vm6, %v20324_v29  ;;  %16021 = vmatpush3.bf16.msra.mxu1 %v18386_v26  ;;  %vm20563_vm2 = vmpackc.low %vm18622_vm0, %vm24676_vm11  ;;  %vm24684_vm11 = vnez %v24479_v40  ;;  %v24693_v40 = vmov 0  ;;  %v24722_v26 = vmov 0 }
 0x34c   : > { %16022 = vmatprep.subr.bf16.mxu1 %v18387_v13  ;;  %v24678_v62 = vsel %vm20563_vm2, 4294967295, %v24677_v62  ;;  %vm20576_vm6 = vmpackc.low %vm18622_vm0, %vm24680_vm15  ;;  %vm24688_vm15 = vnez %v24483_v7  ;;  %v24696_v7 = vrot.slane %v20187_v52, 1  ;;  %v18389_v52 = vld [vmem:[%s23368_s3 + $0xc8] sm:$0xff]  }
 0x34d   : > { %24679 = vst [vmem:[#allocation46_spill] sm:$0xff] %v24678_v62  ;;  %v24682_v44 = vsel %vm20576_vm6, 4294967295, %v24681_v44  ;;  %vm20583_vm8 = vmpackc.low %vm18622_vm0, %vm24684_vm11  ;;  %vm24692_vm11 = vnez %v24485_v18  ;;  %v24699_v18 = vmov 0 }
 0x34e   : > { %24683 = vst [vmem:[#allocation22_spill] sm:$0xff] %v24682_v44  ;;  %v24686_v28 = vsel %vm20583_vm8, 4294967295, %v24685_v28 }
 0x34f   : > { %16023 = vmatpush3.bf16.msra.mxu1 %v18387_v13  ;;  %24687 = vst [vmem:[#allocation60_spill] sm:$0xff] %v24686_v28  ;;  %v24740_v13 = vld [vmem:[#allocation58_spill] sm:$0xff] }
 0x350   : > { %16056 = vmatprep.subr.bf16.mxu1 %v18388_v47 }
 0x352   : > { %15993 = vmatmul.mubr.msk.bf16.gmra.mrb[16].mxu1 %vm20556_vm13, %v20354_v3  ;;  %vm20603_vm13 = vmpackc.low %vm18622_vm0, %vm24692_vm11 }
 0x353   : > { %15996 = vmatprep.mubr.msk.bf16.mxu1 %vm20563_vm2, %v20356_v41  ;;  %vm20596_vm2 = vmpackc.low %vm18622_vm0, %vm24688_vm15  ;;  %v24694_v40 = vsel %vm20603_vm13, 4294967295, %v24693_v40  ;;  %vm24697_vm15 = vcmask 1046528  }
 0x354   : > { %v24690_v17 = vsel %vm20596_vm2, 4294967295, %v24689_v17  ;;  %24695 = vst [vmem:[#allocation52_spill] sm:$0xff] %v24694_v40  ;;  %v4617_v39 = vsel %vm24697_vm15, 0.0, %v24696_v7  ;;  %vm20626_vm11 = vmpackc.low %vm24254_vm9, %vm18622_vm0  ;;  %v18393_v7 = vld [vmem:[%s23368_s3 + $0xe8] sm:$0xff]   ;;  %vm24747_vm15 = vnez %v24746_v21  ;;  %v24758_v21 = vld [vmem:[#allocation37_spill] sm:$0xff] }
 0x355   : > { %24691 = vst [vmem:[#allocation48_spill] sm:$0xff] %v24690_v17  ;;  %v24703_v46 = vsel %vm20626_vm11, 4294967295, %v24702_v46  ;;  %v13388_v61 = vpack.c.bf16 %v4617_v39, %v24492_v30  ;;  %vm20646_vm9 = vmpackc.low %vm24400_vm4, %vm18622_vm0  ;;  %v24729_v39 = vld [vmem:[#allocation45_spill] sm:$0xff]  ;;  %v24748_v30 = vmov 0  ;;  %v18406_v40 = vld [vmem:[%s23368_s3 + $0x150] sm:$0xff]  }
 0x356   : > { %24704 = vst [vmem:[#allocation66_spill] sm:$0xff] %v24703_v46  ;;  %v24709_v48 = vsel %vm20646_vm9, 4294967295, %v24708_v48  ;;  %vm20672_vm4 = vmpackc.low %vm24281_vm1, %vm18622_vm0 }
 0x357   : > { %24710 = vst [vmem:[#allocation69_spill] sm:$0xff] %v24709_v48  ;;  %v24717_v58 = vsel %vm20672_vm4, 4294967295, %v24716_v58  ;;  %vm20691_vm1 = vmpackc.low %vm24285_vm5, %vm18622_vm0 }
 0x358   : > { %24718 = vst [vmem:[#allocation88_spill] sm:$0xff] %v24717_v58  ;;  %v24723_v26 = vsel %vm20691_vm1, 4294967295, %v24722_v26  ;;  %vm20724_vm5 = vmpackc.low %vm24410_vm14, %vm18622_vm0 }
 0x359   : > { %24724 = vst [vmem:[#allocation68_spill] sm:$0xff] %v24723_v26 }
 0x35a   : > { %15997 = vmatmul.mubr.msk.bf16.gmra.mrb[20].mxu1 %vm20576_vm6, %v20380_v22 }
 0x35b   : > { %16000 = vmatprep.mubr.msk.bf16.mxu1 %vm20583_vm8, %v20382_v1  ;;  %vm24698_vm8 = vnez %v24490_v55  ;;  %v24705_v55 = vmov 0 }
 0x35c   : > { %vm20619_vm6 = vmpackc.low %vm18622_vm0, %vm24698_vm8 }
 0x35d   : > { %v24700_v18 = vsel %vm20619_vm6, 4294967295, %v24699_v18  ;;  %vm20639_vm8 = vmpackc.low %vm24266_vm7, %vm18622_vm0 }
 0x35e   : > { %24701 = vst [vmem:[#allocation86_spill] sm:$0xff] %v24700_v18  ;;  %v24706_v55 = vsel %vm20639_vm8, 4294967295, %v24705_v55  ;;  %vm20665_vm7 = vmpackc.low %vm24278_vm12, %vm18622_vm0  ;;  %v24799_v18 = vld [vmem:[#allocation21_spill] sm:$0xff] }
 0x35f   : > { %24707 = vst [vmem:[#allocation62_spill] sm:$0xff] %v24706_v55  ;;  %v24713_v49 = vsel %vm20665_vm7, 4294967295, %v24712_v49  ;;  %vm20698_vm12 = vmpackc.low %vm19384_vm10, %vm18622_vm0 }
 0x360   : > { %24714 = vst [vmem:[#allocation65_spill] sm:$0xff] %v24713_v49  ;;  %vm20717_vm10 = vmpackc.low %vm19388_vm3, %vm18622_vm0 }
 0x361   : > { %v24733_v15 = vsel %vm20717_vm10, 4294967295, %v24732_v15 }
 0x362   : > { %16001 = vmatmul.mubr.msk.bf16.gmra.mrb[24].mxu1 %vm20596_vm2, %v20406_v0  ;;  %24734 = vst [vmem:[#allocation32_spill] sm:$0xff] %v24733_v15 }
 0x363   : > { %16004 = vmatprep.mubr.msk.bf16.mxu1 %vm20603_vm13, %v20408_v34 }
 0x36a   : > { %16005 = vmatmul.mubr.msk.bf16.gmra.mrb[28].mxu1 %vm20619_vm6, %v20437_v42 }
 0x36b   : > { %16024 = vmatprep.mubr.msk.bf16.mxu1 %vm20626_vm11, %v13388_v61  ;;  %v24730_v61 = vld [vmem:[#allocation54_spill] sm:$0xff] }
 0x372   : > { %16025 = vmatmul.mubr.msk.bf16.vlgmr.msra.gmra.mrb[0].mxu1 %vm20639_vm8, %v20211_v19 }
 0x373   : > { %16057 = vmatpush3.bf16.msra.mxu1 %v18388_v47  ;;  %16028 = vmatprep.mubr.msk.bf16.mxu1 %vm20646_vm9, %v20244_v60  ;;  %v24726_v47 = vmov 0 }
 0x374   : > { %16058 = vmatprep.subr.bf16.mxu1 %v18389_v52  ;;  %v24727_v47 = vsel %vm20698_vm12, 4294967295, %v24726_v47 }
 0x375   : > { %24728 = vst [vmem:[#allocation70_spill] sm:$0xff] %v24727_v47 }
 0x377   : > { %16059 = vmatpush3.bf16.msra.mxu1 %v18389_v52  ;;  %v18394_v52 = vld [vmem:[%s23368_s3 + $0xf0] sm:$0xff]  }
 0x378   : > { %16060 = vmatprep.subr.bf16.mxu1 %v18390_v12 }
 0x37a   : > { %16029 = vmatmul.mubr.msk.bf16.gmra.mrb[4].mxu1 %vm20665_vm7, %v24719_v43 }
 0x37b   : > { %16032 = vmatprep.mubr.msk.bf16.mxu1 %vm20672_vm4, %v24720_v38  ;;  %16061 = vmatpush3.bf16.msra.mxu1 %v18390_v12  ;;  %v24741_v12 = vld [vmem:[#allocation27_spill] sm:$0xff] }
 0x37c   : > { %16062 = vmatprep.subr.bf16.mxu1 %v18391_v36  ;;  %vm24742_vm3 = vnez %v24741_v12  ;;  %v24753_v12 = vld [vmem:[#allocation38_spill] sm:$0xff] }
 0x37d   : > { %vm20743_vm14 = vmpackc.low %vm24742_vm3, %vm18622_vm0  ;;  %vm24754_vm3 = vnez %v24753_v12  ;;  %v24764_v12 = vld [vmem:[#allocation90_spill] sm:$0xff] }
 0x37e   : > { %v24744_v32 = vsel %vm20743_vm14, 4294967295, %v24743_v32 }
 0x37f   : > { %16063 = vmatpush3.bf16.msra.mxu1 %v18391_v36  ;;  %v24736_v36 = vmov 0  ;;  %24745 = vst [vmem:[#allocation73_spill] sm:$0xff] %v24744_v32  ;;  %v24763_v32 = vld [vmem:[#allocation71_spill] sm:$0xff] }
 0x380   : > { %16064 = vmatprep.subr.bf16.mxu1 %v18392_v8  ;;  %v24737_v36 = vsel %vm20724_vm5, 4294967295, %v24736_v36 }
 0x381   : > { %24738 = vst [vmem:[#allocation76_spill] sm:$0xff] %v24737_v36 }
 0x382   : > { %16033 = vmatmul.mubr.msk.bf16.gmra.mrb[8].mxu1 %vm20691_vm1, %v24729_v39 }
 0x383   : > { %16036 = vmatprep.mubr.msk.bf16.mxu1 %vm20698_vm12, %v24730_v61  ;;  %16065 = vmatpush3.bf16.msra.mxu1 %v18392_v8  ;;  %v18395_v8 = vld [vmem:[%s23368_s3 + $0xf8] sm:$0xff]  }
 0x384   : > { %16066 = vmatprep.subr.bf16.mxu1 %v18393_v7 }
 0x387   : > { %16067 = vmatpush3.bf16.msra.mxu1 %v18393_v7  ;;  %v18396_v7 = vld [vmem:[%s23368_s3 + $0x100] sm:$0xff]  }
 0x388   : > { %16068 = vmatprep.subr.bf16.mxu1 %v18394_v52 }
 0x38a   : > { %16037 = vmatmul.mubr.msk.bf16.gmra.mrb[12].mxu1 %vm20717_vm10, %v24739_v33  ;;  %vm20750_vm10 = vmpackc.low %vm24747_vm15, %vm18622_vm0  ;;  %vm24759_vm15 = vnez %v24758_v21  ;;  %v24769_v21 = vld [vmem:[#allocation44_spill] sm:$0xff] }
 0x38b   : > { %16040 = vmatprep.mubr.msk.bf16.mxu1 %vm20724_vm5, %v24740_v13  ;;  %16069 = vmatpush3.bf16.msra.mxu1 %v18394_v52  ;;  %v24749_v30 = vsel %vm20750_vm10, 4294967295, %v24748_v30  ;;  %v24751_v52 = vld [vmem:[#allocation61_spill] sm:$0xff]  ;;  %vm20763_vm5 = vmpackc.low %vm24754_vm3, %vm18622_vm0  ;;  %vm24765_vm3 = vnez %v24764_v12  ;;  %v24774_v12 = vld [vmem:[#allocation55_spill] sm:$0xff] }
 0x38c   : > { %16070 = vmatprep.subr.bf16.mxu1 %v18395_v8  ;;  %24750 = vst [vmem:[#allocation74_spill] sm:$0xff] %v24749_v30  ;;  %vm20770_vm12 = vmpackc.low %vm24759_vm15, %vm18622_vm0  ;;  %v24766_v30 = vmov 0  ;;  %vm24770_vm15 = vnez %v24769_v21  ;;  %v24779_v21 = vld [vmem:[#allocation4_spill] sm:$0xff] }
 0x38d   : > { %v24761_v51 = vsel %vm20770_vm12, 4294967295, %v24760_v51 }
 0x38e   : > { %24762 = vst [vmem:[#allocation30_spill] sm:$0xff] %v24761_v51  ;;  %v24776_v51 = vmov 0 }
 0x38f   : > { %16071 = vmatpush3.bf16.msra.mxu1 %v18395_v8  ;;  %v24755_v8 = vmov 0 }
 0x390   : > { %16104 = vmatprep.subr.bf16.mxu1 %v18396_v7  ;;  %v24756_v8 = vsel %vm20763_vm5, 4294967295, %v24755_v8 }
 0x391   : > { %24757 = vst [vmem:[#allocation75_spill] sm:$0xff] %v24756_v8  ;;  %v24781_v8 = vmov 0 }
 0x392   : > { %16041 = vmatmul.mubr.msk.bf16.gmra.mrb[16].mxu1 %vm20743_vm14, %v24751_v52  ;;  %vm20790_vm14 = vmpackc.low %vm24770_vm15, %vm18622_vm0  ;;  %vm24780_vm15 = vnez %v24779_v21  ;;  %v18398_v21 = vld [vmem:[%s23368_s3 + $0x110] sm:$0xff]  }
 0x393   : > { %16044 = vmatprep.mubr.msk.bf16.mxu1 %vm20750_vm10, %v24752_v57  ;;  %vm20783_vm10 = vmpackc.low %vm24765_vm3, %vm18622_vm0  ;;  %v24771_v57 = vmov 0  ;;  %vm24775_vm3 = vnez %v24774_v12  ;;  %v18397_v12 = vld [vmem:[%s23368_s3 + $0x108] sm:$0xff]   ;;  %v24815_v26 = vld [vmem:[#allocation74_spill] sm:$0xff] }
 0x394   : > { %v24767_v30 = vsel %vm20783_vm10, 4294967295, %v24766_v30  ;;  %v24772_v57 = vsel %vm20790_vm14, 4294967295, %v24771_v57 }
 0x395   : > { %24768 = vst [vmem:[#allocation79_spill] sm:$0xff] %v24767_v30  ;;  %24773 = vst [vmem:[#allocation3_spill] sm:$0xff] %v24772_v57 }
 0x39a   : > { %16045 = vmatmul.mubr.msk.bf16.gmra.mrb[20].mxu1 %vm20763_vm5, %v24763_v32  ;;  %vm20810_vm5 = vmpackc.low %vm18622_vm0, %vm24780_vm15  ;;  %vm24786_vm15 = vnez %v24650_v9 }
 0x39b   : > { %16048 = vmatprep.mubr.msk.bf16.mxu1 %vm20770_vm12, %v20402_v5  ;;  %vm20803_vm12 = vmpackc.low %vm24775_vm3, %vm18622_vm0  ;;  %v24782_v8 = vsel %vm20810_vm5, 4294967295, %v24781_v8  ;;  %vm24784_vm3 = vnez %v24642_v53  ;;  %vm24785_vm0 = vnez %v24646_v50 }
 0x39c   : > { %v24777_v51 = vsel %vm20803_vm12, 4294967295, %v24776_v51  ;;  %24783 = vst [vmem:[#allocation6_spill] sm:$0xff] %v24782_v8 }
 0x39d   : > { %24778 = vst [vmem:[#allocation5_spill] sm:$0xff] %v24777_v51  ;;  %v18422_v51 = vld [vmem:[%s23368_s3 + $0x1d0] sm:$0xff]  }
 0x3a2   : > { %16049 = vmatmul.mubr.msk.bf16.gmra.mrb[24].mxu1 %vm20783_vm10, %v20416_v35 }
 0x3a3   : > { %16052 = vmatprep.mubr.msk.bf16.mxu1 %vm20790_vm14, %v20432_v63 }
 0x3aa   : > { %16053 = vmatmul.mubr.msk.bf16.gmra.mrb[28].mxu1 %vm20803_vm12, %v20439_v20 }
 0x3ab   : > { %16072 = vmatprep.mubr.msk.bf16.mxu1 %vm20810_vm5, %v20209_v6  ;;  %v18399_v6 = vld [vmem:[%s23368_s3 + $0x118] sm:$0xff]   ;;  %vm24793_vm5 = vnez %v24678_v62 }
 0x3b2   : > { %16073 = vmatmul.mubr.msk.bf16.vlgmr.msra.gmra.mrb[0].mxu1 %vm24784_vm3, %v20224_v2  ;;  %vm24787_vm3 = vnez %v24654_v56 }
 0x3b3   : > { %16105 = vmatpush3.bf16.msra.mxu1 %v18396_v7  ;;  %16076 = vmatprep.mubr.msk.bf16.mxu1 %vm24785_vm0, %v20248_v27  ;;  %v18400_v7 = vld [vmem:[%s23368_s3 + $0x120] sm:$0xff]   ;;  %vm24788_vm0 = vnez %v24658_v45 }
 0x3b4   : > { %16106 = vmatprep.subr.bf16.mxu1 %v18397_v12 }
 0x3b7   : > { %16107 = vmatpush3.bf16.msra.mxu1 %v18397_v12  ;;  %v18401_v12 = vld [vmem:[%s23368_s3 + $0x128] sm:$0xff]  }
 0x3b8   : > { %16108 = vmatprep.subr.bf16.mxu1 %v18398_v21 }
 0x3ba   : > { %16077 = vmatmul.mubr.msk.bf16.gmra.mrb[4].mxu1 %vm24786_vm15, %v20250_v4  ;;  %vm24789_vm15 = vnez %v24662_v10 }
 0x3bb   : > { %16080 = vmatprep.mubr.msk.bf16.mxu1 %vm24787_vm3, %v20285_v37  ;;  %16109 = vmatpush3.bf16.msra.mxu1 %v18398_v21  ;;  %v18402_v21 = vld [vmem:[%s23368_s3 + $0x130] sm:$0xff]   ;;  %vm24790_vm3 = vnez %v24666_v24 }
 0x3bc   : > { %16110 = vmatprep.subr.bf16.mxu1 %v18399_v6 }
 0x3bf   : > { %16111 = vmatpush3.bf16.msra.mxu1 %v18399_v6  ;;  %v18403_v6 = vld [vmem:[%s23368_s3 + $0x138] sm:$0xff]  }
 0x3c0   : > { %16112 = vmatprep.subr.bf16.mxu1 %v18400_v7 }
 0x3c2   : > { %16081 = vmatmul.mubr.msk.bf16.gmra.mrb[8].mxu1 %vm24788_vm0, %v20287_v59  ;;  %vm24791_vm0 = vnez %v24670_v16 }
 0x3c3   : > { %16084 = vmatprep.mubr.msk.bf16.mxu1 %vm24789_vm15, %v20322_v14  ;;  %16113 = vmatpush3.bf16.msra.mxu1 %v18400_v7  ;;  %v18404_v7 = vld [vmem:[%s23368_s3 + $0x140] sm:$0xff]   ;;  %vm24792_vm15 = vnez %v24674_v11 }
 0x3c4   : > { %16114 = vmatprep.subr.bf16.mxu1 %v18401_v12 }
 0x3c7   : > { %16115 = vmatpush3.bf16.msra.mxu1 %v18401_v12  ;;  %v24796_v12 = vld [vmem:[#allocation19_spill] sm:$0xff] }
 0x3c8   : > { %16116 = vmatprep.subr.bf16.mxu1 %v18402_v21 }
 0x3ca   : > { %16085 = vmatmul.mubr.msk.bf16.gmra.mrb[12].mxu1 %vm24790_vm3, %v20324_v29  ;;  %vm24794_vm3 = vnez %v24682_v44 }
 0x3cb   : > { %16088 = vmatprep.mubr.msk.bf16.mxu1 %vm24791_vm0, %v20354_v3  ;;  %16117 = vmatpush3.bf16.msra.mxu1 %v18402_v21  ;;  %vm24795_vm0 = vnez %v24686_v28  ;;  %v18405_v21 = vld [vmem:[%s23368_s3 + $0x148] sm:$0xff]   ;;  %v24798_v28 = vld [vmem:[#allocation26_spill] sm:$0xff] }
 0x3cc   : > { %16118 = vmatprep.subr.bf16.mxu1 %v18403_v6 }
 0x3cf   : > { %16119 = vmatpush3.bf16.msra.mxu1 %v18403_v6  ;;  %v24797_v6 = vld [vmem:[#allocation13_spill] sm:$0xff] }
 0x3d0   : > { %16152 = vmatprep.subr.bf16.mxu1 %v18404_v7 }
 0x3d2   : > { %16089 = vmatmul.mubr.msk.bf16.gmra.mrb[16].mxu1 %vm24792_vm15, %v20356_v41 }
 0x3d3   : > { %16092 = vmatprep.mubr.msk.bf16.mxu1 %vm24793_vm5, %v20380_v22 }
 0x3da   : > { %16093 = vmatmul.mubr.msk.bf16.gmra.mrb[20].mxu1 %vm24794_vm3, %v20382_v1 }
 0x3db   : > { %16096 = vmatprep.mubr.msk.bf16.mxu1 %vm24795_vm0, %v20406_v0 }
 0x3e2   : > { %16097 = vmatmul.mubr.msk.bf16.gmra.mrb[24].mxu1 %vm20596_vm2, %v20408_v34 }
 0x3e3   : > { %16100 = vmatprep.mubr.msk.bf16.mxu1 %vm20603_vm13, %v20437_v42 }
 0x3ea   : > { %16101 = vmatmul.mubr.msk.bf16.gmra.mrb[28].mxu1 %vm20619_vm6, %v20444_v54  ;;  %v24800_v54 = vld [vmem:[#allocation36_spill] sm:$0xff] }
 0x3eb   : > { %16120 = vmatprep.mubr.bf16.mxu1 %v24796_v12  ;;  %v18407_v12 = vld [vmem:[%s23368_s3 + $0x158] sm:$0xff]  }
 0x3f2   : > { %16121 = vmatmul.mubr.bf16.vlgmr.msra.gmra.mrb[0].mxu1 %v24797_v6  ;;  %v24802_v6 = vld [vmem:[#allocation47_spill] sm:$0xff] }
 0x3f3   : > { %16153 = vmatpush3.bf16.msra.mxu1 %v18404_v7  ;;  %16124 = vmatprep.mubr.bf16.mxu1 %v24798_v28  ;;  %v18408_v7 = vld [vmem:[%s23368_s3 + $0x160] sm:$0xff]   ;;  %v24801_v28 = vld [vmem:[#allocation9_spill] sm:$0xff] }
 0x3f4   : > { %16154 = vmatprep.subr.bf16.mxu1 %v18405_v21 }
 0x3f7   : > { %16155 = vmatpush3.bf16.msra.mxu1 %v18405_v21  ;;  %v18409_v21 = vld [vmem:[%s23368_s3 + $0x168] sm:$0xff]  }
 0x3f8   : > { %16156 = vmatprep.subr.bf16.mxu1 %v18406_v40 }
 0x3fa   : > { %16125 = vmatmul.mubr.bf16.gmra.mrb[4].mxu1 %v24799_v18  ;;  %v24804_v18 = vld [vmem:[#allocation64_spill] sm:$0xff] }
 0x3fb   : > { %16128 = vmatprep.mubr.bf16.mxu1 %v24800_v54  ;;  %16157 = vmatpush3.bf16.msra.mxu1 %v18406_v40  ;;  %v18410_v40 = vld [vmem:[%s23368_s3 + $0x170] sm:$0xff]   ;;  %v24803_v54 = vld [vmem:[#allocation43_spill] sm:$0xff] }
 0x3fc   : > { %16158 = vmatprep.subr.bf16.mxu1 %v18407_v12 }
 0x3ff   : > { %16159 = vmatpush3.bf16.msra.mxu1 %v18407_v12  ;;  %v18411_v12 = vld [vmem:[%s23368_s3 + $0x178] sm:$0xff]  }
 0x400   : > { %16160 = vmatprep.subr.bf16.mxu1 %v18408_v7 }
 0x402   : > { %16129 = vmatmul.mubr.bf16.gmra.mrb[8].mxu1 %v24801_v28  ;;  %v24807_v28 = vld [vmem:[#allocation78_spill] sm:$0xff] }
 0x403   : > { %16132 = vmatprep.mubr.bf16.mxu1 %v24802_v6  ;;  %16161 = vmatpush3.bf16.msra.mxu1 %v18408_v7  ;;  %v18412_v7 = vld [vmem:[%s23368_s3 + $0x180] sm:$0xff]   ;;  %v24805_v6 = vld [vmem:[#allocation59_spill] sm:$0xff] }
 0x404   : > { %16162 = vmatprep.subr.bf16.mxu1 %v18409_v21 }
 0x407   : > { %16163 = vmatpush3.bf16.msra.mxu1 %v18409_v21  ;;  %v24806_v21 = vld [vmem:[#allocation89_spill] sm:$0xff] }
 0x408   : > { %16164 = vmatprep.subr.bf16.mxu1 %v18410_v40 }
 0x40a   : > { %16133 = vmatmul.mubr.bf16.gmra.mrb[12].mxu1 %v24803_v54 }
 0x40b   : > { %16136 = vmatprep.mubr.bf16.mxu1 %v24804_v18  ;;  %16165 = vmatpush3.bf16.msra.mxu1 %v18410_v40  ;;  %v24808_v40 = vld [vmem:[#allocation51_spill] sm:$0xff] }
 0x40c   : > { %16166 = vmatprep.subr.bf16.mxu1 %v18411_v12 }
 0x40f   : > { %16167 = vmatpush3.bf16.msra.mxu1 %v18411_v12  ;;  %v18413_v12 = vld [vmem:[%s23368_s3 + $0x188] sm:$0xff]  }
 0x410   : > { %16200 = vmatprep.subr.bf16.mxu1 %v18412_v7 }
 0x412   : > { %16137 = vmatmul.mubr.bf16.gmra.mrb[16].mxu1 %v24805_v6 }
 0x413   : > { %16140 = vmatprep.mubr.bf16.mxu1 %v24806_v21 }
 0x41a   : > { %16141 = vmatmul.mubr.bf16.gmra.mrb[20].mxu1 %v24807_v28 }
 0x41b   : > { %16144 = vmatprep.mubr.bf16.mxu1 %v20392_v25 }
 0x422   : > { %16145 = vmatmul.mubr.bf16.gmra.mrb[24].mxu1 %v20390_v31 }
 0x423   : > { %16148 = vmatprep.mubr.bf16.mxu1 %v20423_v23 }
 0x42a   : > { %16149 = vmatmul.mubr.bf16.gmra.mrb[28].mxu1 %v24808_v40  ;;  %v18414_v40 = vld [vmem:[%s23368_s3 + $0x190] sm:$0xff]  }
 0x42b   : > { %16168 = vmatprep.mubr.msk.bf16.mxu1 %vm20626_vm11, %v20211_v19  ;;  %v18415_v19 = vld [vmem:[%s23368_s3 + $0x198] sm:$0xff]  }
 0x432   : > { %16169 = vmatmul.mubr.msk.bf16.vlgmr.msra.gmra.mrb[0].mxu1 %vm20639_vm8, %v20244_v60 }
 0x433   : > { %16201 = vmatpush3.bf16.msra.mxu1 %v18412_v7  ;;  %16172 = vmatprep.mubr.msk.bf16.mxu1 %vm20646_vm9, %v24719_v43  ;;  %v18416_v7 = vld [vmem:[%s23368_s3 + $0x1a0] sm:$0xff]   ;;  %vm24816_vm9 = vnez %v24815_v26 }
 0x434   : > { %16202 = vmatprep.subr.bf16.mxu1 %v18413_v12 }
 0x437   : > { %16203 = vmatpush3.bf16.msra.mxu1 %v18413_v12  ;;  %v18417_v12 = vld [vmem:[%s23368_s3 + $0x1a8] sm:$0xff]  }
 0x438   : > { %16204 = vmatprep.subr.bf16.mxu1 %v18414_v40 }
 0x43a   : > { %16173 = vmatmul.mubr.msk.bf16.gmra.mrb[4].mxu1 %vm20665_vm7, %v24720_v38  ;;  %vm24809_vm7 = vnez %v24727_v47  ;;  %v24813_v47 = vld [vmem:[#allocation73_spill] sm:$0xff] }
 0x43b   : > { %16176 = vmatprep.mubr.msk.bf16.mxu1 %vm20672_vm4, %v24729_v39  ;;  %16205 = vmatpush3.bf16.msra.mxu1 %v18414_v40  ;;  %v18418_v40 = vld [vmem:[%s23368_s3 + $0x1b0] sm:$0xff]   ;;  %vm24810_vm4 = vnez %v24733_v15  ;;  %v24817_v15 = vld [vmem:[#allocation75_spill] sm:$0xff] }
 0x43c   : > { %16206 = vmatprep.subr.bf16.mxu1 %v18415_v19 }
 0x43f   : > { %16207 = vmatpush3.bf16.msra.mxu1 %v18415_v19  ;;  %v18419_v19 = vld [vmem:[%s23368_s3 + $0x1b8] sm:$0xff]  }
 0x440   : > { %16208 = vmatprep.subr.bf16.mxu1 %v18416_v7 }
 0x442   : > { %16177 = vmatmul.mubr.msk.bf16.gmra.mrb[8].mxu1 %vm20691_vm1, %v24730_v61  ;;  %vm24811_vm1 = vnez %v24737_v36 }
 0x443   : > { %16180 = vmatprep.mubr.msk.bf16.mxu1 %vm24809_vm7, %v24739_v33  ;;  %16209 = vmatpush3.bf16.msra.mxu1 %v18416_v7  ;;  %v18420_v7 = vld [vmem:[%s23368_s3 + $0x1c0] sm:$0xff]   ;;  %vm24814_vm7 = vnez %v24813_v47 }
 0x444   : > { %16210 = vmatprep.subr.bf16.mxu1 %v18417_v12 }
 0x447   : > { %16211 = vmatpush3.bf16.msra.mxu1 %v18417_v12  ;;  %v24812_v12 = vld [vmem:[#allocation33_spill] sm:$0xff] }
 0x448   : > { %16212 = vmatprep.subr.bf16.mxu1 %v18418_v40 }
 0x44a   : > { %16181 = vmatmul.mubr.msk.bf16.gmra.mrb[12].mxu1 %vm24810_vm4, %v24740_v13  ;;  %vm24818_vm4 = vnez %v24817_v15 }
 0x44b   : > { %16184 = vmatprep.mubr.msk.bf16.mxu1 %vm24811_vm1, %v24751_v52  ;;  %16213 = vmatpush3.bf16.msra.mxu1 %v18418_v40  ;;  %v24819_v40 = vld [vmem:[#allocation30_spill] sm:$0xff] }
 0x44c   : > { %16214 = vmatprep.subr.bf16.mxu1 %v18419_v19  ;;  %vm24820_vm1 = vnez %v24819_v40  ;;  %v18421_v40 = vld [vmem:[%s23368_s3 + $0x1c8] sm:$0xff]  }
 0x44f   : > { %16215 = vmatpush3.bf16.msra.mxu1 %v18419_v19  ;;  %v24821_v19 = vld [vmem:[#allocation14_spill] sm:$0xff] }
 0x450   : > { %16248 = vmatprep.subr.bf16.mxu1 %v18420_v7 }
 0x452   : > { %16185 = vmatmul.mubr.msk.bf16.gmra.mrb[16].mxu1 %vm24814_vm7, %v24812_v12 }
 0x453   : > { %16188 = vmatprep.mubr.msk.bf16.mxu1 %vm24816_vm9, %v24763_v32  ;;  %vm24822_vm9 = vnez %v24782_v8 }
 0x45a   : > { %16189 = vmatmul.mubr.msk.bf16.gmra.mrb[20].mxu1 %vm24818_vm4, %v20402_v5 }
 0x45b   : > { %16192 = vmatprep.mubr.msk.bf16.mxu1 %vm24820_vm1, %v20416_v35  ;;  %vm24823_vm1 = vnez %v24642_v53 }
 0x462   : > { %16193 = vmatmul.mubr.msk.bf16.gmra.mrb[24].mxu1 %vm20783_vm10, %v20432_v63 }
 0x463   : > { %16196 = vmatprep.mubr.msk.bf16.mxu1 %vm20790_vm14, %v20439_v20  ;;  %vm24824_vm14 = vnez %v24646_v50 }
 0x46a   : > { %16197 = vmatmul.mubr.msk.bf16.gmra.mrb[28].mxu1 %vm20803_vm12, %v24821_v19  ;;  %vm24826_vm12 = vnez %v24654_v56 }
 0x46b   : > { %16216 = vmatprep.mubr.msk.bf16.mxu1 %vm24822_vm9, %v20224_v2  ;;  %v18423_v2 = vld [vmem:[%s23368_s3 + $0x1d8] sm:$0xff]   ;;  %vm24825_vm9 = vnez %v24650_v9 }
 0x472   : > { %16217 = vmatmul.mubr.msk.bf16.vlgmr.msra.gmra.mrb[0].mxu1 %vm24823_vm1, %v20248_v27  ;;  %v18424_v27 = vld [vmem:[%s23368_s3 + $0x1e0] sm:$0xff]  }
 0x473   : > { %16249 = vmatpush3.bf16.msra.mxu1 %v18420_v7  ;;  %16220 = vmatprep.mubr.msk.bf16.mxu1 %vm24824_vm14, %v20250_v4  ;;  %v18425_v4 = vld [vmem:[%s23368_s3 + $0x1e8] sm:$0xff]   ;;  %vm24827_vm14 = vnez %v24658_v45  ;;  %v24837_v7 = vmov 0.0  }
 0x474   : > { %16250 = vmatprep.subr.bf16.mxu1 %v18421_v40 }
 0x477   : > { %16251 = vmatpush3.bf16.msra.mxu1 %v18421_v40 }
 0x478   : > { %16252 = vmatprep.subr.bf16.mxu1 %v18422_v51 }
 0x47a   : > { %16221 = vmatmul.mubr.msk.bf16.gmra.mrb[4].mxu1 %vm24825_vm9, %v20285_v37  ;;  %vm24828_vm9 = vnez %v24662_v10  ;;  %v18426_v37 = vld [vmem:[%s23368_s3 + $0x1f0] sm:$0xff]  }
 0x47b   : > { %16224 = vmatprep.mubr.msk.bf16.mxu1 %vm24826_vm12, %v20287_v59  ;;  %16253 = vmatpush3.bf16.msra.mxu1 %v18422_v51  ;;  %v18427_v59 = vld [vmem:[%s23368_s3 + $0x1f8] sm:$0xff]   ;;  %vm24829_vm12 = vnez %v24666_v24  ;;  %v25010_v24 = vld [vmem:[#allocation22_spill] sm:$0xff] }
 0x47c   : > { %16254 = vmatprep.subr.bf16.mxu1 %v18423_v2 }
 0x47f   : > { %16255 = vmatpush3.bf16.msra.mxu1 %v18423_v2  ;;  %v24838_v2 = vld [vmem:[#allocation86_spill] sm:$0xff] }
 0x480   : > { %16256 = vmatprep.subr.bf16.mxu1 %v18424_v27 }
 0x482   : > { %16225 = vmatmul.mubr.msk.bf16.gmra.mrb[8].mxu1 %vm24827_vm14, %v20322_v14  ;;  %vm24830_vm14 = vnez %v24670_v16  ;;  %v18428_v14 = vld [vmem:[%s23368_s3 + $0x200] sm:$0xff]  }
 0x483   : > { %16228 = vmatprep.mubr.msk.bf16.mxu1 %vm24828_vm9, %v20324_v29  ;;  %16257 = vmatpush3.bf16.msra.mxu1 %v18424_v27  ;;  %v24832_v29 = vld [vmem:[#allocation2_spill] sm:$0xff]  ;;  %v18438_v27 = vld [vmem:[%s23370_s5 + $0x50] sm:$0xff]  }
 0x484   : > { %16258 = vmatprep.subr.bf16.mxu1 %v18425_v4 }
 0x487   : > { %16259 = vmatpush3.bf16.msra.mxu1 %v18425_v4  ;;  %v18429_v4 = vld [vmem:[%s23368_s3 + $0x208] sm:$0xff]  }
 0x488   : > { %16260 = vmatprep.subr.bf16.mxu1 %v18426_v37 }
 0x48a   : > { %16229 = vmatmul.mubr.msk.bf16.gmra.mrb[12].mxu1 %vm24829_vm12, %v20354_v3 }
 0x48b   : > { %16232 = vmatprep.mubr.msk.bf16.mxu1 %vm24830_vm14, %v20356_v41  ;;  %16261 = vmatpush3.bf16.msra.mxu1 %v18426_v37  ;;  %v24833_v41 = vld [vmem:[#allocation52_spill] sm:$0xff]  ;;  %v24840_v37 = vld [vmem:[#allocation26_spill] sm:$0xff] }
 0x48c   : > { %16262 = vmatprep.subr.bf16.mxu1 %v18427_v59 }
 0x48f   : > { %16263 = vmatpush3.bf16.msra.mxu1 %v18427_v59  ;;  %v18439_v59 = vld [vmem:[%s23370_s5 + $0x58] sm:$0xff]  }
 0x490   : > { %16296 = vmatprep.subr.bf16.mxu1 %v18428_v14 }
 0x492   : > { %16233 = vmatmul.mubr.msk.bf16.gmra.mrb[16].mxu1 %vm24792_vm15, %v20380_v22  ;;  %v24834_v22 = vld [vmem:[#allocation41_spill] sm:$0xff]  ;;  %vm24836_vm15 = vcmask 1040384  }
 0x493   : > { %16236 = vmatprep.mubr.msk.bf16.mxu1 %vm24793_vm5, %v20382_v1  ;;  %v24835_v51 = vrot.slane %v24834_v22, 7  ;;  %v18430_v22 = vld [vmem:[%s23368_s3 + $0x210] sm:$0xff]  }
 0x495   : > { %v5807_v1 = vsel %vm24836_vm15, %v24835_v51, 0.0  ;;  %v18440_v51 = vld [vmem:[%s23370_s5 + $0x60] sm:$0xff]   ;;  %vm24847_vm15 = vnez %v24709_v48 }
 0x496   : > { %v13673_v40 = vpack.c.bf16 %v24837_v7, %v5807_v1  ;;  %v18431_v1 = vld [vmem:[%s23368_s3 + $0x218] sm:$0xff]  }
 0x49a   : > { %16237 = vmatmul.mubr.msk.bf16.gmra.mrb[20].mxu1 %vm24794_vm3, %v20406_v0  ;;  %v18436_v0 = vld [vmem:[%s23370_s5 + $0x40] sm:$0xff]  }
 0x49b   : > { %16240 = vmatprep.mubr.msk.bf16.mxu1 %vm24795_vm0, %v20408_v34  ;;  %v18437_v34 = vld [vmem:[%s23370_s5 + $0x48] sm:$0xff]   ;;  %16344 = vmatprep.subr.bf16.mxu0 %v18436_v0 }
 0x49c   : > { %16345 = vmatpush3.bf16.msra.mxu0 %v18436_v0  ;;  %v24843_v0 = vld [vmem:[#allocation9_spill] sm:$0xff] }
 0x49d   : > { %16346 = vmatprep.subr.bf16.mxu0 %v18437_v34 }
 0x4a0   : > { %16347 = vmatpush3.bf16.msra.mxu0 %v18437_v34  ;;  %v18432_v34 = vld [vmem:[%s23368_s3 + $0x220] sm:$0xff]  }
 0x4a1   : > { %16348 = vmatprep.subr.bf16.mxu0 %v18438_v27 }
 0x4a2   : > { %16241 = vmatmul.mubr.msk.bf16.gmra.mrb[24].mxu1 %vm20596_vm2, %v20437_v42  ;;  %v24839_v42 = vld [vmem:[#allocation13_spill] sm:$0xff] }
 0x4a3   : > { %16244 = vmatprep.mubr.msk.bf16.mxu1 %vm20603_vm13, %v24832_v29  ;;  %v24841_v29 = vld [vmem:[#allocation21_spill] sm:$0xff]  ;;  %vm24849_vm13 = vnez %v24717_v58 }
 0x4a4   : > { %16349 = vmatpush3.bf16.msra.mxu0 %v18438_v27  ;;  %v18433_v27 = vld [vmem:[%s23368_s3 + $0x228] sm:$0xff]  }
 0x4a5   : > { %16350 = vmatprep.subr.bf16.mxu0 %v18439_v59 }
 0x4a8   : > { %16351 = vmatpush3.bf16.msra.mxu0 %v18439_v59  ;;  %v18435_v59 = vld [vmem:[%s23368_s3 + $0x238] sm:$0xff]  }
 0x4a9   : > { %16352 = vmatprep.subr.bf16.mxu0 %v18440_v51 }
 0x4aa   : > { %16245 = vmatmul.mubr.msk.bf16.gmra.mrb[28].mxu1 %vm20619_vm6, %v13673_v40  ;;  %v18441_v40 = vld [vmem:[%s23370_s5 + $0x68] sm:$0xff]   ;;  %vm24848_vm6 = vnez %v24713_v49 }
 0x4ab   : > { %16264 = vmatprep.mubr.bf16.mxu1 %v24839_v42  ;;  %v18442_v42 = vld [vmem:[%s23370_s5 + $0x70] sm:$0xff]  }
 0x4ac   : > { %16353 = vmatpush3.bf16.msra.mxu0 %v18440_v51 }
 0x4ad   : > { %16354 = vmatprep.subr.bf16.mxu0 %v18441_v40 }
 0x4b0   : > { %16355 = vmatpush3.bf16.msra.mxu0 %v18441_v40 }
 0x4b1   : > { %16356 = vmatprep.subr.bf16.mxu0 %v18442_v42 }
 0x4b2   : > { %16265 = vmatmul.mubr.bf16.vlgmr.msra.gmra.mrb[0].mxu1 %v24840_v37  ;;  %v18434_v37 = vld [vmem:[%s23368_s3 + $0x230] sm:$0xff]  }
 0x4b3   : > { %16297 = vmatpush3.bf16.msra.mxu1 %v18428_v14  ;;  %16268 = vmatprep.mubr.bf16.mxu1 %v24841_v29  ;;  %v24842_v14 = vld [vmem:[#allocation36_spill] sm:$0xff]  ;;  %v24846_v29 = vmov 0.0|0.0  }
 0x4b4   : > { %16298 = vmatprep.subr.bf16.mxu1 %v18429_v4  ;;  %16357 = vmatpush3.bf16.msra.mxu0 %v18442_v42 }
 0x4b7   : > { %16299 = vmatpush3.bf16.msra.mxu1 %v18429_v4  ;;  %v24844_v4 = vld [vmem:[#allocation47_spill] sm:$0xff] }
 0x4b8   : > { %16300 = vmatprep.subr.bf16.mxu1 %v18430_v22 }
 0x4ba   : > { %16269 = vmatmul.mubr.bf16.gmra.mrb[4].mxu1 %v24842_v14 }
 0x4bb   : > { %16272 = vmatprep.mubr.bf16.mxu1 %v24843_v0  ;;  %16301 = vmatpush3.bf16.msra.mxu1 %v18430_v22 }
 0x4bc   : > { %16302 = vmatprep.subr.bf16.mxu1 %v18431_v1 }
 0x4bf   : > { %16303 = vmatpush3.bf16.msra.mxu1 %v18431_v1 }
 0x4c0   : > { %16304 = vmatprep.subr.bf16.mxu1 %v18432_v34 }
 0x4c2   : > { %16273 = vmatmul.mubr.bf16.gmra.mrb[8].mxu1 %v24844_v4 }
 0x4c3   : > { %16276 = vmatprep.mubr.bf16.mxu1 %v24803_v54  ;;  %16305 = vmatpush3.bf16.msra.mxu1 %v18432_v34  ;;  %v24845_v54 = vld [vmem:[#allocation51_spill] sm:$0xff] }
 0x4c4   : > { %16306 = vmatprep.subr.bf16.mxu1 %v18433_v27 }
 0x4c7   : > { %16307 = vmatpush3.bf16.msra.mxu1 %v18433_v27  ;;  %v18446_v27 = vld [vmem:[%s23370_s5 + $0x10] sm:$0xff]  }
 0x4c8   : > { %16308 = vmatprep.subr.bf16.mxu1 %v18434_v37 }
 0x4ca   : > { %16277 = vmatmul.mubr.bf16.gmra.mrb[12].mxu1 %v24804_v18 }
 0x4cb   : > { %16280 = vmatprep.mubr.bf16.mxu1 %v24805_v6  ;;  %16309 = vmatpush3.bf16.msra.mxu1 %v18434_v37 }
 0x4cc   : > { %16310 = vmatprep.subr.bf16.mxu1 %v18435_v59 }
 0x4cf   : > { %16311 = vmatpush3.bf16.msra.mxu1 %v18435_v59 }
 0x4d2   : > { %16281 = vmatmul.mubr.bf16.gmra.mrb[16].mxu1 %v24806_v21 }
 0x4d3   : > { %16284 = vmatprep.mubr.bf16.mxu1 %v24807_v28 }
 0x4da   : > { %16285 = vmatmul.mubr.bf16.gmra.mrb[20].mxu1 %v20392_v25  ;;  %v24850_v25 = vld [vmem:[#allocation68_spill] sm:$0xff] }
 0x4db   : > { %16288 = vmatprep.mubr.bf16.mxu1 %v20390_v31  ;;  %vm24851_vm2 = vnez %v24850_v25  ;;  %v24854_v31 = vld [vmem:[#allocation32_spill] sm:$0xff] }
 0x4e2   : > { %16289 = vmatmul.mubr.bf16.gmra.mrb[24].mxu1 %v20423_v23  ;;  %v24858_v23 = vld [vmem:[#allocation30_spill] sm:$0xff] }
 0x4e3   : > { %16292 = vmatprep.mubr.bf16.mxu1 %v24845_v54 }
 0x4ea   : > { %16293 = vmatmul.mubr.bf16.gmra.mrb[28].mxu1 %v24846_v29 }
 0x4eb   : > { %16312 = vmatprep.mubr.msk.bf16.mxu1 %vm20626_vm11, %v20244_v60  ;;  %v24852_v60 = vld [vmem:[#allocation70_spill] sm:$0xff] }
 0x4ec   : > { %vm24853_vm11 = vnez %v24852_v60 }
 0x4f2   : > { %16313 = vmatmul.mubr.msk.bf16.vlgmr.msra.gmra.mrb[0].mxu1 %vm20639_vm8, %v24719_v43  ;;  %vm24855_vm8 = vnez %v24854_v31 }
 0x4f3   : > { %16316 = vmatprep.mubr.msk.bf16.mxu1 %vm24847_vm15, %v24720_v38  ;;  %vm24856_vm15 = vnez %v24737_v36 }
 0x4fa   : > { %16317 = vmatmul.mubr.msk.bf16.gmra.mrb[4].mxu1 %vm24848_vm6, %v24729_v39 }
 0x4fb   : > { %16320 = vmatprep.mubr.msk.bf16.mxu1 %vm24849_vm13, %v24730_v61  ;;  %vm24857_vm13 = vnez %v24815_v26 }
 0x502   : > { %16321 = vmatmul.mubr.msk.bf16.gmra.mrb[8].mxu1 %vm24851_vm2, %v24739_v33 }
 0x503   : > { %16324 = vmatprep.mubr.msk.bf16.mxu1 %vm24853_vm11, %v24740_v13  ;;  %vm24859_vm11 = vnez %v24858_v23 }
 0x50a   : > { %16325 = vmatmul.mubr.msk.bf16.gmra.mrb[12].mxu1 %vm24855_vm8, %v24751_v52 }
 0x50b   : > { %16328 = vmatprep.mubr.msk.bf16.mxu1 %vm24856_vm15, %v24812_v12  ;;  %vm24860_vm15 = vnez %v24772_v57 }
 0x512   : > { %16329 = vmatmul.mubr.msk.bf16.gmra.mrb[16].mxu1 %vm24814_vm7, %v24763_v32 }
 0x513   : > { %16332 = vmatprep.mubr.msk.bf16.mxu1 %vm24857_vm13, %v20402_v5  ;;  %v18443_v5 = vld [vmem:[%s23370_s5 + $0x78] sm:$0xff]  }
 0x514   : > { %16358 = vmatprep.subr.bf16.mxu0 %v18443_v5 }
 0x515   : > { %16359 = vmatpush3.bf16.msra.mxu0 %v18443_v5 }
 0x51a   : > { %16333 = vmatmul.mubr.msk.bf16.gmra.mrb[20].mxu1 %vm24818_vm4, %v20416_v35  ;;  %v18444_v35 = vld [vmem:[%s23370_s5] sm:$0xff]  }
 0x51b   : > { %16336 = vmatprep.mubr.msk.bf16.mxu1 %vm24859_vm11, %v20432_v63  ;;  %16392 = vmatprep.subr.bf16.mxu0 %v18444_v35  ;;  %v21189_v63 = vld [vmem:[%s23369_s4] ss:$0 sm:$0xff] }
 0x522   : > { %16337 = vmatmul.mubr.msk.bf16.gmra.mrb[24].mxu1 %vm20783_vm10, %v20439_v20 }
 0x523   : > { %16340 = vmatprep.mubr.msk.bf16.mxu1 %vm24860_vm15, %v24821_v19  ;;  %v18445_v19 = vld [vmem:[%s23370_s5 + $0x8] sm:$0xff]   ;;  %vm24908_vm15 = vcmask 1040384  }
 0x524   : > { %vm24909_vm10 = vmmov %vm24908_vm15 }
 0x525   : > { %vm24910_vm11 = vmmov %vm24909_vm10 }
 0x526   : > { %vm24911_vm4 = vmmov %vm24909_vm10 }
 0x52a   : > { %16341 = vmatmul.mubr.bf16.gmra.mrb[28].mxu1 %v24846_v29 }
 0x5c5   : > { %v16314_v20 = vpop.f32.mrb[0].mxu1 }
 0x5c6   : > { %v6515_v28 = vpop.f32.mrb[1].mxu1  ;;  %v6683_v38 = vadd.f32 %v16314_v20, %v21189_v63  ;;  %v18447_v20 = vld [vmem:[%s23370_s5 + $0x18] sm:$0xff]  }
 0x5c7   : > { %v6681_v18 = vadd.f32 %v21189_v63, %v6515_v28  ;;  %v16315_v43 = vpop.f32.mrb[2].mxu1 }
 0x5c8   : > { %v6684_v39 = vadd.f32 %v16315_v43, %v21189_v63  ;;  %v6518_v61 = vpop.f32.mrb[3].mxu1  ;;  %v21201_v6 = vmax.f32 %v6683_v38, 0.0 }
 0x5c9   : > { %v6682_v33 = vadd.f32 %v21189_v63, %v6518_v61  ;;  %v21197_v32 = vmax.f32 %v6681_v18, 0.0 }
 0x5ca   : > { %v21195_v13 = vmax.f32 %v6684_v39, 0.0  ;;  %24864 = vst [vmem:[#allocation16_spill] sm:$0xff] %v21201_v6 }
 0x5cb   : > { %24862 = vst [vmem:[#allocation10_spill] sm:$0xff] %v21197_v32  ;;  %v21199_v52 = vmax.f32 %v6682_v33, 0.0  ;;  %v7377_v44 = vrot.slane %v21197_v32, 1 }
 0x5cc   : > { %24861 = vst [vmem:[#allocation8_spill] sm:$0xff] %v21195_v13  ;;  %v21212_v51 = vpack.c.bf16 %v21195_v13, %v21201_v6 }
 0x5cd   : > { %24863 = vst [vmem:[#allocation11_spill] sm:$0xff] %v21199_v52  ;;  %v21205_v21 = vpack.c.bf16 %v21199_v52, %v21197_v32  ;;  %v16318_v12 = vpop.f32.mrb[4].mxu1 }
 0x5ce   : > { %v6531_v22 = vpop.f32.mrb[5].mxu1  ;;  %24866 = vst [vmem:[#allocation23_spill] sm:$0xff] %v21212_v51  ;;  %v6687_v40 = vadd.f32 %v16318_v12, %v21189_v63 }
 0x5cf   : > { %24865 = vst [vmem:[#allocation18_spill] sm:$0xff] %v21205_v21  ;;  %v6685_v1 = vadd.f32 %v21189_v63, %v6531_v22  ;;  %v16319_v14 = vpop.f32.mrb[6].mxu1  ;;  %16361 = vmatmul.mubr.bf16.vlgmr.msra.gmra.mrb[32].mxu0 %v21205_v21 }
 0x5d0   : > { %v6688_v0 = vadd.f32 %v16319_v14, %v21189_v63  ;;  %16393 = vmatpush3.bf16.msra.mxu0 %v18444_v35  ;;  %v6534_v34 = vpop.f32.mrb[7].mxu1  ;;  %16364 = vmatprep.mubr.bf16.mxu0 %v21212_v51  ;;  %v21229_v54 = vmax.f32 %v6687_v40, 0.0  ;;  %v21307_v51 = vld [vmem:[%s23370_s5 + $0x80] sm:$0xff]  }
 0x5d1   : > { %v6686_v42 = vadd.f32 %v21189_v63, %v6534_v34  ;;  %16394 = vmatprep.subr.bf16.mxu0 %v18445_v19  ;;  %v21225_v37 = vmax.f32 %v6685_v1, 0.0 }
 0x5d2   : > { %v21223_v4 = vmax.f32 %v6688_v0, 0.0  ;;  %24870 = vst [vmem:[#allocation34_spill] sm:$0xff] %v21229_v54 }
 0x5d3   : > { %24868 = vst [vmem:[#allocation29_spill] sm:$0xff] %v21225_v37  ;;  %v21227_v59 = vmax.f32 %v6686_v42, 0.0  ;;  %v18449_v42 = vld [vmem:[%s23370_s5 + $0x28] sm:$0xff]  }
 0x5d4   : > { %24867 = vst [vmem:[#allocation24_spill] sm:$0xff] %v21223_v4  ;;  %16395 = vmatpush3.bf16.msra.mxu0 %v18445_v19  ;;  %v21240_v18 = vpack.c.bf16 %v21223_v4, %v21229_v54  ;;  %v18448_v19 = vld [vmem:[%s23370_s5 + $0x20] sm:$0xff]  }
 0x5d5   : > { %24869 = vst [vmem:[#allocation31_spill] sm:$0xff] %v21227_v59  ;;  %v16322_v5 = vpop.f32.mrb[8].mxu1  ;;  %v21233_v35 = vpack.c.bf16 %v21227_v59, %v21225_v37  ;;  %16396 = vmatprep.subr.bf16.mxu0 %v18446_v27  ;;  %v6784_v25 = vrot.slane %v21227_v59, 7 }
 0x5d6   : > { %v6547_v28 = vpop.f32.mrb[9].mxu1  ;;  %24872 = vst [vmem:[#allocation35_spill] sm:$0xff] %v21240_v18  ;;  %v6691_v39 = vadd.f32 %v16322_v5, %v21189_v63 }
 0x5d7   : > { %24871 = vst [vmem:[#allocation80_spill] sm:$0xff] %v21233_v35  ;;  %v6689_v43 = vadd.f32 %v21189_v63, %v6547_v28  ;;  %v16323_v38 = vpop.f32.mrb[10].mxu1  ;;  %16365 = vmatmul.mubr.bf16.gmra.mrb[36].mxu0 %v21233_v35 }
 0x5d8   : > { %v6692_v61 = vadd.f32 %v16323_v38, %v21189_v63  ;;  %v6550_v33 = vpop.f32.mrb[11].mxu1  ;;  %16368 = vmatprep.mubr.bf16.mxu0 %v21240_v18  ;;  %16397 = vmatpush3.bf16.msra.mxu0 %v18446_v27  ;;  %v21257_v40 = vmax.f32 %v6691_v39, 0.0 }
 0x5d9   : > { %v6690_v12 = vadd.f32 %v21189_v63, %v6550_v33  ;;  %16398 = vmatprep.subr.bf16.mxu0 %v18447_v20  ;;  %v21253_v1 = vmax.f32 %v6689_v43, 0.0  ;;  %v18450_v33 = vld [vmem:[%s23370_s5 + $0x30] sm:$0xff]  }
 0x5da   : > { %v21251_v22 = vmax.f32 %v6692_v61, 0.0  ;;  %24876 = vst [vmem:[#allocation81_spill] sm:$0xff] %v21257_v40 }
 0x5db   : > { %24874 = vst [vmem:[#allocation49_spill] sm:$0xff] %v21253_v1  ;;  %v21255_v14 = vmax.f32 %v6690_v12, 0.0 }
 0x5dc   : > { %24873 = vst [vmem:[#allocation7_spill] sm:$0xff] %v21251_v22  ;;  %16399 = vmatpush3.bf16.msra.mxu0 %v18447_v20  ;;  %v21268_v5 = vpack.c.bf16 %v21251_v22, %v21257_v40 }
 0x5dd   : > { %24875 = vst [vmem:[#allocation57_spill] sm:$0xff] %v21255_v14  ;;  %v16326_v0 = vpop.f32.mrb[12].mxu1  ;;  %v21261_v34 = vpack.c.bf16 %v21255_v14, %v21253_v1  ;;  %16400 = vmatprep.subr.bf16.mxu0 %v18448_v19  ;;  %v6792_v53 = vrot.slane %v21255_v14, 7 }
 0x5de   : > { %v6563_v27 = vpop.f32.mrb[13].mxu1  ;;  %24878 = vst [vmem:[#allocation12_spill] sm:$0xff] %v21268_v5  ;;  %v6695_v20 = vadd.f32 %v16326_v0, %v21189_v63 }
 0x5df   : > { %24877 = vst [vmem:[#allocation56_spill] sm:$0xff] %v21261_v34  ;;  %v6693_v28 = vadd.f32 %v21189_v63, %v6563_v27  ;;  %v16327_v43 = vpop.f32.mrb[14].mxu1  ;;  %16369 = vmatmul.mubr.bf16.gmra.mrb[40].mxu0 %v21261_v34 }
 0x5e0   : > { %v6696_v38 = vadd.f32 %v16327_v43, %v21189_v63  ;;  %v6566_v39 = vpop.f32.mrb[15].mxu1  ;;  %16372 = vmatprep.mubr.bf16.mxu0 %v21268_v5  ;;  %16401 = vmatpush3.bf16.msra.mxu0 %v18448_v19  ;;  %v21285_v0 = vmax.f32 %v6695_v20, 0.0 }
 0x5e1   : > { %v6694_v61 = vadd.f32 %v21189_v63, %v6566_v39  ;;  %16402 = vmatprep.subr.bf16.mxu0 %v18449_v42  ;;  %v21281_v27 = vmax.f32 %v6693_v28, 0.0  ;;  %v18451_v39 = vld [vmem:[%s23370_s5 + $0x38] sm:$0xff]  }
 0x5e2   : > { %v21279_v12 = vmax.f32 %v6696_v38, 0.0  ;;  %24882 = vst [vmem:[#allocation42_spill] sm:$0xff] %v21285_v0 }
 0x5e3   : > { %24880 = vst [vmem:[#allocation17_spill] sm:$0xff] %v21281_v27  ;;  %v21283_v34 = vmax.f32 %v6694_v61, 0.0 }
 0x5e4   : > { %24879 = vst [vmem:[#allocation83_spill] sm:$0xff] %v21279_v12  ;;  %16403 = vmatpush3.bf16.msra.mxu0 %v18449_v42  ;;  %v21296_v28 = vpack.c.bf16 %v21279_v12, %v21285_v0 }
 0x5e5   : > { %24881 = vst [vmem:[#allocation28_spill] sm:$0xff] %v21283_v34  ;;  %v16330_v43 = vpop.f32.mrb[16].mxu1  ;;  %v21289_v19 = vpack.c.bf16 %v21283_v34, %v21281_v27  ;;  %16404 = vmatprep.subr.bf16.mxu0 %v18450_v33 }
 0x5e6   : > { %v6579_v5 = vpop.f32.mrb[17].mxu1  ;;  %24884 = vst [vmem:[#allocation25_spill] sm:$0xff] %v21296_v28  ;;  %v6699_v42 = vadd.f32 %v16330_v43, %v21189_v63 }
 0x5e7   : > { %24883 = vst [vmem:[#allocation20_spill] sm:$0xff] %v21289_v19  ;;  %v6697_v38 = vadd.f32 %v21189_v63, %v6579_v5  ;;  %v16331_v20 = vpop.f32.mrb[18].mxu1  ;;  %16373 = vmatmul.mubr.bf16.gmra.mrb[44].mxu0 %v21289_v19 }
 0x5e8   : > { %v6700_v61 = vadd.f32 %v16331_v20, %v21189_v63  ;;  %v6582_v18 = vpop.f32.mrb[19].mxu1  ;;  %16376 = vmatprep.mubr.bf16.mxu0 %v21296_v28  ;;  %16405 = vmatpush3.bf16.msra.mxu0 %v18450_v33  ;;  %v21315_v43 = vmax.f32 %v6699_v42, 0.0 }
 0x5e9   : > { %v6698_v35 = vadd.f32 %v21189_v63, %v6582_v18  ;;  %16406 = vmatprep.subr.bf16.mxu0 %v18451_v39  ;;  %v21311_v21 = vmax.f32 %v6697_v38, 0.0 }
 0x5ea   : > { %v21309_v5 = vmax.f32 %v6700_v61, 0.0  ;;  %24888 = vst [vmem:[#allocation85_spill] sm:$0xff] %v21315_v43 }
 0x5eb   : > { %24886 = vst [vmem:[#allocation54_spill] sm:$0xff] %v21311_v21  ;;  %v21313_v19 = vmax.f32 %v6698_v35, 0.0 }
 0x5ec   : > { %24885 = vst [vmem:[#allocation45_spill] sm:$0xff] %v21309_v5  ;;  %16407 = vmatpush3.bf16.msra.mxu0 %v18451_v39  ;;  %v21324_v28 = vpack.c.bf16 %v21309_v5, %v21315_v43 }
 0x5ed   : > { %24887 = vst [vmem:[#allocation84_spill] sm:$0xff] %v21313_v19  ;;  %v16334_v20 = vpop.f32.mrb[20].mxu1  ;;  %v21319_v33 = vpack.c.bf16 %v21313_v19, %v21311_v21  ;;  %16440 = vmatprep.subr.bf16.mxu0 %v21307_v51 }
 0x5ee   : > { %v6595_v18 = vpop.f32.mrb[21].mxu1  ;;  %24890 = vst [vmem:[#allocation58_spill] sm:$0xff] %v21324_v28  ;;  %v6703_v35 = vadd.f32 %v16334_v20, %v21189_v63 }
 0x5ef   : > { %24889 = vst [vmem:[#allocation53_spill] sm:$0xff] %v21319_v33  ;;  %v6701_v38 = vadd.f32 %v21189_v63, %v6595_v18  ;;  %v16335_v61 = vpop.f32.mrb[22].mxu1  ;;  %16377 = vmatmul.mubr.bf16.gmra.mrb[48].mxu0 %v21319_v33 }
 0x5f0   : > { %v6704_v39 = vadd.f32 %v16335_v61, %v21189_v63  ;;  %v6598_v42 = vpop.f32.mrb[23].mxu1  ;;  %16380 = vmatprep.mubr.bf16.mxu0 %v21324_v28  ;;  %v21338_v15 = vmax.f32 %v6703_v35, 0.0 }
 0x5f1   : > { %v6702_v8 = vadd.f32 %v21189_v63, %v6598_v42  ;;  %v21334_v30 = vmax.f32 %v6701_v38, 0.0 }
 0x5f2   : > { %v21332_v57 = vmax.f32 %v6704_v39, 0.0  ;;  %24894 = vst [vmem:[#allocation38_spill] sm:$0xff] %v21338_v15 }
 0x5f3   : > { %24892 = vst [vmem:[#allocation87_spill] sm:$0xff] %v21334_v30  ;;  %v21336_v23 = vmax.f32 %v6702_v8, 0.0 }
 0x5f4   : > { %24891 = vst [vmem:[#allocation27_spill] sm:$0xff] %v21332_v57  ;;  %v21346_v61 = vpack.c.bf16 %v21332_v57, %v21338_v15  ;;  %v6820_v16 = vrot.slane %v21332_v57, 7 }
 0x5f5   : > { %24893 = vst [vmem:[#allocation61_spill] sm:$0xff] %v21336_v23  ;;  %v16338_v18 = vpop.f32.mrb[24].mxu1  ;;  %v21342_v33 = vpack.c.bf16 %v21336_v23, %v21334_v30 }
 0x5f6   : > { %v6611_v20 = vpop.f32.mrb[25].mxu1  ;;  %24896 = vst [vmem:[#allocation71_spill] sm:$0xff] %v21346_v61  ;;  %v6707_v8 = vadd.f32 %v16338_v18, %v21189_v63 }
 0x5f7   : > { %24895 = vst [vmem:[#allocation37_spill] sm:$0xff] %v21342_v33  ;;  %v6705_v42 = vadd.f32 %v21189_v63, %v6611_v20  ;;  %v16339_v39 = vpop.f32.mrb[26].mxu1  ;;  %16381 = vmatmul.mubr.bf16.gmra.mrb[52].mxu0 %v21342_v33 }
 0x5f8   : > { %v6708_v38 = vadd.f32 %v16339_v39, %v21189_v63  ;;  %v6614_v35 = vpop.f32.mrb[27].mxu1  ;;  %16384 = vmatprep.mubr.bf16.mxu0 %v21346_v61  ;;  %v21360_v31 = vmax.f32 %v6707_v8, 0.0 }
 0x5f9   : > { %v6706_v28 = vadd.f32 %v21189_v63, %v6614_v35  ;;  %v21356_v47 = vmax.f32 %v6705_v42, 0.0 }
 0x5fa   : > { %v21354_v26 = vmax.f32 %v6708_v38, 0.0  ;;  %24900 = vst [vmem:[#allocation4_spill] sm:$0xff] %v21360_v31 }
 0x5fb   : > { %24898 = vst [vmem:[#allocation44_spill] sm:$0xff] %v21356_v47  ;;  %v21358_v36 = vmax.f32 %v6706_v28, 0.0  ;;  %v6822_v62 = vrot.slane %v21356_v47, 7 }
 0x5fc   : > { %24897 = vst [vmem:[#allocation90_spill] sm:$0xff] %v21354_v26  ;;  %v21371_v35 = vpack.c.bf16 %v21354_v26, %v21360_v31 }
 0x5fd   : > { %24899 = vst [vmem:[#allocation55_spill] sm:$0xff] %v21358_v36  ;;  %v16342_v20 = vpop.f32.mrb[28].mxu1  ;;  %v21364_v33 = vpack.c.bf16 %v21358_v36, %v21356_v47 }
 0x5fe   : > { %v21367_v18 = vadd.f32 %v16342_v20, %v21189_v63  ;;  %v6627_v39 = vpop.f32.mrb[29].mxu1  ;;  %24903 = vst [vmem:[#allocation64_spill] sm:$0xff] %v21371_v35 }
 0x5ff   : > { %24901 = vst [vmem:[#allocation19_spill] sm:$0xff] %v21364_v33  ;;  %v6709_v42 = vadd.f32 %v21189_v63, %v6627_v39  ;;  %v16343_v38 = vpop.f32.mrb[30].mxu1  ;;  %16385 = vmatmul.mubr.bf16.gmra.mrb[56].mxu0 %v21364_v33  ;;  %v6776_v39 = vrot.slane %v21199_v52, 7  ;;  %v6780_v33 = vrot.slane %v21195_v13, 7 }
 0x600   : > { %24902 = vst [vmem:[#allocation43_spill] sm:$0xff] %v21367_v18  ;;  %v21376_v28 = vadd.f32 %v16343_v38, %v21189_v63  ;;  %v6630_v8 = vpop.f32.mrb[31].mxu1  ;;  %16388 = vmatprep.mubr.bf16.mxu0 %v21371_v35  ;;  %v6775_v38 = vrot.slane %v21197_v32, 7 }
 0x601   : > { %v6710_v61 = vadd.f32 %v21189_v63, %v6630_v8  ;;  %v21380_v20 = vmax.f32 %v6709_v42, 0.0  ;;  %v6778_v63 = vrot.slane %v21201_v6, 7 }
 0x602   : > { %24904 = vst [vmem:[#allocation59_spill] sm:$0xff] %v21376_v28  ;;  %v6777_v42 = vsel %vm24908_vm15, %v6775_v38, %v6776_v39  ;;  %v6864_v35 = vsel %vm24911_vm4, 0.0, %v6775_v38  ;;  %v18454_v38 = vld [vmem:[%s23370_s5 + $0x90] sm:$0xff]   ;;  %vm24916_vm15 = vmmov %vm24911_vm4 }
 0x603   : > { %24905 = vst [vmem:[#allocation89_spill] sm:$0xff] %v21380_v20  ;;  %v21382_v18 = vmax.f32 %v6710_v61, 0.0  ;;  %v6779_v61 = vsel %vm24909_vm10, %v6776_v39, %v6778_v63  ;;  %v6781_v8 = vsel %vm24910_vm11, %v6778_v63, %v6780_v33  ;;  %v21398_v28 = vpack.c.bf16 %v6777_v42, %v6864_v35  ;;  %vm24915_vm10 = vmmov %vm24911_vm4 }
 0x604   : > { %v21404_v58 = vpack.c.bf16 %v6781_v8, %v6779_v61  ;;  %v6782_v39 = vrot.slane %v21225_v37, 7  ;;  %vm24914_vm11 = vnez %v24646_v50  ;;  %v6786_v35 = vrot.slane %v21229_v54, 7  ;;  %v18455_v50 = vld [vmem:[%s23370_s5 + $0x98] sm:$0xff]  }
 0x605   : > { %24906 = vst [vmem:[#allocation78_spill] sm:$0xff] %v21382_v18  ;;  %v21386_v60 = vpack.c.bf16 %v21382_v18, %v21380_v20  ;;  %24912 = vst [vmem:[#allocation14_spill] sm:$0xff] %v21398_v28  ;;  %v6830_v3 = vrot.slane %v21380_v20, 7 }
 0x606   : > { %24913 = vst [vmem:[#allocation2_spill] sm:$0xff] %v21404_v58  ;;  %v6785_v63 = vsel %vm24911_vm4, %v6782_v39, %v6784_v25  ;;  %v6787_v42 = vsel %vm24915_vm10, %v6784_v25, %v6786_v35  ;;  %v6790_v25 = vrot.slane %v21253_v1, 7 }
 0x607   : > { %24907 = vst [vmem:[#allocation33_spill] sm:$0xff] %v21386_v60  ;;  %16389 = vmatmul.mubr.bf16.gmra.mrb[60].mxu0 %v21386_v60  ;;  %v18453_v60 = vld [vmem:[%s23370_s5 + $0x88] sm:$0xff]  }
 0x608   : > { %16408 = vmatprep.mubr.bf16.mxu0 %v24846_v29  ;;  %v6788_v29 = vrot.slane %v21223_v4, 7 }
 0x60a   : > { %v6789_v61 = vsel %vm24916_vm15, %v6786_v35, %v6788_v29  ;;  %vm24920_vm15 = vmmov %vm24915_vm10 }
 0x60f   : > { %16409 = vmatmul.mubr.msk.bf16.vlgmr.msra.gmra.mrb[32].mxu0 %vm24823_vm1, %v21398_v28  ;;  %vm24917_vm1 = vmmov %vm24911_vm4  ;;  %v6796_v28 = vrot.slane %v21251_v22, 7  ;;  %vm24918_vm4 = vnez %v24650_v9  ;;  %v6804_v9 = vrot.slane %v21279_v12, 7 }
 0x610   : > { %16441 = vmatpush3.bf16.msra.mxu0 %v21307_v51  ;;  %16412 = vmatprep.mubr.msk.bf16.mxu0 %vm24914_vm11, %v21404_v58  ;;  %v6783_v8 = vsel %vm24917_vm1, %v6780_v33, %v6782_v39  ;;  %v21429_v58 = vpack.c.bf16 %v6789_v61, %v6787_v42  ;;  %vm24919_vm1 = vnez %v24654_v56  ;;  %v18456_v33 = vld [vmem:[%s23370_s5 + $0xa0] sm:$0xff]   ;;  %v6793_v39 = vsel %vm24915_vm10, %v6790_v25, %v6792_v53  ;;  %vm24921_vm11 = vmmov %vm24915_vm10 }
 0x611   : > { %16442 = vmatprep.subr.bf16.mxu0 %v18453_v60  ;;  %v21423_v51 = vpack.c.bf16 %v6785_v63, %v6783_v8  ;;  %v6800_v8 = vrot.slane %v21283_v34, 7 }
 0x614   : > { %16443 = vmatpush3.bf16.msra.mxu0 %v18453_v60  ;;  %v6794_v60 = vrot.slane %v21257_v40, 7 }
 0x615   : > { %16444 = vmatprep.subr.bf16.mxu0 %v18454_v38 }
 0x616   : > { %v6795_v35 = vsel %vm24920_vm15, %v6792_v53, %v6794_v60  ;;  %v6797_v63 = vsel %vm24921_vm11, %v6794_v60, %v6796_v28  ;;  %v6798_v53 = vrot.slane %v21281_v27, 7 }
 0x617   : > { %16413 = vmatmul.mubr.msk.bf16.gmra.mrb[36].mxu0 %vm24918_vm4, %v21423_v51  ;;  %vm24922_vm4 = vmmov %vm24915_vm10  ;;  %v21453_v56 = vpack.c.bf16 %v6797_v63, %v6795_v35  ;;  %vm24923_vm10 = vnez %v24658_v45  ;;  %v6812_v45 = vrot.slane %v21309_v5, 7 }
 0x618   : > { %16416 = vmatprep.mubr.msk.bf16.mxu0 %vm24919_vm1, %v21429_v58  ;;  %16445 = vmatpush3.bf16.msra.mxu0 %v18454_v38  ;;  %v6791_v42 = vsel %vm24922_vm4, %v6788_v29, %v6790_v25  ;;  %v18457_v38 = vld [vmem:[%s23370_s5 + $0xa8] sm:$0xff]   ;;  %v18458_v29 = vld [vmem:[%s23370_s5 + $0xb0] sm:$0xff]   ;;  %vm24924_vm11 = vmmov %vm24922_vm4 }
 0x619   : > { %16446 = vmatprep.subr.bf16.mxu0 %v18455_v50  ;;  %v21447_v61 = vpack.c.bf16 %v6793_v39, %v6791_v42  ;;  %v6801_v25 = vsel %vm24924_vm11, %v6798_v53, %v6800_v8  ;;  %vm24925_vm15 = vmmov %vm24922_vm4  ;;  %v6808_v42 = vrot.slane %v21313_v19, 7 }
 0x61a   : > { %vm24928_vm11 = vmmov %vm24922_vm4 }
 0x61c   : > { %16447 = vmatpush3.bf16.msra.mxu0 %v18455_v50  ;;  %v6802_v50 = vrot.slane %v21285_v0, 7 }
 0x61d   : > { %16448 = vmatprep.subr.bf16.mxu0 %v18456_v33 }
 0x61e   : > { %v6803_v60 = vsel %vm24922_vm4, %v6800_v8, %v6802_v50  ;;  %v6805_v39 = vsel %vm24925_vm15, %v6802_v50, %v6804_v9  ;;  %v18460_v8 = vld [vmem:[%s23370_s5 + $0xc0] sm:$0xff]   ;;  %vm24929_vm15 = vmmov %vm24922_vm4 }
 0x61f   : > { %16417 = vmatmul.mubr.msk.bf16.gmra.mrb[40].mxu0 %vm24923_vm10, %v21447_v61  ;;  %vm24926_vm10 = vmmov %vm24922_vm4  ;;  %v21477_v10 = vpack.c.bf16 %v6805_v39, %v6803_v60 }
 0x620   : > { %16420 = vmatprep.mubr.msk.bf16.mxu0 %vm24828_vm9, %v21453_v56  ;;  %16449 = vmatpush3.bf16.msra.mxu0 %v18456_v33  ;;  %v6799_v35 = vsel %vm24926_vm10, %v6796_v28, %v6798_v53  ;;  %v18459_v33 = vld [vmem:[%s23370_s5 + $0xb8] sm:$0xff]   ;;  %v6806_v28 = vrot.slane %v21311_v21, 7  ;;  %vm24927_vm10 = vmmov %vm24922_vm4 }
 0x621   : > { %16450 = vmatprep.subr.bf16.mxu0 %v18457_v38  ;;  %v21471_v63 = vpack.c.bf16 %v6801_v25, %v6799_v35 }
 0x622   : > { %v6809_v53 = vsel %vm24927_vm10, %v6806_v28, %v6808_v42  ;;  %v6807_v60 = vsel %vm24929_vm15, %v6804_v9, %v6806_v28  ;;  %v6818_v9 = vrot.slane %v21338_v15, 7  ;;  %vm24932_vm10 = vmmov %vm24922_vm4 }
 0x623   : > { %v21495_v39 = vpack.c.bf16 %v6809_v53, %v6807_v60  ;;  %vm24934_vm15 = vmmov %vm24922_vm4 }
 0x624   : > { %16451 = vmatpush3.bf16.msra.mxu0 %v18457_v38  ;;  %v6810_v38 = vrot.slane %v21315_v43, 7 }
 0x625   : > { %16452 = vmatprep.subr.bf16.mxu0 %v18458_v29  ;;  %24930 = vst [vmem:[#allocation41_spill] sm:$0xff] %v21495_v39 }
 0x626   : > { %v6811_v50 = vsel %vm24928_vm11, %v6808_v42, %v6810_v38  ;;  %v6813_v25 = vsel %vm24922_vm4, %v6810_v38, %v6812_v45  ;;  %v6814_v42 = vrot.slane %v21334_v30, 7  ;;  %vm24933_vm11 = vmmov %vm24922_vm4  ;;  %v6821_v38 = vsel %vm24922_vm4, %v6818_v9, %v6820_v16 }
 0x627   : > { %16421 = vmatmul.mubr.msk.bf16.gmra.mrb[44].mxu0 %vm24829_vm12, %v21471_v63  ;;  %v21498_v35 = vpack.c.bf16 %v6813_v25, %v6811_v50  ;;  %v6824_v25 = vrot.slane %v21358_v36, 7 }
 0x628   : > { %16424 = vmatprep.mubr.msk.bf16.mxu0 %vm24830_vm14, %v21477_v10  ;;  %16453 = vmatpush3.bf16.msra.mxu0 %v18458_v29  ;;  %v6816_v29 = vrot.slane %v21336_v23, 7  ;;  %vm24931_vm14 = vnez %v24674_v11  ;;  %v6815_v53 = vsel %vm24934_vm15, %v6812_v45, %v6814_v42  ;;  %v6828_v11 = vrot.slane %v21354_v26, 7  ;;  %vm24937_vm15 = vmmov %vm24922_vm4 }
 0x629   : > { %16454 = vmatprep.subr.bf16.mxu0 %v18459_v33  ;;  %v6826_v45 = vrot.slane %v21360_v31, 7 }
 0x62a   : > { %v6819_v28 = vsel %vm24933_vm11, %v6816_v29, %v6818_v9  ;;  %vm24936_vm11 = vmmov %vm24922_vm4 }
 0x62b   : > { %v21516_v60 = vpack.c.bf16 %v6821_v38, %v6819_v28  ;;  %v6829_v9 = vsel %vm24922_vm4, %v6826_v45, %v6828_v11  ;;  %v23826_v38 = vrot.slane %v21382_v18, 7 }
 0x62c   : > { %16455 = vmatpush3.bf16.msra.mxu0 %v18459_v33  ;;  %v6817_v33 = vsel %vm24932_vm10, %v6814_v42, %v6816_v29  ;;  %vm24935_vm10 = vmmov %vm24922_vm4  ;;  %v6827_v42 = vsel %vm24936_vm11, %v6824_v25, %v6826_v45 }
 0x62d   : > { %16488 = vmatprep.subr.bf16.mxu0 %v18460_v8  ;;  %v21513_v50 = vpack.c.bf16 %v6817_v33, %v6815_v53  ;;  %v6825_v29 = vsel %vm24935_vm10, %v6822_v62, %v6824_v25  ;;  %v6823_v33 = vsel %vm24937_vm15, %v6820_v16, %v6822_v62  ;;  %v21534_v53 = vpack.c.bf16 %v6829_v9, %v6827_v42  ;;  %vm24941_vm11 = vmmov %vm24922_vm4 }
 0x62e   : > { %v21531_v28 = vpack.c.bf16 %v6825_v29, %v6823_v33  ;;  %vm24940_vm10 = vnez %v24833_v41  ;;  %v6833_v16 = vsel %vm24941_vm11, %v6830_v3, %v23826_v38  ;;  %vm24942_vm4 = vcmask 1046528   ;;  %vm24943_vm15 = vmmov %vm24941_vm11 }
 0x62f   : > { %16425 = vmatmul.mubr.msk.bf16.gmra.mrb[48].mxu0 %vm24931_vm14, %v21495_v39  ;;  %v7469_v62 = vsel %vm24942_vm4, 0.0, %v7377_v44  ;;  %v6831_v25 = vsel %vm24943_vm15, %v6828_v11, %v6830_v3  ;;  %v7378_v29 = vrot.slane %v21199_v52, 1  ;;  %v7384_v9 = vrot.slane %v21225_v37, 1  ;;  %vm24947_vm15 = vmmov %vm24942_vm4  ;;  %v18461_v37 = vld [vmem:[%s23370_s5 + $0xc8] sm:$0xff]  }
 0x630   : > { %16428 = vmatprep.mubr.msk.bf16.mxu0 %vm24793_vm5, %v21498_v35  ;;  %24938 = vst [vmem:[#allocation13_spill] sm:$0xff] %v21531_v28  ;;  %v21549_v45 = vpack.c.bf16 %v6833_v16, %v6831_v25  ;;  %v13871_v42 = vpack.c.bf16 %v7469_v62, %v24837_v7  ;;  %v7380_v33 = vrot.slane %v21201_v6, 1  ;;  %vm24946_vm11 = vnez %v24703_v46  ;;  %v25006_v6 = vld [vmem:[#allocation77_spill] sm:$0xff] }
 0x631   : > { %v7382_v38 = vrot.slane %v21195_v13, 1  ;;  %v7379_v11 = vsel %vm24942_vm4, %v7377_v44, %v7378_v29  ;;  %v7386_v52 = vrot.slane %v21227_v59, 1  ;;  %v7388_v44 = vrot.slane %v21229_v54, 1  ;;  %v25003_v54 = vld [vmem:[#allocation72_spill] sm:$0xff]  ;;  %v25005_v13 = vld [vmem:[#allocation39_spill] sm:$0xff] }
 0x632   : > { %24944 = vst [vmem:[#allocation26_spill] sm:$0xff] %v21549_v45  ;;  %v7381_v3 = vsel %vm24947_vm15, %v7378_v29, %v7380_v33  ;;  %v18462_v29 = vld [vmem:[%s23370_s5 + $0xd0] sm:$0xff]  }
 0x633   : > { %v21564_v62 = vpack.c.bf16 %v7381_v3, %v7379_v11 }
 0x637   : > { %16429 = vmatmul.mubr.msk.bf16.gmra.mrb[52].mxu0 %vm24794_vm3, %v21513_v50  ;;  %vm24949_vm3 = vmmov %vm24942_vm4 }
 0x638   : > { %16432 = vmatprep.mubr.msk.bf16.mxu0 %vm24795_vm0, %v21516_v60  ;;  %vm24939_vm0 = vnez %v24690_v17  ;;  %v7383_v25 = vsel %vm24949_vm3, %v7380_v33, %v7382_v38  ;;  %vm24951_vm3 = vnez %v24709_v48 }
 0x63f   : > { %16433 = vmatmul.mubr.msk.bf16.gmra.mrb[56].mxu0 %vm24939_vm0, %v21531_v28  ;;  %vm24945_vm0 = vnez %v24838_v2 }
 0x640   : > { %16436 = vmatprep.mubr.msk.bf16.mxu0 %vm24940_vm10, %v21534_v53  ;;  %vm24948_vm10 = vmmov %vm24942_vm4  ;;  %vm24950_vm4 = vnez %v24706_v55 }
 0x641   : > { %v7385_v16 = vsel %vm24948_vm10, %v7382_v38, %v7384_v9  ;;  %v7390_v38 = vrot.slane %v21223_v4, 1  ;;  %v7387_v33 = vsel %vm24948_vm10, %v7384_v9, %v7386_v52  ;;  %vm24952_vm15 = vmmov %vm24948_vm10  ;;  %v7400_v9 = vrot.slane %v21281_v27, 1  ;;  %v24985_v4 = vld [vmem:[#allocation79_spill] sm:$0xff] }
 0x642   : > { %v21571_v32 = vpack.c.bf16 %v7385_v16, %v7383_v25  ;;  %v7389_v11 = vsel %vm24952_vm15, %v7386_v52, %v7388_v44  ;;  %v18463_v25 = vld [vmem:[%s23370_s5 + $0xd8] sm:$0xff]   ;;  %v7396_v52 = vrot.slane %v21257_v40, 1 }
 0x643   : > { %v21588_v16 = vpack.c.bf16 %v7389_v11, %v7387_v33  ;;  %v24972_v40 = vld [vmem:[#allocation73_spill] sm:$0xff] }
 0x647   : > { %16437 = vmatmul.mubr.msk.bf16.gmra.mrb[60].mxu0 %vm24945_vm0, %v21549_v45 }
 0x648   : > { %16456 = vmatprep.mubr.msk.bf16.mxu0 %vm24946_vm11, %v13871_v42  ;;  %v7392_v42 = vrot.slane %v21253_v1, 1  ;;  %vm24953_vm11 = vmmov %vm24948_vm10  ;;  %v7394_v1 = vrot.slane %v21255_v14, 1  ;;  %v7402_v14 = vrot.slane %v21283_v34, 1 }
 0x64a   : > { %v7393_v3 = vsel %vm24953_vm11, %v7390_v38, %v7392_v42 }
 0x64f   : > { %16457 = vmatmul.mubr.msk.bf16.vlgmr.msra.gmra.mrb[32].mxu0 %vm24950_vm4, %v21564_v62  ;;  %vm24954_vm4 = vmmov %vm24948_vm10 }
 0x650   : > { %16489 = vmatpush3.bf16.msra.mxu0 %v18460_v8  ;;  %16460 = vmatprep.mubr.msk.bf16.mxu0 %vm24951_vm3, %v21571_v32  ;;  %v7391_v8 = vsel %vm24954_vm4, %v7388_v44, %v7390_v38  ;;  %v7398_v44 = vrot.slane %v21251_v22, 1  ;;  %v18464_v38 = vld [vmem:[%s23370_s5 + $0xe0] sm:$0xff]   ;;  %v7395_v33 = vsel %vm24954_vm4, %v7392_v42, %v7394_v1  ;;  %vm24957_vm10 = vmmov %vm24954_vm4  ;;  %v7408_v42 = vrot.slane %v21311_v21, 1 }
 0x651   : > { %16490 = vmatprep.subr.bf16.mxu0 %v18461_v37  ;;  %v21595_v59 = vpack.c.bf16 %v7393_v3, %v7391_v8  ;;  %v7397_v11 = vsel %vm24957_vm10, %v7394_v1, %v7396_v52  ;;  %vm24958_vm15 = vmmov %vm24954_vm4  ;;  %v24960_v1 = vld [vmem:[#allocation68_spill] sm:$0xff] }
 0x652   : > { %v7401_v3 = vsel %vm24958_vm15, %v7398_v44, %v7400_v9  ;;  %v21612_v8 = vpack.c.bf16 %v7397_v11, %v7395_v33  ;;  %v24961_v33 = vld [vmem:[#allocation70_spill] sm:$0xff]  ;;  %vm24963_vm10 = vmmov %vm24954_vm4 }
 0x653   : > { %vm24964_vm15 = vmmov %vm24954_vm4 }
 0x654   : > { %16491 = vmatpush3.bf16.msra.mxu0 %v18461_v37  ;;  %v24955_v37 = vld [vmem:[#allocation88_spill] sm:$0xff] }
 0x655   : > { %16492 = vmatprep.subr.bf16.mxu0 %v18462_v29  ;;  %vm24956_vm11 = vnez %v24955_v37 }
 0x657   : > { %16461 = vmatmul.mubr.msk.bf16.gmra.mrb[36].mxu0 %vm24848_vm6, %v21588_v16  ;;  %vm24959_vm6 = vmmov %vm24954_vm4 }
 0x658   : > { %16464 = vmatprep.mubr.msk.bf16.mxu0 %vm24956_vm11, %v21595_v59  ;;  %16493 = vmatpush3.bf16.msra.mxu0 %v18462_v29  ;;  %v7399_v27 = vsel %vm24959_vm6, %v7396_v52, %v7398_v44  ;;  %v18465_v29 = vld [vmem:[%s23370_s5 + $0xe8] sm:$0xff]   ;;  %vm24962_vm6 = vnez %v24961_v33  ;;  %v7406_v52 = vrot.slane %v21279_v12, 1  ;;  %v7403_v44 = vsel %vm24954_vm4, %v7400_v9, %v7402_v14 }
 0x659   : > { %16494 = vmatprep.subr.bf16.mxu0 %v18463_v25  ;;  %v21619_v22 = vpack.c.bf16 %v7401_v3, %v7399_v27  ;;  %v18466_v27 = vld [vmem:[%s23370_s5 + $0xf0] sm:$0xff]   ;;  %v7410_v12 = vrot.slane %v21313_v19, 1  ;;  %v7416_v9 = vrot.slane %v21334_v30, 1 }
 0x65a   : > { %v7409_v3 = vsel %vm24964_vm15, %v7406_v52, %v7408_v42  ;;  %vm24970_vm15 = vmmov %vm24954_vm4 }
 0x65c   : > { %16495 = vmatpush3.bf16.msra.mxu0 %v18463_v25  ;;  %v7404_v25 = vrot.slane %v21285_v0, 1 }
 0x65d   : > { %16496 = vmatprep.subr.bf16.mxu0 %v18464_v38 }
 0x65e   : > { %v7405_v11 = vsel %vm24963_vm10, %v7402_v14, %v7404_v25  ;;  %v24966_v14 = vld [vmem:[#allocation32_spill] sm:$0xff]  ;;  %vm24969_vm10 = vmmov %vm24954_vm4 }
 0x65f   : > { %16465 = vmatmul.mubr.msk.bf16.gmra.mrb[40].mxu0 %vm24851_vm2, %v21612_v8  ;;  %v21636_v21 = vpack.c.bf16 %v7405_v11, %v7403_v44  ;;  %vm24965_vm2 = vmmov %vm24954_vm4  ;;  %v24967_v44 = vld [vmem:[#allocation76_spill] sm:$0xff] }
 0x660   : > { %16468 = vmatprep.mubr.msk.bf16.mxu0 %vm24962_vm6, %v21619_v22  ;;  %16497 = vmatpush3.bf16.msra.mxu0 %v18464_v38  ;;  %v7407_v34 = vsel %vm24965_vm2, %v7404_v25, %v7406_v52  ;;  %v18467_v38 = vld [vmem:[%s23370_s5 + $0xf8] sm:$0xff]   ;;  %vm24968_vm2 = vnez %v24967_v44  ;;  %v7414_v25 = vrot.slane %v21309_v5, 1  ;;  %v7411_v52 = vsel %vm24954_vm4, %v7408_v42, %v7410_v12  ;;  %v24973_v42 = vld [vmem:[#allocation74_spill] sm:$0xff] }
 0x661   : > { %16498 = vmatprep.subr.bf16.mxu0 %v18465_v29  ;;  %v21643_v0 = vpack.c.bf16 %v7409_v3, %v7407_v34  ;;  %v18468_v34 = vld [vmem:[%s23370_s5 + $0x100] sm:$0xff]  }
 0x662   : > { %v7417_v3 = vsel %vm24970_vm15, %v7414_v25, %v7416_v9  ;;  %vm24976_vm15 = vmmov %vm24954_vm4 }
 0x664   : > { %16499 = vmatpush3.bf16.msra.mxu0 %v18465_v29  ;;  %v7412_v29 = vrot.slane %v21315_v43, 1  ;;  %v7424_v43 = vrot.slane %v21356_v47, 1 }
 0x665   : > { %16500 = vmatprep.subr.bf16.mxu0 %v18466_v27 }
 0x666   : > { %v7413_v11 = vsel %vm24969_vm10, %v7410_v12, %v7412_v29  ;;  %v7420_v12 = vrot.slane %v21338_v15, 1  ;;  %vm24975_vm10 = vmmov %vm24954_vm4  ;;  %v24977_v15 = vld [vmem:[#allocation75_spill] sm:$0xff] }
 0x667   : > { %16469 = vmatmul.mubr.msk.bf16.gmra.mrb[44].mxu0 %vm24855_vm8, %v21636_v21  ;;  %v21660_v30 = vpack.c.bf16 %v7413_v11, %v7411_v52  ;;  %vm24971_vm8 = vmmov %vm24954_vm4 }
 0x668   : > { %16472 = vmatprep.mubr.msk.bf16.mxu0 %vm24968_vm2, %v21643_v0  ;;  %16501 = vmatpush3.bf16.msra.mxu0 %v18466_v27  ;;  %v7415_v19 = vsel %vm24971_vm8, %v7412_v29, %v7414_v25  ;;  %v7418_v27 = vrot.slane %v21336_v23, 1  ;;  %vm24974_vm8 = vmmov %vm24954_vm4  ;;  %v7432_v23 = vrot.slane %v21380_v20, 1 }
 0x669   : > { %16502 = vmatprep.subr.bf16.mxu0 %v18467_v38  ;;  %v21664_v5 = vpack.c.bf16 %v7417_v3, %v7415_v19  ;;  %v7426_v3 = vrot.slane %v21358_v36, 1 }
 0x66a   : > { %v7419_v29 = vsel %vm24974_vm8, %v7416_v9, %v7418_v27  ;;  %v7421_v25 = vsel %vm24954_vm4, %v7418_v27, %v7420_v12  ;;  %v7428_v9 = vrot.slane %v21360_v31, 1  ;;  %v24979_v27 = vld [vmem:[#allocation30_spill] sm:$0xff]  ;;  %v7434_v31 = vrot.slane %v21382_v18, 1 }
 0x66b   : > { %v21678_v52 = vpack.c.bf16 %v7421_v25, %v7419_v29  ;;  %vm24980_vm8 = vnez %v24979_v27  ;;  %v7430_v29 = vrot.slane %v21354_v26, 1  ;;  %v24995_v26 = vld [vmem:[#allocation2_spill] sm:$0xff] }
 0x66c   : > { %16503 = vmatpush3.bf16.msra.mxu0 %v18467_v38  ;;  %v7422_v38 = vrot.slane %v21332_v57, 1 }
 0x66d   : > { %16536 = vmatprep.subr.bf16.mxu0 %v18468_v34 }
 0x66e   : > { %v7425_v19 = vsel %vm24975_vm10, %v7422_v38, %v7424_v43  ;;  %v7423_v11 = vsel %vm24976_vm15, %v7420_v12, %v7422_v38  ;;  %v7427_v12 = vsel %vm24954_vm4, %v7424_v43, %v7426_v3  ;;  %vm24981_vm10 = vmmov %vm24954_vm4 }
 0x66f   : > { %16473 = vmatmul.mubr.msk.bf16.gmra.mrb[48].mxu0 %vm24814_vm7, %v21660_v30  ;;  %v21682_v47 = vpack.c.bf16 %v7425_v19, %v7423_v11  ;;  %v7429_v38 = vsel %vm24981_vm10, %v7426_v3, %v7428_v9  ;;  %vm24982_vm15 = vmmov %vm24954_vm4  ;;  %v24983_v19 = vld [vmem:[#allocation43_spill] sm:$0xff] }
 0x670   : > { %16476 = vmatprep.mubr.msk.bf16.mxu0 %vm24857_vm13, %v21664_v5  ;;  %vm24978_vm13 = vnez %v24977_v15  ;;  %v7433_v25 = vsel %vm24982_vm15, %v7430_v29, %v7432_v23  ;;  %v21697_v11 = vmax.f32 %v24983_v19, 0.0  ;;  %v21699_v20 = vpack.c.bf16 %v7429_v38, %v7427_v12  ;;  %v24987_v3 = vld [vmem:[#allocation3_spill] sm:$0xff]  ;;  %vm24989_vm15 = vmmov %vm24981_vm10  ;;  %v24992_v12 = vld [vmem:[#allocation14_spill] sm:$0xff] }
 0x671   : > { %v7435_v19 = vsel %vm24981_vm10, %v7432_v23, %v7434_v31  ;;  %v24993_v38 = vld [vmem:[#allocation6_spill] sm:$0xff]  ;;  %v24996_v23 = vld [vmem:[#allocation15_spill] sm:$0xff] }
 0x672   : > { %v23858_v43 = vrot.slane %v21697_v11, 1  ;;  %vm24997_vm10 = vnez %v24996_v23  ;;  %v7776_v7 = vrot.slane %v21697_v11, 7  ;;  %v18576_v23 = vld [vmem:[%s23374_s9 + $0x1e0] sm:$0xff]  }
 0x677   : > { %16477 = vmatmul.mubr.msk.bf16.gmra.mrb[52].mxu0 %vm24978_vm13, %v21678_v52  ;;  %vm24984_vm13 = vmmov %vm24954_vm4  ;;  %vm24988_vm4 = vnez %v24987_v3  ;;  %v18493_v3 = vld [vmem:[%s23370_s5 + $0x1c8] sm:$0xff]  }
 0x678   : > { %16480 = vmatprep.mubr.msk.bf16.mxu0 %vm24980_vm8, %v21682_v47  ;;  %v7431_v36 = vsel %vm24984_vm13, %v7428_v9, %v7430_v29  ;;  %vm24986_vm8 = vnez %v24985_v4  ;;  %v7437_v9 = vsel %vm24989_vm15, %v7434_v31, %v23858_v43  ;;  %v24998_v31 = vld [vmem:[#allocation82_spill] sm:$0xff] }
 0x679   : > { %v21703_v57 = vpack.c.bf16 %v7433_v25, %v7431_v36  ;;  %v21716_v29 = vpack.c.bf16 %v7437_v9, %v7435_v19  ;;  %v24990_v36 = vld [vmem:[#allocation5_spill] sm:$0xff]  ;;  %v18469_v25 = vld [vmem:[%s23370_s5 + $0x108] sm:$0xff]   ;;  %vm24999_vm15 = vnez %v24998_v31  ;;  %v18470_v19 = vld [vmem:[%s23370_s5 + $0x110] sm:$0xff]  }
 0x67a   : > { %vm24991_vm13 = vnez %v24990_v36  ;;  %v18471_v9 = vld [vmem:[%s23370_s5 + $0x118] sm:$0xff]   ;;  %v18472_v43 = vld [vmem:[%s23370_s5 + $0x120] sm:$0xff]  }
 0x67f   : > { %16481 = vmatmul.mubr.msk.bf16.gmra.mrb[56].mxu0 %vm24986_vm8, %v21699_v20  ;;  %vm24994_vm8 = vnez %v24993_v38 }
 0x680   : > { %16484 = vmatprep.mubr.msk.bf16.mxu0 %vm24988_vm4, %v21703_v57 }
 0x687   : > { %16485 = vmatmul.mubr.msk.bf16.gmra.mrb[60].mxu0 %vm24991_vm13, %v21716_v29 }
 0x688   : > { %16504 = vmatprep.mubr.msk.bf16.mxu0 %vm24994_vm8, %v24992_v12  ;;  %v25000_v12 = vld [vmem:[#allocation63_spill] sm:$0xff] }
 0x689   : > { %vm25001_vm8 = vnez %v25000_v12 }
 0x68f   : > { %16505 = vmatmul.mubr.msk.bf16.vlgmr.msra.gmra.mrb[32].mxu0 %vm24997_vm10, %v24995_v26 }
 0x690   : > { %16537 = vmatpush3.bf16.msra.mxu0 %v18468_v34  ;;  %16508 = vmatprep.mubr.msk.bf16.mxu0 %vm24999_vm15, %v21423_v51  ;;  %v25002_v34 = vld [vmem:[#allocation67_spill] sm:$0xff]  ;;  %vm25004_vm15 = vnez %v25003_v54 }
 0x691   : > { %16538 = vmatprep.subr.bf16.mxu0 %v18469_v25 }
 0x694   : > { %16539 = vmatpush3.bf16.msra.mxu0 %v18469_v25  ;;  %v18473_v25 = vld [vmem:[%s23370_s5 + $0x128] sm:$0xff]  }
 0x695   : > { %16540 = vmatprep.subr.bf16.mxu0 %v18470_v19 }
 0x697   : > { %16509 = vmatmul.mubr.msk.bf16.gmra.mrb[36].mxu0 %vm25001_vm8, %v21429_v58 }
 0x698   : > { %16512 = vmatprep.mubr.msk.bf16.mxu0 %vm24919_vm1, %v21447_v61  ;;  %16541 = vmatpush3.bf16.msra.mxu0 %v18470_v19  ;;  %v18474_v19 = vld [vmem:[%s23370_s5 + $0x130] sm:$0xff]  }
 0x699   : > { %16542 = vmatprep.subr.bf16.mxu0 %v18471_v9 }
 0x69c   : > { %16543 = vmatpush3.bf16.msra.mxu0 %v18471_v9  ;;  %v18475_v9 = vld [vmem:[%s23370_s5 + $0x138] sm:$0xff]  }
 0x69d   : > { %16544 = vmatprep.subr.bf16.mxu0 %v18472_v43 }
 0x69f   : > { %16513 = vmatmul.mubr.msk.bf16.gmra.mrb[40].mxu0 %vm25004_vm15, %v21453_v56  ;;  %vm25007_vm15 = vnez %v25006_v6  ;;  %v25014_v6 = vld [vmem:[#allocation59_spill] sm:$0xff] }
 0x6a0   : > { %16516 = vmatprep.mubr.msk.bf16.mxu0 %vm24828_vm9, %v21471_v63  ;;  %16545 = vmatpush3.bf16.msra.mxu0 %v18472_v43  ;;  %v18476_v43 = vld [vmem:[%s23370_s5 + $0x140] sm:$0xff]  }
 0x6a1   : > { %16546 = vmatprep.subr.bf16.mxu0 %v18473_v25 }
 0x6a4   : > { %16547 = vmatpush3.bf16.msra.mxu0 %v18473_v25  ;;  %v25008_v25 = vld [vmem:[#allocation50_spill] sm:$0xff] }
 0x6a5   : > { %16548 = vmatprep.subr.bf16.mxu0 %v18474_v19 }
 0x6a7   : > { %16517 = vmatmul.mubr.msk.bf16.gmra.mrb[44].mxu0 %vm24829_vm12, %v21477_v10  ;;  %vm25011_vm12 = vnez %v25010_v24  ;;  %v25017_v24 = vrot.slane %v21382_v18, 7  ;;  %v25026_v18 = vld [vmem:[#allocation20_spill] sm:$0xff] }
 0x6a8   : > { %16520 = vmatprep.mubr.msk.bf16.mxu0 %vm25007_vm15, %v21495_v39  ;;  %16549 = vmatpush3.bf16.msra.mxu0 %v18474_v19  ;;  %v25012_v19 = vld [vmem:[#allocation60_spill] sm:$0xff]  ;;  %v21785_v39 = vmax.f32 %v25014_v6, 0.0 }
 0x6a9   : > { %16550 = vmatprep.subr.bf16.mxu0 %v18475_v9  ;;  %vm25013_vm15 = vnez %v25012_v19 }
 0x6ac   : > { %16551 = vmatpush3.bf16.msra.mxu0 %v18475_v9  ;;  %v23874_v9 = vrot.slane %v21785_v39, 7 }
 0x6ad   : > { %16584 = vmatprep.subr.bf16.mxu0 %v18476_v43 }
 0x6af   : > { %16521 = vmatmul.mubr.msk.bf16.gmra.mrb[48].mxu0 %vm24931_vm14, %v21498_v35  ;;  %vm25015_vm14 = vnez %v24690_v17  ;;  %v25020_v17 = vld [vmem:[#allocation18_spill] sm:$0xff] }
 0x6b0   : > { %16524 = vmatprep.mubr.msk.bf16.mxu0 %vm24793_vm5, %v21513_v50  ;;  %vm25016_vm5 = vnez %v24833_v41  ;;  %v18477_v41 = vld [vmem:[%s23370_s5 + $0x148] sm:$0xff]  }
 0x6b7   : > { %16525 = vmatmul.mubr.msk.bf16.gmra.mrb[52].mxu0 %vm25011_vm12, %v21516_v60  ;;  %vm25018_vm12 = vcmask 1040384  }
 0x6b8   : > { %16528 = vmatprep.mubr.msk.bf16.mxu0 %vm25013_vm15, %v21531_v28  ;;  %v7777_v19 = vsel %vm25018_vm12, %v25017_v24, %v7776_v7  ;;  %vm25019_vm15 = vmmov %vm25018_vm12  ;;  %v25022_v24 = vld [vmem:[#allocation80_spill] sm:$0xff]  ;;  %vm25036_vm12 = vnez %v24703_v46 }
 0x6b9   : > { %v7779_v6 = vsel %vm25019_vm15, %v7776_v7, %v23874_v9  ;;  %v18478_v7 = vld [vmem:[%s23370_s5 + $0x150] sm:$0xff]   ;;  %vm25037_vm15 = vnez %v24706_v55 }
 0x6ba   : > { %v21801_v28 = vpack.c.bf16 %v7779_v6, %v7777_v19  ;;  %v25023_v19 = vld [vmem:[#allocation35_spill] sm:$0xff]  ;;  %v25024_v6 = vld [vmem:[#allocation56_spill] sm:$0xff] }
 0x6bb   : > { %v25025_v9 = vld [vmem:[#allocation12_spill] sm:$0xff] }
 0x6bc   : > { %v25179_v55 = vld [vmem:[#allocation4_spill] sm:$0xff] }
 0x6bf   : > { %16529 = vmatmul.mubr.msk.bf16.gmra.mrb[56].mxu0 %vm25015_vm14, %v21534_v53 }
 0x6c0   : > { %16532 = vmatprep.mubr.msk.bf16.mxu0 %vm25016_vm5, %v21549_v45  ;;  %v25021_v45 = vld [vmem:[#allocation23_spill] sm:$0xff] }
 0x6c7   : > { %16533 = vmatmul.mubr.msk.bf16.gmra.mrb[60].mxu0 %vm24945_vm0, %v21801_v28 }
 0x6c8   : > { %16552 = vmatprep.mubr.bf16.mxu0 %v25020_v17  ;;  %v18479_v17 = vld [vmem:[%s23370_s5 + $0x158] sm:$0xff]  }
 0x6cf   : > { %16553 = vmatmul.mubr.bf16.vlgmr.msra.gmra.mrb[32].mxu0 %v25021_v45  ;;  %v25033_v45 = vld [vmem:[#allocation64_spill] sm:$0xff] }
 0x6d0   : > { %16585 = vmatpush3.bf16.msra.mxu0 %v18476_v43  ;;  %16556 = vmatprep.mubr.bf16.mxu0 %v25022_v24  ;;  %v18480_v43 = vld [vmem:[%s23370_s5 + $0x160] sm:$0xff]   ;;  %v25032_v24 = vld [vmem:[#allocation19_spill] sm:$0xff] }
 0x6d1   : > { %16586 = vmatprep.subr.bf16.mxu0 %v18477_v41 }
 0x6d4   : > { %16587 = vmatpush3.bf16.msra.mxu0 %v18477_v41  ;;  %v18481_v41 = vld [vmem:[%s23370_s5 + $0x168] sm:$0xff]  }
 0x6d5   : > { %16588 = vmatprep.subr.bf16.mxu0 %v18478_v7 }
 0x6d7   : > { %16557 = vmatmul.mubr.bf16.gmra.mrb[36].mxu0 %v25023_v19  ;;  %v25028_v19 = vld [vmem:[#allocation53_spill] sm:$0xff] }
 0x6d8   : > { %16560 = vmatprep.mubr.bf16.mxu0 %v25024_v6  ;;  %16589 = vmatpush3.bf16.msra.mxu0 %v18478_v7  ;;  %v18482_v7 = vld [vmem:[%s23370_s5 + $0x170] sm:$0xff]   ;;  %v25027_v6 = vld [vmem:[#allocation25_spill] sm:$0xff] }
 0x6d9   : > { %16590 = vmatprep.subr.bf16.mxu0 %v18479_v17 }
 0x6dc   : > { %16591 = vmatpush3.bf16.msra.mxu0 %v18479_v17  ;;  %v18483_v17 = vld [vmem:[%s23370_s5 + $0x178] sm:$0xff]  }
 0x6dd   : > { %16592 = vmatprep.subr.bf16.mxu0 %v18480_v43 }
 0x6df   : > { %16561 = vmatmul.mubr.bf16.gmra.mrb[40].mxu0 %v25025_v9  ;;  %v25031_v9 = vld [vmem:[#allocation71_spill] sm:$0xff] }
 0x6e0   : > { %16564 = vmatprep.mubr.bf16.mxu0 %v25026_v18  ;;  %16593 = vmatpush3.bf16.msra.mxu0 %v18480_v43  ;;  %v18484_v43 = vld [vmem:[%s23370_s5 + $0x180] sm:$0xff]  }
 0x6e1   : > { %16594 = vmatprep.subr.bf16.mxu0 %v18481_v41  ;;  %v25029_v18 = vld [vmem:[#allocation58_spill] sm:$0xff] }
 0x6e4   : > { %16595 = vmatpush3.bf16.msra.mxu0 %v18481_v41  ;;  %v25030_v41 = vld [vmem:[#allocation37_spill] sm:$0xff] }
 0x6e5   : > { %16596 = vmatprep.subr.bf16.mxu0 %v18482_v7 }
 0x6e7   : > { %16565 = vmatmul.mubr.bf16.gmra.mrb[44].mxu0 %v25027_v6  ;;  %v25034_v6 = vld [vmem:[#allocation33_spill] sm:$0xff] }
 0x6e8   : > { %16568 = vmatprep.mubr.bf16.mxu0 %v25028_v19  ;;  %16597 = vmatpush3.bf16.msra.mxu0 %v18482_v7  ;;  %v21847_v7 = vpack.c.bf16 %v21785_v39, %v21697_v11 }
 0x6e9   : > { %16598 = vmatprep.subr.bf16.mxu0 %v18483_v17 }
 0x6ea   : > { %25035 = vst [vmem:[#allocation21_spill] sm:$0xff] %v21847_v7 }
 0x6ec   : > { %16599 = vmatpush3.bf16.msra.mxu0 %v18483_v17  ;;  %v18485_v17 = vld [vmem:[%s23370_s5 + $0x188] sm:$0xff]  }
 0x6ed   : > { %16632 = vmatprep.subr.bf16.mxu0 %v18484_v43 }
 0x6ef   : > { %16569 = vmatmul.mubr.bf16.gmra.mrb[48].mxu0 %v25029_v18 }
 0x6f0   : > { %16572 = vmatprep.mubr.bf16.mxu0 %v25030_v41 }
 0x6f7   : > { %16573 = vmatmul.mubr.bf16.gmra.mrb[52].mxu0 %v25031_v9 }
 0x6f8   : > { %16576 = vmatprep.mubr.bf16.mxu0 %v25032_v24 }
 0x6ff   : > { %16577 = vmatmul.mubr.bf16.gmra.mrb[56].mxu0 %v25033_v45 }
 0x700   : > { %16580 = vmatprep.mubr.bf16.mxu0 %v25034_v6 }
 0x707   : > { %16581 = vmatmul.mubr.bf16.gmra.mrb[60].mxu0 %v21847_v7  ;;  %v18486_v7 = vld [vmem:[%s23370_s5 + $0x190] sm:$0xff]  }
 0x708   : > { %16600 = vmatprep.mubr.msk.bf16.mxu0 %vm25036_vm12, %v21564_v62  ;;  %v18487_v62 = vld [vmem:[%s23370_s5 + $0x198] sm:$0xff]   ;;  %vm25038_vm12 = vnez %v24713_v49 }
 0x70f   : > { %16601 = vmatmul.mubr.msk.bf16.vlgmr.msra.gmra.mrb[32].mxu0 %vm25037_vm15, %v21571_v32 }
 0x710   : > { %16633 = vmatpush3.bf16.msra.mxu0 %v18484_v43  ;;  %16604 = vmatprep.mubr.msk.bf16.mxu0 %vm24951_vm3, %v21588_v16  ;;  %v18488_v43 = vld [vmem:[%s23370_s5 + $0x1a0] sm:$0xff]   ;;  %vm25039_vm3 = vnez %v24960_v1 }
 0x711   : > { %16634 = vmatprep.subr.bf16.mxu0 %v18485_v17 }
 0x714   : > { %16635 = vmatpush3.bf16.msra.mxu0 %v18485_v17  ;;  %v18489_v17 = vld [vmem:[%s23370_s5 + $0x1a8] sm:$0xff]  }
 0x715   : > { %16636 = vmatprep.subr.bf16.mxu0 %v18486_v7 }
 0x717   : > { %16605 = vmatmul.mubr.msk.bf16.gmra.mrb[36].mxu0 %vm25038_vm12, %v21595_v59 }
 0x718   : > { %16608 = vmatprep.mubr.msk.bf16.mxu0 %vm24956_vm11, %v21612_v8  ;;  %16637 = vmatpush3.bf16.msra.mxu0 %v18486_v7  ;;  %v18490_v7 = vld [vmem:[%s23370_s5 + $0x1b0] sm:$0xff]   ;;  %vm25040_vm11 = vnez %v24966_v14 }
 0x719   : > { %16638 = vmatprep.subr.bf16.mxu0 %v18487_v62 }
 0x71c   : > { %16639 = vmatpush3.bf16.msra.mxu0 %v18487_v62  ;;  %v18491_v62 = vld [vmem:[%s23370_s5 + $0x1b8] sm:$0xff]  }
 0x71d   : > { %16640 = vmatprep.subr.bf16.mxu0 %v18488_v43 }
 0x71f   : > { %16609 = vmatmul.mubr.msk.bf16.gmra.mrb[40].mxu0 %vm25039_vm3, %v21619_v22  ;;  %vm25044_vm3 = vnez %v24985_v4 }
 0x720   : > { %16612 = vmatprep.mubr.msk.bf16.mxu0 %vm24962_vm6, %v21636_v21  ;;  %16641 = vmatpush3.bf16.msra.mxu0 %v18488_v43  ;;  %v18492_v43 = vld [vmem:[%s23370_s5 + $0x1c0] sm:$0xff]   ;;  %vm25041_vm6 = vnez %v24973_v42 }
 0x721   : > { %16642 = vmatprep.subr.bf16.mxu0 %v18489_v17 }
 0x724   : > { %16643 = vmatpush3.bf16.msra.mxu0 %v18489_v17  ;;  %v8347_v17 = vrot.slane %v21785_v39, 1 }
 0x725   : > { %16644 = vmatprep.subr.bf16.mxu0 %v18490_v7 }
 0x727   : > { %16613 = vmatmul.mubr.msk.bf16.gmra.mrb[44].mxu0 %vm25040_vm11, %v21643_v0  ;;  %vm25042_vm11 = vnez %v24977_v15 }
 0x728   : > { %16616 = vmatprep.mubr.msk.bf16.mxu0 %vm24968_vm2, %v21660_v30  ;;  %16645 = vmatpush3.bf16.msra.mxu0 %v18490_v7  ;;  %vm25043_vm2 = vnez %v24979_v27  ;;  %v25045_v7 = vrot.slane %v21697_v11, 1 }
 0x729   : > { %16646 = vmatprep.subr.bf16.mxu0 %v18491_v62 }
 0x72c   : > { %16647 = vmatpush3.bf16.msra.mxu0 %v18491_v62 }
 0x72d   : > { %16680 = vmatprep.subr.bf16.mxu0 %v18492_v43 }
 0x72f   : > { %16617 = vmatmul.mubr.msk.bf16.gmra.mrb[48].mxu0 %vm24814_vm7, %v21664_v5 }
 0x730   : > { %16620 = vmatprep.mubr.msk.bf16.mxu0 %vm25041_vm6, %v21678_v52  ;;  %vm25046_vm6 = vcmask 1046528  }
 0x731   : > { %v8348_v62 = vsel %vm25046_vm6, %v25045_v7, %v8347_v17  ;;  %vm25047_vm7 = vmmov %vm25046_vm6  ;;  %vm25050_vm6 = vnez %v25003_v54  ;;  %v25059_v7 = vld [vmem:[#allocation13_spill] sm:$0xff] }
 0x732   : > { %v8351_v15 = vsel %vm25047_vm7, %v8347_v17, 0.0  ;;  %vm25049_vm7 = vnez %v24998_v31  ;;  %v25057_v17 = vld [vmem:[#allocation46_spill] sm:$0xff]  ;;  %v18577_v31 = vld [vmem:[%s23374_s9 + $0x1e8] sm:$0xff]  }
 0x733   : > { %v21924_v42 = vpack.c.bf16 %v8351_v15, %v8348_v62  ;;  %v18494_v15 = vld [vmem:[%s23370_s5 + $0x1d0] sm:$0xff]   ;;  %v25060_v62 = vld [vmem:[#allocation22_spill] sm:$0xff] }
 0x737   : > { %16621 = vmatmul.mubr.msk.bf16.gmra.mrb[52].mxu0 %vm25042_vm11, %v21682_v47 }
 0x738   : > { %16624 = vmatprep.mubr.msk.bf16.mxu0 %vm25043_vm2, %v21699_v20  ;;  %vm25048_vm2 = vnez %v24993_v38  ;;  %v25120_v38 = vld [vmem:[#allocation81_spill] sm:$0xff] }
 0x73f   : > { %16625 = vmatmul.mubr.msk.bf16.gmra.mrb[56].mxu0 %vm25044_vm3, %v21703_v57 }
 0x740   : > { %16628 = vmatprep.mubr.msk.bf16.mxu0 %vm24988_vm4, %v21716_v29 }
 0x747   : > { %16629 = vmatmul.mubr.msk.bf16.gmra.mrb[60].mxu0 %vm24991_vm13, %v21924_v42 }
 0x748   : > { %16648 = vmatprep.mubr.msk.bf16.mxu0 %vm25048_vm2, %v24995_v26  ;;  %v18495_v26 = vld [vmem:[%s23370_s5 + $0x1d8] sm:$0xff]  }
 0x74f   : > { %16649 = vmatmul.mubr.msk.bf16.vlgmr.msra.gmra.mrb[32].mxu0 %vm24997_vm10, %v21423_v51  ;;  %v18497_v51 = vld [vmem:[%s23370_s5 + $0x1e8] sm:$0xff]  }
 0x750   : > { %16681 = vmatpush3.bf16.msra.mxu0 %v18492_v43  ;;  %16652 = vmatprep.mubr.msk.bf16.mxu0 %vm25049_vm7, %v21429_v58  ;;  %v18496_v58 = vld [vmem:[%s23370_s5 + $0x1e0] sm:$0xff]   ;;  %v25052_v43 = vld [vmem:[#allocation40_spill] sm:$0xff] }
 0x751   : > { %16682 = vmatprep.subr.bf16.mxu0 %v18493_v3  ;;  %vm25053_vm2 = vnez %v25052_v43 }
 0x754   : > { %16683 = vmatpush3.bf16.msra.mxu0 %v18493_v3  ;;  %v25051_v3 = vld [vmem:[#allocation41_spill] sm:$0xff] }
 0x755   : > { %16684 = vmatprep.subr.bf16.mxu0 %v18494_v15 }
 0x757   : > { %16653 = vmatmul.mubr.msk.bf16.gmra.mrb[36].mxu0 %vm25001_vm8, %v21447_v61  ;;  %v18499_v61 = vld [vmem:[%s23370_s5 + $0x1f8] sm:$0xff]  }
 0x758   : > { %16656 = vmatprep.mubr.msk.bf16.mxu0 %vm24919_vm1, %v21453_v56  ;;  %16685 = vmatpush3.bf16.msra.mxu0 %v18494_v15  ;;  %v18498_v56 = vld [vmem:[%s23370_s5 + $0x1f0] sm:$0xff]   ;;  %v25064_v15 = vld [vmem:[#allocation26_spill] sm:$0xff] }
 0x759   : > { %16686 = vmatprep.subr.bf16.mxu0 %v18495_v26 }
 0x75c   : > { %16687 = vmatpush3.bf16.msra.mxu0 %v18495_v26 }
 0x75d   : > { %16688 = vmatprep.subr.bf16.mxu0 %v18496_v58 }
 0x75f   : > { %16657 = vmatmul.mubr.msk.bf16.gmra.mrb[40].mxu0 %vm25050_vm6, %v21471_v63  ;;  %v25054_v63 = vld [vmem:[#allocation77_spill] sm:$0xff]  ;;  %vm25058_vm6 = vnez %v25057_v17 }
 0x760   : > { %16660 = vmatprep.mubr.msk.bf16.mxu0 %vm24828_vm9, %v21477_v10  ;;  %16689 = vmatpush3.bf16.msra.mxu0 %v18496_v58  ;;  %vm25055_vm13 = vnez %v25054_v63  ;;  %v18500_v10 = vld [vmem:[%s23370_s5 + $0x200] sm:$0xff]   ;;  %vm25056_vm9 = vnez %v25008_v25 }
 0x761   : > { %16690 = vmatprep.subr.bf16.mxu0 %v18497_v51 }
 0x764   : > { %16691 = vmatpush3.bf16.msra.mxu0 %v18497_v51  ;;  %v25069_v51 = vmov 0.0  }
 0x765   : > { %16692 = vmatprep.subr.bf16.mxu0 %v18498_v56 }
 0x767   : > { %16661 = vmatmul.mubr.msk.bf16.gmra.mrb[44].mxu0 %vm25053_vm2, %v25051_v3  ;;  %vm25061_vm2 = vnez %v25060_v62  ;;  %v25070_v3 = vld [vmem:[#allocation23_spill] sm:$0xff] }
 0x768   : > { %16664 = vmatprep.mubr.msk.bf16.mxu0 %vm25055_vm13, %v21498_v35  ;;  %16693 = vmatpush3.bf16.msra.mxu0 %v18498_v56  ;;  %v25062_v35 = vld [vmem:[#allocation60_spill] sm:$0xff] }
 0x769   : > { %16694 = vmatprep.subr.bf16.mxu0 %v18499_v61  ;;  %vm25063_vm13 = vnez %v25062_v35 }
 0x76c   : > { %16695 = vmatpush3.bf16.msra.mxu0 %v18499_v61  ;;  %v18509_v61 = vld [vmem:[%s23372_s7 + $0x8] sm:$0xff]  }
 0x76d   : > { %16728 = vmatprep.subr.bf16.mxu0 %v18500_v10 }
 0x76f   : > { %16665 = vmatmul.mubr.msk.bf16.gmra.mrb[48].mxu0 %vm25056_vm9, %v21513_v50  ;;  %v25067_v50 = vrot.slane %v21785_v39, 7  ;;  %vm25068_vm9 = vcmask 1040384  }
 0x770   : > { %16668 = vmatprep.mubr.msk.bf16.mxu0 %vm25058_vm6, %v21516_v60 }
 0x771   : > { %v8659_v60 = vsel %vm25068_vm9, %v25067_v50, 0.0  ;;  %v18511_v50 = vld [vmem:[%s23372_s7 + $0x18] sm:$0xff]   ;;  %vm25079_vm9 = vnez %v24703_v46 }
 0x772   : > { %v14156_v56 = vpack.c.bf16 %v25069_v51, %v8659_v60  ;;  %v25072_v60 = vld [vmem:[#allocation35_spill] sm:$0xff] }
 0x777   : > { %16669 = vmatmul.mubr.msk.bf16.gmra.mrb[52].mxu0 %vm25061_vm2, %v25059_v7  ;;  %v18501_v7 = vld [vmem:[%s23370_s5 + $0x208] sm:$0xff]  }
 0x778   : > { %16672 = vmatprep.mubr.msk.bf16.mxu0 %vm25063_vm13, %v21534_v53  ;;  %v18508_v53 = vld [vmem:[%s23372_s7] sm:$0xff]  }
 0x779   : > { %16776 = vmatprep.subr.bf16.mxu1 %v18508_v53 }
 0x77a   : > { %16777 = vmatpush3.bf16.msra.mxu1 %v18508_v53  ;;  %v18512_v53 = vld [vmem:[%s23372_s7 + $0x20] sm:$0xff]  }
 0x77b   : > { %16778 = vmatprep.subr.bf16.mxu1 %v18509_v61 }
 0x77e   : > { %16779 = vmatpush3.bf16.msra.mxu1 %v18509_v61  ;;  %v18503_v61 = vld [vmem:[%s23370_s5 + $0x218] sm:$0xff]  }
 0x77f   : > { %16673 = vmatmul.mubr.msk.bf16.gmra.mrb[56].mxu0 %vm25015_vm14, %v25064_v15  ;;  %v25071_v15 = vld [vmem:[#allocation80_spill] sm:$0xff]  ;;  %vm25082_vm14 = vnez %v24960_v1 }
 0x780   : > { %16676 = vmatprep.mubr.msk.bf16.mxu0 %vm25016_vm5, %v21801_v28  ;;  %v18510_v28 = vld [vmem:[%s23372_s7 + $0x10] sm:$0xff]   ;;  %vm25081_vm5 = vnez %v24955_v37 }
 0x781   : > { %16780 = vmatprep.subr.bf16.mxu1 %v18510_v28 }
 0x782   : > { %16781 = vmatpush3.bf16.msra.mxu1 %v18510_v28  ;;  %v25074_v28 = vld [vmem:[#allocation12_spill] sm:$0xff] }
 0x783   : > { %16782 = vmatprep.subr.bf16.mxu1 %v18511_v50 }
 0x786   : > { %16783 = vmatpush3.bf16.msra.mxu1 %v18511_v50  ;;  %v18505_v50 = vld [vmem:[%s23370_s5 + $0x228] sm:$0xff]  }
 0x787   : > { %16677 = vmatmul.mubr.msk.bf16.gmra.mrb[60].mxu0 %vm24945_vm0, %v14156_v56  ;;  %v18502_v56 = vld [vmem:[%s23370_s5 + $0x210] sm:$0xff]   ;;  %16784 = vmatprep.subr.bf16.mxu1 %v18512_v53  ;;  %vm25080_vm0 = vnez %v24709_v48 }
 0x788   : > { %16696 = vmatprep.mubr.bf16.mxu0 %v25070_v3  ;;  %v18513_v3 = vld [vmem:[%s23372_s7 + $0x28] sm:$0xff]  }
 0x78a   : > { %16785 = vmatpush3.bf16.msra.mxu1 %v18512_v53  ;;  %v18506_v53 = vld [vmem:[%s23370_s5 + $0x230] sm:$0xff]  }
 0x78b   : > { %16786 = vmatprep.subr.bf16.mxu1 %v18513_v3 }
 0x78e   : > { %16787 = vmatpush3.bf16.msra.mxu1 %v18513_v3  ;;  %v25078_v3 = vmov 0.0|0.0  }
 0x78f   : > { %16697 = vmatmul.mubr.bf16.vlgmr.msra.gmra.mrb[32].mxu0 %v25071_v15  ;;  %v18514_v15 = vld [vmem:[%s23372_s7 + $0x30] sm:$0xff]  }
 0x790   : > { %16729 = vmatpush3.bf16.msra.mxu0 %v18500_v10  ;;  %16700 = vmatprep.mubr.bf16.mxu0 %v25072_v60  ;;  %v25073_v10 = vld [vmem:[#allocation56_spill] sm:$0xff] }
 0x791   : > { %16730 = vmatprep.subr.bf16.mxu0 %v18501_v7  ;;  %v25075_v60 = vld [vmem:[#allocation20_spill] sm:$0xff]  ;;  %16788 = vmatprep.subr.bf16.mxu1 %v18514_v15 }
 0x792   : > { %16789 = vmatpush3.bf16.msra.mxu1 %v18514_v15 }
 0x794   : > { %16731 = vmatpush3.bf16.msra.mxu0 %v18501_v7  ;;  %v18504_v7 = vld [vmem:[%s23370_s5 + $0x220] sm:$0xff]  }
 0x795   : > { %16732 = vmatprep.subr.bf16.mxu0 %v18502_v56 }
 0x797   : > { %16701 = vmatmul.mubr.bf16.gmra.mrb[36].mxu0 %v25073_v10  ;;  %v25077_v10 = vld [vmem:[#allocation21_spill] sm:$0xff] }
 0x798   : > { %16704 = vmatprep.mubr.bf16.mxu0 %v25074_v28  ;;  %16733 = vmatpush3.bf16.msra.mxu0 %v18502_v56  ;;  %v25076_v56 = vld [vmem:[#allocation25_spill] sm:$0xff] }
 0x799   : > { %16734 = vmatprep.subr.bf16.mxu0 %v18503_v61 }
 0x79c   : > { %16735 = vmatpush3.bf16.msra.mxu0 %v18503_v61  ;;  %v18507_v61 = vld [vmem:[%s23370_s5 + $0x238] sm:$0xff]  }
 0x79d   : > { %16736 = vmatprep.subr.bf16.mxu0 %v18504_v7 }
 0x79f   : > { %16705 = vmatmul.mubr.bf16.gmra.mrb[40].mxu0 %v25075_v60 }
 0x7a0   : > { %16708 = vmatprep.mubr.bf16.mxu0 %v25076_v56  ;;  %16737 = vmatpush3.bf16.msra.mxu0 %v18504_v7  ;;  %v18517_v7 = vld [vmem:[%s23374_s9 + $0x48] sm:$0xff]  }
 0x7a1   : > { %16738 = vmatprep.subr.bf16.mxu0 %v18505_v50 }
 0x7a4   : > { %16739 = vmatpush3.bf16.msra.mxu0 %v18505_v50 }
 0x7a5   : > { %16740 = vmatprep.subr.bf16.mxu0 %v18506_v53 }
 0x7a7   : > { %16709 = vmatmul.mubr.bf16.gmra.mrb[44].mxu0 %v25028_v19 }
 0x7a8   : > { %16712 = vmatprep.mubr.bf16.mxu0 %v25029_v18  ;;  %16741 = vmatpush3.bf16.msra.mxu0 %v18506_v53 }
 0x7a9   : > { %16742 = vmatprep.subr.bf16.mxu0 %v18507_v61 }
 0x7ac   : > { %16743 = vmatpush3.bf16.msra.mxu0 %v18507_v61 }
 0x7af   : > { %16713 = vmatmul.mubr.bf16.gmra.mrb[48].mxu0 %v25030_v41 }
 0x7b0   : > { %16716 = vmatprep.mubr.bf16.mxu0 %v25031_v9 }
 0x7b7   : > { %16717 = vmatmul.mubr.bf16.gmra.mrb[52].mxu0 %v25032_v24 }
 0x7b8   : > { %16720 = vmatprep.mubr.bf16.mxu0 %v25033_v45 }
 0x7bf   : > { %16721 = vmatmul.mubr.bf16.gmra.mrb[56].mxu0 %v25034_v6 }
 0x7c0   : > { %16724 = vmatprep.mubr.bf16.mxu0 %v25077_v10 }
 0x7c7   : > { %16725 = vmatmul.mubr.bf16.gmra.mrb[60].mxu0 %v25078_v3 }
 0x7c8   : > { %16744 = vmatprep.mubr.msk.bf16.mxu0 %vm25079_vm9, %v21571_v32  ;;  %vm25083_vm9 = vnez %v24961_v33  ;;  %v25087_v32 = vld [vmem:[#allocation74_spill] sm:$0xff] }
 0x7cf   : > { %16745 = vmatmul.mubr.msk.bf16.vlgmr.msra.gmra.mrb[32].mxu0 %vm25037_vm15, %v21588_v16  ;;  %vm25084_vm15 = vnez %v24966_v14 }
 0x7d0   : > { %16748 = vmatprep.mubr.msk.bf16.mxu0 %vm25080_vm0, %v21595_v59  ;;  %vm25085_vm0 = vnez %v24967_v44  ;;  %v22117_v59 = vld [vmem:[%s23371_s6] ss:$0 sm:$0xff] }
 0x7d7   : > { %16749 = vmatmul.mubr.msk.bf16.gmra.mrb[36].mxu0 %vm25038_vm12, %v21612_v8  ;;  %vm25086_vm12 = vnez %v24972_v40 }
 0x7d8   : > { %16752 = vmatprep.mubr.msk.bf16.mxu0 %vm25081_vm5, %v21619_v22  ;;  %vm25088_vm5 = vnez %v25087_v32  ;;  %v25135_v32 = vld [vmem:[#allocation42_spill] sm:$0xff] }
 0x7df   : > { %16753 = vmatmul.mubr.msk.bf16.gmra.mrb[40].mxu0 %vm25082_vm14, %v21636_v21 }
 0x7e0   : > { %16756 = vmatprep.mubr.msk.bf16.mxu0 %vm25083_vm9, %v21643_v0  ;;  %vm25090_vm9 = vnez %v24979_v27 }
 0x7e7   : > { %16757 = vmatmul.mubr.msk.bf16.gmra.mrb[44].mxu0 %vm25084_vm15, %v21660_v30 }
 0x7e8   : > { %16760 = vmatprep.mubr.msk.bf16.mxu0 %vm25085_vm0, %v21664_v5 }
 0x7ef   : > { %16761 = vmatmul.mubr.msk.bf16.gmra.mrb[48].mxu0 %vm25086_vm12, %v21678_v52 }
 0x7f0   : > { %16764 = vmatprep.mubr.msk.bf16.mxu0 %vm25088_vm5, %v21682_v47  ;;  %v18515_v47 = vld [vmem:[%s23372_s7 + $0x38] sm:$0xff]  }
 0x7f1   : > { %16790 = vmatprep.subr.bf16.mxu1 %v18515_v47 }
 0x7f2   : > { %16791 = vmatpush3.bf16.msra.mxu1 %v18515_v47  ;;  %v18518_v47 = vld [vmem:[%s23374_s9 + $0x50] sm:$0xff]  }
 0x7f7   : > { %16765 = vmatmul.mubr.msk.bf16.gmra.mrb[52].mxu0 %vm25042_vm11, %v21699_v20 }
 0x7f8   : > { %16768 = vmatprep.mubr.msk.bf16.mxu0 %vm25090_vm9, %v21703_v57  ;;  %v18516_v57 = vld [vmem:[%s23374_s9 + $0x40] sm:$0xff]  }
 0x7f9   : > { %16824 = vmatprep.subr.bf16.mxu1 %v18516_v57 }
 0x7ff   : > { %16769 = vmatmul.mubr.msk.bf16.gmra.mrb[56].mxu0 %vm25044_vm3, %v21716_v29 }
 0x800   : > { %16772 = vmatprep.mubr.msk.bf16.mxu0 %vm24988_vm4, %v21924_v42  ;;  %vm25102_vm4 = vcmask 1046528  }
 0x801   : > { %vm25103_vm3 = vmmov %vm25102_vm4 }
 0x802   : > { %vm25104_vm9 = vmmov %vm25103_vm3 }
 0x803   : > { %vm25203_vm11 = vmmov %vm25103_vm3 }
 0x804   : > { %vm25204_vm5 = vmmov %vm25103_vm3 }
 0x805   : > { %vm25205_vm12 = vmmov %vm25103_vm3 }
 0x807   : > { %16773 = vmatmul.mubr.bf16.gmra.mrb[60].mxu0 %v25078_v3 }
 0x8a2   : > { %v16746_v22 = vpop.f32.mrb[32].mxu0 }
 0x8a3   : > { %v9535_v0 = vadd.f32 %v16746_v22, %v22117_v59  ;;  %v9367_v5 = vpop.f32.mrb[33].mxu0 }
 0x8a4   : > { %v9533_v18 = vadd.f32 %v22117_v59, %v9367_v5  ;;  %v16747_v20 = vpop.f32.mrb[34].mxu0 }
 0x8a5   : > { %v9536_v45 = vadd.f32 %v16747_v20, %v22117_v59  ;;  %v9370_v16 = vpop.f32.mrb[35].mxu0  ;;  %v9567_v42 = vmax.f32 %v9535_v0, 0.0 }
 0x8a6   : > { %v9534_v8 = vadd.f32 %v22117_v59, %v9370_v16  ;;  %v9565_v29 = vmax.f32 %v9533_v18, 0.0 }
 0x8a7   : > { %v9568_v52 = vmax.f32 %v9536_v45, 0.0 }
 0x8a8   : > { %v9566_v9 = vmax.f32 %v9534_v8, 0.0 }
 0x8a9   : > { %v9598_v24 = vpack.c.bf16 %v9568_v52, %v9567_v42 }
 0x8aa   : > { %v9597_v19 = vpack.c.bf16 %v9566_v9, %v9565_v29  ;;  %v16750_v6 = vpop.f32.mrb[36].mxu0 }
 0x8ab   : > { %v9539_v41 = vadd.f32 %v16750_v6, %v22117_v59  ;;  %v9383_v28 = vpop.f32.mrb[37].mxu0  ;;  %v18520_v6 = vld [vmem:[%s23374_s9 + $0x60] sm:$0xff]  }
 0x8ac   : > { %v9537_v15 = vadd.f32 %v22117_v59, %v9383_v28  ;;  %v16751_v50 = vpop.f32.mrb[38].mxu0  ;;  %16792 = vmatprep.mubr.bf16.mxu1 %v9597_v19 }
 0x8ad   : > { %v9540_v60 = vadd.f32 %v16751_v50, %v22117_v59  ;;  %v9386_v56 = vpop.f32.mrb[39].mxu0  ;;  %16793 = vmatmul.mubr.bf16.vlgmr.msra.gmra.mrb[32].mxu1 %v9598_v24  ;;  %v9571_v61 = vmax.f32 %v9539_v41, 0.0 }
 0x8ae   : > { %v9538_v53 = vadd.f32 %v22117_v59, %v9386_v56  ;;  %16825 = vmatpush3.bf16.msra.mxu1 %v18516_v57  ;;  %v9569_v22 = vmax.f32 %v9537_v15, 0.0  ;;  %v18519_v57 = vld [vmem:[%s23374_s9 + $0x58] sm:$0xff]  }
 0x8af   : > { %v9572_v10 = vmax.f32 %v9540_v60, 0.0  ;;  %16826 = vmatprep.subr.bf16.mxu1 %v18517_v7 }
 0x8b0   : > { %v9570_v0 = vmax.f32 %v9538_v53, 0.0  ;;  %v18521_v53 = vld [vmem:[%s23374_s9 + $0x68] sm:$0xff]  }
 0x8b1   : > { %v9600_v5 = vpack.c.bf16 %v9572_v10, %v9571_v61 }
 0x8b2   : > { %v9599_v18 = vpack.c.bf16 %v9570_v0, %v9569_v22  ;;  %v16754_v20 = vpop.f32.mrb[40].mxu0  ;;  %16827 = vmatpush3.bf16.msra.mxu1 %v18517_v7 }
 0x8b3   : > { %v9543_v45 = vadd.f32 %v16754_v20, %v22117_v59  ;;  %v9399_v16 = vpop.f32.mrb[41].mxu0  ;;  %16828 = vmatprep.subr.bf16.mxu1 %v18518_v47  ;;  %v18522_v20 = vld [vmem:[%s23374_s9 + $0x70] sm:$0xff]  }
 0x8b4   : > { %v9541_v8 = vadd.f32 %v22117_v59, %v9399_v16  ;;  %v16755_v42 = vpop.f32.mrb[42].mxu0  ;;  %16796 = vmatprep.mubr.bf16.mxu1 %v9599_v18 }
 0x8b5   : > { %v9544_v52 = vadd.f32 %v16755_v42, %v22117_v59  ;;  %v9402_v29 = vpop.f32.mrb[43].mxu0  ;;  %16797 = vmatmul.mubr.bf16.gmra.mrb[36].mxu1 %v9600_v5  ;;  %v9575_v24 = vmax.f32 %v9543_v45, 0.0 }
 0x8b6   : > { %v9542_v9 = vadd.f32 %v22117_v59, %v9402_v29  ;;  %16829 = vmatpush3.bf16.msra.mxu1 %v18518_v47  ;;  %v9573_v41 = vmax.f32 %v9541_v8, 0.0 }
 0x8b7   : > { %v9576_v19 = vmax.f32 %v9544_v52, 0.0  ;;  %16830 = vmatprep.subr.bf16.mxu1 %v18519_v57 }
 0x8b8   : > { %v9574_v28 = vmax.f32 %v9542_v9, 0.0 }
 0x8b9   : > { %v9602_v7 = vpack.c.bf16 %v9576_v19, %v9575_v24 }
 0x8ba   : > { %v9601_v15 = vpack.c.bf16 %v9574_v28, %v9573_v41  ;;  %v16758_v50 = vpop.f32.mrb[44].mxu0  ;;  %16831 = vmatpush3.bf16.msra.mxu1 %v18519_v57 }
 0x8bb   : > { %v9547_v60 = vadd.f32 %v16758_v50, %v22117_v59  ;;  %v9415_v56 = vpop.f32.mrb[45].mxu0  ;;  %16832 = vmatprep.subr.bf16.mxu1 %v18520_v6 }
 0x8bc   : > { %v9545_v61 = vadd.f32 %v22117_v59, %v9415_v56  ;;  %v16759_v10 = vpop.f32.mrb[46].mxu0  ;;  %16800 = vmatprep.mubr.bf16.mxu1 %v9601_v15 }
 0x8bd   : > { %v9548_v47 = vadd.f32 %v16759_v10, %v22117_v59  ;;  %v9418_v22 = vpop.f32.mrb[47].mxu0  ;;  %16801 = vmatmul.mubr.bf16.gmra.mrb[40].mxu1 %v9602_v7  ;;  %v9579_v5 = vmax.f32 %v9547_v60, 0.0 }
 0x8be   : > { %v9546_v0 = vadd.f32 %v22117_v59, %v9418_v22  ;;  %16833 = vmatpush3.bf16.msra.mxu1 %v18520_v6  ;;  %v9577_v45 = vmax.f32 %v9545_v61, 0.0 }
 0x8bf   : > { %v9580_v18 = vmax.f32 %v9548_v47, 0.0  ;;  %16834 = vmatprep.subr.bf16.mxu1 %v18521_v53 }
 0x8c0   : > { %v9578_v16 = vmax.f32 %v9546_v0, 0.0 }
 0x8c1   : > { %v9604_v57 = vpack.c.bf16 %v9580_v18, %v9579_v5 }
 0x8c2   : > { %v9603_v8 = vpack.c.bf16 %v9578_v16, %v9577_v45  ;;  %v16762_v42 = vpop.f32.mrb[48].mxu0  ;;  %16835 = vmatpush3.bf16.msra.mxu1 %v18521_v53 }
 0x8c3   : > { %v9551_v52 = vadd.f32 %v16762_v42, %v22117_v59  ;;  %v9431_v29 = vpop.f32.mrb[49].mxu0  ;;  %16836 = vmatprep.subr.bf16.mxu1 %v18522_v20 }
 0x8c4   : > { %v9549_v9 = vadd.f32 %v22117_v59, %v9431_v29  ;;  %v16763_v24 = vpop.f32.mrb[50].mxu0  ;;  %16804 = vmatprep.mubr.bf16.mxu1 %v9603_v8 }
 0x8c5   : > { %v9552_v19 = vadd.f32 %v16763_v24, %v22117_v59  ;;  %v9434_v6 = vpop.f32.mrb[51].mxu0  ;;  %16805 = vmatmul.mubr.bf16.gmra.mrb[44].mxu1 %v9604_v57  ;;  %v9583_v28 = vmax.f32 %v9551_v52, 0.0 }
 0x8c6   : > { %v9550_v41 = vadd.f32 %v22117_v59, %v9434_v6  ;;  %16837 = vmatpush3.bf16.msra.mxu1 %v18522_v20  ;;  %v9581_v15 = vmax.f32 %v9549_v9, 0.0 }
 0x8c7   : > { %v9584_v7 = vmax.f32 %v9552_v19, 0.0 }
 0x8c8   : > { %v9582_v50 = vmax.f32 %v9550_v41, 0.0 }
 0x8c9   : > { %v9606_v60 = vpack.c.bf16 %v9584_v7, %v9583_v28 }
 0x8ca   : > { %v9605_v56 = vpack.c.bf16 %v9582_v50, %v9581_v15  ;;  %v16766_v53 = vpop.f32.mrb[52].mxu0 }
 0x8cb   : > { %v9555_v61 = vadd.f32 %v16766_v53, %v22117_v59  ;;  %v9447_v10 = vpop.f32.mrb[53].mxu0 }
 0x8cc   : > { %v9553_v47 = vadd.f32 %v22117_v59, %v9447_v10  ;;  %v16767_v22 = vpop.f32.mrb[54].mxu0  ;;  %16808 = vmatprep.mubr.bf16.mxu1 %v9605_v56 }
 0x8cd   : > { %v9556_v0 = vadd.f32 %v16767_v22, %v22117_v59  ;;  %v9450_v5 = vpop.f32.mrb[55].mxu0  ;;  %16809 = vmatmul.mubr.bf16.gmra.mrb[48].mxu1 %v9606_v60  ;;  %v9587_v20 = vmax.f32 %v9555_v61, 0.0 }
 0x8ce   : > { %v9554_v18 = vadd.f32 %v22117_v59, %v9450_v5  ;;  %v9585_v16 = vmax.f32 %v9553_v47, 0.0 }
 0x8cf   : > { %v9588_v45 = vmax.f32 %v9556_v0, 0.0 }
 0x8d0   : > { %v9586_v57 = vmax.f32 %v9554_v18, 0.0 }
 0x8d1   : > { %v9608_v8 = vpack.c.bf16 %v9588_v45, %v9587_v20 }
 0x8d2   : > { %v9607_v42 = vpack.c.bf16 %v9586_v57, %v9585_v16  ;;  %v16770_v52 = vpop.f32.mrb[56].mxu0 }
 0x8d3   : > { %v9559_v29 = vadd.f32 %v16770_v52, %v22117_v59  ;;  %v9463_v9 = vpop.f32.mrb[57].mxu0 }
 0x8d4   : > { %v9557_v24 = vadd.f32 %v22117_v59, %v9463_v9  ;;  %v16771_v19 = vpop.f32.mrb[58].mxu0  ;;  %16812 = vmatprep.mubr.bf16.mxu1 %v9607_v42  ;;  %v22179_v9 = vld [vmem:[%s23373_s8] ss:$0 sm:$0xff] }
 0x8d5   : > { %v9560_v6 = vadd.f32 %v16771_v19, %v22117_v59  ;;  %v9466_v41 = vpop.f32.mrb[59].mxu0  ;;  %16813 = vmatmul.mubr.bf16.gmra.mrb[52].mxu1 %v9608_v8  ;;  %v9591_v7 = vmax.f32 %v9559_v29, 0.0  ;;  %v18523_v29 = vld [vmem:[%s23374_s9 + $0x78] sm:$0xff]  }
 0x8d6   : > { %v9558_v28 = vadd.f32 %v22117_v59, %v9466_v41  ;;  %v9589_v50 = vmax.f32 %v9557_v24, 0.0  ;;  %16838 = vmatprep.subr.bf16.mxu1 %v18523_v29 }
 0x8d7   : > { %v9592_v15 = vmax.f32 %v9560_v6, 0.0  ;;  %16839 = vmatpush3.bf16.msra.mxu1 %v18523_v29 }
 0x8d8   : > { %v9590_v60 = vmax.f32 %v9558_v28, 0.0 }
 0x8d9   : > { %v9610_v56 = vpack.c.bf16 %v9592_v15, %v9591_v7  ;;  %v25094_v7 = vld [vmem:[#allocation16_spill] sm:$0xff] }
 0x8da   : > { %v9609_v53 = vpack.c.bf16 %v9590_v60, %v9589_v50  ;;  %v16774_v61 = vpop.f32.mrb[60].mxu0 }
 0x8db   : > { %v9563_v10 = vadd.f32 %v16774_v61, %v22117_v59  ;;  %v9479_v47 = vpop.f32.mrb[61].mxu0 }
 0x8dc   : > { %v9561_v22 = vadd.f32 %v22117_v59, %v9479_v47  ;;  %v16775_v0 = vpop.f32.mrb[62].mxu0  ;;  %16816 = vmatprep.mubr.bf16.mxu1 %v9609_v53 }
 0x8dd   : > { %v9564_v5 = vadd.f32 %v16775_v0, %v22117_v59  ;;  %v9482_v18 = vpop.f32.mrb[63].mxu0  ;;  %16817 = vmatmul.mubr.bf16.gmra.mrb[56].mxu1 %v9610_v56  ;;  %v9595_v45 = vmax.f32 %v9563_v10, 0.0  ;;  %v25096_v56 = vld [vmem:[#allocation10_spill] sm:$0xff]  ;;  %v25098_v10 = vld [vmem:[#allocation8_spill] sm:$0xff] }
 0x8de   : > { %v9562_v20 = vadd.f32 %v22117_v59, %v9482_v18  ;;  %v9593_v57 = vmax.f32 %v9561_v22, 0.0  ;;  %v18524_v59 = vld [vmem:[%s23374_s9] sm:$0xff]   ;;  %v25099_v22 = vld [vmem:[#allocation11_spill] sm:$0xff] }
 0x8df   : > { %v9596_v16 = vmax.f32 %v9564_v5, 0.0  ;;  %16872 = vmatprep.subr.bf16.mxu1 %v18524_v59 }
 0x8e0   : > { %v9594_v8 = vmax.f32 %v9562_v20, 0.0 }
 0x8e1   : > { %v9612_v42 = vpack.c.bf16 %v9596_v16, %v9595_v45 }
 0x8e2   : > { %v9611_v52 = vpack.c.bf16 %v9594_v8, %v9593_v57  ;;  %v18525_v8 = vld [vmem:[%s23374_s9 + $0x8] sm:$0xff]  }
 0x8e4   : > { %16820 = vmatprep.mubr.bf16.mxu1 %v9611_v52 }
 0x8e5   : > { %16821 = vmatmul.mubr.bf16.gmra.mrb[60].mxu1 %v9612_v42 }
 0x8e6   : > { %16840 = vmatprep.mubr.bf16.mxu1 %v25078_v3 }
 0x980   : > { %v16794_v24 = vpop.f32.mrb[32].mxu1 }
 0x981   : > { %v22182_v19 = vadd.f32 %v16794_v24, %v22179_v9  ;;  %v9718_v6 = vpop.f32.mrb[33].mxu1 }
 0x982   : > { %v22185_v41 = vadd.f32 %v22179_v9, %v9718_v6  ;;  %v16795_v28 = vpop.f32.mrb[34].mxu1 }
 0x983   : > { %25092 = vst [vmem:[#allocation36_spill] sm:$0xff] %v22182_v19  ;;  %v22189_v15 = vadd.f32 %v22182_v19, %v25094_v7  ;;  %v22192_v50 = vadd.f32 %v16795_v28, %v22179_v9  ;;  %v9721_v60 = vpop.f32.mrb[35].mxu1 }
 0x984   : > { %25093 = vst [vmem:[#allocation9_spill] sm:$0xff] %v22185_v41  ;;  %v22196_v53 = vadd.f32 %v22185_v41, %v25096_v56  ;;  %v22199_v61 = vadd.f32 %v22179_v9, %v9721_v60 }
 0x985   : > { %25095 = vst [vmem:[#allocation47_spill] sm:$0xff] %v22192_v50  ;;  %v22203_v47 = vadd.f32 %v22192_v50, %v25098_v10  ;;  %v10512_v5 = vrot.slane %v22189_v15, 1  ;;  %v25108_v10 = vld [vmem:[#allocation34_spill] sm:$0xff] }
 0x986   : > { %25097 = vst [vmem:[#allocation51_spill] sm:$0xff] %v22199_v61  ;;  %v22207_v0 = vadd.f32 %v22199_v61, %v25099_v22  ;;  %v23894_v20 = vrot.slane %v22196_v53, 1 }
 0x987   : > { %v10514_v18 = vrot.slane %v22203_v47, 1  ;;  %v22234_v60 = vpack.c.bf16 %v22203_v47, %v22189_v15 }
 0x988   : > { %v22214_v45 = vpack.c.bf16 %v22207_v0, %v22196_v53  ;;  %v10510_v16 = vrot.slane %v22207_v0, 1  ;;  %v16798_v57 = vpop.f32.mrb[36].mxu1 }
 0x989   : > { %v22221_v42 = vadd.f32 %v16798_v57, %v22179_v9  ;;  %v9734_v52 = vpop.f32.mrb[37].mxu1  ;;  %v10515_v29 = vsel %vm25102_vm4, %v10512_v5, %v10514_v18  ;;  %25106 = vst [vmem:[#allocation15_spill] sm:$0xff] %v22234_v60  ;;  %vm25117_vm4 = vmmov %vm25103_vm3 }
 0x98a   : > { %25100 = vst [vmem:[#allocation43_spill] sm:$0xff] %v22214_v45  ;;  %v10511_v24 = vsel %vm25103_vm3, %v23894_v20, %v10510_v16  ;;  %v10513_v6 = vsel %vm25104_vm9, %v10510_v16, %v10512_v5  ;;  %v22229_v28 = vadd.f32 %v22179_v9, %v9734_v52  ;;  %v16799_v7 = vpop.f32.mrb[38].mxu1  ;;  %16841 = vmatmul.mubr.bf16.vlgmr.msra.gmra.mrb[64].mxu1 %v22214_v45  ;;  %v25110_v16 = vld [vmem:[#allocation29_spill] sm:$0xff]  ;;  %vm25124_vm9 = vmmov %vm25103_vm3 }
 0x98b   : > { %25101 = vst [vmem:[#allocation14_spill] sm:$0xff] %v22221_v42  ;;  %v22236_v56 = vpack.c.bf16 %v10513_v6, %v10511_v24  ;;  %v22240_v22 = vadd.f32 %v22221_v42, %v25108_v10  ;;  %v22243_v57 = vadd.f32 %v16799_v7, %v22179_v9  ;;  %16873 = vmatpush3.bf16.msra.mxu1 %v18524_v59  ;;  %v9737_v5 = vpop.f32.mrb[39].mxu1  ;;  %v18526_v24 = vld [vmem:[%s23374_s9 + $0x10] sm:$0xff]   ;;  %v25113_v10 = vld [vmem:[#allocation31_spill] sm:$0xff] }
 0x98c   : > { %25105 = vst [vmem:[#allocation2_spill] sm:$0xff] %v22229_v28  ;;  %v22247_v52 = vadd.f32 %v22229_v28, %v25110_v16  ;;  %v22250_v20 = vadd.f32 %v22179_v9, %v9737_v5  ;;  %16844 = vmatprep.mubr.bf16.mxu1 %v22234_v60  ;;  %16874 = vmatprep.subr.bf16.mxu1 %v18525_v8  ;;  %v25112_v6 = vld [vmem:[#allocation24_spill] sm:$0xff] }
 0x98d   : > { %25107 = vst [vmem:[#allocation82_spill] sm:$0xff] %v22236_v56  ;;  %25109 = vst [vmem:[#allocation63_spill] sm:$0xff] %v22243_v57  ;;  %v22258_v7 = vadd.f32 %v22243_v57, %v25112_v6  ;;  %v10520_v5 = vrot.slane %v22240_v22, 1  ;;  %v18527_v6 = vld [vmem:[%s23374_s9 + $0x18] sm:$0xff]  }
 0x98e   : > { %25111 = vst [vmem:[#allocation67_spill] sm:$0xff] %v22250_v20  ;;  %v10516_v59 = vrot.slane %v22247_v52, 1  ;;  %v22263_v16 = vadd.f32 %v22250_v20, %v25113_v10 }
 0x98f   : > { %v10522_v28 = vrot.slane %v22258_v7, 1  ;;  %16875 = vmatpush3.bf16.msra.mxu1 %v18525_v8  ;;  %v22280_v57 = vpack.c.bf16 %v22258_v7, %v22240_v22 }
 0x990   : > { %v10518_v42 = vrot.slane %v22263_v16, 1  ;;  %v16802_v61 = vpop.f32.mrb[40].mxu1  ;;  %v22270_v50 = vpack.c.bf16 %v22263_v16, %v22247_v52  ;;  %16876 = vmatprep.subr.bf16.mxu1 %v18526_v24  ;;  %v10517_v8 = vsel %vm25103_vm3, %v10514_v18, %v10516_v59  ;;  %v25122_v18 = vld [vmem:[#allocation49_spill] sm:$0xff] }
 0x991   : > { %v22276_v10 = vadd.f32 %v16802_v61, %v22179_v9  ;;  %v9750_v20 = vpop.f32.mrb[41].mxu1  ;;  %25116 = vst [vmem:[#allocation50_spill] sm:$0xff] %v22280_v57  ;;  %v10523_v41 = vsel %vm25117_vm4, %v10520_v5, %v10522_v28  ;;  %v22288_v45 = vpack.c.bf16 %v10517_v8, %v10515_v29  ;;  %vm25131_vm4 = vmmov %vm25103_vm3 }
 0x992   : > { %25114 = vst [vmem:[#allocation72_spill] sm:$0xff] %v22270_v50  ;;  %v22285_v19 = vadd.f32 %v22179_v9, %v9750_v20  ;;  %v16803_v60 = vpop.f32.mrb[42].mxu1  ;;  %16845 = vmatmul.mubr.bf16.gmra.mrb[68].mxu1 %v22270_v50  ;;  %v10519_v29 = vsel %vm25124_vm9, %v10516_v59, %v10518_v42  ;;  %vm25132_vm9 = vmmov %vm25103_vm3 }
 0x993   : > { %25115 = vst [vmem:[#allocation39_spill] sm:$0xff] %v22276_v10  ;;  %25119 = vst [vmem:[#allocation18_spill] sm:$0xff] %v22288_v45  ;;  %v22292_v61 = vadd.f32 %v22276_v10, %v25120_v38  ;;  %v22295_v36 = vadd.f32 %v16803_v60, %v22179_v9  ;;  %v9753_v30 = vpop.f32.mrb[43].mxu1  ;;  %16848 = vmatprep.mubr.bf16.mxu1 %v22280_v57  ;;  %16877 = vmatpush3.bf16.msra.mxu1 %v18526_v24  ;;  %v18528_v38 = vld [vmem:[%s23374_s9 + $0x20] sm:$0xff]   ;;  %v25125_v60 = vld [vmem:[#allocation7_spill] sm:$0xff] }
 0x994   : > { %25118 = vst [vmem:[#allocation59_spill] sm:$0xff] %v22285_v19  ;;  %v22300_v20 = vadd.f32 %v22285_v19, %v25122_v18  ;;  %v22303_v4 = vadd.f32 %v22179_v9, %v9753_v30  ;;  %16878 = vmatprep.subr.bf16.mxu1 %v18527_v6  ;;  %v10521_v24 = vsel %vm25103_vm3, %v10518_v42, %v10520_v5  ;;  %v25126_v18 = vld [vmem:[#allocation57_spill] sm:$0xff]  ;;  %v18529_v42 = vld [vmem:[%s23374_s9 + $0x28] sm:$0xff]  }
 0x995   : > { %25121 = vst [vmem:[#allocation53_spill] sm:$0xff] %v22295_v36  ;;  %v22311_v8 = vadd.f32 %v22295_v36, %v25125_v60  ;;  %v22319_v30 = vpack.c.bf16 %v10521_v24, %v10519_v29  ;;  %v10528_v57 = vrot.slane %v22292_v61, 1 }
 0x996   : > { %25123 = vst [vmem:[#allocation58_spill] sm:$0xff] %v22303_v4  ;;  %v10524_v10 = vrot.slane %v22300_v20, 1  ;;  %v22317_v19 = vadd.f32 %v22303_v4, %v25126_v18 }
 0x997   : > { %25127 = vst [vmem:[#allocation37_spill] sm:$0xff] %v22319_v30  ;;  %v10530_v50 = vrot.slane %v22311_v8, 1  ;;  %16879 = vmatpush3.bf16.msra.mxu1 %v18527_v6  ;;  %v22336_v24 = vpack.c.bf16 %v22311_v8, %v22292_v61 }
 0x998   : > { %v10526_v59 = vrot.slane %v22317_v19, 1  ;;  %v16806_v27 = vpop.f32.mrb[44].mxu1  ;;  %v22326_v60 = vpack.c.bf16 %v22317_v19, %v22300_v20  ;;  %16880 = vmatprep.subr.bf16.mxu1 %v18528_v38  ;;  %v10525_v6 = vsel %vm25131_vm4, %v10522_v28, %v10524_v10  ;;  %v25137_v28 = vld [vmem:[#allocation17_spill] sm:$0xff]  ;;  %vm25140_vm4 = vmmov %vm25103_vm3 }
 0x999   : > { %v22332_v5 = vadd.f32 %v16806_v27, %v22179_v9  ;;  %v9766_v29 = vpop.f32.mrb[45].mxu1  ;;  %25130 = vst [vmem:[#allocation64_spill] sm:$0xff] %v22336_v24  ;;  %v10531_v18 = vsel %vm25132_vm9, %v10528_v57, %v10530_v50  ;;  %v22344_v21 = vpack.c.bf16 %v10525_v6, %v10523_v41  ;;  %vm25146_vm9 = vmmov %vm25103_vm3 }
 0x99a   : > { %25128 = vst [vmem:[#allocation71_spill] sm:$0xff] %v22326_v60  ;;  %v22341_v4 = vadd.f32 %v22179_v9, %v9766_v29  ;;  %v16807_v36 = vpop.f32.mrb[46].mxu1  ;;  %16849 = vmatmul.mubr.bf16.gmra.mrb[72].mxu1 %v22326_v60  ;;  %v10527_v41 = vsel %vm25103_vm3, %v10524_v10, %v10526_v59 }
 0x99b   : > { %25129 = vst [vmem:[#allocation19_spill] sm:$0xff] %v22332_v5  ;;  %25134 = vst [vmem:[#allocation41_spill] sm:$0xff] %v22344_v21  ;;  %v22348_v27 = vadd.f32 %v22332_v5, %v25135_v32  ;;  %v22351_v40 = vadd.f32 %v16807_v36, %v22179_v9  ;;  %v9769_v44 = vpop.f32.mrb[47].mxu1  ;;  %16852 = vmatprep.mubr.bf16.mxu1 %v22336_v24  ;;  %16881 = vmatpush3.bf16.msra.mxu1 %v18528_v38  ;;  %v18530_v32 = vld [vmem:[%s23374_s9 + $0x30] sm:$0xff]   ;;  %v25139_v36 = vld [vmem:[#allocation83_spill] sm:$0xff] }
 0x99c   : > { %25133 = vst [vmem:[#allocation33_spill] sm:$0xff] %v22341_v4  ;;  %v22356_v29 = vadd.f32 %v22341_v4, %v25137_v28  ;;  %v22359_v14 = vadd.f32 %v22179_v9, %v9769_v44  ;;  %16882 = vmatprep.subr.bf16.mxu1 %v18529_v42  ;;  %v10529_v38 = vsel %vm25140_vm4, %v10526_v59, %v10528_v57  ;;  %v25141_v28 = vld [vmem:[#allocation28_spill] sm:$0xff]  ;;  %v18531_v57 = vld [vmem:[%s23374_s9 + $0x38] sm:$0xff]   ;;  %vm25153_vm4 = vmmov %vm25103_vm3 }
 0x99d   : > { %25136 = vst [vmem:[#allocation40_spill] sm:$0xff] %v22351_v40  ;;  %v22367_v6 = vadd.f32 %v22351_v40, %v25139_v36  ;;  %v22375_v44 = vpack.c.bf16 %v10529_v38, %v10527_v41  ;;  %v10536_v24 = vrot.slane %v22348_v27, 1 }
 0x99e   : > { %25138 = vst [vmem:[#allocation77_spill] sm:$0xff] %v22359_v14  ;;  %v10532_v5 = vrot.slane %v22356_v29, 1  ;;  %v22373_v4 = vadd.f32 %v22359_v14, %v25141_v28 }
 0x99f   : > { %25142 = vst [vmem:[#allocation46_spill] sm:$0xff] %v22375_v44  ;;  %v10538_v60 = vrot.slane %v22367_v6, 1  ;;  %16883 = vmatpush3.bf16.msra.mxu1 %v18529_v42  ;;  %v22392_v38 = vpack.c.bf16 %v22367_v6, %v22348_v27  ;;  %v25149_v44 = vld [vmem:[#allocation85_spill] sm:$0xff] }
 0x9a0   : > { %v10534_v10 = vrot.slane %v22373_v4, 1  ;;  %v16810_v33 = vpop.f32.mrb[48].mxu1  ;;  %v22382_v36 = vpack.c.bf16 %v22373_v4, %v22356_v29  ;;  %16884 = vmatprep.subr.bf16.mxu1 %v18530_v32  ;;  %v10533_v42 = vsel %vm25146_vm9, %v10530_v50, %v10532_v5  ;;  %v25151_v50 = vld [vmem:[#allocation54_spill] sm:$0xff]  ;;  %vm25155_vm9 = vmmov %vm25103_vm3 }
 0x9a1   : > { %v22388_v59 = vadd.f32 %v16810_v33, %v22179_v9  ;;  %v9782_v41 = vpop.f32.mrb[49].mxu1  ;;  %25145 = vst [vmem:[#allocation26_spill] sm:$0xff] %v22392_v38  ;;  %v10539_v28 = vsel %vm25103_vm3, %v10536_v24, %v10538_v60  ;;  %v22400_v1 = vpack.c.bf16 %v10533_v42, %v10531_v18  ;;  %v22420_v18 = vld [vmem:[%s23374_s9 + $0x80] sm:$0xff]  }
 0x9a2   : > { %25143 = vst [vmem:[#allocation13_spill] sm:$0xff] %v22382_v36  ;;  %v22397_v14 = vadd.f32 %v22179_v9, %v9782_v41  ;;  %v16811_v40 = vpop.f32.mrb[50].mxu1  ;;  %16853 = vmatmul.mubr.bf16.gmra.mrb[76].mxu1 %v22382_v36 }
 0x9a3   : > { %25144 = vst [vmem:[#allocation22_spill] sm:$0xff] %v22388_v59  ;;  %25148 = vst [vmem:[#allocation80_spill] sm:$0xff] %v22400_v1  ;;  %v22404_v33 = vadd.f32 %v22388_v59, %v25149_v44  ;;  %v22407_v37 = vadd.f32 %v16811_v40, %v22179_v9  ;;  %v9785_v21 = vpop.f32.mrb[51].mxu1  ;;  %16856 = vmatprep.mubr.bf16.mxu1 %v22392_v38  ;;  %16885 = vmatpush3.bf16.msra.mxu1 %v18530_v32  ;;  %v25154_v44 = vld [vmem:[#allocation45_spill] sm:$0xff] }
 0x9a4   : > { %25147 = vst [vmem:[#allocation23_spill] sm:$0xff] %v22397_v14  ;;  %v22412_v41 = vadd.f32 %v22397_v14, %v25151_v50  ;;  %v22415_v49 = vadd.f32 %v22179_v9, %v9785_v21  ;;  %16886 = vmatprep.subr.bf16.mxu1 %v18531_v57  ;;  %v10535_v40 = vsel %vm25153_vm4, %v10532_v5, %v10534_v10  ;;  %v25156_v14 = vld [vmem:[#allocation84_spill] sm:$0xff]  ;;  %vm25161_vm4 = vmmov %vm25103_vm3 }
 0x9a5   : > { %25150 = vst [vmem:[#allocation35_spill] sm:$0xff] %v22407_v37  ;;  %v22425_v42 = vadd.f32 %v22407_v37, %v25154_v44  ;;  %v10537_v32 = vsel %vm25155_vm9, %v10534_v10, %v10536_v24  ;;  %v10544_v38 = vrot.slane %v22404_v33, 1  ;;  %vm25168_vm9 = vmmov %vm25103_vm3 }
 0x9a6   : > { %25152 = vst [vmem:[#allocation56_spill] sm:$0xff] %v22415_v49  ;;  %v10540_v50 = vrot.slane %v22412_v41, 1  ;;  %v22431_v21 = vadd.f32 %v22415_v49, %v25156_v14  ;;  %v22433_v59 = vpack.c.bf16 %v10537_v32, %v10535_v40 }
 0x9a7   : > { %v10546_v36 = vrot.slane %v22425_v42, 1  ;;  %16887 = vmatpush3.bf16.msra.mxu1 %v18531_v57  ;;  %v22448_v10 = vpack.c.bf16 %v22425_v42, %v22404_v33 }
 0x9a8   : > { %25157 = vst [vmem:[#allocation12_spill] sm:$0xff] %v22433_v59  ;;  %v10542_v5 = vrot.slane %v22431_v21, 1  ;;  %v16814_v1 = vpop.f32.mrb[52].mxu1  ;;  %v22440_v44 = vpack.c.bf16 %v22431_v21, %v22412_v41  ;;  %16920 = vmatprep.subr.bf16.mxu1 %v22420_v18  ;;  %v10541_v40 = vsel %vm25103_vm3, %v10538_v60, %v10540_v50  ;;  %v25164_v59 = vld [vmem:[#allocation38_spill] sm:$0xff]  ;;  %v25166_v60 = vld [vmem:[#allocation87_spill] sm:$0xff] }
 0x9a9   : > { %v22444_v24 = vadd.f32 %v16814_v1, %v22179_v9  ;;  %v9798_v14 = vpop.f32.mrb[53].mxu1  ;;  %25160 = vst [vmem:[#allocation21_spill] sm:$0xff] %v22448_v10  ;;  %v10547_v57 = vsel %vm25161_vm4, %v10544_v38, %v10546_v36  ;;  %v22456_v37 = vpack.c.bf16 %v10541_v40, %v10539_v28  ;;  %vm25175_vm4 = vmmov %vm25103_vm3 }
 0x9aa   : > { %25158 = vst [vmem:[#allocation20_spill] sm:$0xff] %v22440_v44  ;;  %v22453_v32 = vadd.f32 %v22179_v9, %v9798_v14  ;;  %v16815_v49 = vpop.f32.mrb[54].mxu1  ;;  %16857 = vmatmul.mubr.bf16.gmra.mrb[80].mxu1 %v22440_v44  ;;  %v10543_v28 = vsel %vm25168_vm9, %v10540_v50, %v10542_v5  ;;  %v10545_v40 = vsel %vm25103_vm3, %v10542_v5, %v10544_v38  ;;  %v25169_v44 = vld [vmem:[#allocation27_spill] sm:$0xff]  ;;  %vm25176_vm9 = vmmov %vm25103_vm3 }
 0x9ab   : > { %25159 = vst [vmem:[#allocation25_spill] sm:$0xff] %v22444_v24  ;;  %25163 = vst [vmem:[#allocation10_spill] sm:$0xff] %v22456_v37  ;;  %v22460_v1 = vadd.f32 %v22444_v24, %v25164_v59  ;;  %v22463_v30 = vadd.f32 %v16815_v49, %v22179_v9  ;;  %v9801_v48 = vpop.f32.mrb[55].mxu1  ;;  %16860 = vmatprep.mubr.bf16.mxu1 %v22448_v10  ;;  %v22479_v49 = vpack.c.bf16 %v10545_v40, %v10543_v28  ;;  %v25171_v10 = vld [vmem:[#allocation61_spill] sm:$0xff] }
 0x9ac   : > { %25162 = vst [vmem:[#allocation16_spill] sm:$0xff] %v22453_v32  ;;  %v22468_v45 = vadd.f32 %v22453_v32, %v25166_v60  ;;  %v22471_v14 = vadd.f32 %v22179_v9, %v9801_v48 }
 0x9ad   : > { %25165 = vst [vmem:[#allocation8_spill] sm:$0xff] %v22463_v30  ;;  %v22477_v59 = vadd.f32 %v22463_v30, %v25169_v44  ;;  %25170 = vst [vmem:[#allocation34_spill] sm:$0xff] %v22479_v49  ;;  %v10552_v60 = vrot.slane %v22460_v1, 1 }
 0x9ae   : > { %25167 = vst [vmem:[#allocation11_spill] sm:$0xff] %v22471_v14  ;;  %v10548_v24 = vrot.slane %v22468_v45, 1  ;;  %v22484_v37 = vadd.f32 %v22471_v14, %v25171_v10 }
 0x9af   : > { %v10554_v48 = vrot.slane %v22477_v59, 1  ;;  %v22498_v28 = vpack.c.bf16 %v22477_v59, %v22460_v1 }
 0x9b0   : > { %v10550_v50 = vrot.slane %v22484_v37, 1  ;;  %v16818_v32 = vpop.f32.mrb[56].mxu1  ;;  %v22491_v38 = vpack.c.bf16 %v22484_v37, %v22468_v45  ;;  %v10549_v10 = vsel %vm25175_vm4, %v10546_v36, %v10548_v24  ;;  %v25181_v36 = vld [vmem:[#allocation44_spill] sm:$0xff]  ;;  %vm25183_vm4 = vmmov %vm25103_vm3 }
 0x9b1   : > { %v22494_v5 = vadd.f32 %v16818_v32, %v22179_v9  ;;  %v9814_v44 = vpop.f32.mrb[57].mxu1  ;;  %25174 = vst [vmem:[#allocation31_spill] sm:$0xff] %v22498_v28  ;;  %v10555_v40 = vsel %vm25176_vm9, %v10552_v60, %v10554_v48  ;;  %v22506_v49 = vpack.c.bf16 %v10549_v10, %v10547_v57  ;;  %vm25190_vm9 = vmmov %vm25103_vm3 }
 0x9b2   : > { %25172 = vst [vmem:[#allocation29_spill] sm:$0xff] %v22491_v38  ;;  %v22503_v14 = vadd.f32 %v22179_v9, %v9814_v44  ;;  %v16819_v30 = vpop.f32.mrb[58].mxu1  ;;  %16861 = vmatmul.mubr.bf16.gmra.mrb[84].mxu1 %v22491_v38  ;;  %v10551_v57 = vsel %vm25103_vm3, %v10548_v24, %v10550_v50  ;;  %v10553_v10 = vsel %vm25183_vm4, %v10550_v50, %v10552_v60  ;;  %v25184_v38 = vld [vmem:[#allocation90_spill] sm:$0xff]  ;;  %vm25195_vm4 = vmmov %vm25103_vm3 }
 0x9b3   : > { %25173 = vst [vmem:[#allocation24_spill] sm:$0xff] %v22494_v5  ;;  %25178 = vst [vmem:[#allocation49_spill] sm:$0xff] %v22506_v49  ;;  %v22510_v32 = vadd.f32 %v22494_v5, %v25179_v55  ;;  %v22513_v56 = vadd.f32 %v16819_v30, %v22179_v9  ;;  %v9817_v46 = vpop.f32.mrb[59].mxu1  ;;  %16864 = vmatprep.mubr.bf16.mxu1 %v22498_v28  ;;  %v22529_v30 = vpack.c.bf16 %v10553_v10, %v10551_v57  ;;  %v25186_v28 = vld [vmem:[#allocation55_spill] sm:$0xff] }
 0x9b4   : > { %25177 = vst [vmem:[#allocation81_spill] sm:$0xff] %v22503_v14  ;;  %v22518_v2 = vadd.f32 %v22503_v14, %v25181_v36  ;;  %v22521_v44 = vadd.f32 %v22179_v9, %v9817_v46 }
 0x9b5   : > { %25180 = vst [vmem:[#allocation7_spill] sm:$0xff] %v22513_v56  ;;  %v22527_v55 = vadd.f32 %v22513_v56, %v25184_v38  ;;  %25185 = vst [vmem:[#allocation42_spill] sm:$0xff] %v22529_v30  ;;  %v10560_v36 = vrot.slane %v22510_v32, 1 }
 0x9b6   : > { %25182 = vst [vmem:[#allocation57_spill] sm:$0xff] %v22521_v44  ;;  %v10556_v5 = vrot.slane %v22518_v2, 1  ;;  %v22534_v49 = vadd.f32 %v22521_v44, %v25186_v28 }
 0x9b7   : > { %v10562_v46 = vrot.slane %v22527_v55, 1  ;;  %v22548_v57 = vpack.c.bf16 %v22527_v55, %v22510_v32 }
 0x9b8   : > { %v10558_v24 = vrot.slane %v22534_v49, 1  ;;  %v16822_v14 = vpop.f32.mrb[60].mxu1  ;;  %v22541_v60 = vpack.c.bf16 %v22534_v49, %v22518_v2  ;;  %v10557_v28 = vsel %vm25190_vm9, %v10554_v48, %v10556_v5  ;;  %v25193_v48 = vld [vmem:[#allocation89_spill] sm:$0xff]  ;;  %vm25196_vm9 = vmmov %vm25103_vm3 }
 0x9b9   : > { %v22544_v50 = vadd.f32 %v16822_v14, %v22179_v9  ;;  %v9830_v38 = vpop.f32.mrb[61].mxu1  ;;  %25189 = vst [vmem:[#allocation28_spill] sm:$0xff] %v22548_v57  ;;  %v10563_v10 = vsel %vm25103_vm3, %v10560_v36, %v10562_v46  ;;  %v22556_v30 = vpack.c.bf16 %v10557_v28, %v10555_v40 }
 0x9ba   : > { %25187 = vst [vmem:[#allocation17_spill] sm:$0xff] %v22541_v60  ;;  %v22553_v44 = vadd.f32 %v22179_v9, %v9830_v38  ;;  %v16823_v56 = vpop.f32.mrb[62].mxu1  ;;  %16865 = vmatmul.mubr.bf16.gmra.mrb[88].mxu1 %v22541_v60  ;;  %v10559_v60 = vsel %vm25195_vm4, %v10556_v5, %v10558_v24  ;;  %v10561_v40 = vsel %vm25196_vm9, %v10558_v24, %v10560_v36  ;;  %vm25201_vm4 = vcmask 1040384   ;;  %vm25202_vm9 = vmmov %vm25103_vm3 }
 0x9bb   : > { %25188 = vst [vmem:[#allocation83_spill] sm:$0xff] %v22544_v50  ;;  %v9875_v14 = vadd.f32 %v22544_v50, %v21697_v11  ;;  %v22561_v51 = vadd.f32 %v16823_v56, %v22179_v9  ;;  %v9833_v58 = vpop.f32.mrb[63].mxu1  ;;  %16868 = vmatprep.mubr.bf16.mxu1 %v22548_v57  ;;  %v22577_v56 = vpack.c.bf16 %v10561_v40, %v10559_v60  ;;  %v25199_v57 = vld [vmem:[#allocation78_spill] sm:$0xff] }
 0x9bc   : > { %25191 = vst [vmem:[#allocation85_spill] sm:$0xff] %v22553_v44  ;;  %v22566_v26 = vadd.f32 %v22553_v44, %v25193_v48  ;;  %v22569_v38 = vadd.f32 %v22179_v9, %v9833_v58 }
 0x9bd   : > { %25192 = vst [vmem:[#allocation54_spill] sm:$0xff] %v22561_v51  ;;  %v22575_v11 = vadd.f32 %v22561_v51, %v21785_v39  ;;  %25198 = vst [vmem:[#allocation38_spill] sm:$0xff] %v22577_v56  ;;  %v10568_v28 = vrot.slane %v9875_v14, 1  ;;  %v10908_v44 = vrot.slane %v9875_v14, 7  ;;  %v9908_v39 = vrot.slane %v22207_v0, 7 }
 0x9be   : > { %25194 = vst [vmem:[#allocation45_spill] sm:$0xff] %v22569_v38  ;;  %v10564_v50 = vrot.slane %v22566_v26, 1  ;;  %v22582_v48 = vadd.f32 %v22569_v38, %v25199_v57  ;;  %v9912_v0 = vrot.slane %v22203_v47, 7  ;;  %v9910_v47 = vrot.slane %v22189_v15, 7 }
 0x9bf   : > { %25197 = vst [vmem:[#allocation84_spill] sm:$0xff] %v22575_v11  ;;  %v23987_v58 = vrot.slane %v22575_v11, 7  ;;  %v11479_v9 = vrot.slane %v22575_v11, 1  ;;  %v22587_v5 = vpack.c.bf16 %v22575_v11, %v9875_v14  ;;  %v9920_v15 = vrot.slane %v22258_v7, 7 }
 0x9c0   : > { %v10566_v24 = vrot.slane %v22582_v48, 1  ;;  %v22594_v60 = vpack.c.bf16 %v22582_v48, %v22566_v26  ;;  %v10565_v57 = vsel %vm25103_vm3, %v10562_v46, %v10564_v50  ;;  %v9907_v46 = vrot.slane %v22196_v53, 7  ;;  %vm25207_vm3 = vmmov %vm25201_vm4 }
 0x9c1   : > { %25200 = vst [vmem:[#allocation87_spill] sm:$0xff] %v22587_v5  ;;  %v10911_v40 = vsel %vm25201_vm4, %v10908_v44, %v23987_v58  ;;  %v11480_v38 = vsel %vm25202_vm9, %v10568_v28, %v11479_v9  ;;  %v11483_v14 = vsel %vm25203_vm11, %v11479_v9, 0.0  ;;  %v22604_v36 = vpack.c.bf16 %v10565_v57, %v10563_v10  ;;  %vm25210_vm11 = vmmov %vm25207_vm3 }
 0x9c2   : > { %16869 = vmatmul.mubr.bf16.gmra.mrb[92].mxu1 %v22594_v60  ;;  %v10567_v51 = vsel %vm25204_vm5, %v10564_v50, %v10566_v24  ;;  %v10569_v5 = vsel %vm25205_vm12, %v10566_v24, %v10568_v28  ;;  %v25206_v58 = vrot.slane %v22582_v48, 7  ;;  %v22615_v56 = vpack.c.bf16 %v11483_v14, %v11480_v38  ;;  %vm25211_vm5 = vmmov %vm25207_vm3 }
 0x9c3   : > { %16888 = vmatprep.mubr.bf16.mxu1 %v25078_v3  ;;  %v22610_v11 = vpack.c.bf16 %v10569_v5, %v10567_v51  ;;  %v9909_v50 = vsel %vm25210_vm11, %v9907_v46, %v9908_v39  ;;  %v9911_v28 = vsel %vm25211_vm5, %v9908_v39, %v9910_v47  ;;  %vm25212_vm12 = vmmov %vm25207_vm3  ;;  %v9916_v38 = vrot.slane %v22263_v16, 7  ;;  %v18534_v16 = vld [vmem:[%s23374_s9 + $0x90] sm:$0xff]  }
 0x9c4   : > { %v10909_v9 = vsel %vm25207_vm3, %v25206_v58, %v10908_v44  ;;  %25208 = vst [vmem:[#allocation27_spill] sm:$0xff] %v22615_v56  ;;  %v9913_v24 = vsel %vm25212_vm12, %v9910_v47, %v9912_v0  ;;  %vm25213_vm4 = vmmov %vm25207_vm3  ;;  %v18533_v44 = vld [vmem:[%s23374_s9 + $0x88] sm:$0xff]   ;;  %v9914_v5 = vrot.slane %v22247_v52, 7  ;;  %v9918_v39 = vrot.slane %v22240_v22, 7  ;;  %v18535_v22 = vld [vmem:[%s23374_s9 + $0x98] sm:$0xff]  }
 0x9c5   : > { %v22618_v10 = vpack.c.bf16 %v10911_v40, %v10909_v9  ;;  %v9996_v57 = vsel %vm25213_vm4, 0.0, %v9907_v46  ;;  %v22630_v58 = vpack.c.bf16 %v9913_v24, %v9911_v28  ;;  %vm25214_vm9 = vmmov %vm25207_vm3  ;;  %v9924_v46 = vrot.slane %v22317_v19, 7  ;;  %v18536_v19 = vld [vmem:[%s23374_s9 + $0xa0] sm:$0xff]   ;;  %v25289_v56 = vld [vmem:[#allocation5_spill] sm:$0xff] }
 0x9c6   : > { %v22624_v51 = vpack.c.bf16 %v9909_v50, %v9996_v57  ;;  %v9917_v7 = vsel %vm25214_vm9, %v9914_v5, %v9916_v38  ;;  %v9919_v40 = vsel %vm25207_vm3, %v9916_v38, %v9918_v39  ;;  %vm25215_vm11 = vmmov %vm25207_vm3  ;;  %v9928_v47 = vrot.slane %v22311_v8, 7  ;;  %v25284_v3 = vld [vmem:[#allocation38_spill] sm:$0xff] }
 0x9c7   : > { %25209 = vst [vmem:[#allocation61_spill] sm:$0xff] %v22618_v10  ;;  %v9921_v14 = vsel %vm25215_vm11, %v9918_v39, %v9920_v15  ;;  %vm25216_vm5 = vmmov %vm25207_vm3  ;;  %v9926_v50 = vrot.slane %v22292_v61, 7  ;;  %v18537_v61 = vld [vmem:[%s23374_s9 + $0xa8] sm:$0xff]   ;;  %vm25220_vm11 = vnez %v25003_v54  ;;  %v9934_v39 = vrot.slane %v22348_v27, 7  ;;  %v18539_v27 = vld [vmem:[%s23374_s9 + $0xb8] sm:$0xff]  }
 0x9c8   : > { %v9915_v52 = vsel %vm25216_vm5, %v9912_v0, %v9914_v5  ;;  %v22655_v9 = vpack.c.bf16 %v9921_v14, %v9919_v40  ;;  %v9922_v0 = vrot.slane %v22300_v20, 7  ;;  %vm25217_vm12 = vmmov %vm25207_vm3  ;;  %v9936_v5 = vrot.slane %v22367_v6, 7 }
 0x9c9   : > { %vm25218_vm4 = vmmov %vm25207_vm3  ;;  %vm25221_vm5 = vnez %v25005_v13  ;;  %v9940_v14 = vrot.slane %v22431_v21, 7  ;;  %v18540_v21 = vld [vmem:[%s23374_s9 + $0xc0] sm:$0xff]  }
 0x9ca   : > { %16889 = vmatmul.mubr.msk.bf16.vlgmr.msra.gmra.mrb[64].mxu1 %vm24997_vm10, %v22624_v51  ;;  %v9925_v8 = vsel %vm25217_vm12, %v9922_v0, %v9924_v46  ;;  %v9927_v28 = vsel %vm25218_vm4, %v9924_v46, %v9926_v50  ;;  %vm25219_vm9 = vmmov %vm25207_vm3  ;;  %v9923_v20 = vsel %vm25207_vm3, %v9920_v15, %v9922_v0  ;;  %v9930_v15 = vrot.slane %v22356_v29, 7 }
 0x9cb   : > { %16921 = vmatpush3.bf16.msra.mxu1 %v22420_v18  ;;  %16892 = vmatprep.mubr.msk.bf16.mxu1 %vm25049_vm7, %v22630_v58  ;;  %v22649_v18 = vpack.c.bf16 %v9917_v7, %v9915_v52  ;;  %v9929_v24 = vsel %vm25219_vm9, %v9926_v50, %v9928_v47  ;;  %v22673_v57 = vpack.c.bf16 %v9925_v8, %v9923_v20  ;;  %vm25222_vm12 = vmmov %vm25207_vm3  ;;  %v9938_v46 = vrot.slane %v22412_v41, 7 }
 0x9cc   : > { %16922 = vmatprep.subr.bf16.mxu1 %v18533_v44  ;;  %v22679_v38 = vpack.c.bf16 %v9929_v24, %v9927_v28  ;;  %vm25223_vm4 = vmmov %vm25207_vm3  ;;  %v9931_v29 = vsel %vm25207_vm3, %v9928_v47, %v9930_v15  ;;  %v9942_v47 = vrot.slane %v22404_v33, 7  ;;  %v9948_v8 = vrot.slane %v22484_v37, 7 }
 0x9cd   : > { %vm25224_vm9 = vmmov %vm25207_vm3  ;;  %v9952_v28 = vrot.slane %v22477_v59, 7  ;;  %v9946_v24 = vrot.slane %v22468_v45, 7  ;;  %v9950_v20 = vrot.slane %v22460_v1, 7  ;;  %v9960_v45 = vrot.slane %v22527_v55, 7 }
 0x9ce   : > { %v9937_v7 = vsel %vm25224_vm9, %v9934_v39, %v9936_v5  ;;  %vm25227_vm9 = vmmov %vm25207_vm3  ;;  %v9943_v0 = vsel %vm25207_vm3, %v9940_v14, %v9942_v47  ;;  %v9954_v1 = vrot.slane %v22518_v2, 7  ;;  %v25237_v2 = vld [vmem:[#allocation48_spill] sm:$0xff] }
 0x9cf   : > { %16923 = vmatpush3.bf16.msra.mxu1 %v18533_v44  ;;  %v9932_v44 = vrot.slane %v22373_v4, 7  ;;  %v18538_v4 = vld [vmem:[%s23374_s9 + $0xb0] sm:$0xff]  }
 0x9d0   : > { %16924 = vmatprep.subr.bf16.mxu1 %v18534_v16  ;;  %v9955_v55 = vsel %vm25207_vm3, %v9952_v28, %v9954_v1 }
 0x9d1   : > { %v9933_v6 = vsel %vm25222_vm12, %v9930_v15, %v9932_v44  ;;  %vm25225_vm12 = vnez %v25052_v43  ;;  %v9956_v15 = vrot.slane %v22534_v49, 7 }
 0x9d2   : > { %16893 = vmatmul.mubr.msk.bf16.gmra.mrb[68].mxu1 %vm25001_vm8, %v22649_v18  ;;  %v22697_v40 = vpack.c.bf16 %v9933_v6, %v9931_v29 }
 0x9d3   : > { %16896 = vmatprep.mubr.msk.bf16.mxu1 %vm24919_vm1, %v22655_v9  ;;  %16925 = vmatpush3.bf16.msra.mxu1 %v18534_v16  ;;  %v9935_v16 = vsel %vm25223_vm4, %v9932_v44, %v9934_v39  ;;  %vm25226_vm4 = vnez %v25054_v63 }
 0x9d4   : > { %16926 = vmatprep.subr.bf16.mxu1 %v18535_v22  ;;  %v22703_v52 = vpack.c.bf16 %v9937_v7, %v9935_v16 }
 0x9d7   : > { %16927 = vmatpush3.bf16.msra.mxu1 %v18535_v22  ;;  %v9944_v22 = vrot.slane %v22425_v42, 7  ;;  %v9941_v42 = vsel %vm25227_vm9, %v9938_v46, %v9940_v14  ;;  %vm25233_vm9 = vmmov %vm25207_vm3  ;;  %v25241_v14 = vrot.slane %v22582_v48, 7  ;;  %v18541_v48 = vld [vmem:[%s23374_s9 + $0xc8] sm:$0xff]  }
 0x9d8   : > { %16928 = vmatprep.subr.bf16.mxu1 %v18536_v19  ;;  %v9953_v44 = vsel %vm25233_vm9, %v9950_v20, %v9952_v28  ;;  %vm25236_vm9 = vmmov %vm25207_vm3  ;;  %v25253_v28 = vld [vmem:[#allocation62_spill] sm:$0xff] }
 0x9d9   : > { %v9947_v59 = vsel %vm25207_vm3, %v9944_v22, %v9946_v24 }
 0x9da   : > { %16897 = vmatmul.mubr.msk.bf16.gmra.mrb[72].mxu1 %vm25220_vm11, %v22673_v57 }
 0x9db   : > { %16900 = vmatprep.mubr.msk.bf16.mxu1 %vm25221_vm5, %v22679_v38  ;;  %16929 = vmatpush3.bf16.msra.mxu1 %v18536_v19  ;;  %vm25228_vm5 = vmmov %vm25207_vm3 }
 0x9dc   : > { %16930 = vmatprep.subr.bf16.mxu1 %v18537_v61  ;;  %v9945_v50 = vsel %vm25228_vm5, %v9942_v47, %v9944_v22  ;;  %vm25231_vm5 = vmmov %vm25207_vm3 }
 0x9dd   : > { %v22724_v33 = vpack.c.bf16 %v9945_v50, %v9943_v0  ;;  %v25247_v50 = vmov 0.0  }
 0x9df   : > { %16931 = vmatpush3.bf16.msra.mxu1 %v18537_v61  ;;  %v9949_v61 = vsel %vm25231_vm5, %v9946_v24, %v9948_v8  ;;  %vm25234_vm5 = vmmov %vm25207_vm3  ;;  %v25255_v24 = vld [vmem:[#allocation18_spill] sm:$0xff] }
 0x9e0   : > { %16932 = vmatprep.subr.bf16.mxu1 %v18538_v4  ;;  %v9957_v6 = vsel %vm25234_vm5, %v9954_v1, %v9956_v15  ;;  %vm25242_vm5 = vmmov %vm25207_vm3  ;;  %v18545_v1 = vld [vmem:[%s23374_s9 + $0xe8] sm:$0xff]  }
 0x9e1   : > { %v22757_v7 = vpack.c.bf16 %v9957_v6, %v9955_v55  ;;  %v25265_v6 = vld [vmem:[#allocation68_spill] sm:$0xff] }
 0x9e2   : > { %16901 = vmatmul.mubr.msk.bf16.gmra.mrb[76].mxu1 %vm25225_vm12, %v22697_v40  ;;  %vm25229_vm12 = vmmov %vm25207_vm3  ;;  %v18546_v55 = vld [vmem:[%s23374_s9 + $0xf0] sm:$0xff]  }
 0x9e3   : > { %16904 = vmatprep.mubr.msk.bf16.mxu1 %vm25226_vm4, %v22703_v52  ;;  %16933 = vmatpush3.bf16.msra.mxu1 %v18538_v4  ;;  %v9939_v41 = vsel %vm25229_vm12, %v9936_v5, %v9938_v46  ;;  %vm25230_vm4 = vnez %v25008_v25  ;;  %vm25232_vm12 = vmmov %vm25207_vm3  ;;  %v22739_v5 = vpack.c.bf16 %v9949_v61, %v9947_v59  ;;  %v9958_v4 = vrot.slane %v22510_v32, 7  ;;  %v25239_v32 = vld [vmem:[#allocation52_spill] sm:$0xff]  ;;  %v25259_v59 = vld [vmem:[#allocation65_spill] sm:$0xff] }
 0x9e4   : > { %16934 = vmatprep.subr.bf16.mxu1 %v18539_v27  ;;  %v22721_v19 = vpack.c.bf16 %v9941_v42, %v9939_v41  ;;  %v9951_v37 = vsel %vm25232_vm12, %v9948_v8, %v9950_v20  ;;  %vm25235_vm12 = vmmov %vm25207_vm3  ;;  %v25243_v46 = vrot.slane %v22196_v53, 1  ;;  %v25250_v8 = vld [vmem:[#allocation66_spill] sm:$0xff]  ;;  %v25256_v20 = vld [vmem:[#allocation69_spill] sm:$0xff] }
 0x9e5   : > { %v22742_v39 = vpack.c.bf16 %v9953_v44, %v9951_v37  ;;  %v9959_v49 = vsel %vm25235_vm12, %v9956_v15, %v9958_v4  ;;  %v9961_v16 = vsel %vm25236_vm9, %v9958_v4, %v9960_v45  ;;  %vm25244_vm12 = vcmask 1046528   ;;  %vm25245_vm9 = vmmov %vm25207_vm3  ;;  %v25252_v53 = vld [vmem:[#allocation82_spill] sm:$0xff]  ;;  %v18542_v61 = vld [vmem:[%s23374_s9 + $0xd0] sm:$0xff]  }
 0x9e6   : > { %v22759_v29 = vpack.c.bf16 %v9961_v16, %v9959_v49  ;;  %v10601_v47 = vsel %vm25244_vm12, 0.0, %v25243_v46  ;;  %vm25257_vm12 = vnez %v25256_v20  ;;  %v18543_v37 = vld [vmem:[%s23374_s9 + $0xd8] sm:$0xff]   ;;  %v25262_v15 = vld [vmem:[#allocation88_spill] sm:$0xff]  ;;  %v25264_v4 = vld [vmem:[#allocation46_spill] sm:$0xff] }
 0x9e7   : > { %16935 = vmatpush3.bf16.msra.mxu1 %v18539_v27  ;;  %v9962_v27 = vrot.slane %v22566_v26, 7  ;;  %v14363_v41 = vpack.c.bf16 %v10601_v47, %v25247_v50  ;;  %v25248_v26 = vld [vmem:[#allocation86_spill] sm:$0xff]  ;;  %v25258_v44 = vld [vmem:[#allocation37_spill] sm:$0xff]  ;;  %v25266_v49 = vld [vmem:[#allocation80_spill] sm:$0xff] }
 0x9e8   : > { %16968 = vmatprep.subr.bf16.mxu1 %v18540_v21  ;;  %vm25249_vm3 = vnez %v25248_v26  ;;  %v25267_v16 = vld [vmem:[#allocation70_spill] sm:$0xff]  ;;  %v25272_v47 = vld [vmem:[#allocation76_spill] sm:$0xff]  ;;  %v25285_v50 = vld [vmem:[#allocation79_spill] sm:$0xff] }
 0x9e9   : > { %v9965_v22 = vsel %vm25242_vm5, %v9962_v27, %v25241_v14  ;;  %v9963_v42 = vsel %vm25245_vm9, %v9960_v45, %v9962_v27  ;;  %vm25254_vm5 = vnez %v25253_v28  ;;  %vm25260_vm9 = vnez %v25259_v59  ;;  %v18544_v45 = vld [vmem:[%s23374_s9 + $0xe0] sm:$0xff]   ;;  %v18547_v27 = vld [vmem:[%s23374_s9 + $0xf8] sm:$0xff]   ;;  %v25269_v14 = vld [vmem:[#allocation12_spill] sm:$0xff] }
 0x9ea   : > { %16905 = vmatmul.mubr.msk.bf16.gmra.mrb[80].mxu1 %vm25230_vm4, %v22721_v19  ;;  %v22775_v0 = vpack.c.bf16 %v9965_v22, %v9963_v42  ;;  %v25270_v22 = vld [vmem:[#allocation32_spill] sm:$0xff]  ;;  %v25271_v46 = vld [vmem:[#allocation10_spill] sm:$0xff] }
 0x9eb   : > { %16908 = vmatprep.mubr.msk.bf16.mxu1 %vm25058_vm6, %v22724_v33  ;;  %v18548_v42 = vld [vmem:[%s23374_s9 + $0x100] sm:$0xff]   ;;  %v25341_v25 = vld [vmem:[#allocation84_spill] sm:$0xff] }
 0x9ec   : > { %25246 = vst [vmem:[#allocation4_spill] sm:$0xff] %v22775_v0  ;;  %v25302_v26 = vld [vmem:[#allocation50_spill] sm:$0xff] }
 0x9f2   : > { %16909 = vmatmul.mubr.msk.bf16.gmra.mrb[84].mxu1 %vm25061_vm2, %v22739_v5  ;;  %vm25238_vm2 = vnez %v25237_v2  ;;  %v25311_v2 = vld [vmem:[#allocation17_spill] sm:$0xff] }
 0x9f3   : > { %16912 = vmatprep.mubr.msk.bf16.mxu1 %vm25063_vm13, %v22742_v39  ;;  %vm25240_vm13 = vnez %v25239_v32 }
 0x9fa   : > { %16913 = vmatmul.mubr.msk.bf16.gmra.mrb[88].mxu1 %vm25238_vm2, %v22757_v7 }
 0x9fb   : > { %16916 = vmatprep.mubr.msk.bf16.mxu1 %vm25240_vm13, %v22759_v29  ;;  %vm25251_vm13 = vnez %v25250_v8 }
 0xa02   : > { %16917 = vmatmul.mubr.msk.bf16.gmra.mrb[92].mxu1 %vm25249_vm3, %v22775_v0 }
 0xa03   : > { %16936 = vmatprep.mubr.msk.bf16.mxu1 %vm25251_vm13, %v14363_v41  ;;  %v25273_v41 = vld [vmem:[#allocation34_spill] sm:$0xff] }
 0xa0a   : > { %16937 = vmatmul.mubr.msk.bf16.vlgmr.msra.gmra.mrb[64].mxu1 %vm25254_vm5, %v25252_v53  ;;  %vm25263_vm5 = vnez %v25262_v15 }
 0xa0b   : > { %16969 = vmatpush3.bf16.msra.mxu1 %v18540_v21  ;;  %16940 = vmatprep.mubr.msk.bf16.mxu1 %vm25257_vm12, %v25255_v24  ;;  %v25261_v21 = vld [vmem:[#allocation41_spill] sm:$0xff] }
 0xa0c   : > { %16970 = vmatprep.subr.bf16.mxu1 %v18541_v48 }
 0xa0f   : > { %16971 = vmatpush3.bf16.msra.mxu1 %v18541_v48  ;;  %v25274_v48 = vld [vmem:[#allocation73_spill] sm:$0xff] }
 0xa10   : > { %16972 = vmatprep.subr.bf16.mxu1 %v18542_v61 }
 0xa12   : > { %16941 = vmatmul.mubr.msk.bf16.gmra.mrb[68].mxu1 %vm25260_vm9, %v25258_v44  ;;  %vm25268_vm9 = vnez %v25267_v16 }
 0xa13   : > { %16944 = vmatprep.mubr.msk.bf16.mxu1 %vm25263_vm5, %v25261_v21  ;;  %16973 = vmatpush3.bf16.msra.mxu1 %v18542_v61  ;;  %v25276_v61 = vld [vmem:[#allocation49_spill] sm:$0xff]  ;;  %vm25286_vm5 = vnez %v25285_v50 }
 0xa14   : > { %16974 = vmatprep.subr.bf16.mxu1 %v18543_v37 }
 0xa17   : > { %16975 = vmatpush3.bf16.msra.mxu1 %v18543_v37  ;;  %v25277_v37 = vld [vmem:[#allocation74_spill] sm:$0xff] }
 0xa18   : > { %16976 = vmatprep.subr.bf16.mxu1 %v18544_v45 }
 0xa1a   : > { %16945 = vmatmul.mubr.msk.bf16.gmra.mrb[72].mxu1 %vm25082_vm14, %v25264_v4  ;;  %vm25278_vm14 = vnez %v25277_v37  ;;  %v25291_v37 = vld [vmem:[#allocation6_spill] sm:$0xff] }
 0xa1b   : > { %16948 = vmatprep.mubr.msk.bf16.mxu1 %vm25268_vm9, %v25266_v49  ;;  %16977 = vmatpush3.bf16.msra.mxu1 %v18544_v45  ;;  %vm25275_vm9 = vnez %v25274_v48  ;;  %v25279_v45 = vld [vmem:[#allocation42_spill] sm:$0xff] }
 0xa1c   : > { %16978 = vmatprep.subr.bf16.mxu1 %v18545_v1 }
 0xa1f   : > { %16979 = vmatpush3.bf16.msra.mxu1 %v18545_v1  ;;  %v25280_v1 = vld [vmem:[#allocation75_spill] sm:$0xff] }
 0xa20   : > { %16980 = vmatprep.subr.bf16.mxu1 %v18546_v55 }
 0xa22   : > { %16949 = vmatmul.mubr.msk.bf16.gmra.mrb[76].mxu1 %vm25084_vm15, %v25269_v14  ;;  %vm25281_vm15 = vnez %v25280_v1 }
 0xa23   : > { %16952 = vmatprep.mubr.msk.bf16.mxu1 %vm25085_vm0, %v25271_v46  ;;  %16981 = vmatpush3.bf16.msra.mxu1 %v18546_v55  ;;  %v25282_v55 = vld [vmem:[#allocation30_spill] sm:$0xff] }
 0xa24   : > { %16982 = vmatprep.subr.bf16.mxu1 %v18547_v27  ;;  %vm25283_vm0 = vnez %v25282_v55  ;;  %v18549_v55 = vld [vmem:[%s23374_s9 + $0x108] sm:$0xff]  }
 0xa27   : > { %16983 = vmatpush3.bf16.msra.mxu1 %v18547_v27  ;;  %v25287_v27 = vld [vmem:[#allocation3_spill] sm:$0xff] }
 0xa28   : > { %17016 = vmatprep.subr.bf16.mxu1 %v18548_v42  ;;  %vm25288_vm12 = vnez %v25287_v27 }
 0xa2a   : > { %16953 = vmatmul.mubr.msk.bf16.gmra.mrb[80].mxu1 %vm25275_vm9, %v25273_v41  ;;  %vm25290_vm9 = vnez %v25289_v56  ;;  %v18550_v56 = vld [vmem:[%s23374_s9 + $0x110] sm:$0xff]  }
 0xa2b   : > { %16956 = vmatprep.mubr.msk.bf16.mxu1 %vm25278_vm14, %v25276_v61  ;;  %vm25292_vm14 = vnez %v25291_v37  ;;  %v25349_v37 = vld [vmem:[#allocation50_spill] sm:$0xff] }
 0xa32   : > { %16957 = vmatmul.mubr.msk.bf16.gmra.mrb[84].mxu1 %vm25281_vm15, %v25279_v45 }
 0xa33   : > { %16960 = vmatprep.mubr.msk.bf16.mxu1 %vm25283_vm0, %v22556_v30 }
 0xa3a   : > { %16961 = vmatmul.mubr.msk.bf16.gmra.mrb[88].mxu1 %vm25286_vm5, %v25284_v3 }
 0xa3b   : > { %16964 = vmatprep.mubr.msk.bf16.mxu1 %vm25288_vm12, %v22604_v36 }
 0xa42   : > { %16965 = vmatmul.mubr.msk.bf16.gmra.mrb[92].mxu1 %vm25290_vm9, %v22610_v11 }
 0xa43   : > { %16984 = vmatprep.mubr.msk.bf16.mxu1 %vm25292_vm14, %v22624_v51  ;;  %v18551_v51 = vld [vmem:[%s23374_s9 + $0x118] sm:$0xff]  }
 0xa4a   : > { %16985 = vmatmul.mubr.msk.bf16.vlgmr.msra.gmra.mrb[64].mxu1 %vm24997_vm10, %v22630_v58 }
 0xa4b   : > { %17017 = vmatpush3.bf16.msra.mxu1 %v18548_v42  ;;  %16988 = vmatprep.mubr.msk.bf16.mxu1 %vm25049_vm7, %v22649_v18  ;;  %v18552_v42 = vld [vmem:[%s23374_s9 + $0x120] sm:$0xff]  }
 0xa4c   : > { %17018 = vmatprep.subr.bf16.mxu1 %v18549_v55 }
 0xa4f   : > { %17019 = vmatpush3.bf16.msra.mxu1 %v18549_v55  ;;  %v18553_v55 = vld [vmem:[%s23374_s9 + $0x128] sm:$0xff]  }
 0xa50   : > { %17020 = vmatprep.subr.bf16.mxu1 %v18550_v56 }
 0xa52   : > { %16989 = vmatmul.mubr.msk.bf16.gmra.mrb[68].mxu1 %vm25001_vm8, %v22655_v9  ;;  %vm25293_vm8 = vnez %v25005_v13 }
 0xa53   : > { %16992 = vmatprep.mubr.msk.bf16.mxu1 %vm24919_vm1, %v22673_v57  ;;  %17021 = vmatpush3.bf16.msra.mxu1 %v18550_v56  ;;  %v18554_v56 = vld [vmem:[%s23374_s9 + $0x130] sm:$0xff]   ;;  %vm25294_vm1 = vnez %v25052_v43 }
 0xa54   : > { %17022 = vmatprep.subr.bf16.mxu1 %v18551_v51 }
 0xa57   : > { %17023 = vmatpush3.bf16.msra.mxu1 %v18551_v51  ;;  %v18555_v51 = vld [vmem:[%s23374_s9 + $0x138] sm:$0xff]  }
 0xa58   : > { %17024 = vmatprep.subr.bf16.mxu1 %v18552_v42 }
 0xa5a   : > { %16993 = vmatmul.mubr.msk.bf16.gmra.mrb[72].mxu1 %vm25220_vm11, %v22679_v38  ;;  %vm25295_vm11 = vnez %v25054_v63 }
 0xa5b   : > { %16996 = vmatprep.mubr.msk.bf16.mxu1 %vm25293_vm8, %v22697_v40  ;;  %17025 = vmatpush3.bf16.msra.mxu1 %v18552_v42  ;;  %v18556_v42 = vld [vmem:[%s23374_s9 + $0x140] sm:$0xff]   ;;  %vm25298_vm8 = vnez %v25239_v32  ;;  %v18558_v32 = vld [vmem:[%s23374_s9 + $0x150] sm:$0xff]  }
 0xa5c   : > { %17026 = vmatprep.subr.bf16.mxu1 %v18553_v55 }
 0xa5f   : > { %17027 = vmatpush3.bf16.msra.mxu1 %v18553_v55  ;;  %v25299_v55 = vld [vmem:[#allocation43_spill] sm:$0xff] }
 0xa60   : > { %17028 = vmatprep.subr.bf16.mxu1 %v18554_v56 }
 0xa62   : > { %16997 = vmatmul.mubr.msk.bf16.gmra.mrb[76].mxu1 %vm25294_vm1, %v22703_v52  ;;  %vm25296_vm1 = vnez %v25060_v62  ;;  %v25345_v62 = vld [vmem:[#allocation86_spill] sm:$0xff] }
 0xa63   : > { %17000 = vmatprep.mubr.msk.bf16.mxu1 %vm25295_vm11, %v22721_v19  ;;  %17029 = vmatpush3.bf16.msra.mxu1 %v18554_v56  ;;  %vm25297_vm11 = vnez %v25062_v35  ;;  %v18557_v56 = vld [vmem:[%s23374_s9 + $0x148] sm:$0xff]   ;;  %v25301_v35 = vld [vmem:[#allocation72_spill] sm:$0xff] }
 0xa64   : > { %17030 = vmatprep.subr.bf16.mxu1 %v18555_v51 }
 0xa67   : > { %17031 = vmatpush3.bf16.msra.mxu1 %v18555_v51  ;;  %v25300_v51 = vld [vmem:[#allocation15_spill] sm:$0xff] }
 0xa68   : > { %17064 = vmatprep.subr.bf16.mxu1 %v18556_v42 }
 0xa6a   : > { %17001 = vmatmul.mubr.msk.bf16.gmra.mrb[80].mxu1 %vm25230_vm4, %v22724_v33 }
 0xa6b   : > { %17004 = vmatprep.mubr.msk.bf16.mxu1 %vm25058_vm6, %v22739_v5 }
 0xa72   : > { %17005 = vmatmul.mubr.msk.bf16.gmra.mrb[84].mxu1 %vm25296_vm1, %v22742_v39 }
 0xa73   : > { %17008 = vmatprep.mubr.msk.bf16.mxu1 %vm25297_vm11, %v22757_v7 }
 0xa7a   : > { %17009 = vmatmul.mubr.msk.bf16.gmra.mrb[88].mxu1 %vm25238_vm2, %v22759_v29 }
 0xa7b   : > { %17012 = vmatprep.mubr.msk.bf16.mxu1 %vm25298_vm8, %v22775_v0  ;;  %v25312_v0 = vld [vmem:[#allocation28_spill] sm:$0xff]  ;;  %vm25315_vm8 = vnez %v25256_v20 }
 0xa82   : > { %17013 = vmatmul.mubr.msk.bf16.gmra.mrb[92].mxu1 %vm25249_vm3, %v22618_v10  ;;  %v25303_v10 = vld [vmem:[#allocation71_spill] sm:$0xff]  ;;  %vm25314_vm3 = vnez %v25253_v28 }
 0xa83   : > { %17032 = vmatprep.mubr.bf16.mxu1 %v25299_v55  ;;  %v18559_v55 = vld [vmem:[%s23374_s9 + $0x158] sm:$0xff]  }
 0xa8a   : > { %17033 = vmatmul.mubr.bf16.vlgmr.msra.gmra.mrb[64].mxu1 %v25300_v51  ;;  %v25305_v51 = vld [vmem:[#allocation13_spill] sm:$0xff] }
 0xa8b   : > { %17065 = vmatpush3.bf16.msra.mxu1 %v18556_v42  ;;  %17036 = vmatprep.mubr.bf16.mxu1 %v25301_v35  ;;  %v18560_v42 = vld [vmem:[%s23374_s9 + $0x160] sm:$0xff]   ;;  %v25304_v35 = vld [vmem:[#allocation64_spill] sm:$0xff] }
 0xa8c   : > { %17066 = vmatprep.subr.bf16.mxu1 %v18557_v56 }
 0xa8f   : > { %17067 = vmatpush3.bf16.msra.mxu1 %v18557_v56  ;;  %v18561_v56 = vld [vmem:[%s23374_s9 + $0x168] sm:$0xff]  }
 0xa90   : > { %17068 = vmatprep.subr.bf16.mxu1 %v18558_v32 }
 0xa92   : > { %17037 = vmatmul.mubr.bf16.gmra.mrb[68].mxu1 %v25302_v26  ;;  %v25307_v26 = vld [vmem:[#allocation20_spill] sm:$0xff] }
 0xa93   : > { %17040 = vmatprep.mubr.bf16.mxu1 %v25303_v10  ;;  %17069 = vmatpush3.bf16.msra.mxu1 %v18558_v32  ;;  %v18562_v32 = vld [vmem:[%s23374_s9 + $0x170] sm:$0xff]   ;;  %v25306_v10 = vld [vmem:[#allocation26_spill] sm:$0xff] }
 0xa94   : > { %17070 = vmatprep.subr.bf16.mxu1 %v18559_v55 }
 0xa97   : > { %17071 = vmatpush3.bf16.msra.mxu1 %v18559_v55  ;;  %v18563_v55 = vld [vmem:[%s23374_s9 + $0x178] sm:$0xff]  }
 0xa98   : > { %17072 = vmatprep.subr.bf16.mxu1 %v18560_v42 }
 0xa9a   : > { %17041 = vmatmul.mubr.bf16.gmra.mrb[72].mxu1 %v25304_v35  ;;  %v25310_v35 = vld [vmem:[#allocation31_spill] sm:$0xff] }
 0xa9b   : > { %17044 = vmatprep.mubr.bf16.mxu1 %v25305_v51  ;;  %17073 = vmatpush3.bf16.msra.mxu1 %v18560_v42  ;;  %v18564_v42 = vld [vmem:[%s23374_s9 + $0x180] sm:$0xff]   ;;  %v25308_v51 = vld [vmem:[#allocation21_spill] sm:$0xff] }
 0xa9c   : > { %17074 = vmatprep.subr.bf16.mxu1 %v18561_v56 }
 0xa9f   : > { %17075 = vmatpush3.bf16.msra.mxu1 %v18561_v56  ;;  %v25309_v56 = vld [vmem:[#allocation29_spill] sm:$0xff] }
 0xaa0   : > { %17076 = vmatprep.subr.bf16.mxu1 %v18562_v32 }
 0xaa2   : > { %17045 = vmatmul.mubr.bf16.gmra.mrb[76].mxu1 %v25306_v10 }
 0xaa3   : > { %17048 = vmatprep.mubr.bf16.mxu1 %v25307_v26  ;;  %17077 = vmatpush3.bf16.msra.mxu1 %v18562_v32  ;;  %v25313_v32 = vld [vmem:[#allocation87_spill] sm:$0xff] }
 0xaa4   : > { %17078 = vmatprep.subr.bf16.mxu1 %v18563_v55 }
 0xaa7   : > { %17079 = vmatpush3.bf16.msra.mxu1 %v18563_v55  ;;  %v18565_v55 = vld [vmem:[%s23374_s9 + $0x188] sm:$0xff]  }
 0xaa8   : > { %17112 = vmatprep.subr.bf16.mxu1 %v18564_v42 }
 0xaaa   : > { %17049 = vmatmul.mubr.bf16.gmra.mrb[80].mxu1 %v25308_v51 }
 0xaab   : > { %17052 = vmatprep.mubr.bf16.mxu1 %v25309_v56 }
 0xab2   : > { %17053 = vmatmul.mubr.bf16.gmra.mrb[84].mxu1 %v25310_v35 }
 0xab3   : > { %17056 = vmatprep.mubr.bf16.mxu1 %v25311_v2 }
 0xaba   : > { %17057 = vmatmul.mubr.bf16.gmra.mrb[88].mxu1 %v25312_v0 }
 0xabb   : > { %17060 = vmatprep.mubr.bf16.mxu1 %v22594_v60 }
 0xac2   : > { %17061 = vmatmul.mubr.bf16.gmra.mrb[92].mxu1 %v25313_v32  ;;  %v18566_v32 = vld [vmem:[%s23374_s9 + $0x190] sm:$0xff]  }
 0xac3   : > { %17080 = vmatprep.mubr.msk.bf16.mxu1 %vm25251_vm13, %v25252_v53  ;;  %v18567_v53 = vld [vmem:[%s23374_s9 + $0x198] sm:$0xff]   ;;  %vm25316_vm13 = vnez %v25259_v59 }
 0xaca   : > { %17081 = vmatmul.mubr.msk.bf16.vlgmr.msra.gmra.mrb[64].mxu1 %vm25314_vm3, %v25255_v24  ;;  %vm25317_vm3 = vnez %v25262_v15 }
 0xacb   : > { %17113 = vmatpush3.bf16.msra.mxu1 %v18564_v42  ;;  %17084 = vmatprep.mubr.msk.bf16.mxu1 %vm25315_vm8, %v25258_v44  ;;  %v18568_v42 = vld [vmem:[%s23374_s9 + $0x1a0] sm:$0xff]   ;;  %vm25318_vm8 = vnez %v25265_v6 }
 0xacc   : > { %17114 = vmatprep.subr.bf16.mxu1 %v18565_v55 }
 0xacf   : > { %17115 = vmatpush3.bf16.msra.mxu1 %v18565_v55  ;;  %v18569_v55 = vld [vmem:[%s23374_s9 + $0x1a8] sm:$0xff]  }
 0xad0   : > { %17116 = vmatprep.subr.bf16.mxu1 %v18566_v32 }
 0xad2   : > { %17085 = vmatmul.mubr.msk.bf16.gmra.mrb[68].mxu1 %vm25316_vm13, %v25261_v21  ;;  %vm25319_vm13 = vnez %v25267_v16 }
 0xad3   : > { %17088 = vmatprep.mubr.msk.bf16.mxu1 %vm25317_vm3, %v25264_v4  ;;  %17117 = vmatpush3.bf16.msra.mxu1 %v18566_v32  ;;  %v18570_v32 = vld [vmem:[%s23374_s9 + $0x1b0] sm:$0xff]   ;;  %vm25320_vm3 = vnez %v25270_v22 }
 0xad4   : > { %17118 = vmatprep.subr.bf16.mxu1 %v18567_v53 }
 0xad7   : > { %17119 = vmatpush3.bf16.msra.mxu1 %v18567_v53  ;;  %v18571_v53 = vld [vmem:[%s23374_s9 + $0x1b8] sm:$0xff]  }
 0xad8   : > { %17120 = vmatprep.subr.bf16.mxu1 %v18568_v42 }
 0xada   : > { %17089 = vmatmul.mubr.msk.bf16.gmra.mrb[72].mxu1 %vm25318_vm8, %v25266_v49  ;;  %vm25321_vm8 = vnez %v25272_v47 }
 0xadb   : > { %17092 = vmatprep.mubr.msk.bf16.mxu1 %vm25319_vm13, %v25269_v14  ;;  %17121 = vmatpush3.bf16.msra.mxu1 %v18568_v42  ;;  %v18572_v42 = vld [vmem:[%s23374_s9 + $0x1c0] sm:$0xff]   ;;  %vm25322_vm13 = vnez %v25274_v48  ;;  %v18574_v48 = vld [vmem:[%s23374_s9 + $0x1d0] sm:$0xff]  }
 0xadc   : > { %17122 = vmatprep.subr.bf16.mxu1 %v18569_v55 }
 0xadf   : > { %17123 = vmatpush3.bf16.msra.mxu1 %v18569_v55  ;;  %v25323_v55 = vld [vmem:[#allocation74_spill] sm:$0xff] }
 0xae0   : > { %17124 = vmatprep.subr.bf16.mxu1 %v18570_v32  ;;  %vm25324_vm2 = vnez %v25323_v55 }
 0xae2   : > { %17093 = vmatmul.mubr.msk.bf16.gmra.mrb[76].mxu1 %vm25320_vm3, %v25271_v46 }
 0xae3   : > { %17096 = vmatprep.mubr.msk.bf16.mxu1 %vm25321_vm8, %v25273_v41  ;;  %17125 = vmatpush3.bf16.msra.mxu1 %v18570_v32  ;;  %v18573_v32 = vld [vmem:[%s23374_s9 + $0x1c8] sm:$0xff]  }
 0xae4   : > { %17126 = vmatprep.subr.bf16.mxu1 %v18571_v53 }
 0xae7   : > { %17127 = vmatpush3.bf16.msra.mxu1 %v18571_v53  ;;  %v25326_v53 = vld [vmem:[#allocation27_spill] sm:$0xff] }
 0xae8   : > { %17160 = vmatprep.subr.bf16.mxu1 %v18572_v42 }
 0xaea   : > { %17097 = vmatmul.mubr.msk.bf16.gmra.mrb[80].mxu1 %vm25322_vm13, %v25276_v61 }
 0xaeb   : > { %17100 = vmatprep.mubr.msk.bf16.mxu1 %vm25324_vm2, %v25279_v45 }
 0xaf2   : > { %17101 = vmatmul.mubr.msk.bf16.gmra.mrb[84].mxu1 %vm25281_vm15, %v22556_v30 }
 0xaf3   : > { %17104 = vmatprep.mubr.msk.bf16.mxu1 %vm25283_vm0, %v25284_v3 }
 0xafa   : > { %17105 = vmatmul.mubr.msk.bf16.gmra.mrb[88].mxu1 %vm25286_vm5, %v22604_v36 }
 0xafb   : > { %17108 = vmatprep.mubr.msk.bf16.mxu1 %vm25288_vm12, %v22610_v11 }
 0xb02   : > { %17109 = vmatmul.mubr.msk.bf16.gmra.mrb[92].mxu1 %vm25290_vm9, %v25326_v53  ;;  %vm25331_vm9 = vnez %v25005_v13  ;;  %v18580_v13 = vld [vmem:[%s23374_s9 + $0x200] sm:$0xff]  }
 0xb03   : > { %17128 = vmatprep.mubr.msk.bf16.mxu1 %vm25292_vm14, %v22630_v58  ;;  %v18575_v58 = vld [vmem:[%s23374_s9 + $0x1d8] sm:$0xff]   ;;  %vm25328_vm14 = vnez %v25000_v12  ;;  %v18578_v12 = vld [vmem:[%s23374_s9 + $0x1f0] sm:$0xff]  }
 0xb0a   : > { %17129 = vmatmul.mubr.msk.bf16.vlgmr.msra.gmra.mrb[64].mxu1 %vm24997_vm10, %v22649_v18  ;;  %vm25329_vm10 = vnez %v25002_v34  ;;  %v18579_v34 = vld [vmem:[%s23374_s9 + $0x1f8] sm:$0xff]  }
 0xb0b   : > { %17161 = vmatpush3.bf16.msra.mxu1 %v18572_v42  ;;  %17132 = vmatprep.mubr.msk.bf16.mxu1 %vm25049_vm7, %v22655_v9  ;;  %vm25330_vm7 = vnez %v25003_v54  ;;  %v25338_v18 = vld [vmem:[#allocation61_spill] sm:$0xff]  ;;  %v25339_v9 = vld [vmem:[#allocation52_spill] sm:$0xff] }
 0xb0c   : > { %17162 = vmatprep.subr.bf16.mxu1 %v18573_v32  ;;  %v18582_v42 = vld [vmem:[%s23374_s9 + $0x210] sm:$0xff]   ;;  %v25352_v54 = vld [vmem:[#allocation13_spill] sm:$0xff] }
 0xb0f   : > { %17163 = vmatpush3.bf16.msra.mxu1 %v18573_v32  ;;  %v18592_v32 = vld [vmem:[%s23376_s11 + $0x20] sm:$0xff]  }
 0xb10   : > { %17164 = vmatprep.subr.bf16.mxu1 %v18574_v48 }
 0xb12   : > { %17133 = vmatmul.mubr.msk.bf16.gmra.mrb[68].mxu1 %vm25328_vm14, %v22673_v57  ;;  %vm25332_vm14 = vnez %v25052_v43  ;;  %v25335_v43 = vld [vmem:[#allocation4_spill] sm:$0xff]  ;;  %v25342_v57 = vrot.slane %v25341_v25, 7 }
 0xb13   : > { %17136 = vmatprep.mubr.msk.bf16.mxu1 %vm25329_vm10, %v22679_v38  ;;  %17165 = vmatpush3.bf16.msra.mxu1 %v18574_v48  ;;  %vm25333_vm10 = vnez %v25054_v63  ;;  %v25336_v63 = vld [vmem:[#allocation48_spill] sm:$0xff]  ;;  %v25344_v38 = vmov 0.0   ;;  %v18583_v48 = vld [vmem:[%s23374_s9 + $0x218] sm:$0xff]  }
 0xb14   : > { %17166 = vmatprep.subr.bf16.mxu1 %v18575_v58 }
 0xb17   : > { %17167 = vmatpush3.bf16.msra.mxu1 %v18575_v58  ;;  %v25350_v58 = vld [vmem:[#allocation71_spill] sm:$0xff] }
 0xb18   : > { %17168 = vmatprep.subr.bf16.mxu1 %v18576_v23 }
 0xb1a   : > { %17137 = vmatmul.mubr.msk.bf16.gmra.mrb[72].mxu1 %vm25330_vm7, %v22697_v40  ;;  %vm25337_vm7 = vnez %v25336_v63  ;;  %v18587_v63 = vld [vmem:[%s23374_s9 + $0x238] sm:$0xff]  }
 0xb1b   : > { %17140 = vmatprep.mubr.msk.bf16.mxu1 %vm25331_vm9, %v22703_v52  ;;  %17169 = vmatpush3.bf16.msra.mxu1 %v18576_v23  ;;  %vm25340_vm9 = vnez %v25339_v9  ;;  %v18588_v52 = vld [vmem:[%s23376_s11] sm:$0xff]   ;;  %v18593_v23 = vld [vmem:[%s23376_s11 + $0x28] sm:$0xff]  }
 0xb1c   : > { %17170 = vmatprep.subr.bf16.mxu1 %v18577_v31  ;;  %17256 = vmatprep.subr.bf16.mxu0 %v18588_v52 }
 0xb1d   : > { %17257 = vmatpush3.bf16.msra.mxu0 %v18588_v52 }
 0xb1f   : > { %17171 = vmatpush3.bf16.msra.mxu1 %v18577_v31  ;;  %v25351_v31 = vld [vmem:[#allocation64_spill] sm:$0xff] }
 0xb20   : > { %17172 = vmatprep.subr.bf16.mxu1 %v18578_v12 }
 0xb22   : > { %17141 = vmatmul.mubr.msk.bf16.gmra.mrb[76].mxu1 %vm25332_vm14, %v22721_v19  ;;  %v18589_v19 = vld [vmem:[%s23376_s11 + $0x8] sm:$0xff]   ;;  %vm25357_vm14 = vnez %v25256_v20 }
 0xb23   : > { %17144 = vmatprep.mubr.msk.bf16.mxu1 %vm25333_vm10, %v22724_v33  ;;  %17173 = vmatpush3.bf16.msra.mxu1 %v18578_v12  ;;  %v25347_v33 = vld [vmem:[#allocation15_spill] sm:$0xff]  ;;  %v18584_v12 = vld [vmem:[%s23374_s9 + $0x220] sm:$0xff]   ;;  %vm25358_vm10 = vnez %v25259_v59 }
 0xb24   : > { %17174 = vmatprep.subr.bf16.mxu1 %v18579_v34  ;;  %17258 = vmatprep.subr.bf16.mxu0 %v18589_v19 }
 0xb25   : > { %17259 = vmatpush3.bf16.msra.mxu0 %v18589_v19 }
 0xb27   : > { %17175 = vmatpush3.bf16.msra.mxu1 %v18579_v34  ;;  %v18594_v34 = vld [vmem:[%s23376_s11 + $0x30] sm:$0xff]  }
 0xb28   : > { %17208 = vmatprep.subr.bf16.mxu1 %v18580_v13 }
 0xb2a   : > { %17145 = vmatmul.mubr.msk.bf16.gmra.mrb[80].mxu1 %vm25230_vm4, %v22739_v5  ;;  %vm25343_vm4 = vcmask 1040384   ;;  %v18590_v5 = vld [vmem:[%s23376_s11 + $0x10] sm:$0xff]  }
 0xb2b   : > { %17148 = vmatprep.mubr.msk.bf16.mxu1 %vm25058_vm6, %v22742_v39  ;;  %v11791_v17 = vsel %vm25343_vm4, %v25342_v57, 0.0  ;;  %v18581_v39 = vld [vmem:[%s23374_s9 + $0x208] sm:$0xff]   ;;  %17260 = vmatprep.subr.bf16.mxu0 %v18590_v5  ;;  %vm25355_vm6 = vnez %v25250_v8  ;;  %vm25361_vm4 = vnez %v25267_v16 }
 0xb2c   : > { %v14648_v40 = vpack.c.bf16 %v25344_v38, %v11791_v17  ;;  %17261 = vmatpush3.bf16.msra.mxu0 %v18590_v5 }
 0xb32   : > { %17149 = vmatmul.mubr.msk.bf16.gmra.mrb[84].mxu1 %vm25296_vm1, %v22757_v7  ;;  %vm25346_vm1 = vnez %v25345_v62  ;;  %v25348_v7 = vld [vmem:[#allocation72_spill] sm:$0xff] }
 0xb33   : > { %17152 = vmatprep.mubr.msk.bf16.mxu1 %vm25297_vm11, %v22759_v29  ;;  %v18591_v29 = vld [vmem:[%s23376_s11 + $0x18] sm:$0xff]   ;;  %vm25356_vm11 = vnez %v25253_v28 }
 0xb34   : > { %17262 = vmatprep.subr.bf16.mxu0 %v18591_v29 }
 0xb35   : > { %17263 = vmatpush3.bf16.msra.mxu0 %v18591_v29 }
 0xb36   : > { %17264 = vmatprep.subr.bf16.mxu0 %v18592_v32 }
 0xb39   : > { %17265 = vmatpush3.bf16.msra.mxu0 %v18592_v32 }
 0xb3a   : > { %17153 = vmatmul.mubr.msk.bf16.gmra.mrb[88].mxu1 %vm25337_vm7, %v25335_v43  ;;  %17266 = vmatprep.subr.bf16.mxu0 %v18593_v23  ;;  %v18586_v43 = vld [vmem:[%s23374_s9 + $0x230] sm:$0xff]   ;;  %vm25359_vm7 = vnez %v25262_v15 }
 0xb3b   : > { %17156 = vmatprep.mubr.msk.bf16.mxu1 %vm25340_vm9, %v25338_v18  ;;  %v25354_v18 = vmov 0.0|0.0   ;;  %vm25360_vm9 = vnez %v25265_v6 }
 0xb3d   : > { %17267 = vmatpush3.bf16.msra.mxu0 %v18593_v23 }
 0xb3e   : > { %17268 = vmatprep.subr.bf16.mxu0 %v18594_v34 }
 0xb41   : > { %17269 = vmatpush3.bf16.msra.mxu0 %v18594_v34 }
 0xb42   : > { %17157 = vmatmul.mubr.msk.bf16.gmra.mrb[92].mxu1 %vm25346_vm1, %v14648_v40 }
 0xb43   : > { %17176 = vmatprep.mubr.bf16.mxu1 %v25347_v33 }
 0xb4a   : > { %17177 = vmatmul.mubr.bf16.vlgmr.msra.gmra.mrb[64].mxu1 %v25348_v7 }
 0xb4b   : > { %17209 = vmatpush3.bf16.msra.mxu1 %v18580_v13  ;;  %17180 = vmatprep.mubr.bf16.mxu1 %v25349_v37  ;;  %v18585_v13 = vld [vmem:[%s23374_s9 + $0x228] sm:$0xff]  }
 0xb4c   : > { %17210 = vmatprep.subr.bf16.mxu1 %v18581_v39 }
 0xb4f   : > { %17211 = vmatpush3.bf16.msra.mxu1 %v18581_v39 }
 0xb50   : > { %17212 = vmatprep.subr.bf16.mxu1 %v18582_v42 }
 0xb52   : > { %17181 = vmatmul.mubr.bf16.gmra.mrb[68].mxu1 %v25350_v58 }
 0xb53   : > { %17184 = vmatprep.mubr.bf16.mxu1 %v25351_v31  ;;  %17213 = vmatpush3.bf16.msra.mxu1 %v18582_v42 }
 0xb54   : > { %17214 = vmatprep.subr.bf16.mxu1 %v18583_v48 }
 0xb57   : > { %17215 = vmatpush3.bf16.msra.mxu1 %v18583_v48 }
 0xb58   : > { %17216 = vmatprep.subr.bf16.mxu1 %v18584_v12 }
 0xb5a   : > { %17185 = vmatmul.mubr.bf16.gmra.mrb[72].mxu1 %v25352_v54 }
 0xb5b   : > { %17188 = vmatprep.mubr.bf16.mxu1 %v25306_v10  ;;  %17217 = vmatpush3.bf16.msra.mxu1 %v18584_v12  ;;  %v25353_v10 = vld [vmem:[#allocation87_spill] sm:$0xff] }
 0xb5c   : > { %17218 = vmatprep.subr.bf16.mxu1 %v18585_v13 }
 0xb5f   : > { %17219 = vmatpush3.bf16.msra.mxu1 %v18585_v13 }
 0xb60   : > { %17220 = vmatprep.subr.bf16.mxu1 %v18586_v43 }
 0xb62   : > { %17189 = vmatmul.mubr.bf16.gmra.mrb[76].mxu1 %v25307_v26 }
 0xb63   : > { %17192 = vmatprep.mubr.bf16.mxu1 %v25308_v51  ;;  %17221 = vmatpush3.bf16.msra.mxu1 %v18586_v43 }
 0xb64   : > { %17222 = vmatprep.subr.bf16.mxu1 %v18587_v63 }
 0xb67   : > { %17223 = vmatpush3.bf16.msra.mxu1 %v18587_v63 }
 0xb6a   : > { %17193 = vmatmul.mubr.bf16.gmra.mrb[80].mxu1 %v25309_v56 }
 0xb6b   : > { %17196 = vmatprep.mubr.bf16.mxu1 %v25310_v35 }
 0xb72   : > { %17197 = vmatmul.mubr.bf16.gmra.mrb[84].mxu1 %v25311_v2 }
 0xb73   : > { %17200 = vmatprep.mubr.bf16.mxu1 %v25312_v0 }
 0xb7a   : > { %17201 = vmatmul.mubr.bf16.gmra.mrb[88].mxu1 %v22594_v60 }
 0xb7b   : > { %17204 = vmatprep.mubr.bf16.mxu1 %v25353_v10 }
 0xb82   : > { %17205 = vmatmul.mubr.bf16.gmra.mrb[92].mxu1 %v25354_v18 }
 0xb83   : > { %17224 = vmatprep.mubr.msk.bf16.mxu1 %vm25355_vm6, %v25255_v24 }
 0xb8a   : > { %17225 = vmatmul.mubr.msk.bf16.vlgmr.msra.gmra.mrb[64].mxu1 %vm25356_vm11, %v25258_v44 }
 0xb8b   : > { %17228 = vmatprep.mubr.msk.bf16.mxu1 %vm25357_vm14, %v25261_v21 }
 0xb92   : > { %17229 = vmatmul.mubr.msk.bf16.gmra.mrb[68].mxu1 %vm25358_vm10, %v25264_v4 }
 0xb93   : > { %17232 = vmatprep.mubr.msk.bf16.mxu1 %vm25359_vm7, %v25266_v49 }
 0xb9a   : > { %17233 = vmatmul.mubr.msk.bf16.gmra.mrb[72].mxu1 %vm25360_vm9, %v25269_v14 }
 0xb9b   : > { %17236 = vmatprep.mubr.msk.bf16.mxu1 %vm25361_vm4, %v25271_v46 }
 0xba2   : > { %17237 = vmatmul.mubr.msk.bf16.gmra.mrb[76].mxu1 %vm25320_vm3, %v25273_v41 }
 0xba3   : > { %17240 = vmatprep.mubr.msk.bf16.mxu1 %vm25321_vm8, %v25276_v61 }
 0xbaa   : > { %17241 = vmatmul.mubr.msk.bf16.gmra.mrb[80].mxu1 %vm25322_vm13, %v25279_v45 }
 0xbab   : > { %17244 = vmatprep.mubr.msk.bf16.mxu1 %vm25324_vm2, %v22556_v30  ;;  %v18595_v30 = vld [vmem:[%s23376_s11 + $0x38] sm:$0xff]  }
 0xbac   : > { %17270 = vmatprep.subr.bf16.mxu0 %v18595_v30 }
 0xbad   : > { %17271 = vmatpush3.bf16.msra.mxu0 %v18595_v30 }
 0xbb2   : > { %17245 = vmatmul.mubr.msk.bf16.gmra.mrb[84].mxu1 %vm25281_vm15, %v25284_v3  ;;  %v23221_v3 = vld [vmem:[%s23375_s10] ss:$0 sm:$0xff] }
 0xbb3   : > { %17248 = vmatprep.mubr.msk.bf16.mxu1 %vm25283_vm0, %v22604_v36 }
 0xbba   : > { %17249 = vmatmul.mubr.msk.bf16.gmra.mrb[88].mxu1 %vm25286_vm5, %v22610_v11 }
 0xbbb   : > { %17252 = vmatprep.mubr.msk.bf16.mxu1 %vm25288_vm12, %v25326_v53 }
 0xbc2   : > { %17253 = vmatmul.mubr.bf16.gmra.mrb[92].mxu1 %v25354_v18 }
 0xc5d   : > { %v17226_v36 = vpop.f32.mrb[64].mxu1 }
 0xc5e   : > { %v12667_v11 = vadd.f32 %v17226_v36, %v23221_v3  ;;  %v12499_v2 = vpop.f32.mrb[65].mxu1 }
 0xc5f   : > { %v12665_v0 = vadd.f32 %v23221_v3, %v12499_v2  ;;  %v17227_v50 = vpop.f32.mrb[66].mxu1 }
 0xc60   : > { %v12668_v26 = vadd.f32 %v17227_v50, %v23221_v3  ;;  %v12502_v8 = vpop.f32.mrb[67].mxu1  ;;  %v12699_v24 = vmax.f32 %v12667_v11, 0.0 }
 0xc61   : > { %v12666_v28 = vadd.f32 %v23221_v3, %v12502_v8  ;;  %v12697_v44 = vmax.f32 %v12665_v0, 0.0 }
 0xc62   : > { %v12700_v20 = vmax.f32 %v12668_v26, 0.0 }
 0xc63   : > { %v12698_v59 = vmax.f32 %v12666_v28, 0.0 }
 0xc64   : > { %v12730_v21 = vpack.c.bf16 %v12700_v20, %v12699_v24 }
 0xc65   : > { %v12729_v15 = vpack.c.bf16 %v12698_v59, %v12697_v44  ;;  %v17230_v4 = vpop.f32.mrb[68].mxu1 }
 0xc66   : > { %v12671_v6 = vadd.f32 %v17230_v4, %v23221_v3  ;;  %v12515_v49 = vpop.f32.mrb[69].mxu1 }
 0xc67   : > { %v12669_v16 = vadd.f32 %v23221_v3, %v12515_v49  ;;  %v17231_v14 = vpop.f32.mrb[70].mxu1  ;;  %17272 = vmatprep.mubr.bf16.mxu0 %v12729_v15 }
 0xc68   : > { %v12672_v22 = vadd.f32 %v17231_v14, %v23221_v3  ;;  %v12518_v46 = vpop.f32.mrb[71].mxu1  ;;  %17273 = vmatmul.mubr.bf16.vlgmr.msra.gmra.mrb[64].mxu0 %v12730_v21  ;;  %v12703_v41 = vmax.f32 %v12671_v6, 0.0 }
 0xc69   : > { %v12670_v47 = vadd.f32 %v23221_v3, %v12518_v46  ;;  %v12701_v45 = vmax.f32 %v12669_v16, 0.0 }
 0xc6a   : > { %v12704_v61 = vmax.f32 %v12672_v22, 0.0 }
 0xc6b   : > { %v12702_v1 = vmax.f32 %v12670_v47, 0.0 }
 0xc6c   : > { %v12732_v27 = vpack.c.bf16 %v12704_v61, %v12703_v41 }
 0xc6d   : > { %v12731_v51 = vpack.c.bf16 %v12702_v1, %v12701_v45  ;;  %v17234_v56 = vpop.f32.mrb[72].mxu1 }
 0xc6e   : > { %v12675_v55 = vadd.f32 %v17234_v56, %v23221_v3  ;;  %v12531_v53 = vpop.f32.mrb[73].mxu1 }
 0xc6f   : > { %v12673_v9 = vadd.f32 %v23221_v3, %v12531_v53  ;;  %v17235_v25 = vpop.f32.mrb[74].mxu1  ;;  %17276 = vmatprep.mubr.bf16.mxu0 %v12731_v51 }
 0xc70   : > { %v12676_v57 = vadd.f32 %v17235_v25, %v23221_v3  ;;  %v12534_v17 = vpop.f32.mrb[75].mxu1  ;;  %17277 = vmatmul.mubr.bf16.gmra.mrb[68].mxu0 %v12732_v27  ;;  %v12707_v40 = vmax.f32 %v12675_v55, 0.0 }
 0xc71   : > { %v12674_v38 = vadd.f32 %v23221_v3, %v12534_v17  ;;  %v12705_v52 = vmax.f32 %v12673_v9, 0.0 }
 0xc72   : > { %v12708_v62 = vmax.f32 %v12676_v57, 0.0 }
 0xc73   : > { %v12706_v19 = vmax.f32 %v12674_v38, 0.0 }
 0xc74   : > { %v12734_v33 = vpack.c.bf16 %v12708_v62, %v12707_v40 }
 0xc75   : > { %v12733_v5 = vpack.c.bf16 %v12706_v19, %v12705_v52  ;;  %v17238_v39 = vpop.f32.mrb[76].mxu1 }
 0xc76   : > { %v12679_v7 = vadd.f32 %v17238_v39, %v23221_v3  ;;  %v12547_v29 = vpop.f32.mrb[77].mxu1 }
 0xc77   : > { %v12677_v37 = vadd.f32 %v23221_v3, %v12547_v29  ;;  %v17239_v42 = vpop.f32.mrb[78].mxu1  ;;  %17280 = vmatprep.mubr.bf16.mxu0 %v12733_v5 }
 0xc78   : > { %v12680_v32 = vadd.f32 %v17239_v42, %v23221_v3  ;;  %v12550_v48 = vpop.f32.mrb[79].mxu1  ;;  %17281 = vmatmul.mubr.bf16.gmra.mrb[72].mxu0 %v12734_v33  ;;  %v12711_v23 = vmax.f32 %v12679_v7, 0.0 }
 0xc79   : > { %v12678_v58 = vadd.f32 %v23221_v3, %v12550_v48  ;;  %v12709_v12 = vmax.f32 %v12677_v37, 0.0 }
 0xc7a   : > { %v12712_v31 = vmax.f32 %v12680_v32, 0.0 }
 0xc7b   : > { %v12710_v34 = vmax.f32 %v12678_v58, 0.0  ;;  %v23258_v58 = vld [vmem:[%s23377_s12] ss:$0 sm:$0xff] }
 0xc7c   : > { %v12736_v13 = vpack.c.bf16 %v12712_v31, %v12711_v23 }
 0xc7d   : > { %v12735_v54 = vpack.c.bf16 %v12710_v34, %v12709_v12  ;;  %v17242_v43 = vpop.f32.mrb[80].mxu1 }
 0xc7e   : > { %v12683_v63 = vadd.f32 %v17242_v43, %v23221_v3  ;;  %v12563_v10 = vpop.f32.mrb[81].mxu1 }
 0xc7f   : > { %v12681_v18 = vadd.f32 %v23221_v3, %v12563_v10  ;;  %v17243_v35 = vpop.f32.mrb[82].mxu1  ;;  %17284 = vmatprep.mubr.bf16.mxu0 %v12735_v54  ;;  %v25365_v10 = vld [vmem:[#allocation9_spill] sm:$0xff] }
 0xc80   : > { %v12684_v60 = vadd.f32 %v17243_v35, %v23221_v3  ;;  %v12566_v30 = vpop.f32.mrb[83].mxu1  ;;  %17285 = vmatmul.mubr.bf16.gmra.mrb[76].mxu0 %v12736_v13  ;;  %v12715_v11 = vmax.f32 %v12683_v63, 0.0  ;;  %v25364_v13 = vld [vmem:[#allocation36_spill] sm:$0xff] }
 0xc81   : > { %v12682_v36 = vadd.f32 %v23221_v3, %v12566_v30  ;;  %v12713_v0 = vmax.f32 %v12681_v18, 0.0 }
 0xc82   : > { %v12716_v2 = vmax.f32 %v12684_v60, 0.0  ;;  %v25366_v60 = vld [vmem:[#allocation47_spill] sm:$0xff] }
 0xc83   : > { %v12714_v50 = vmax.f32 %v12682_v36, 0.0  ;;  %v25367_v36 = vld [vmem:[#allocation51_spill] sm:$0xff] }
 0xc84   : > { %v12738_v26 = vpack.c.bf16 %v12716_v2, %v12715_v11 }
 0xc85   : > { %v12737_v8 = vpack.c.bf16 %v12714_v50, %v12713_v0  ;;  %v17246_v28 = vpop.f32.mrb[84].mxu1 }
 0xc86   : > { %v12687_v24 = vadd.f32 %v17246_v28, %v23221_v3  ;;  %v12579_v20 = vpop.f32.mrb[85].mxu1  ;;  %v25368_v28 = vld [vmem:[#allocation14_spill] sm:$0xff] }
 0xc87   : > { %v12685_v44 = vadd.f32 %v23221_v3, %v12579_v20  ;;  %v17247_v59 = vpop.f32.mrb[86].mxu1  ;;  %17288 = vmatprep.mubr.bf16.mxu0 %v12737_v8 }
 0xc88   : > { %v12688_v21 = vadd.f32 %v17247_v59, %v23221_v3  ;;  %v12582_v15 = vpop.f32.mrb[87].mxu1  ;;  %17289 = vmatmul.mubr.bf16.gmra.mrb[80].mxu0 %v12738_v26  ;;  %v12719_v6 = vmax.f32 %v12687_v24, 0.0  ;;  %v25369_v59 = vld [vmem:[#allocation2_spill] sm:$0xff] }
 0xc89   : > { %v12686_v4 = vadd.f32 %v23221_v3, %v12582_v15  ;;  %v12717_v16 = vmax.f32 %v12685_v44, 0.0 }
 0xc8a   : > { %v12720_v49 = vmax.f32 %v12688_v21, 0.0 }
 0xc8b   : > { %v12718_v14 = vmax.f32 %v12686_v4, 0.0  ;;  %v25370_v4 = vld [vmem:[#allocation63_spill] sm:$0xff] }
 0xc8c   : > { %v12740_v22 = vpack.c.bf16 %v12720_v49, %v12719_v6  ;;  %v25371_v49 = vld [vmem:[#allocation67_spill] sm:$0xff] }
 0xc8d   : > { %v12739_v46 = vpack.c.bf16 %v12718_v14, %v12717_v16  ;;  %v17250_v47 = vpop.f32.mrb[88].mxu1 }
 0xc8e   : > { %v12691_v41 = vadd.f32 %v17250_v47, %v23221_v3  ;;  %v12595_v61 = vpop.f32.mrb[89].mxu1 }
 0xc8f   : > { %v12689_v45 = vadd.f32 %v23221_v3, %v12595_v61  ;;  %v17251_v1 = vpop.f32.mrb[90].mxu1  ;;  %17292 = vmatprep.mubr.bf16.mxu0 %v12739_v46  ;;  %v25372_v61 = vld [vmem:[#allocation39_spill] sm:$0xff] }
 0xc90   : > { %v12692_v27 = vadd.f32 %v17251_v1, %v23221_v3  ;;  %v12598_v51 = vpop.f32.mrb[91].mxu1  ;;  %17293 = vmatmul.mubr.bf16.gmra.mrb[84].mxu0 %v12740_v22  ;;  %v12723_v55 = vmax.f32 %v12691_v41, 0.0 }
 0xc91   : > { %v12690_v56 = vadd.f32 %v23221_v3, %v12598_v51  ;;  %v12721_v9 = vmax.f32 %v12689_v45, 0.0  ;;  %v25373_v51 = vld [vmem:[#allocation59_spill] sm:$0xff] }
 0xc92   : > { %v12724_v53 = vmax.f32 %v12692_v27, 0.0 }
 0xc93   : > { %v12722_v25 = vmax.f32 %v12690_v56, 0.0 }
 0xc94   : > { %v12742_v57 = vpack.c.bf16 %v12724_v53, %v12723_v55  ;;  %v25374_v53 = vld [vmem:[#allocation53_spill] sm:$0xff] }
 0xc95   : > { %v12741_v17 = vpack.c.bf16 %v12722_v25, %v12721_v9  ;;  %v17254_v38 = vpop.f32.mrb[92].mxu1  ;;  %v25375_v25 = vld [vmem:[#allocation58_spill] sm:$0xff] }
 0xc96   : > { %v12695_v40 = vadd.f32 %v17254_v38, %v23221_v3  ;;  %v12611_v62 = vpop.f32.mrb[93].mxu1 }
 0xc97   : > { %v12693_v52 = vadd.f32 %v23221_v3, %v12611_v62  ;;  %v17255_v19 = vpop.f32.mrb[94].mxu1  ;;  %17296 = vmatprep.mubr.bf16.mxu0 %v12741_v17 }
 0xc98   : > { %v12696_v33 = vadd.f32 %v17255_v19, %v23221_v3  ;;  %v12614_v5 = vpop.f32.mrb[95].mxu1  ;;  %17297 = vmatmul.mubr.bf16.gmra.mrb[88].mxu0 %v12742_v57  ;;  %v12727_v7 = vmax.f32 %v12695_v40, 0.0  ;;  %v25376_v19 = vld [vmem:[#allocation19_spill] sm:$0xff] }
 0xc99   : > { %v12694_v39 = vadd.f32 %v23221_v3, %v12614_v5  ;;  %v12725_v37 = vmax.f32 %v12693_v52, 0.0 }
 0xc9a   : > { %v12728_v29 = vmax.f32 %v12696_v33, 0.0 }
 0xc9b   : > { %v12726_v42 = vmax.f32 %v12694_v39, 0.0 }
 0xc9c   : > { %v12744_v32 = vpack.c.bf16 %v12728_v29, %v12727_v7  ;;  %v25377_v7 = vld [vmem:[#allocation33_spill] sm:$0xff] }
 0xc9d   : > { %v12743_v48 = vpack.c.bf16 %v12726_v42, %v12725_v37  ;;  %v25378_v42 = vld [vmem:[#allocation40_spill] sm:$0xff] }
 0xc9f   : > { %17300 = vmatprep.mubr.bf16.mxu0 %v12743_v48  ;;  %v25379_v48 = vld [vmem:[#allocation77_spill] sm:$0xff] }
 0xca0   : > { %17301 = vmatmul.mubr.bf16.gmra.mrb[92].mxu0 %v12744_v32 }
 0xd3b   : > { %v17274_v23 = vpop.f32.mrb[64].mxu0 }
 0xd3c   : > { %v12859_v31 = vadd.f32 %v17274_v23, %v23258_v58  ;;  %v12850_v12 = vpop.f32.mrb[65].mxu0 }
 0xd3d   : > { %v12851_v3 = vadd.f32 %v23258_v58, %v12850_v12  ;;  %v17275_v34 = vpop.f32.mrb[66].mxu0 }
 0xd3e   : > { %v12979_v54 = vadd.f32 %v12859_v31, %v25364_v13  ;;  %v12862_v43 = vadd.f32 %v17275_v34, %v23258_v58  ;;  %v12853_v63 = vpop.f32.mrb[67].mxu0 }
 0xd3f   : > { %v12977_v18 = vadd.f32 %v12851_v3, %v25365_v10  ;;  %v12854_v35 = vadd.f32 %v23258_v58, %v12853_v63 }
 0xd40   : > { %13011 = vst [vmem:[%s23265_s16 + $0x10] sm:$0xff] %v12979_v54  ;;  %v12980_v30 = vadd.f32 %v12862_v43, %v25366_v60  ;;  %v25380_v54 = vld [vmem:[#allocation22_spill] sm:$0xff] }
 0xd41   : > { %13009 = vst [vmem:[%s23265_s16] sm:$0xff] %v12977_v18  ;;  %v12978_v11 = vadd.f32 %v12854_v35, %v25367_v36  ;;  %v25381_v18 = vld [vmem:[#allocation23_spill] sm:$0xff] }
 0xd42   : > { %13012 = vst [vmem:[%s23265_s16 + $0x18] sm:$0xff] %v12980_v30  ;;  %v25382_v30 = vld [vmem:[#allocation35_spill] sm:$0xff] }
 0xd43   : > { %13010 = vst [vmem:[%s23265_s16 + $0x8] sm:$0xff] %v12978_v11  ;;  %v17278_v2 = vpop.f32.mrb[68].mxu0  ;;  %v25383_v11 = vld [vmem:[#allocation56_spill] sm:$0xff] }
 0xd44   : > { %v12875_v0 = vadd.f32 %v17278_v2, %v23258_v58  ;;  %v12866_v50 = vpop.f32.mrb[69].mxu0 }
 0xd45   : > { %v12867_v26 = vadd.f32 %v23258_v58, %v12866_v50  ;;  %v17279_v8 = vpop.f32.mrb[70].mxu0 }
 0xd46   : > { %v12983_v24 = vadd.f32 %v12875_v0, %v25368_v28  ;;  %v12878_v20 = vadd.f32 %v17279_v8, %v23258_v58  ;;  %v12869_v44 = vpop.f32.mrb[71].mxu0 }
 0xd47   : > { %v12981_v21 = vadd.f32 %v12867_v26, %v25369_v59  ;;  %v12870_v15 = vadd.f32 %v23258_v58, %v12869_v44 }
 0xd48   : > { %13015 = vst [vmem:[%s23265_s16 + $0x30] sm:$0xff] %v12983_v24  ;;  %v12984_v6 = vadd.f32 %v12878_v20, %v25370_v4  ;;  %v25384_v24 = vld [vmem:[#allocation25_spill] sm:$0xff] }
 0xd49   : > { %13013 = vst [vmem:[%s23265_s16 + $0x20] sm:$0xff] %v12981_v21  ;;  %v12982_v16 = vadd.f32 %v12870_v15, %v25371_v49  ;;  %v25385_v21 = vld [vmem:[#allocation16_spill] sm:$0xff] }
 0xd4a   : > { %13016 = vst [vmem:[%s23265_s16 + $0x38] sm:$0xff] %v12984_v6  ;;  %v25386_v6 = vld [vmem:[#allocation8_spill] sm:$0xff] }
 0xd4b   : > { %13014 = vst [vmem:[%s23265_s16 + $0x28] sm:$0xff] %v12982_v16  ;;  %v17282_v14 = vpop.f32.mrb[72].mxu0  ;;  %v25387_v16 = vld [vmem:[#allocation11_spill] sm:$0xff] }
 0xd4c   : > { %v12891_v22 = vadd.f32 %v17282_v14, %v23258_v58  ;;  %v12882_v46 = vpop.f32.mrb[73].mxu0 }
 0xd4d   : > { %v12883_v47 = vadd.f32 %v23258_v58, %v12882_v46  ;;  %v17283_v41 = vpop.f32.mrb[74].mxu0 }
 0xd4e   : > { %v12987_v45 = vadd.f32 %v12891_v22, %v25372_v61  ;;  %v12894_v1 = vadd.f32 %v17283_v41, %v23258_v58  ;;  %v12885_v27 = vpop.f32.mrb[75].mxu0 }
 0xd4f   : > { %v12985_v56 = vadd.f32 %v12883_v47, %v25373_v51  ;;  %v12886_v55 = vadd.f32 %v23258_v58, %v12885_v27 }
 0xd50   : > { %13019 = vst [vmem:[%s23265_s16 + $0x50] sm:$0xff] %v12987_v45  ;;  %v12988_v9 = vadd.f32 %v12894_v1, %v25374_v53  ;;  %v25388_v45 = vld [vmem:[#allocation24_spill] sm:$0xff] }
 0xd51   : > { %13017 = vst [vmem:[%s23265_s16 + $0x40] sm:$0xff] %v12985_v56  ;;  %v12986_v57 = vadd.f32 %v12886_v55, %v25375_v25  ;;  %v25389_v56 = vld [vmem:[#allocation81_spill] sm:$0xff] }
 0xd52   : > { %13020 = vst [vmem:[%s23265_s16 + $0x58] sm:$0xff] %v12988_v9  ;;  %v25390_v9 = vld [vmem:[#allocation7_spill] sm:$0xff] }
 0xd53   : > { %13018 = vst [vmem:[%s23265_s16 + $0x48] sm:$0xff] %v12986_v57  ;;  %v17286_v17 = vpop.f32.mrb[76].mxu0  ;;  %v25391_v57 = vld [vmem:[#allocation57_spill] sm:$0xff] }
 0xd54   : > { %v12907_v38 = vadd.f32 %v17286_v17, %v23258_v58  ;;  %v12898_v40 = vpop.f32.mrb[77].mxu0 }
 0xd55   : > { %v12899_v62 = vadd.f32 %v23258_v58, %v12898_v40  ;;  %v17287_v52 = vpop.f32.mrb[78].mxu0 }
 0xd56   : > { %v12991_v33 = vadd.f32 %v12907_v38, %v25376_v19  ;;  %v12910_v5 = vadd.f32 %v17287_v52, %v23258_v58  ;;  %v12901_v39 = vpop.f32.mrb[79].mxu0 }
 0xd57   : > { %v12989_v29 = vadd.f32 %v12899_v62, %v25377_v7  ;;  %v12902_v37 = vadd.f32 %v23258_v58, %v12901_v39 }
 0xd58   : > { %13023 = vst [vmem:[%s23265_s16 + $0x70] sm:$0xff] %v12991_v33  ;;  %v12992_v32 = vadd.f32 %v12910_v5, %v25378_v42  ;;  %v25392_v33 = vld [vmem:[#allocation83_spill] sm:$0xff] }
 0xd59   : > { %13021 = vst [vmem:[%s23265_s16 + $0x60] sm:$0xff] %v12989_v29  ;;  %v12990_v23 = vadd.f32 %v12902_v37, %v25379_v48  ;;  %v25393_v29 = vld [vmem:[#allocation85_spill] sm:$0xff] }
 0xd5a   : > { %13024 = vst [vmem:[%s23265_s16 + $0x78] sm:$0xff] %v12992_v32  ;;  %v25394_v32 = vld [vmem:[#allocation54_spill] sm:$0xff] }
 0xd5b   : > { %13022 = vst [vmem:[%s23265_s16 + $0x68] sm:$0xff] %v12990_v23  ;;  %v17290_v31 = vpop.f32.mrb[80].mxu0  ;;  %v25395_v23 = vld [vmem:[#allocation45_spill] sm:$0xff] }
 0xd5c   : > { %v12923_v12 = vadd.f32 %v17290_v31, %v23258_v58  ;;  %v12914_v3 = vpop.f32.mrb[81].mxu0 }
 0xd5d   : > { %v12915_v34 = vadd.f32 %v23258_v58, %v12914_v3  ;;  %v17291_v13 = vpop.f32.mrb[82].mxu0 }
 0xd5e   : > { %v12995_v43 = vadd.f32 %v12923_v12, %v25380_v54  ;;  %v12926_v63 = vadd.f32 %v17291_v13, %v23258_v58  ;;  %v12917_v10 = vpop.f32.mrb[83].mxu0 }
 0xd5f   : > { %v12993_v35 = vadd.f32 %v12915_v34, %v25381_v18  ;;  %v12918_v60 = vadd.f32 %v23258_v58, %v12917_v10 }
 0xd60   : > { %13027 = vst [vmem:[%s23265_s16 + $0x90] sm:$0xff] %v12995_v43  ;;  %v12996_v36 = vadd.f32 %v12926_v63, %v25382_v30 }
 0xd61   : > { %13025 = vst [vmem:[%s23265_s16 + $0x80] sm:$0xff] %v12993_v35  ;;  %v12994_v2 = vadd.f32 %v12918_v60, %v25383_v11 }
 0xd62   : > { %13028 = vst [vmem:[%s23265_s16 + $0x98] sm:$0xff] %v12996_v36 }
 0xd63   : > { %13026 = vst [vmem:[%s23265_s16 + $0x88] sm:$0xff] %v12994_v2  ;;  %v17294_v0 = vpop.f32.mrb[84].mxu0 }
 0xd64   : > { %v12939_v50 = vadd.f32 %v17294_v0, %v23258_v58  ;;  %v12930_v26 = vpop.f32.mrb[85].mxu0 }
 0xd65   : > { %v12931_v8 = vadd.f32 %v23258_v58, %v12930_v26  ;;  %v17295_v28 = vpop.f32.mrb[86].mxu0 }
 0xd66   : > { %v12999_v20 = vadd.f32 %v12939_v50, %v25384_v24  ;;  %v12942_v44 = vadd.f32 %v17295_v28, %v23258_v58  ;;  %v12933_v59 = vpop.f32.mrb[87].mxu0 }
 0xd67   : > { %v12997_v15 = vadd.f32 %v12931_v8, %v25385_v21  ;;  %v12934_v4 = vadd.f32 %v23258_v58, %v12933_v59 }
 0xd68   : > { %13031 = vst [vmem:[%s23265_s16 + $0xb0] sm:$0xff] %v12999_v20  ;;  %v13000_v49 = vadd.f32 %v12942_v44, %v25386_v6 }
 0xd69   : > { %13029 = vst [vmem:[%s23265_s16 + $0xa0] sm:$0xff] %v12997_v15  ;;  %v12998_v14 = vadd.f32 %v12934_v4, %v25387_v16 }
 0xd6a   : > { %13032 = vst [vmem:[%s23265_s16 + $0xb8] sm:$0xff] %v13000_v49 }
 0xd6b   : > { %13030 = vst [vmem:[%s23265_s16 + $0xa8] sm:$0xff] %v12998_v14  ;;  %v17298_v22 = vpop.f32.mrb[88].mxu0 }
 0xd6c   : > { %v12955_v46 = vadd.f32 %v17298_v22, %v23258_v58  ;;  %v12946_v47 = vpop.f32.mrb[89].mxu0 }
 0xd6d   : > { %v12947_v41 = vadd.f32 %v23258_v58, %v12946_v47  ;;  %v17299_v61 = vpop.f32.mrb[90].mxu0 }
 0xd6e   : > { %v13003_v1 = vadd.f32 %v12955_v46, %v25388_v45  ;;  %v12958_v27 = vadd.f32 %v17299_v61, %v23258_v58  ;;  %v12949_v51 = vpop.f32.mrb[91].mxu0 }
 0xd6f   : > { %v13001_v55 = vadd.f32 %v12947_v41, %v25389_v56  ;;  %v12950_v53 = vadd.f32 %v23258_v58, %v12949_v51 }
 0xd70   : > { %13035 = vst [vmem:[%s23265_s16 + $0xd0] sm:$0xff] %v13003_v1  ;;  %v13004_v25 = vadd.f32 %v12958_v27, %v25390_v9 }
 0xd71   : > { %13033 = vst [vmem:[%s23265_s16 + $0xc0] sm:$0xff] %v13001_v55  ;;  %v13002_v17 = vadd.f32 %v12950_v53, %v25391_v57 }
 0xd72   : > { %13036 = vst [vmem:[%s23265_s16 + $0xd8] sm:$0xff] %v13004_v25 }
 0xd73   : > { %13034 = vst [vmem:[%s23265_s16 + $0xc8] sm:$0xff] %v13002_v17  ;;  %v17302_v38 = vpop.f32.mrb[92].mxu0 }
 0xd74   : > { %v12971_v40 = vadd.f32 %v17302_v38, %v23258_v58  ;;  %v12962_v62 = vpop.f32.mrb[93].mxu0 }
 0xd75   : > { %v12963_v52 = vadd.f32 %v23258_v58, %v12962_v62  ;;  %v17303_v19 = vpop.f32.mrb[94].mxu0 }
 0xd76   : > { %v13007_v5 = vadd.f32 %v12971_v40, %v25392_v33  ;;  %v12974_v39 = vadd.f32 %v17303_v19, %v23258_v58  ;;  %v12965_v7 = vpop.f32.mrb[95].mxu0 }
 0xd77   : > { %v13005_v37 = vadd.f32 %v12963_v52, %v25393_v29  ;;  %v12966_v42 = vadd.f32 %v23258_v58, %v12965_v7 }
 0xd78   : > { %13039 = vst [vmem:[%s23265_s16 + $0xf0] sm:$0xff] %v13007_v5  ;;  %v13008_v48 = vadd.f32 %v12974_v39, %v25394_v32 }
 0xd79   : > { %13037 = vst [vmem:[%s23265_s16 + $0xe0] sm:$0xff] %v13005_v37  ;;  %v13006_v31 = vadd.f32 %v12966_v42, %v25395_v23 }
 0xd7a   : > { %13040 = vst [vmem:[%s23265_s16 + $0xf8] sm:$0xff] %v13008_v48 }
 0xd7b   : > { %13038 = vst [vmem:[%s23265_s16 + $0xe8] sm:$0xff] %v13006_v31 }
 0xd7c PF: > { %s23_s25 = sadd.s32 1, %s18618_s25  }
 0xd7d   : > { %p20_p4 = scmp.ge.s32.totalorder %s23_s25, 4  }
 0xd7f   :  { %22 = sbr.rel (!%p20_p4) target bundleno = 1 (0x1), region = 134 }

</bundles_post_ra>
